<compile_context>
chip_gen: v6e
topology: v6e:2x2x1
jax: 0.10.0
libtpu: 0.0.40
codegen_flags: <defaults>
</compile_context>

<pallas_src>
import functools

import jax
import jax.numpy as jnp
from jax.experimental import pallas as pl
from jax.experimental.pallas import tpu as pltpu

BN_EPS = 1e-5


def _round_up(x, m):
    return ((x + m - 1) // m) * m


def _tpu_budget():
    """Pick (TILE_M, vmem_limit_bytes) per TPU generation."""
    vmem = 64 * 1024 * 1024                      # conservative default (v7x per-TC)
    try:
        vmem = int(getattr(pltpu.get_tpu_info(), "vmem_capacity_bytes", vmem))
    except Exception:
        pass
    if vmem >= 100 * 1024 * 1024:                # v5e / v6e: 128 MiB VMEM
        tile_m = 1024
    else:                                        # v7x: 64 MiB VMEM per TensorCore
        tile_m = 512
    # 48 MiB scoped limit is safe on every generation and far above what the
    # double-buffered tiles below need.
    return tile_m, 48 * 1024 * 1024


_TILE_M, _VMEM_LIMIT = _tpu_budget()


# ----------------------------------------------------------------------------
# Pallas kernels
# ----------------------------------------------------------------------------
def _conv_matmul_kernel(a_ref, b_ref, scale_ref, shift_ref, mask_ref, *rest,
                        has_residual):
    """One M-tile of: out = act((a @ b) * scale + shift [+ residual]).

    a/b are bf16, accumulation and the BN-affine epilogue are f32, output is
    cast to o_ref.dtype (bf16 activations).  `mask` selects per output column
    whether ReLU is applied (1.0) or not (0.0)."""
    if has_residual:
        res_ref, o_ref = rest
    else:
        (o_ref,) = rest
    acc = jnp.dot(a_ref[...], b_ref[...], preferred_element_type=jnp.float32)
    out = acc * scale_ref[...] + shift_ref[...]
    if has_residual:
        out = out + res_ref[...].astype(jnp.float32)
    out = jnp.where(mask_ref[...] > 0.5, jnp.maximum(out, 0.0), out)
    o_ref[...] = out.astype(o_ref.dtype)


def matmul_bn_act(a, b, scale, shift, relu_mask, residual=None,
                  out_dtype=jnp.bfloat16):
    """Tiled (over M) fused conv-as-matmul: bf16 operands, f32 accumulate,
    per-channel affine, optional residual add, masked ReLU."""
    M, K = a.shape
    N = b.shape[1]
    tm = min(_TILE_M, _round_up(M, 8))
    Mp = _round_up(M, tm)
    if Mp != M:
        a = jnp.pad(a, ((0, Mp - M), (0, 0)))
        if residual is not None:
            residual = jnp.pad(residual, ((0, Mp - M), (0, 0)))
    has_res = residual is not None

    in_specs = [
        pl.BlockSpec((tm, K), lambda i: (i, 0)),       # A tile (streamed over M)
        pl.BlockSpec((K, N), lambda i: (0, 0)),        # weights (resident)
        pl.BlockSpec((1, N), lambda i: (0, 0)),        # scale
        pl.BlockSpec((1, N), lambda i: (0, 0)),        # shift
        pl.BlockSpec((1, N), lambda i: (0, 0)),        # relu mask
    ]
    args = [a.astype(jnp.bfloat16), b.astype(jnp.bfloat16),
            scale.reshape(1, N).astype(jnp.float32),
            shift.reshape(1, N).astype(jnp.float32),
            relu_mask.reshape(1, N).astype(jnp.float32)]
    if has_res:
        in_specs.append(pl.BlockSpec((tm, N), lambda i: (i, 0)))
        args.append(residual.astype(jnp.bfloat16))

    kernel = functools.partial(_conv_matmul_kernel, has_residual=has_res)
    out = pl.pallas_call(
        kernel,
        out_shape=jax.ShapeDtypeStruct((Mp, N), out_dtype),
        grid=(Mp // tm,),
        in_specs=in_specs,
        out_specs=pl.BlockSpec((tm, N), lambda i: (i, 0)),
        compiler_params=pltpu.CompilerParams(
            dimension_semantics=("parallel",),
            vmem_limit_bytes=_VMEM_LIMIT),
    )(*args)
    return out[:M] if Mp != M else out


def _mlp_heads_kernel(x_ref, w1_ref, b1_ref, w2_ref, b2_ref, w3_ref, b3_ref,
                      o_ref):
    """fc1 -> relu -> head1 -> relu -> head2 fused; intermediates stay in VMEM."""
    h = jnp.dot(x_ref[...], w1_ref[...], preferred_element_type=jnp.float32)
    h = h + b1_ref[...]
    h = jnp.maximum(h, 0.0)
    h = jnp.dot(h, w2_ref[...], preferred_element_type=jnp.float32) + b2_ref[...]
    h = jnp.maximum(h, 0.0)
    o_ref[...] = (jnp.dot(h, w3_ref[...], preferred_element_type=jnp.float32)
                  + b3_ref[...])


def mlp_heads(x, fc1, head1, head2):
    B = x.shape[0]
    N = head2['w'].shape[1]
    args = [x.astype(jnp.float32),
            fc1['w'].astype(jnp.float32), fc1['b'].reshape(1, -1).astype(jnp.float32),
            head1['w'].astype(jnp.float32), head1['b'].reshape(1, -1).astype(jnp.float32),
            head2['w'].astype(jnp.float32), head2['b'].reshape(1, -1).astype(jnp.float32)]
    return pl.pallas_call(
        _mlp_heads_kernel,
        out_shape=jax.ShapeDtypeStruct((B, N), jnp.float32),
        in_specs=[pl.BlockSpec(memory_space=pltpu.MemorySpace.VMEM)] * 7,
        out_specs=pl.BlockSpec(memory_space=pltpu.MemorySpace.VMEM),
    )(*args)


# ----------------------------------------------------------------------------
# Plain-JAX glue: im2col, maxpool
# ----------------------------------------------------------------------------
def im2col(x, kh, kw, stride, padding):
    """x: (B, H, W, C) -> (B*Ho*Wo, kh*kw*C) with (kh, kw, C) flattening order."""
    B, H, W, C = x.shape
    xp = jnp.pad(x, ((0, 0), (padding, padding), (padding, padding), (0, 0)))
    Ho = (H + 2 * padding - kh) // stride + 1
    Wo = (W + 2 * padding - kw) // stride + 1
    patches = []
    for i in range(kh):
        for j in range(kw):
            patches.append(xp[:, i:i + stride * Ho:stride,
                               j:j + stride * Wo:stride, :])
    cols = jnp.concatenate(patches, axis=-1)
    return cols.reshape(B * Ho * Wo, kh * kw * C), (B, Ho, Wo)


def maxpool_3x3_s2_p1(x):
    B, H, W, C = x.shape
    xp = jnp.pad(x, ((0, 0), (1, 1), (1, 1), (0, 0)),
                 constant_values=-jnp.inf)
    Ho = (H + 2 - 3) // 2 + 1
    Wo = (W + 2 - 3) // 2 + 1
    out = jnp.full((B, Ho, Wo, C), -jnp.inf, dtype=x.dtype)
    for i in range(3):
        for j in range(3):
            out = jnp.maximum(out, xp[:, i:i + 2 * Ho:2, j:j + 2 * Wo:2, :])
    return out


# ----------------------------------------------------------------------------
# Model pieces
# ----------------------------------------------------------------------------
def conv_bn(x, w, scale, shift, stride, padding, relu_mask=None, residual=None):
    """conv(no bias) + BatchNorm(affine) + masked ReLU (+ fused residual add),
    all inside one Pallas matmul kernel (via im2col)."""
    kh, kw, cin, cout = w.shape
    cols, (B, Ho, Wo) = im2col(x, kh, kw, stride, padding)
    if relu_mask is None:
        relu_mask = jnp.ones((cout,), jnp.float32)
    res2 = None if residual is None else residual.reshape(-1, cout)
    y = matmul_bn_act(cols, w.reshape(kh * kw * cin, cout),
                      scale, shift, relu_mask, residual=res2)
    return y.reshape(B, Ho, Wo, cout)


def basic_block(x, blk, stride):
    cin = x.shape[-1]
    planes = blk['conv1_w'].shape[-1]
    if 'ds_w' in blk:
        # Fuse conv1(3x3, stride s) and the 1x1/stride-s downsample into a
        # single matmul: the 1x1 conv reads exactly the centre tap of the 3x3
        # im2col window, so embed its weights at tap (1,1) and concat along N.
        w_ds = jnp.zeros((3, 3, cin, planes),
                         blk['ds_w'].dtype).at[1, 1].set(blk['ds_w'][0, 0])
        w_cat = jnp.concatenate([blk['conv1_w'], w_ds], axis=-1)
        scale_cat = jnp.concatenate([blk['bn1']['scale'], blk['ds_bn']['scale']])
        shift_cat = jnp.concatenate([blk['bn1']['shift'], blk['ds_bn']['shift']])
        relu_mask = jnp.concatenate([jnp.ones((planes,), jnp.float32),
                                     jnp.zeros((planes,), jnp.float32)])
        y = conv_bn(x, w_cat, scale_cat, shift_cat, stride, 1,
                    relu_mask=relu_mask)
        out = y[..., :planes]          # conv1+bn1+relu branch
        identity = y[..., planes:]     # downsample+bn branch (no relu)
    else:
        out = conv_bn(x, blk['conv1_w'], blk['bn1']['scale'],
                      blk['bn1']['shift'], stride, 1)
        identity = x
    # conv2 + bn2 + residual-add + relu fused in one kernel epilogue
    return conv_bn(out, blk['conv2_w'], blk['bn2']['scale'],
                   blk['bn2']['shift'], 1, 1, residual=identity)


def resnet_features(x_nhwc, P):
    x = conv_bn(x_nhwc, P['conv1_w'], P['bn1']['scale'], P['bn1']['shift'], 2, 3)
    x = maxpool_3x3_s2_p1(x)
    for blocks in P['layers']:
        for blk, s in blocks:
            x = basic_block(x, blk, s)
    # AdaptiveAvgPool2d((1,1)) + flatten
    return jnp.mean(x.astype(jnp.float32), axis=(1, 2))


def prediction_model_forward(x_nchw, clin_data, P):
    x = jnp.transpose(x_nchw, (0, 2, 3, 1)).astype(jnp.bfloat16)  # NCHW -> NHWC
    features = resnet_features(x, P)                              # (B, 512 // csd)
    dense_input = jnp.concatenate(
        [features, clin_data.astype(jnp.float32)], axis=1)
    # fc1 + extra heads fused into one Pallas kernel
    return mlp_heads(dense_input, P['fc1'], P['head1'], P['head2'])


# ----------------------------------------------------------------------------
# Deterministic parameter initialization
# ----------------------------------------------------------------------------
class KeyGen:
    def __init__(self, seed):
        self.key = jax.random.PRNGKey(seed)

    def __call__(self):
        self.key, sub = jax.random.split(self.key)
        return sub


def conv_init(kg, kh, kw, cin, cout):
    # kaiming_normal_(fan_out, relu) like PyTorch init; stored as (kh,kw,cin,cout)
    std = (2.0 / (cout * kh * kw)) ** 0.5
    return jax.random.normal(kg(), (kh, kw, cin, cout), jnp.float32) * std


def bn_init(c):
    # eval-mode BN with gamma=1, beta=0, running_mean=0, running_var=1
    scale = jnp.full((c,), 1.0 / jnp.sqrt(1.0 + BN_EPS), jnp.float32)
    shift = jnp.zeros((c,), jnp.float32)
    return {'scale': scale, 'shift': shift}


def linear_init(kg, fan_in, fan_out):
    bound = 1.0 / (fan_in ** 0.5)
    w = jax.random.uniform(kg(), (fan_in, fan_out), jnp.float32, -bound, bound)
    b = jax.random.uniform(kg(), (fan_out,), jnp.float32, -bound, bound)
    return {'w': w, 'b': b}


def init_params(seed, image_channels, num_clin_features, out_classes,
                latent_fc_features=64, channel_size_divide=2):
    kg = KeyGen(seed)
    P = {}
    inplanes = 64 // channel_size_divide
    P['conv1_w'] = conv_init(kg, 7, 7, image_channels, inplanes)
    P['bn1'] = bn_init(inplanes)

    layer_planes = [64 // channel_size_divide, 128 // channel_size_divide,
                    256 // channel_size_divide, 512 // channel_size_divide]
    layers = []
    for li, planes in enumerate(layer_planes):
        first_stride = 1 if li == 0 else 2
        blocks = []
        for bi in range(2):                       # resnet18: 2 blocks / layer
            s = first_stride if bi == 0 else 1
            blk = {
                'conv1_w': conv_init(kg, 3, 3, inplanes, planes),
                'bn1': bn_init(planes),
                'conv2_w': conv_init(kg, 3, 3, planes, planes),
                'bn2': bn_init(planes),
            }
            if s != 1 or inplanes != planes:
                blk['ds_w'] = conv_init(kg, 1, 1, inplanes, planes)
                blk['ds_bn'] = bn_init(planes)
            blocks.append((blk, s))
            inplanes = planes
        layers.append(blocks)
    P['layers'] = layers

    feat_dim = 512 // channel_size_divide
    P['fc1'] = linear_init(kg, feat_dim + num_clin_features, latent_fc_features)
    # n_heads=3 -> extra_heads = [Linear(latent, latent), Linear(latent, out_classes)]
    P['head1'] = linear_init(kg, latent_fc_features, latent_fc_features)
    P['head2'] = linear_init(kg, latent_fc_features, out_classes)
    return P


# ----------------------------------------------------------------------------
# Main
# ----------------------------------------------------------------------------
if __name__ == "__main__":
    B = 2
    image_channels = 3
    H = W = 32
    num_clin_features = 8
    out_classes = 3

    key = jax.random.PRNGKey(0)
    kx, kc = jax.random.split(key)
    x = jax.random.normal(kx, (B, image_channels, H, W), jnp.float32)   # NCHW like PyTorch
    clin = jax.random.normal(kc, (B, num_clin_features), jnp.float32)

    params = init_params(seed=0,
                         image_channels=image_channels,
                         num_clin_features=num_clin_features,
                         out_classes=out_classes,
                         latent_fc_features=64,
                         channel_size_divide=2)

    fwd = jax.jit(lambda xx, cc: prediction_model_forward(xx, cc, params))
    out = fwd(x, clin)
    out = jax.block_until_ready(out)
    assert out.shape == (B, out_classes), out.shape
    assert jnp.all(jnp.isfinite(out))
    print("KERNEL_OK")
</pallas_src>

<mosaic_0001>
module attributes {stable_mosaic.version = 11 : i64} {
  func.func @_conv_matmul_kernel(%arg0: i32, %arg1: memref<512x147xbf16, #tpu.memory_space<vmem>>, %arg2: memref<147x32xbf16, #tpu.memory_space<vmem>>, %arg3: memref<1x32xf32, #tpu.memory_space<vmem>>, %arg4: memref<1x32xf32, #tpu.memory_space<vmem>>, %arg5: memref<1x32xf32, #tpu.memory_space<vmem>>, %arg6: memref<512x32xbf16, #tpu.memory_space<vmem>>) attributes {dimension_semantics = [#tpu.dimension_semantics<parallel>], iteration_bounds = array<i64: 1>, scalar_prefetch = 0 : i64, scratch_operands = 0 : i64, tpu.core_type = #tpu.core_type<tc>, window_params = [{transform_indices = @transform_0, window_bounds = array<i64: 512, 147>}, {pipeline_mode = #tpu.pipeline_mode<synchronous>, transform_indices = @transform_1, window_bounds = array<i64: 147, 32>}, {pipeline_mode = #tpu.pipeline_mode<synchronous>, transform_indices = @transform_2, window_bounds = array<i64: 1, 32>}, {pipeline_mode = #tpu.pipeline_mode<synchronous>, transform_indices = @transform_3, window_bounds = array<i64: 1, 32>}, {pipeline_mode = #tpu.pipeline_mode<synchronous>, transform_indices = @transform_4, window_bounds = array<i64: 1, 32>}, {transform_indices = @transform_5, window_bounds = array<i64: 512, 32>}]} {
    %c0 = arith.constant 0 : index
    %c0_0 = arith.constant 0 : index
    %0 = vector.load %arg1[%c0, %c0_0] : memref<512x147xbf16, #tpu.memory_space<vmem>>, vector<512x147xbf16>
    %c0_1 = arith.constant 0 : index
    %c0_2 = arith.constant 0 : index
    %1 = vector.load %arg2[%c0_1, %c0_2] : memref<147x32xbf16, #tpu.memory_space<vmem>>, vector<147x32xbf16>
    %cst = arith.constant dense<0.000000e+00> : vector<512x32xf32>
    %2 = tpu.matmul %0, %1, %cst {dimension_numbers = #tpu.dot_dimension_numbers<[1], [0], [0], [1], [0, 0, 1, 1], [], []>} : vector<512x147xbf16>, vector<147x32xbf16>, vector<512x32xf32> -> vector<512x32xf32>
    %c0_3 = arith.constant 0 : index
    %c0_4 = arith.constant 0 : index
    %3 = vector.load %arg3[%c0_3, %c0_4] : memref<1x32xf32, #tpu.memory_space<vmem>>, vector<1x32xf32>
    %4 = vector.broadcast %3 : vector<1x32xf32> to vector<512x32xf32>
    %5 = arith.mulf %2, %4 : vector<512x32xf32>
    %c0_5 = arith.constant 0 : index
    %c0_6 = arith.constant 0 : index
    %6 = vector.load %arg4[%c0_5, %c0_6] : memref<1x32xf32, #tpu.memory_space<vmem>>, vector<1x32xf32>
    %7 = vector.broadcast %6 : vector<1x32xf32> to vector<512x32xf32>
    %8 = arith.addf %5, %7 : vector<512x32xf32>
    %c0_7 = arith.constant 0 : index
    %c0_8 = arith.constant 0 : index
    %9 = vector.load %arg5[%c0_7, %c0_8] : memref<1x32xf32, #tpu.memory_space<vmem>>, vector<1x32xf32>
    %cst_9 = arith.constant 5.000000e-01 : f32
    %10 = vector.broadcast %cst_9 : f32 to vector<1x32xf32>
    %11 = arith.cmpf ogt, %9, %10 : vector<1x32xf32>
    %cst_10 = arith.constant 0.000000e+00 : f32
    %12 = vector.broadcast %cst_10 : f32 to vector<512x32xf32>
    %13 = arith.maximumf %8, %12 : vector<512x32xf32>
    %14 = vector.shape_cast %11 : vector<1x32xi1> to vector<1x32xi1>
    %15 = vector.broadcast %14 : vector<1x32xi1> to vector<512x32xi1>
    %16 = arith.select %15, %13, %8 : vector<512x32xi1>, vector<512x32xf32>
    %17 = arith.truncf %16 : vector<512x32xf32> to vector<512x32xbf16>
    %c0_11 = arith.constant 0 : index
    %c0_12 = arith.constant 0 : index
    %18 = vector.load %arg6[%c0_11, %c0_12] : memref<512x32xbf16, #tpu.memory_space<vmem>>, vector<512x32xbf16>
    tpu.vector_store %arg6[%c0_11, %c0_12], %17 {strides = array<i32>} : memref<512x32xbf16, #tpu.memory_space<vmem>>, vector<512x32xbf16>,
    return
  }
  func.func @transform_0(%arg0: i32) -> (i32, i32) {
    %c0_i32 = arith.constant 0 : i32
    %c0_i32_0 = arith.constant 0 : i32
    return %arg0, %c0_i32 : i32, i32
  }
  func.func @transform_1(%arg0: i32) -> (i32, i32) {
    %c0_i32 = arith.constant 0 : i32
    %c0_i32_0 = arith.constant 0 : i32
    %c0_i32_1 = arith.constant 0 : i32
    return %c0_i32, %c0_i32_0 : i32, i32
  }
  func.func @transform_2(%arg0: i32) -> (i32, i32) {
    %c0_i32 = arith.constant 0 : i32
    %c0_i32_0 = arith.constant 0 : i32
    %c0_i32_1 = arith.constant 0 : i32
    return %c0_i32, %c0_i32_0 : i32, i32
  }
  func.func @transform_3(%arg0: i32) -> (i32, i32) {
    %c0_i32 = arith.constant 0 : i32
    %c0_i32_0 = arith.constant 0 : i32
    %c0_i32_1 = arith.constant 0 : i32
    return %c0_i32, %c0_i32_0 : i32, i32
  }
  func.func @transform_4(%arg0: i32) -> (i32, i32) {
    %c0_i32 = arith.constant 0 : i32
    %c0_i32_0 = arith.constant 0 : i32
    %c0_i32_1 = arith.constant 0 : i32
    return %c0_i32, %c0_i32_0 : i32, i32
  }
  func.func @transform_5(%arg0: i32) -> (i32, i32) {
    %c0_i32 = arith.constant 0 : i32
    %c0_i32_0 = arith.constant 0 : i32
    return %arg0, %c0_i32 : i32, i32
  }
}

module attributes {stable_mosaic.version = 11 : i64} {
  func.func @_conv_matmul_kernel(%arg0: i32, %arg1: memref<128x288xbf16, #tpu.memory_space<vmem>>, %arg2: memref<288x32xbf16, #tpu.memory_space<vmem>>, %arg3: memref<1x32xf32, #tpu.memory_space<vmem>>, %arg4: memref<1x32xf32, #tpu.memory_space<vmem>>, %arg5: memref<1x32xf32, #tpu.memory_space<vmem>>, %arg6: memref<128x32xbf16, #tpu.memory_space<vmem>>) attributes {dimension_semantics = [#tpu.dimension_semantics<parallel>], iteration_bounds = array<i64: 1>, scalar_prefetch = 0 : i64, scratch_operands = 0 : i64, tpu.core_type = #tpu.core_type<tc>, window_params = [{transform_indices = @transform_0, window_bounds = array<i64: 128, 288>}, {pipeline_mode = #tpu.pipeline_mode<synchronous>, transform_indices = @transform_1, window_bounds = array<i64: 288, 32>}, {pipeline_mode = #tpu.pipeline_mode<synchronous>, transform_indices = @transform_2, window_bounds = array<i64: 1, 32>}, {pipeline_mode = #tpu.pipeline_mode<synchronous>, transform_indices = @transform_3, window_bounds = array<i64: 1, 32>}, {pipeline_mode = #tpu.pipeline_mode<synchronous>, transform_indices = @transform_4, window_bounds = array<i64: 1, 32>}, {transform_indices = @transform_5, window_bounds = array<i64: 128, 32>}]} {
    %c0 = arith.constant 0 : index
    %c0_0 = arith.constant 0 : index
    %0 = vector.load %arg1[%c0, %c0_0] : memref<128x288xbf16, #tpu.memory_space<vmem>>, vector<128x288xbf16>
    %c0_1 = arith.constant 0 : index
    %c0_2 = arith.constant 0 : index
    %1 = vector.load %arg2[%c0_1, %c0_2] : memref<288x32xbf16, #tpu.memory_space<vmem>>, vector<288x32xbf16>
    %cst = arith.constant dense<0.000000e+00> : vector<128x32xf32>
    %2 = tpu.matmul %0, %1, %cst {dimension_numbers = #tpu.dot_dimension_numbers<[1], [0], [0], [1], [0, 0, 1, 1], [], []>} : vector<128x288xbf16>, vector<288x32xbf16>, vector<128x32xf32> -> vector<128x32xf32>
    %c0_3 = arith.constant 0 : index
    %c0_4 = arith.constant 0 : index
    %3 = vector.load %arg3[%c0_3, %c0_4] : memref<1x32xf32, #tpu.memory_space<vmem>>, vector<1x32xf32>
    %4 = vector.broadcast %3 : vector<1x32xf32> to vector<128x32xf32>
    %5 = arith.mulf %2, %4 : vector<128x32xf32>
    %c0_5 = arith.constant 0 : index
    %c0_6 = arith.constant 0 : index
    %6 = vector.load %arg4[%c0_5, %c0_6] : memref<1x32xf32, #tpu.memory_space<vmem>>, vector<1x32xf32>
    %7 = vector.broadcast %6 : vector<1x32xf32> to vector<128x32xf32>
    %8 = arith.addf %5, %7 : vector<128x32xf32>
    %c0_7 = arith.constant 0 : index
    %c0_8 = arith.constant 0 : index
    %9 = vector.load %arg5[%c0_7, %c0_8] : memref<1x32xf32, #tpu.memory_space<vmem>>, vector<1x32xf32>
    %cst_9 = arith.constant 5.000000e-01 : f32
    %10 = vector.broadcast %cst_9 : f32 to vector<1x32xf32>
    %11 = arith.cmpf ogt, %9, %10 : vector<1x32xf32>
    %cst_10 = arith.constant 0.000000e+00 : f32
    %12 = vector.broadcast %cst_10 : f32 to vector<128x32xf32>
    %13 = arith.maximumf %8, %12 : vector<128x32xf32>
    %14 = vector.shape_cast %11 : vector<1x32xi1> to vector<1x32xi1>
    %15 = vector.broadcast %14 : vector<1x32xi1> to vector<128x32xi1>
    %16 = arith.select %15, %13, %8 : vector<128x32xi1>, vector<128x32xf32>
    %17 = arith.truncf %16 : vector<128x32xf32> to vector<128x32xbf16>
    %c0_11 = arith.constant 0 : index
    %c0_12 = arith.constant 0 : index
    %18 = vector.load %arg6[%c0_11, %c0_12] : memref<128x32xbf16, #tpu.memory_space<vmem>>, vector<128x32xbf16>
    tpu.vector_store %arg6[%c0_11, %c0_12], %17 {strides = array<i32>} : memref<128x32xbf16, #tpu.memory_space<vmem>>, vector<128x32xbf16>,
    return
  }
  func.func @transform_0(%arg0: i32) -> (i32, i32) {
    %c0_i32 = arith.constant 0 : i32
    %c0_i32_0 = arith.constant 0 : i32
    return %arg0, %c0_i32 : i32, i32
  }
  func.func @transform_1(%arg0: i32) -> (i32, i32) {
    %c0_i32 = arith.constant 0 : i32
    %c0_i32_0 = arith.constant 0 : i32
    %c0_i32_1 = arith.constant 0 : i32
    return %c0_i32, %c0_i32_0 : i32, i32
  }
  func.func @transform_2(%arg0: i32) -> (i32, i32) {
    %c0_i32 = arith.constant 0 : i32
    %c0_i32_0 = arith.constant 0 : i32
    %c0_i32_1 = arith.constant 0 : i32
    return %c0_i32, %c0_i32_0 : i32, i32
  }
  func.func @transform_3(%arg0: i32) -> (i32, i32) {
    %c0_i32 = arith.constant 0 : i32
    %c0_i32_0 = arith.constant 0 : i32
    %c0_i32_1 = arith.constant 0 : i32
    return %c0_i32, %c0_i32_0 : i32, i32
  }
  func.func @transform_4(%arg0: i32) -> (i32, i32) {
    %c0_i32 = arith.constant 0 : i32
    %c0_i32_0 = arith.constant 0 : i32
    %c0_i32_1 = arith.constant 0 : i32
    return %c0_i32, %c0_i32_0 : i32, i32
  }
  func.func @transform_5(%arg0: i32) -> (i32, i32) {
    %c0_i32 = arith.constant 0 : i32
    %c0_i32_0 = arith.constant 0 : i32
    return %arg0, %c0_i32 : i32, i32
  }
}

module attributes {stable_mosaic.version = 11 : i64} {
  func.func @_conv_matmul_kernel(%arg0: i32, %arg1: memref<128x288xbf16, #tpu.memory_space<vmem>>, %arg2: memref<288x32xbf16, #tpu.memory_space<vmem>>, %arg3: memref<1x32xf32, #tpu.memory_space<vmem>>, %arg4: memref<1x32xf32, #tpu.memory_space<vmem>>, %arg5: memref<1x32xf32, #tpu.memory_space<vmem>>, %arg6: memref<128x32xbf16, #tpu.memory_space<vmem>>, %arg7: memref<128x32xbf16, #tpu.memory_space<vmem>>) attributes {dimension_semantics = [#tpu.dimension_semantics<parallel>], iteration_bounds = array<i64: 1>, scalar_prefetch = 0 : i64, scratch_operands = 0 : i64, tpu.core_type = #tpu.core_type<tc>, window_params = [{transform_indices = @transform_0, window_bounds = array<i64: 128, 288>}, {pipeline_mode = #tpu.pipeline_mode<synchronous>, transform_indices = @transform_1, window_bounds = array<i64: 288, 32>}, {pipeline_mode = #tpu.pipeline_mode<synchronous>, transform_indices = @transform_2, window_bounds = array<i64: 1, 32>}, {pipeline_mode = #tpu.pipeline_mode<synchronous>, transform_indices = @transform_3, window_bounds = array<i64: 1, 32>}, {pipeline_mode = #tpu.pipeline_mode<synchronous>, transform_indices = @transform_4, window_bounds = array<i64: 1, 32>}, {transform_indices = @transform_5, window_bounds = array<i64: 128, 32>}, {transform_indices = @transform_6, window_bounds = array<i64: 128, 32>}]} {
    %c0 = arith.constant 0 : index
    %c0_0 = arith.constant 0 : index
    %0 = vector.load %arg1[%c0, %c0_0] : memref<128x288xbf16, #tpu.memory_space<vmem>>, vector<128x288xbf16>
    %c0_1 = arith.constant 0 : index
    %c0_2 = arith.constant 0 : index
    %1 = vector.load %arg2[%c0_1, %c0_2] : memref<288x32xbf16, #tpu.memory_space<vmem>>, vector<288x32xbf16>
    %cst = arith.constant dense<0.000000e+00> : vector<128x32xf32>
    %2 = tpu.matmul %0, %1, %cst {dimension_numbers = #tpu.dot_dimension_numbers<[1], [0], [0], [1], [0, 0, 1, 1], [], []>} : vector<128x288xbf16>, vector<288x32xbf16>, vector<128x32xf32> -> vector<128x32xf32>
    %c0_3 = arith.constant 0 : index
    %c0_4 = arith.constant 0 : index
    %3 = vector.load %arg3[%c0_3, %c0_4] : memref<1x32xf32, #tpu.memory_space<vmem>>, vector<1x32xf32>
    %4 = vector.broadcast %3 : vector<1x32xf32> to vector<128x32xf32>
    %5 = arith.mulf %2, %4 : vector<128x32xf32>
    %c0_5 = arith.constant 0 : index
    %c0_6 = arith.constant 0 : index
    %6 = vector.load %arg4[%c0_5, %c0_6] : memref<1x32xf32, #tpu.memory_space<vmem>>, vector<1x32xf32>
    %7 = vector.broadcast %6 : vector<1x32xf32> to vector<128x32xf32>
    %8 = arith.addf %5, %7 : vector<128x32xf32>
    %c0_7 = arith.constant 0 : index
    %c0_8 = arith.constant 0 : index
    %9 = vector.load %arg6[%c0_7, %c0_8] : memref<128x32xbf16, #tpu.memory_space<vmem>>, vector<128x32xbf16>
    %10 = arith.extf %9 : vector<128x32xbf16> to vector<128x32xf32>
    %11 = arith.addf %8, %10 : vector<128x32xf32>
    %c0_9 = arith.constant 0 : index
    %c0_10 = arith.constant 0 : index
    %12 = vector.load %arg5[%c0_9, %c0_10] : memref<1x32xf32, #tpu.memory_space<vmem>>, vector<1x32xf32>
    %cst_11 = arith.constant 5.000000e-01 : f32
    %13 = vector.broadcast %cst_11 : f32 to vector<1x32xf32>
    %14 = arith.cmpf ogt, %12, %13 : vector<1x32xf32>
    %cst_12 = arith.constant 0.000000e+00 : f32
    %15 = vector.broadcast %cst_12 : f32 to vector<128x32xf32>
    %16 = arith.maximumf %11, %15 : vector<128x32xf32>
    %17 = vector.shape_cast %14 : vector<1x32xi1> to vector<1x32xi1>
    %18 = vector.broadcast %17 : vector<1x32xi1> to vector<128x32xi1>
    %19 = arith.select %18, %16, %11 : vector<128x32xi1>, vector<128x32xf32>
    %20 = arith.truncf %19 : vector<128x32xf32> to vector<128x32xbf16>
    %c0_13 = arith.constant 0 : index
    %c0_14 = arith.constant 0 : index
    %21 = vector.load %arg7[%c0_13, %c0_14] : memref<128x32xbf16, #tpu.memory_space<vmem>>, vector<128x32xbf16>
    tpu.vector_store %arg7[%c0_13, %c0_14], %20 {strides = array<i32>} : memref<128x32xbf16, #tpu.memory_space<vmem>>, vector<128x32xbf16>,
    return
  }
  func.func @transform_0(%arg0: i32) -> (i32, i32) {
    %c0_i32 = arith.constant 0 : i32
    %c0_i32_0 = arith.constant 0 : i32
    return %arg0, %c0_i32 : i32, i32
  }
  func.func @transform_1(%arg0: i32) -> (i32, i32) {
    %c0_i32 = arith.constant 0 : i32
    %c0_i32_0 = arith.constant 0 : i32
    %c0_i32_1 = arith.constant 0 : i32
    return %c0_i32, %c0_i32_0 : i32, i32
  }
  func.func @transform_2(%arg0: i32) -> (i32, i32) {
    %c0_i32 = arith.constant 0 : i32
    %c0_i32_0 = arith.constant 0 : i32
    %c0_i32_1 = arith.constant 0 : i32
    return %c0_i32, %c0_i32_0 : i32, i32
  }
  func.func @transform_3(%arg0: i32) -> (i32, i32) {
    %c0_i32 = arith.constant 0 : i32
    %c0_i32_0 = arith.constant 0 : i32
    %c0_i32_1 = arith.constant 0 : i32
    return %c0_i32, %c0_i32_0 : i32, i32
  }
  func.func @transform_4(%arg0: i32) -> (i32, i32) {
    %c0_i32 = arith.constant 0 : i32
    %c0_i32_0 = arith.constant 0 : i32
    %c0_i32_1 = arith.constant 0 : i32
    return %c0_i32, %c0_i32_0 : i32, i32
  }
  func.func @transform_5(%arg0: i32) -> (i32, i32) {
    %c0_i32 = arith.constant 0 : i32
    %c0_i32_0 = arith.constant 0 : i32
    return %arg0, %c0_i32 : i32, i32
  }
  func.func @transform_6(%arg0: i32) -> (i32, i32) {
    %c0_i32 = arith.constant 0 : i32
    %c0_i32_0 = arith.constant 0 : i32
    return %arg0, %c0_i32 : i32, i32
  }
}

module attributes {stable_mosaic.version = 11 : i64} {
  func.func @_conv_matmul_kernel(%arg0: i32, %arg1: memref<32x288xbf16, #tpu.memory_space<vmem>>, %arg2: memref<288x128xbf16, #tpu.memory_space<vmem>>, %arg3: memref<1x128xf32, #tpu.memory_space<vmem>>, %arg4: memref<1x128xf32, #tpu.memory_space<vmem>>, %arg5: memref<1x128xf32, #tpu.memory_space<vmem>>, %arg6: memref<32x128xbf16, #tpu.memory_space<vmem>>) attributes {dimension_semantics = [#tpu.dimension_semantics<parallel>], iteration_bounds = array<i64: 1>, scalar_prefetch = 0 : i64, scratch_operands = 0 : i64, tpu.core_type = #tpu.core_type<tc>, window_params = [{transform_indices = @transform_0, window_bounds = array<i64: 32, 288>}, {pipeline_mode = #tpu.pipeline_mode<synchronous>, transform_indices = @transform_1, window_bounds = array<i64: 288, 128>}, {pipeline_mode = #tpu.pipeline_mode<synchronous>, transform_indices = @transform_2, window_bounds = array<i64: 1, 128>}, {pipeline_mode = #tpu.pipeline_mode<synchronous>, transform_indices = @transform_3, window_bounds = array<i64: 1, 128>}, {pipeline_mode = #tpu.pipeline_mode<synchronous>, transform_indices = @transform_4, window_bounds = array<i64: 1, 128>}, {transform_indices = @transform_5, window_bounds = array<i64: 32, 128>}]} {
    %c0 = arith.constant 0 : index
    %c0_0 = arith.constant 0 : index
    %0 = vector.load %arg1[%c0, %c0_0] : memref<32x288xbf16, #tpu.memory_space<vmem>>, vector<32x288xbf16>
    %c0_1 = arith.constant 0 : index
    %c0_2 = arith.constant 0 : index
    %1 = vector.load %arg2[%c0_1, %c0_2] : memref<288x128xbf16, #tpu.memory_space<vmem>>, vector<288x128xbf16>
    %cst = arith.constant dense<0.000000e+00> : vector<32x128xf32>
    %2 = tpu.matmul %0, %1, %cst {dimension_numbers = #tpu.dot_dimension_numbers<[1], [0], [0], [1], [0, 0, 1, 1], [], []>} : vector<32x288xbf16>, vector<288x128xbf16>, vector<32x128xf32> -> vector<32x128xf32>
    %c0_3 = arith.constant 0 : index
    %c0_4 = arith.constant 0 : index
    %3 = vector.load %arg3[%c0_3, %c0_4] : memref<1x128xf32, #tpu.memory_space<vmem>>, vector<1x128xf32>
    %4 = vector.broadcast %3 : vector<1x128xf32> to vector<32x128xf32>
    %5 = arith.mulf %2, %4 : vector<32x128xf32>
    %c0_5 = arith.constant 0 : index
    %c0_6 = arith.constant 0 : index
    %6 = vector.load %arg4[%c0_5, %c0_6] : memref<1x128xf32, #tpu.memory_space<vmem>>, vector<1x128xf32>
    %7 = vector.broadcast %6 : vector<1x128xf32> to vector<32x128xf32>
    %8 = arith.addf %5, %7 : vector<32x128xf32>
    %c0_7 = arith.constant 0 : index
    %c0_8 = arith.constant 0 : index
    %9 = vector.load %arg5[%c0_7, %c0_8] : memref<1x128xf32, #tpu.memory_space<vmem>>, vector<1x128xf32>
    %cst_9 = arith.constant 5.000000e-01 : f32
    %10 = vector.broadcast %cst_9 : f32 to vector<1x128xf32>
    %11 = arith.cmpf ogt, %9, %10 : vector<1x128xf32>
    %cst_10 = arith.constant 0.000000e+00 : f32
    %12 = vector.broadcast %cst_10 : f32 to vector<32x128xf32>
    %13 = arith.maximumf %8, %12 : vector<32x128xf32>
    %14 = vector.shape_cast %11 : vector<1x128xi1> to vector<1x128xi1>
    %15 = vector.broadcast %14 : vector<1x128xi1> to vector<32x128xi1>
    %16 = arith.select %15, %13, %8 : vector<32x128xi1>, vector<32x128xf32>
    %17 = arith.truncf %16 : vector<32x128xf32> to vector<32x128xbf16>
    %c0_11 = arith.constant 0 : index
    %c0_12 = arith.constant 0 : index
    %18 = vector.load %arg6[%c0_11, %c0_12] : memref<32x128xbf16, #tpu.memory_space<vmem>>, vector<32x128xbf16>
    tpu.vector_store %arg6[%c0_11, %c0_12], %17 {strides = array<i32>} : memref<32x128xbf16, #tpu.memory_space<vmem>>, vector<32x128xbf16>,
    return
  }
  func.func @transform_0(%arg0: i32) -> (i32, i32) {
    %c0_i32 = arith.constant 0 : i32
    %c0_i32_0 = arith.constant 0 : i32
    return %arg0, %c0_i32 : i32, i32
  }
  func.func @transform_1(%arg0: i32) -> (i32, i32) {
    %c0_i32 = arith.constant 0 : i32
    %c0_i32_0 = arith.constant 0 : i32
    %c0_i32_1 = arith.constant 0 : i32
    return %c0_i32, %c0_i32_0 : i32, i32
  }
  func.func @transform_2(%arg0: i32) -> (i32, i32) {
    %c0_i32 = arith.constant 0 : i32
    %c0_i32_0 = arith.constant 0 : i32
    %c0_i32_1 = arith.constant 0 : i32
    return %c0_i32, %c0_i32_0 : i32, i32
  }
  func.func @transform_3(%arg0: i32) -> (i32, i32) {
    %c0_i32 = arith.constant 0 : i32
    %c0_i32_0 = arith.constant 0 : i32
    %c0_i32_1 = arith.constant 0 : i32
    return %c0_i32, %c0_i32_0 : i32, i32
  }
  func.func @transform_4(%arg0: i32) -> (i32, i32) {
    %c0_i32 = arith.constant 0 : i32
    %c0_i32_0 = arith.constant 0 : i32
    %c0_i32_1 = arith.constant 0 : i32
    return %c0_i32, %c0_i32_0 : i32, i32
  }
  func.func @transform_5(%arg0: i32) -> (i32, i32) {
    %c0_i32 = arith.constant 0 : i32
    %c0_i32_0 = arith.constant 0 : i32
    return %arg0, %c0_i32 : i32, i32
  }
}

module attributes {stable_mosaic.version = 11 : i64} {
  func.func @_conv_matmul_kernel(%arg0: i32, %arg1: memref<32x576xbf16, #tpu.memory_space<vmem>>, %arg2: memref<576x64xbf16, #tpu.memory_space<vmem>>, %arg3: memref<1x64xf32, #tpu.memory_space<vmem>>, %arg4: memref<1x64xf32, #tpu.memory_space<vmem>>, %arg5: memref<1x64xf32, #tpu.memory_space<vmem>>, %arg6: memref<32x64xbf16, #tpu.memory_space<vmem>>) attributes {dimension_semantics = [#tpu.dimension_semantics<parallel>], iteration_bounds = array<i64: 1>, scalar_prefetch = 0 : i64, scratch_operands = 0 : i64, tpu.core_type = #tpu.core_type<tc>, window_params = [{transform_indices = @transform_0, window_bounds = array<i64: 32, 576>}, {pipeline_mode = #tpu.pipeline_mode<synchronous>, transform_indices = @transform_1, window_bounds = array<i64: 576, 64>}, {pipeline_mode = #tpu.pipeline_mode<synchronous>, transform_indices = @transform_2, window_bounds = array<i64: 1, 64>}, {pipeline_mode = #tpu.pipeline_mode<synchronous>, transform_indices = @transform_3, window_bounds = array<i64: 1, 64>}, {pipeline_mode = #tpu.pipeline_mode<synchronous>, transform_indices = @transform_4, window_bounds = array<i64: 1, 64>}, {transform_indices = @transform_5, window_bounds = array<i64: 32, 64>}]} {
    %c0 = arith.constant 0 : index
    %c0_0 = arith.constant 0 : index
    %0 = vector.load %arg1[%c0, %c0_0] : memref<32x576xbf16, #tpu.memory_space<vmem>>, vector<32x576xbf16>
    %c0_1 = arith.constant 0 : index
    %c0_2 = arith.constant 0 : index
    %1 = vector.load %arg2[%c0_1, %c0_2] : memref<576x64xbf16, #tpu.memory_space<vmem>>, vector<576x64xbf16>
    %cst = arith.constant dense<0.000000e+00> : vector<32x64xf32>
    %2 = tpu.matmul %0, %1, %cst {dimension_numbers = #tpu.dot_dimension_numbers<[1], [0], [0], [1], [0, 0, 1, 1], [], []>} : vector<32x576xbf16>, vector<576x64xbf16>, vector<32x64xf32> -> vector<32x64xf32>
    %c0_3 = arith.constant 0 : index
    %c0_4 = arith.constant 0 : index
    %3 = vector.load %arg3[%c0_3, %c0_4] : memref<1x64xf32, #tpu.memory_space<vmem>>, vector<1x64xf32>
    %4 = vector.broadcast %3 : vector<1x64xf32> to vector<32x64xf32>
    %5 = arith.mulf %2, %4 : vector<32x64xf32>
    %c0_5 = arith.constant 0 : index
    %c0_6 = arith.constant 0 : index
    %6 = vector.load %arg4[%c0_5, %c0_6] : memref<1x64xf32, #tpu.memory_space<vmem>>, vector<1x64xf32>
    %7 = vector.broadcast %6 : vector<1x64xf32> to vector<32x64xf32>
    %8 = arith.addf %5, %7 : vector<32x64xf32>
    %c0_7 = arith.constant 0 : index
    %c0_8 = arith.constant 0 : index
    %9 = vector.load %arg5[%c0_7, %c0_8] : memref<1x64xf32, #tpu.memory_space<vmem>>, vector<1x64xf32>
    %cst_9 = arith.constant 5.000000e-01 : f32
    %10 = vector.broadcast %cst_9 : f32 to vector<1x64xf32>
    %11 = arith.cmpf ogt, %9, %10 : vector<1x64xf32>
    %cst_10 = arith.constant 0.000000e+00 : f32
    %12 = vector.broadcast %cst_10 : f32 to vector<32x64xf32>
    %13 = arith.maximumf %8, %12 : vector<32x64xf32>
    %14 = vector.shape_cast %11 : vector<1x64xi1> to vector<1x64xi1>
    %15 = vector.broadcast %14 : vector<1x64xi1> to vector<32x64xi1>
    %16 = arith.select %15, %13, %8 : vector<32x64xi1>, vector<32x64xf32>
    %17 = arith.truncf %16 : vector<32x64xf32> to vector<32x64xbf16>
    %c0_11 = arith.constant 0 : index
    %c0_12 = arith.constant 0 : index
    %18 = vector.load %arg6[%c0_11, %c0_12] : memref<32x64xbf16, #tpu.memory_space<vmem>>, vector<32x64xbf16>
    tpu.vector_store %arg6[%c0_11, %c0_12], %17 {strides = array<i32>} : memref<32x64xbf16, #tpu.memory_space<vmem>>, vector<32x64xbf16>,
    return
  }
  func.func @transform_0(%arg0: i32) -> (i32, i32) {
    %c0_i32 = arith.constant 0 : i32
    %c0_i32_0 = arith.constant 0 : i32
    return %arg0, %c0_i32 : i32, i32
  }
  func.func @transform_1(%arg0: i32) -> (i32, i32) {
    %c0_i32 = arith.constant 0 : i32
    %c0_i32_0 = arith.constant 0 : i32
    %c0_i32_1 = arith.constant 0 : i32
    return %c0_i32, %c0_i32_0 : i32, i32
  }
  func.func @transform_2(%arg0: i32) -> (i32, i32) {
    %c0_i32 = arith.constant 0 : i32
    %c0_i32_0 = arith.constant 0 : i32
    %c0_i32_1 = arith.constant 0 : i32
    return %c0_i32, %c0_i32_0 : i32, i32
  }
  func.func @transform_3(%arg0: i32) -> (i32, i32) {
    %c0_i32 = arith.constant 0 : i32
    %c0_i32_0 = arith.constant 0 : i32
    %c0_i32_1 = arith.constant 0 : i32
    return %c0_i32, %c0_i32_0 : i32, i32
  }
  func.func @transform_4(%arg0: i32) -> (i32, i32) {
    %c0_i32 = arith.constant 0 : i32
    %c0_i32_0 = arith.constant 0 : i32
    %c0_i32_1 = arith.constant 0 : i32
    return %c0_i32, %c0_i32_0 : i32, i32
  }
  func.func @transform_5(%arg0: i32) -> (i32, i32) {
    %c0_i32 = arith.constant 0 : i32
    %c0_i32_0 = arith.constant 0 : i32
    return %arg0, %c0_i32 : i32, i32
  }
}

module attributes {stable_mosaic.version = 11 : i64} {
  func.func @_conv_matmul_kernel(%arg0: i32, %arg1: memref<32x576xbf16, #tpu.memory_space<vmem>>, %arg2: memref<576x64xbf16, #tpu.memory_space<vmem>>, %arg3: memref<1x64xf32, #tpu.memory_space<vmem>>, %arg4: memref<1x64xf32, #tpu.memory_space<vmem>>, %arg5: memref<1x64xf32, #tpu.memory_space<vmem>>, %arg6: memref<32x64xbf16, #tpu.memory_space<vmem>>, %arg7: memref<32x64xbf16, #tpu.memory_space<vmem>>) attributes {dimension_semantics = [#tpu.dimension_semantics<parallel>], iteration_bounds = array<i64: 1>, scalar_prefetch = 0 : i64, scratch_operands = 0 : i64, tpu.core_type = #tpu.core_type<tc>, window_params = [{transform_indices = @transform_0, window_bounds = array<i64: 32, 576>}, {pipeline_mode = #tpu.pipeline_mode<synchronous>, transform_indices = @transform_1, window_bounds = array<i64: 576, 64>}, {pipeline_mode = #tpu.pipeline_mode<synchronous>, transform_indices = @transform_2, window_bounds = array<i64: 1, 64>}, {pipeline_mode = #tpu.pipeline_mode<synchronous>, transform_indices = @transform_3, window_bounds = array<i64: 1, 64>}, {pipeline_mode = #tpu.pipeline_mode<synchronous>, transform_indices = @transform_4, window_bounds = array<i64: 1, 64>}, {transform_indices = @transform_5, window_bounds = array<i64: 32, 64>}, {transform_indices = @transform_6, window_bounds = array<i64: 32, 64>}]} {
    %c0 = arith.constant 0 : index
    %c0_0 = arith.constant 0 : index
    %0 = vector.load %arg1[%c0, %c0_0] : memref<32x576xbf16, #tpu.memory_space<vmem>>, vector<32x576xbf16>
    %c0_1 = arith.constant 0 : index
    %c0_2 = arith.constant 0 : index
    %1 = vector.load %arg2[%c0_1, %c0_2] : memref<576x64xbf16, #tpu.memory_space<vmem>>, vector<576x64xbf16>
    %cst = arith.constant dense<0.000000e+00> : vector<32x64xf32>
    %2 = tpu.matmul %0, %1, %cst {dimension_numbers = #tpu.dot_dimension_numbers<[1], [0], [0], [1], [0, 0, 1, 1], [], []>} : vector<32x576xbf16>, vector<576x64xbf16>, vector<32x64xf32> -> vector<32x64xf32>
    %c0_3 = arith.constant 0 : index
    %c0_4 = arith.constant 0 : index
    %3 = vector.load %arg3[%c0_3, %c0_4] : memref<1x64xf32, #tpu.memory_space<vmem>>, vector<1x64xf32>
    %4 = vector.broadcast %3 : vector<1x64xf32> to vector<32x64xf32>
    %5 = arith.mulf %2, %4 : vector<32x64xf32>
    %c0_5 = arith.constant 0 : index
    %c0_6 = arith.constant 0 : index
    %6 = vector.load %arg4[%c0_5, %c0_6] : memref<1x64xf32, #tpu.memory_space<vmem>>, vector<1x64xf32>
    %7 = vector.broadcast %6 : vector<1x64xf32> to vector<32x64xf32>
    %8 = arith.addf %5, %7 : vector<32x64xf32>
    %c0_7 = arith.constant 0 : index
    %c0_8 = arith.constant 0 : index
    %9 = vector.load %arg6[%c0_7, %c0_8] : memref<32x64xbf16, #tpu.memory_space<vmem>>, vector<32x64xbf16>
    %10 = arith.extf %9 : vector<32x64xbf16> to vector<32x64xf32>
    %11 = arith.addf %8, %10 : vector<32x64xf32>
    %c0_9 = arith.constant 0 : index
    %c0_10 = arith.constant 0 : index
    %12 = vector.load %arg5[%c0_9, %c0_10] : memref<1x64xf32, #tpu.memory_space<vmem>>, vector<1x64xf32>
    %cst_11 = arith.constant 5.000000e-01 : f32
    %13 = vector.broadcast %cst_11 : f32 to vector<1x64xf32>
    %14 = arith.cmpf ogt, %12, %13 : vector<1x64xf32>
    %cst_12 = arith.constant 0.000000e+00 : f32
    %15 = vector.broadcast %cst_12 : f32 to vector<32x64xf32>
    %16 = arith.maximumf %11, %15 : vector<32x64xf32>
    %17 = vector.shape_cast %14 : vector<1x64xi1> to vector<1x64xi1>
    %18 = vector.broadcast %17 : vector<1x64xi1> to vector<32x64xi1>
    %19 = arith.select %18, %16, %11 : vector<32x64xi1>, vector<32x64xf32>
    %20 = arith.truncf %19 : vector<32x64xf32> to vector<32x64xbf16>
    %c0_13 = arith.constant 0 : index
    %c0_14 = arith.constant 0 : index
    %21 = vector.load %arg7[%c0_13, %c0_14] : memref<32x64xbf16, #tpu.memory_space<vmem>>, vector<32x64xbf16>
    tpu.vector_store %arg7[%c0_13, %c0_14], %20 {strides = array<i32>} : memref<32x64xbf16, #tpu.memory_space<vmem>>, vector<32x64xbf16>,
    return
  }
  func.func @transform_0(%arg0: i32) -> (i32, i32) {
    %c0_i32 = arith.constant 0 : i32
    %c0_i32_0 = arith.constant 0 : i32
    return %arg0, %c0_i32 : i32, i32
  }
  func.func @transform_1(%arg0: i32) -> (i32, i32) {
    %c0_i32 = arith.constant 0 : i32
    %c0_i32_0 = arith.constant 0 : i32
    %c0_i32_1 = arith.constant 0 : i32
    return %c0_i32, %c0_i32_0 : i32, i32
  }
  func.func @transform_2(%arg0: i32) -> (i32, i32) {
    %c0_i32 = arith.constant 0 : i32
    %c0_i32_0 = arith.constant 0 : i32
    %c0_i32_1 = arith.constant 0 : i32
    return %c0_i32, %c0_i32_0 : i32, i32
  }
  func.func @transform_3(%arg0: i32) -> (i32, i32) {
    %c0_i32 = arith.constant 0 : i32
    %c0_i32_0 = arith.constant 0 : i32
    %c0_i32_1 = arith.constant 0 : i32
    return %c0_i32, %c0_i32_0 : i32, i32
  }
  func.func @transform_4(%arg0: i32) -> (i32, i32) {
    %c0_i32 = arith.constant 0 : i32
    %c0_i32_0 = arith.constant 0 : i32
    %c0_i32_1 = arith.constant 0 : i32
    return %c0_i32, %c0_i32_0 : i32, i32
  }
  func.func @transform_5(%arg0: i32) -> (i32, i32) {
    %c0_i32 = arith.constant 0 : i32
    %c0_i32_0 = arith.constant 0 : i32
    return %arg0, %c0_i32 : i32, i32
  }
  func.func @transform_6(%arg0: i32) -> (i32, i32) {
    %c0_i32 = arith.constant 0 : i32
    %c0_i32_0 = arith.constant 0 : i32
    return %arg0, %c0_i32 : i32, i32
  }
}

module attributes {stable_mosaic.version = 11 : i64} {
  func.func @_conv_matmul_kernel(%arg0: i32, %arg1: memref<8x576xbf16, #tpu.memory_space<vmem>>, %arg2: memref<576x256xbf16, #tpu.memory_space<vmem>>, %arg3: memref<1x256xf32, #tpu.memory_space<vmem>>, %arg4: memref<1x256xf32, #tpu.memory_space<vmem>>, %arg5: memref<1x256xf32, #tpu.memory_space<vmem>>, %arg6: memref<8x256xbf16, #tpu.memory_space<vmem>>) attributes {dimension_semantics = [#tpu.dimension_semantics<parallel>], iteration_bounds = array<i64: 1>, scalar_prefetch = 0 : i64, scratch_operands = 0 : i64, tpu.core_type = #tpu.core_type<tc>, window_params = [{transform_indices = @transform_0, window_bounds = array<i64: 8, 576>}, {pipeline_mode = #tpu.pipeline_mode<synchronous>, transform_indices = @transform_1, window_bounds = array<i64: 576, 256>}, {pipeline_mode = #tpu.pipeline_mode<synchronous>, transform_indices = @transform_2, window_bounds = array<i64: 1, 256>}, {pipeline_mode = #tpu.pipeline_mode<synchronous>, transform_indices = @transform_3, window_bounds = array<i64: 1, 256>}, {pipeline_mode = #tpu.pipeline_mode<synchronous>, transform_indices = @transform_4, window_bounds = array<i64: 1, 256>}, {transform_indices = @transform_5, window_bounds = array<i64: 8, 256>}]} {
    %c0 = arith.constant 0 : index
    %c0_0 = arith.constant 0 : index
    %0 = vector.load %arg1[%c0, %c0_0] : memref<8x576xbf16, #tpu.memory_space<vmem>>, vector<8x576xbf16>
    %c0_1 = arith.constant 0 : index
    %c0_2 = arith.constant 0 : index
    %1 = vector.load %arg2[%c0_1, %c0_2] : memref<576x256xbf16, #tpu.memory_space<vmem>>, vector<576x256xbf16>
    %cst = arith.constant dense<0.000000e+00> : vector<8x256xf32>
    %2 = tpu.matmul %0, %1, %cst {dimension_numbers = #tpu.dot_dimension_numbers<[1], [0], [0], [1], [0, 0, 1, 1], [], []>} : vector<8x576xbf16>, vector<576x256xbf16>, vector<8x256xf32> -> vector<8x256xf32>
    %c0_3 = arith.constant 0 : index
    %c0_4 = arith.constant 0 : index
    %3 = vector.load %arg3[%c0_3, %c0_4] : memref<1x256xf32, #tpu.memory_space<vmem>>, vector<1x256xf32>
    %4 = vector.broadcast %3 : vector<1x256xf32> to vector<8x256xf32>
    %5 = arith.mulf %2, %4 : vector<8x256xf32>
    %c0_5 = arith.constant 0 : index
    %c0_6 = arith.constant 0 : index
    %6 = vector.load %arg4[%c0_5, %c0_6] : memref<1x256xf32, #tpu.memory_space<vmem>>, vector<1x256xf32>
    %7 = vector.broadcast %6 : vector<1x256xf32> to vector<8x256xf32>
    %8 = arith.addf %5, %7 : vector<8x256xf32>
    %c0_7 = arith.constant 0 : index
    %c0_8 = arith.constant 0 : index
    %9 = vector.load %arg5[%c0_7, %c0_8] : memref<1x256xf32, #tpu.memory_space<vmem>>, vector<1x256xf32>
    %cst_9 = arith.constant 5.000000e-01 : f32
    %10 = vector.broadcast %cst_9 : f32 to vector<1x256xf32>
    %11 = arith.cmpf ogt, %9, %10 : vector<1x256xf32>
    %cst_10 = arith.constant 0.000000e+00 : f32
    %12 = vector.broadcast %cst_10 : f32 to vector<8x256xf32>
    %13 = arith.maximumf %8, %12 : vector<8x256xf32>
    %14 = vector.shape_cast %11 : vector<1x256xi1> to vector<1x256xi1>
    %15 = vector.broadcast %14 : vector<1x256xi1> to vector<8x256xi1>
    %16 = arith.select %15, %13, %8 : vector<8x256xi1>, vector<8x256xf32>
    %17 = arith.truncf %16 : vector<8x256xf32> to vector<8x256xbf16>
    %c0_11 = arith.constant 0 : index
    %c0_12 = arith.constant 0 : index
    %18 = vector.load %arg6[%c0_11, %c0_12] : memref<8x256xbf16, #tpu.memory_space<vmem>>, vector<8x256xbf16>
    tpu.vector_store %arg6[%c0_11, %c0_12], %17 {strides = array<i32>} : memref<8x256xbf16, #tpu.memory_space<vmem>>, vector<8x256xbf16>,
    return
  }
  func.func @transform_0(%arg0: i32) -> (i32, i32) {
    %c0_i32 = arith.constant 0 : i32
    %c0_i32_0 = arith.constant 0 : i32
    return %arg0, %c0_i32 : i32, i32
  }
  func.func @transform_1(%arg0: i32) -> (i32, i32) {
    %c0_i32 = arith.constant 0 : i32
    %c0_i32_0 = arith.constant 0 : i32
    %c0_i32_1 = arith.constant 0 : i32
    return %c0_i32, %c0_i32_0 : i32, i32
  }
  func.func @transform_2(%arg0: i32) -> (i32, i32) {
    %c0_i32 = arith.constant 0 : i32
    %c0_i32_0 = arith.constant 0 : i32
    %c0_i32_1 = arith.constant 0 : i32
    return %c0_i32, %c0_i32_0 : i32, i32
  }
  func.func @transform_3(%arg0: i32) -> (i32, i32) {
    %c0_i32 = arith.constant 0 : i32
    %c0_i32_0 = arith.constant 0 : i32
    %c0_i32_1 = arith.constant 0 : i32
    return %c0_i32, %c0_i32_0 : i32, i32
  }
  func.func @transform_4(%arg0: i32) -> (i32, i32) {
    %c0_i32 = arith.constant 0 : i32
    %c0_i32_0 = arith.constant 0 : i32
    %c0_i32_1 = arith.constant 0 : i32
    return %c0_i32, %c0_i32_0 : i32, i32
  }
  func.func @transform_5(%arg0: i32) -> (i32, i32) {
    %c0_i32 = arith.constant 0 : i32
    %c0_i32_0 = arith.constant 0 : i32
    return %arg0, %c0_i32 : i32, i32
  }
}

module attributes {stable_mosaic.version = 11 : i64} {
  func.func @_conv_matmul_kernel(%arg0: i32, %arg1: memref<8x1152xbf16, #tpu.memory_space<vmem>>, %arg2: memref<1152x128xbf16, #tpu.memory_space<vmem>>, %arg3: memref<1x128xf32, #tpu.memory_space<vmem>>, %arg4: memref<1x128xf32, #tpu.memory_space<vmem>>, %arg5: memref<1x128xf32, #tpu.memory_space<vmem>>, %arg6: memref<8x128xbf16, #tpu.memory_space<vmem>>, %arg7: memref<8x128xbf16, #tpu.memory_space<vmem>>) attributes {dimension_semantics = [#tpu.dimension_semantics<parallel>], iteration_bounds = array<i64: 1>, scalar_prefetch = 0 : i64, scratch_operands = 0 : i64, tpu.core_type = #tpu.core_type<tc>, window_params = [{transform_indices = @transform_0, window_bounds = array<i64: 8, 1152>}, {pipeline_mode = #tpu.pipeline_mode<synchronous>, transform_indices = @transform_1, window_bounds = array<i64: 1152, 128>}, {pipeline_mode = #tpu.pipeline_mode<synchronous>, transform_indices = @transform_2, window_bounds = array<i64: 1, 128>}, {pipeline_mode = #tpu.pipeline_mode<synchronous>, transform_indices = @transform_3, window_bounds = array<i64: 1, 128>}, {pipeline_mode = #tpu.pipeline_mode<synchronous>, transform_indices = @transform_4, window_bounds = array<i64: 1, 128>}, {transform_indices = @transform_5, window_bounds = array<i64: 8, 128>}, {transform_indices = @transform_6, window_bounds = array<i64: 8, 128>}]} {
    %c0 = arith.constant 0 : index
    %c0_0 = arith.constant 0 : index
    %0 = vector.load %arg1[%c0, %c0_0] : memref<8x1152xbf16, #tpu.memory_space<vmem>>, vector<8x1152xbf16>
    %c0_1 = arith.constant 0 : index
    %c0_2 = arith.constant 0 : index
    %1 = vector.load %arg2[%c0_1, %c0_2] : memref<1152x128xbf16, #tpu.memory_space<vmem>>, vector<1152x128xbf16>
    %cst = arith.constant dense<0.000000e+00> : vector<8x128xf32>
    %2 = tpu.matmul %0, %1, %cst {dimension_numbers = #tpu.dot_dimension_numbers<[1], [0], [0], [1], [0, 0, 1, 1], [], []>} : vector<8x1152xbf16>, vector<1152x128xbf16>, vector<8x128xf32> -> vector<8x128xf32>
    %c0_3 = arith.constant 0 : index
    %c0_4 = arith.constant 0 : index
    %3 = vector.load %arg3[%c0_3, %c0_4] : memref<1x128xf32, #tpu.memory_space<vmem>>, vector<1x128xf32>
    %4 = vector.broadcast %3 : vector<1x128xf32> to vector<8x128xf32>
    %5 = arith.mulf %2, %4 : vector<8x128xf32>
    %c0_5 = arith.constant 0 : index
    %c0_6 = arith.constant 0 : index
    %6 = vector.load %arg4[%c0_5, %c0_6] : memref<1x128xf32, #tpu.memory_space<vmem>>, vector<1x128xf32>
    %7 = vector.broadcast %6 : vector<1x128xf32> to vector<8x128xf32>
    %8 = arith.addf %5, %7 : vector<8x128xf32>
    %c0_7 = arith.constant 0 : index
    %c0_8 = arith.constant 0 : index
    %9 = vector.load %arg6[%c0_7, %c0_8] : memref<8x128xbf16, #tpu.memory_space<vmem>>, vector<8x128xbf16>
    %10 = arith.extf %9 : vector<8x128xbf16> to vector<8x128xf32>
    %11 = arith.addf %8, %10 : vector<8x128xf32>
    %c0_9 = arith.constant 0 : index
    %c0_10 = arith.constant 0 : index
    %12 = vector.load %arg5[%c0_9, %c0_10] : memref<1x128xf32, #tpu.memory_space<vmem>>, vector<1x128xf32>
    %cst_11 = arith.constant 5.000000e-01 : f32
    %13 = vector.broadcast %cst_11 : f32 to vector<1x128xf32>
    %14 = arith.cmpf ogt, %12, %13 : vector<1x128xf32>
    %cst_12 = arith.constant 0.000000e+00 : f32
    %15 = vector.broadcast %cst_12 : f32 to vector<8x128xf32>
    %16 = arith.maximumf %11, %15 : vector<8x128xf32>
    %17 = vector.shape_cast %14 : vector<1x128xi1> to vector<1x128xi1>
    %18 = vector.broadcast %17 : vector<1x128xi1> to vector<8x128xi1>
    %19 = arith.select %18, %16, %11 : vector<8x128xi1>, vector<8x128xf32>
    %20 = arith.truncf %19 : vector<8x128xf32> to vector<8x128xbf16>
    %c0_13 = arith.constant 0 : index
    %c0_14 = arith.constant 0 : index
    %21 = vector.load %arg7[%c0_13, %c0_14] : memref<8x128xbf16, #tpu.memory_space<vmem>>, vector<8x128xbf16>
    tpu.vector_store %arg7[%c0_13, %c0_14], %20 {strides = array<i32>} : memref<8x128xbf16, #tpu.memory_space<vmem>>, vector<8x128xbf16>,
    return
  }
  func.func @transform_0(%arg0: i32) -> (i32, i32) {
    %c0_i32 = arith.constant 0 : i32
    %c0_i32_0 = arith.constant 0 : i32
    return %arg0, %c0_i32 : i32, i32
  }
  func.func @transform_1(%arg0: i32) -> (i32, i32) {
    %c0_i32 = arith.constant 0 : i32
    %c0_i32_0 = arith.constant 0 : i32
    %c0_i32_1 = arith.constant 0 : i32
    return %c0_i32, %c0_i32_0 : i32, i32
  }
  func.func @transform_2(%arg0: i32) -> (i32, i32) {
    %c0_i32 = arith.constant 0 : i32
    %c0_i32_0 = arith.constant 0 : i32
    %c0_i32_1 = arith.constant 0 : i32
    return %c0_i32, %c0_i32_0 : i32, i32
  }
  func.func @transform_3(%arg0: i32) -> (i32, i32) {
    %c0_i32 = arith.constant 0 : i32
    %c0_i32_0 = arith.constant 0 : i32
    %c0_i32_1 = arith.constant 0 : i32
    return %c0_i32, %c0_i32_0 : i32, i32
  }
  func.func @transform_4(%arg0: i32) -> (i32, i32) {
    %c0_i32 = arith.constant 0 : i32
    %c0_i32_0 = arith.constant 0 : i32
    %c0_i32_1 = arith.constant 0 : i32
    return %c0_i32, %c0_i32_0 : i32, i32
  }
  func.func @transform_5(%arg0: i32) -> (i32, i32) {
    %c0_i32 = arith.constant 0 : i32
    %c0_i32_0 = arith.constant 0 : i32
    return %arg0, %c0_i32 : i32, i32
  }
  func.func @transform_6(%arg0: i32) -> (i32, i32) {
    %c0_i32 = arith.constant 0 : i32
    %c0_i32_0 = arith.constant 0 : i32
    return %arg0, %c0_i32 : i32, i32
  }
}

module attributes {stable_mosaic.version = 11 : i64} {
  func.func @_conv_matmul_kernel(%arg0: i32, %arg1: memref<8x1152xbf16, #tpu.memory_space<vmem>>, %arg2: memref<1152x128xbf16, #tpu.memory_space<vmem>>, %arg3: memref<1x128xf32, #tpu.memory_space<vmem>>, %arg4: memref<1x128xf32, #tpu.memory_space<vmem>>, %arg5: memref<1x128xf32, #tpu.memory_space<vmem>>, %arg6: memref<8x128xbf16, #tpu.memory_space<vmem>>) attributes {dimension_semantics = [#tpu.dimension_semantics<parallel>], iteration_bounds = array<i64: 1>, scalar_prefetch = 0 : i64, scratch_operands = 0 : i64, tpu.core_type = #tpu.core_type<tc>, window_params = [{transform_indices = @transform_0, window_bounds = array<i64: 8, 1152>}, {pipeline_mode = #tpu.pipeline_mode<synchronous>, transform_indices = @transform_1, window_bounds = array<i64: 1152, 128>}, {pipeline_mode = #tpu.pipeline_mode<synchronous>, transform_indices = @transform_2, window_bounds = array<i64: 1, 128>}, {pipeline_mode = #tpu.pipeline_mode<synchronous>, transform_indices = @transform_3, window_bounds = array<i64: 1, 128>}, {pipeline_mode = #tpu.pipeline_mode<synchronous>, transform_indices = @transform_4, window_bounds = array<i64: 1, 128>}, {transform_indices = @transform_5, window_bounds = array<i64: 8, 128>}]} {
    %c0 = arith.constant 0 : index
    %c0_0 = arith.constant 0 : index
    %0 = vector.load %arg1[%c0, %c0_0] : memref<8x1152xbf16, #tpu.memory_space<vmem>>, vector<8x1152xbf16>
    %c0_1 = arith.constant 0 : index
    %c0_2 = arith.constant 0 : index
    %1 = vector.load %arg2[%c0_1, %c0_2] : memref<1152x128xbf16, #tpu.memory_space<vmem>>, vector<1152x128xbf16>
    %cst = arith.constant dense<0.000000e+00> : vector<8x128xf32>
    %2 = tpu.matmul %0, %1, %cst {dimension_numbers = #tpu.dot_dimension_numbers<[1], [0], [0], [1], [0, 0, 1, 1], [], []>} : vector<8x1152xbf16>, vector<1152x128xbf16>, vector<8x128xf32> -> vector<8x128xf32>
    %c0_3 = arith.constant 0 : index
    %c0_4 = arith.constant 0 : index
    %3 = vector.load %arg3[%c0_3, %c0_4] : memref<1x128xf32, #tpu.memory_space<vmem>>, vector<1x128xf32>
    %4 = vector.broadcast %3 : vector<1x128xf32> to vector<8x128xf32>
    %5 = arith.mulf %2, %4 : vector<8x128xf32>
    %c0_5 = arith.constant 0 : index
    %c0_6 = arith.constant 0 : index
    %6 = vector.load %arg4[%c0_5, %c0_6] : memref<1x128xf32, #tpu.memory_space<vmem>>, vector<1x128xf32>
    %7 = vector.broadcast %6 : vector<1x128xf32> to vector<8x128xf32>
    %8 = arith.addf %5, %7 : vector<8x128xf32>
    %c0_7 = arith.constant 0 : index
    %c0_8 = arith.constant 0 : index
    %9 = vector.load %arg5[%c0_7, %c0_8] : memref<1x128xf32, #tpu.memory_space<vmem>>, vector<1x128xf32>
    %cst_9 = arith.constant 5.000000e-01 : f32
    %10 = vector.broadcast %cst_9 : f32 to vector<1x128xf32>
    %11 = arith.cmpf ogt, %9, %10 : vector<1x128xf32>
    %cst_10 = arith.constant 0.000000e+00 : f32
    %12 = vector.broadcast %cst_10 : f32 to vector<8x128xf32>
    %13 = arith.maximumf %8, %12 : vector<8x128xf32>
    %14 = vector.shape_cast %11 : vector<1x128xi1> to vector<1x128xi1>
    %15 = vector.broadcast %14 : vector<1x128xi1> to vector<8x128xi1>
    %16 = arith.select %15, %13, %8 : vector<8x128xi1>, vector<8x128xf32>
    %17 = arith.truncf %16 : vector<8x128xf32> to vector<8x128xbf16>
    %c0_11 = arith.constant 0 : index
    %c0_12 = arith.constant 0 : index
    %18 = vector.load %arg6[%c0_11, %c0_12] : memref<8x128xbf16, #tpu.memory_space<vmem>>, vector<8x128xbf16>
    tpu.vector_store %arg6[%c0_11, %c0_12], %17 {strides = array<i32>} : memref<8x128xbf16, #tpu.memory_space<vmem>>, vector<8x128xbf16>,
    return
  }
  func.func @transform_0(%arg0: i32) -> (i32, i32) {
    %c0_i32 = arith.constant 0 : i32
    %c0_i32_0 = arith.constant 0 : i32
    return %arg0, %c0_i32 : i32, i32
  }
  func.func @transform_1(%arg0: i32) -> (i32, i32) {
    %c0_i32 = arith.constant 0 : i32
    %c0_i32_0 = arith.constant 0 : i32
    %c0_i32_1 = arith.constant 0 : i32
    return %c0_i32, %c0_i32_0 : i32, i32
  }
  func.func @transform_2(%arg0: i32) -> (i32, i32) {
    %c0_i32 = arith.constant 0 : i32
    %c0_i32_0 = arith.constant 0 : i32
    %c0_i32_1 = arith.constant 0 : i32
    return %c0_i32, %c0_i32_0 : i32, i32
  }
  func.func @transform_3(%arg0: i32) -> (i32, i32) {
    %c0_i32 = arith.constant 0 : i32
    %c0_i32_0 = arith.constant 0 : i32
    %c0_i32_1 = arith.constant 0 : i32
    return %c0_i32, %c0_i32_0 : i32, i32
  }
  func.func @transform_4(%arg0: i32) -> (i32, i32) {
    %c0_i32 = arith.constant 0 : i32
    %c0_i32_0 = arith.constant 0 : i32
    %c0_i32_1 = arith.constant 0 : i32
    return %c0_i32, %c0_i32_0 : i32, i32
  }
  func.func @transform_5(%arg0: i32) -> (i32, i32) {
    %c0_i32 = arith.constant 0 : i32
    %c0_i32_0 = arith.constant 0 : i32
    return %arg0, %c0_i32 : i32, i32
  }
}

module attributes {stable_mosaic.version = 11 : i64} {
  func.func @_conv_matmul_kernel(%arg0: i32, %arg1: memref<8x1152xbf16, #tpu.memory_space<vmem>>, %arg2: memref<1152x512xbf16, #tpu.memory_space<vmem>>, %arg3: memref<1x512xf32, #tpu.memory_space<vmem>>, %arg4: memref<1x512xf32, #tpu.memory_space<vmem>>, %arg5: memref<1x512xf32, #tpu.memory_space<vmem>>, %arg6: memref<8x512xbf16, #tpu.memory_space<vmem>>) attributes {dimension_semantics = [#tpu.dimension_semantics<parallel>], iteration_bounds = array<i64: 1>, scalar_prefetch = 0 : i64, scratch_operands = 0 : i64, tpu.core_type = #tpu.core_type<tc>, window_params = [{transform_indices = @transform_0, window_bounds = array<i64: 8, 1152>}, {pipeline_mode = #tpu.pipeline_mode<synchronous>, transform_indices = @transform_1, window_bounds = array<i64: 1152, 512>}, {pipeline_mode = #tpu.pipeline_mode<synchronous>, transform_indices = @transform_2, window_bounds = array<i64: 1, 512>}, {pipeline_mode = #tpu.pipeline_mode<synchronous>, transform_indices = @transform_3, window_bounds = array<i64: 1, 512>}, {pipeline_mode = #tpu.pipeline_mode<synchronous>, transform_indices = @transform_4, window_bounds = array<i64: 1, 512>}, {transform_indices = @transform_5, window_bounds = array<i64: 8, 512>}]} {
    %c0 = arith.constant 0 : index
    %c0_0 = arith.constant 0 : index
    %0 = vector.load %arg1[%c0, %c0_0] : memref<8x1152xbf16, #tpu.memory_space<vmem>>, vector<8x1152xbf16>
    %c0_1 = arith.constant 0 : index
    %c0_2 = arith.constant 0 : index
    %1 = vector.load %arg2[%c0_1, %c0_2] : memref<1152x512xbf16, #tpu.memory_space<vmem>>, vector<1152x512xbf16>
    %cst = arith.constant dense<0.000000e+00> : vector<8x512xf32>
    %2 = tpu.matmul %0, %1, %cst {dimension_numbers = #tpu.dot_dimension_numbers<[1], [0], [0], [1], [0, 0, 1, 1], [], []>} : vector<8x1152xbf16>, vector<1152x512xbf16>, vector<8x512xf32> -> vector<8x512xf32>
    %c0_3 = arith.constant 0 : index
    %c0_4 = arith.constant 0 : index
    %3 = vector.load %arg3[%c0_3, %c0_4] : memref<1x512xf32, #tpu.memory_space<vmem>>, vector<1x512xf32>
    %4 = vector.broadcast %3 : vector<1x512xf32> to vector<8x512xf32>
    %5 = arith.mulf %2, %4 : vector<8x512xf32>
    %c0_5 = arith.constant 0 : index
    %c0_6 = arith.constant 0 : index
    %6 = vector.load %arg4[%c0_5, %c0_6] : memref<1x512xf32, #tpu.memory_space<vmem>>, vector<1x512xf32>
    %7 = vector.broadcast %6 : vector<1x512xf32> to vector<8x512xf32>
    %8 = arith.addf %5, %7 : vector<8x512xf32>
    %c0_7 = arith.constant 0 : index
    %c0_8 = arith.constant 0 : index
    %9 = vector.load %arg5[%c0_7, %c0_8] : memref<1x512xf32, #tpu.memory_space<vmem>>, vector<1x512xf32>
    %cst_9 = arith.constant 5.000000e-01 : f32
    %10 = vector.broadcast %cst_9 : f32 to vector<1x512xf32>
    %11 = arith.cmpf ogt, %9, %10 : vector<1x512xf32>
    %cst_10 = arith.constant 0.000000e+00 : f32
    %12 = vector.broadcast %cst_10 : f32 to vector<8x512xf32>
    %13 = arith.maximumf %8, %12 : vector<8x512xf32>
    %14 = vector.shape_cast %11 : vector<1x512xi1> to vector<1x512xi1>
    %15 = vector.broadcast %14 : vector<1x512xi1> to vector<8x512xi1>
    %16 = arith.select %15, %13, %8 : vector<8x512xi1>, vector<8x512xf32>
    %17 = arith.truncf %16 : vector<8x512xf32> to vector<8x512xbf16>
    %c0_11 = arith.constant 0 : index
    %c0_12 = arith.constant 0 : index
    %18 = vector.load %arg6[%c0_11, %c0_12] : memref<8x512xbf16, #tpu.memory_space<vmem>>, vector<8x512xbf16>
    tpu.vector_store %arg6[%c0_11, %c0_12], %17 {strides = array<i32>} : memref<8x512xbf16, #tpu.memory_space<vmem>>, vector<8x512xbf16>,
    return
  }
  func.func @transform_0(%arg0: i32) -> (i32, i32) {
    %c0_i32 = arith.constant 0 : i32
    %c0_i32_0 = arith.constant 0 : i32
    return %arg0, %c0_i32 : i32, i32
  }
  func.func @transform_1(%arg0: i32) -> (i32, i32) {
    %c0_i32 = arith.constant 0 : i32
    %c0_i32_0 = arith.constant 0 : i32
    %c0_i32_1 = arith.constant 0 : i32
    return %c0_i32, %c0_i32_0 : i32, i32
  }
  func.func @transform_2(%arg0: i32) -> (i32, i32) {
    %c0_i32 = arith.constant 0 : i32
    %c0_i32_0 = arith.constant 0 : i32
    %c0_i32_1 = arith.constant 0 : i32
    return %c0_i32, %c0_i32_0 : i32, i32
  }
  func.func @transform_3(%arg0: i32) -> (i32, i32) {
    %c0_i32 = arith.constant 0 : i32
    %c0_i32_0 = arith.constant 0 : i32
    %c0_i32_1 = arith.constant 0 : i32
    return %c0_i32, %c0_i32_0 : i32, i32
  }
  func.func @transform_4(%arg0: i32) -> (i32, i32) {
    %c0_i32 = arith.constant 0 : i32
    %c0_i32_0 = arith.constant 0 : i32
    %c0_i32_1 = arith.constant 0 : i32
    return %c0_i32, %c0_i32_0 : i32, i32
  }
  func.func @transform_5(%arg0: i32) -> (i32, i32) {
    %c0_i32 = arith.constant 0 : i32
    %c0_i32_0 = arith.constant 0 : i32
    return %arg0, %c0_i32 : i32, i32
  }
}

module attributes {stable_mosaic.version = 11 : i64} {
  func.func @_conv_matmul_kernel(%arg0: i32, %arg1: memref<8x2304xbf16, #tpu.memory_space<vmem>>, %arg2: memref<2304x256xbf16, #tpu.memory_space<vmem>>, %arg3: memref<1x256xf32, #tpu.memory_space<vmem>>, %arg4: memref<1x256xf32, #tpu.memory_space<vmem>>, %arg5: memref<1x256xf32, #tpu.memory_space<vmem>>, %arg6: memref<8x256xbf16, #tpu.memory_space<vmem>>, %arg7: memref<8x256xbf16, #tpu.memory_space<vmem>>) attributes {dimension_semantics = [#tpu.dimension_semantics<parallel>], iteration_bounds = array<i64: 1>, scalar_prefetch = 0 : i64, scratch_operands = 0 : i64, tpu.core_type = #tpu.core_type<tc>, window_params = [{transform_indices = @transform_0, window_bounds = array<i64: 8, 2304>}, {pipeline_mode = #tpu.pipeline_mode<synchronous>, transform_indices = @transform_1, window_bounds = array<i64: 2304, 256>}, {pipeline_mode = #tpu.pipeline_mode<synchronous>, transform_indices = @transform_2, window_bounds = array<i64: 1, 256>}, {pipeline_mode = #tpu.pipeline_mode<synchronous>, transform_indices = @transform_3, window_bounds = array<i64: 1, 256>}, {pipeline_mode = #tpu.pipeline_mode<synchronous>, transform_indices = @transform_4, window_bounds = array<i64: 1, 256>}, {transform_indices = @transform_5, window_bounds = array<i64: 8, 256>}, {transform_indices = @transform_6, window_bounds = array<i64: 8, 256>}]} {
    %c0 = arith.constant 0 : index
    %c0_0 = arith.constant 0 : index
    %0 = vector.load %arg1[%c0, %c0_0] : memref<8x2304xbf16, #tpu.memory_space<vmem>>, vector<8x2304xbf16>
    %c0_1 = arith.constant 0 : index
    %c0_2 = arith.constant 0 : index
    %1 = vector.load %arg2[%c0_1, %c0_2] : memref<2304x256xbf16, #tpu.memory_space<vmem>>, vector<2304x256xbf16>
    %cst = arith.constant dense<0.000000e+00> : vector<8x256xf32>
    %2 = tpu.matmul %0, %1, %cst {dimension_numbers = #tpu.dot_dimension_numbers<[1], [0], [0], [1], [0, 0, 1, 1], [], []>} : vector<8x2304xbf16>, vector<2304x256xbf16>, vector<8x256xf32> -> vector<8x256xf32>
    %c0_3 = arith.constant 0 : index
    %c0_4 = arith.constant 0 : index
    %3 = vector.load %arg3[%c0_3, %c0_4] : memref<1x256xf32, #tpu.memory_space<vmem>>, vector<1x256xf32>
    %4 = vector.broadcast %3 : vector<1x256xf32> to vector<8x256xf32>
    %5 = arith.mulf %2, %4 : vector<8x256xf32>
    %c0_5 = arith.constant 0 : index
    %c0_6 = arith.constant 0 : index
    %6 = vector.load %arg4[%c0_5, %c0_6] : memref<1x256xf32, #tpu.memory_space<vmem>>, vector<1x256xf32>
    %7 = vector.broadcast %6 : vector<1x256xf32> to vector<8x256xf32>
    %8 = arith.addf %5, %7 : vector<8x256xf32>
    %c0_7 = arith.constant 0 : index
    %c0_8 = arith.constant 0 : index
    %9 = vector.load %arg6[%c0_7, %c0_8] : memref<8x256xbf16, #tpu.memory_space<vmem>>, vector<8x256xbf16>
    %10 = arith.extf %9 : vector<8x256xbf16> to vector<8x256xf32>
    %11 = arith.addf %8, %10 : vector<8x256xf32>
    %c0_9 = arith.constant 0 : index
    %c0_10 = arith.constant 0 : index
    %12 = vector.load %arg5[%c0_9, %c0_10] : memref<1x256xf32, #tpu.memory_space<vmem>>, vector<1x256xf32>
    %cst_11 = arith.constant 5.000000e-01 : f32
    %13 = vector.broadcast %cst_11 : f32 to vector<1x256xf32>
    %14 = arith.cmpf ogt, %12, %13 : vector<1x256xf32>
    %cst_12 = arith.constant 0.000000e+00 : f32
    %15 = vector.broadcast %cst_12 : f32 to vector<8x256xf32>
    %16 = arith.maximumf %11, %15 : vector<8x256xf32>
    %17 = vector.shape_cast %14 : vector<1x256xi1> to vector<1x256xi1>
    %18 = vector.broadcast %17 : vector<1x256xi1> to vector<8x256xi1>
    %19 = arith.select %18, %16, %11 : vector<8x256xi1>, vector<8x256xf32>
    %20 = arith.truncf %19 : vector<8x256xf32> to vector<8x256xbf16>
    %c0_13 = arith.constant 0 : index
    %c0_14 = arith.constant 0 : index
    %21 = vector.load %arg7[%c0_13, %c0_14] : memref<8x256xbf16, #tpu.memory_space<vmem>>, vector<8x256xbf16>
    tpu.vector_store %arg7[%c0_13, %c0_14], %20 {strides = array<i32>} : memref<8x256xbf16, #tpu.memory_space<vmem>>, vector<8x256xbf16>,
    return
  }
  func.func @transform_0(%arg0: i32) -> (i32, i32) {
    %c0_i32 = arith.constant 0 : i32
    %c0_i32_0 = arith.constant 0 : i32
    return %arg0, %c0_i32 : i32, i32
  }
  func.func @transform_1(%arg0: i32) -> (i32, i32) {
    %c0_i32 = arith.constant 0 : i32
    %c0_i32_0 = arith.constant 0 : i32
    %c0_i32_1 = arith.constant 0 : i32
    return %c0_i32, %c0_i32_0 : i32, i32
  }
  func.func @transform_2(%arg0: i32) -> (i32, i32) {
    %c0_i32 = arith.constant 0 : i32
    %c0_i32_0 = arith.constant 0 : i32
    %c0_i32_1 = arith.constant 0 : i32
    return %c0_i32, %c0_i32_0 : i32, i32
  }
  func.func @transform_3(%arg0: i32) -> (i32, i32) {
    %c0_i32 = arith.constant 0 : i32
    %c0_i32_0 = arith.constant 0 : i32
    %c0_i32_1 = arith.constant 0 : i32
    return %c0_i32, %c0_i32_0 : i32, i32
  }
  func.func @transform_4(%arg0: i32) -> (i32, i32) {
    %c0_i32 = arith.constant 0 : i32
    %c0_i32_0 = arith.constant 0 : i32
    %c0_i32_1 = arith.constant 0 : i32
    return %c0_i32, %c0_i32_0 : i32, i32
  }
  func.func @transform_5(%arg0: i32) -> (i32, i32) {
    %c0_i32 = arith.constant 0 : i32
    %c0_i32_0 = arith.constant 0 : i32
    return %arg0, %c0_i32 : i32, i32
  }
  func.func @transform_6(%arg0: i32) -> (i32, i32) {
    %c0_i32 = arith.constant 0 : i32
    %c0_i32_0 = arith.constant 0 : i32
    return %arg0, %c0_i32 : i32, i32
  }
}

module attributes {stable_mosaic.version = 11 : i64} {
  func.func @_conv_matmul_kernel(%arg0: i32, %arg1: memref<8x2304xbf16, #tpu.memory_space<vmem>>, %arg2: memref<2304x256xbf16, #tpu.memory_space<vmem>>, %arg3: memref<1x256xf32, #tpu.memory_space<vmem>>, %arg4: memref<1x256xf32, #tpu.memory_space<vmem>>, %arg5: memref<1x256xf32, #tpu.memory_space<vmem>>, %arg6: memref<8x256xbf16, #tpu.memory_space<vmem>>) attributes {dimension_semantics = [#tpu.dimension_semantics<parallel>], iteration_bounds = array<i64: 1>, scalar_prefetch = 0 : i64, scratch_operands = 0 : i64, tpu.core_type = #tpu.core_type<tc>, window_params = [{transform_indices = @transform_0, window_bounds = array<i64: 8, 2304>}, {pipeline_mode = #tpu.pipeline_mode<synchronous>, transform_indices = @transform_1, window_bounds = array<i64: 2304, 256>}, {pipeline_mode = #tpu.pipeline_mode<synchronous>, transform_indices = @transform_2, window_bounds = array<i64: 1, 256>}, {pipeline_mode = #tpu.pipeline_mode<synchronous>, transform_indices = @transform_3, window_bounds = array<i64: 1, 256>}, {pipeline_mode = #tpu.pipeline_mode<synchronous>, transform_indices = @transform_4, window_bounds = array<i64: 1, 256>}, {transform_indices = @transform_5, window_bounds = array<i64: 8, 256>}]} {
    %c0 = arith.constant 0 : index
    %c0_0 = arith.constant 0 : index
    %0 = vector.load %arg1[%c0, %c0_0] : memref<8x2304xbf16, #tpu.memory_space<vmem>>, vector<8x2304xbf16>
    %c0_1 = arith.constant 0 : index
    %c0_2 = arith.constant 0 : index
    %1 = vector.load %arg2[%c0_1, %c0_2] : memref<2304x256xbf16, #tpu.memory_space<vmem>>, vector<2304x256xbf16>
    %cst = arith.constant dense<0.000000e+00> : vector<8x256xf32>
    %2 = tpu.matmul %0, %1, %cst {dimension_numbers = #tpu.dot_dimension_numbers<[1], [0], [0], [1], [0, 0, 1, 1], [], []>} : vector<8x2304xbf16>, vector<2304x256xbf16>, vector<8x256xf32> -> vector<8x256xf32>
    %c0_3 = arith.constant 0 : index
    %c0_4 = arith.constant 0 : index
    %3 = vector.load %arg3[%c0_3, %c0_4] : memref<1x256xf32, #tpu.memory_space<vmem>>, vector<1x256xf32>
    %4 = vector.broadcast %3 : vector<1x256xf32> to vector<8x256xf32>
    %5 = arith.mulf %2, %4 : vector<8x256xf32>
    %c0_5 = arith.constant 0 : index
    %c0_6 = arith.constant 0 : index
    %6 = vector.load %arg4[%c0_5, %c0_6] : memref<1x256xf32, #tpu.memory_space<vmem>>, vector<1x256xf32>
    %7 = vector.broadcast %6 : vector<1x256xf32> to vector<8x256xf32>
    %8 = arith.addf %5, %7 : vector<8x256xf32>
    %c0_7 = arith.constant 0 : index
    %c0_8 = arith.constant 0 : index
    %9 = vector.load %arg5[%c0_7, %c0_8] : memref<1x256xf32, #tpu.memory_space<vmem>>, vector<1x256xf32>
    %cst_9 = arith.constant 5.000000e-01 : f32
    %10 = vector.broadcast %cst_9 : f32 to vector<1x256xf32>
    %11 = arith.cmpf ogt, %9, %10 : vector<1x256xf32>
    %cst_10 = arith.constant 0.000000e+00 : f32
    %12 = vector.broadcast %cst_10 : f32 to vector<8x256xf32>
    %13 = arith.maximumf %8, %12 : vector<8x256xf32>
    %14 = vector.shape_cast %11 : vector<1x256xi1> to vector<1x256xi1>
    %15 = vector.broadcast %14 : vector<1x256xi1> to vector<8x256xi1>
    %16 = arith.select %15, %13, %8 : vector<8x256xi1>, vector<8x256xf32>
    %17 = arith.truncf %16 : vector<8x256xf32> to vector<8x256xbf16>
    %c0_11 = arith.constant 0 : index
    %c0_12 = arith.constant 0 : index
    %18 = vector.load %arg6[%c0_11, %c0_12] : memref<8x256xbf16, #tpu.memory_space<vmem>>, vector<8x256xbf16>
    tpu.vector_store %arg6[%c0_11, %c0_12], %17 {strides = array<i32>} : memref<8x256xbf16, #tpu.memory_space<vmem>>, vector<8x256xbf16>,
    return
  }
  func.func @transform_0(%arg0: i32) -> (i32, i32) {
    %c0_i32 = arith.constant 0 : i32
    %c0_i32_0 = arith.constant 0 : i32
    return %arg0, %c0_i32 : i32, i32
  }
  func.func @transform_1(%arg0: i32) -> (i32, i32) {
    %c0_i32 = arith.constant 0 : i32
    %c0_i32_0 = arith.constant 0 : i32
    %c0_i32_1 = arith.constant 0 : i32
    return %c0_i32, %c0_i32_0 : i32, i32
  }
  func.func @transform_2(%arg0: i32) -> (i32, i32) {
    %c0_i32 = arith.constant 0 : i32
    %c0_i32_0 = arith.constant 0 : i32
    %c0_i32_1 = arith.constant 0 : i32
    return %c0_i32, %c0_i32_0 : i32, i32
  }
  func.func @transform_3(%arg0: i32) -> (i32, i32) {
    %c0_i32 = arith.constant 0 : i32
    %c0_i32_0 = arith.constant 0 : i32
    %c0_i32_1 = arith.constant 0 : i32
    return %c0_i32, %c0_i32_0 : i32, i32
  }
  func.func @transform_4(%arg0: i32) -> (i32, i32) {
    %c0_i32 = arith.constant 0 : i32
    %c0_i32_0 = arith.constant 0 : i32
    %c0_i32_1 = arith.constant 0 : i32
    return %c0_i32, %c0_i32_0 : i32, i32
  }
  func.func @transform_5(%arg0: i32) -> (i32, i32) {
    %c0_i32 = arith.constant 0 : i32
    %c0_i32_0 = arith.constant 0 : i32
    return %arg0, %c0_i32 : i32, i32
  }
}

module attributes {stable_mosaic.version = 11 : i64} {
  func.func @_mlp_heads_kernel(%arg0: memref<2x264xf32, #tpu.memory_space<vmem>>, %arg1: memref<264x64xf32, #tpu.memory_space<vmem>>, %arg2: memref<1x64xf32, #tpu.memory_space<vmem>>, %arg3: memref<64x64xf32, #tpu.memory_space<vmem>>, %arg4: memref<1x64xf32, #tpu.memory_space<vmem>>, %arg5: memref<64x3xf32, #tpu.memory_space<vmem>>, %arg6: memref<1x3xf32, #tpu.memory_space<vmem>>, %arg7: memref<2x3xf32, #tpu.memory_space<vmem>>) attributes {dimension_semantics = [], scalar_prefetch = 0 : i64, scratch_operands = 0 : i64, tpu.core_type = #tpu.core_type<tc>} {
    %c0 = arith.constant 0 : index
    %c0_0 = arith.constant 0 : index
    %0 = vector.load %arg0[%c0, %c0_0] : memref<2x264xf32, #tpu.memory_space<vmem>>, vector<2x264xf32>
    %c0_1 = arith.constant 0 : index
    %c0_2 = arith.constant 0 : index
    %1 = vector.load %arg1[%c0_1, %c0_2] : memref<264x64xf32, #tpu.memory_space<vmem>>, vector<264x64xf32>
    %cst = arith.constant dense<0.000000e+00> : vector<2x64xf32>
    %2 = tpu.matmul %0, %1, %cst {dimension_numbers = #tpu.dot_dimension_numbers<[1], [0], [0], [1], [0, 0, 1, 1], [], []>} : vector<2x264xf32>, vector<264x64xf32>, vector<2x64xf32> -> vector<2x64xf32>
    %c0_3 = arith.constant 0 : index
    %c0_4 = arith.constant 0 : index
    %3 = vector.load %arg2[%c0_3, %c0_4] : memref<1x64xf32, #tpu.memory_space<vmem>>, vector<1x64xf32>
    %4 = vector.broadcast %3 : vector<1x64xf32> to vector<2x64xf32>
    %5 = arith.addf %2, %4 : vector<2x64xf32>
    %cst_5 = arith.constant 0.000000e+00 : f32
    %6 = vector.broadcast %cst_5 : f32 to vector<2x64xf32>
    %7 = arith.maximumf %5, %6 : vector<2x64xf32>
    %c0_6 = arith.constant 0 : index
    %c0_7 = arith.constant 0 : index
    %8 = vector.load %arg3[%c0_6, %c0_7] : memref<64x64xf32, #tpu.memory_space<vmem>>, vector<64x64xf32>
    %cst_8 = arith.constant dense<0.000000e+00> : vector<2x64xf32>
    %9 = tpu.matmul %7, %8, %cst_8 {dimension_numbers = #tpu.dot_dimension_numbers<[1], [0], [0], [1], [0, 0, 1, 1], [], []>} : vector<2x64xf32>, vector<64x64xf32>, vector<2x64xf32> -> vector<2x64xf32>
    %c0_9 = arith.constant 0 : index
    %c0_10 = arith.constant 0 : index
    %10 = vector.load %arg4[%c0_9, %c0_10] : memref<1x64xf32, #tpu.memory_space<vmem>>, vector<1x64xf32>
    %11 = vector.broadcast %10 : vector<1x64xf32> to vector<2x64xf32>
    %12 = arith.addf %9, %11 : vector<2x64xf32>
    %cst_11 = arith.constant 0.000000e+00 : f32
    %13 = vector.broadcast %cst_11 : f32 to vector<2x64xf32>
    %14 = arith.maximumf %12, %13 : vector<2x64xf32>
    %c0_12 = arith.constant 0 : index
    %c0_13 = arith.constant 0 : index
    %15 = vector.load %arg5[%c0_12, %c0_13] : memref<64x3xf32, #tpu.memory_space<vmem>>, vector<64x3xf32>
    %cst_14 = arith.constant dense<0.000000e+00> : vector<2x3xf32>
    %16 = tpu.matmul %14, %15, %cst_14 {dimension_numbers = #tpu.dot_dimension_numbers<[1], [0], [0], [1], [0, 0, 1, 1], [], []>} : vector<2x64xf32>, vector<64x3xf32>, vector<2x3xf32> -> vector<2x3xf32>
    %c0_15 = arith.constant 0 : index
    %c0_16 = arith.constant 0 : index
    %17 = vector.load %arg6[%c0_15, %c0_16] : memref<1x3xf32, #tpu.memory_space<vmem>>, vector<1x3xf32>
    %18 = vector.broadcast %17 : vector<1x3xf32> to vector<2x3xf32>
    %19 = arith.addf %16, %18 : vector<2x3xf32>
    %c0_17 = arith.constant 0 : index
    %c0_18 = arith.constant 0 : index
    %20 = vector.load %arg7[%c0_17, %c0_18] : memref<2x3xf32, #tpu.memory_space<vmem>>, vector<2x3xf32>
    tpu.vector_store %arg7[%c0_17, %c0_18], %19 {strides = array<i32>} : memref<2x3xf32, #tpu.memory_space<vmem>>, vector<2x3xf32>,
    return
  }
}

</mosaic_0001>

<bundles_post_ra>
// kernel: _lambda_.19
= control target key start
LH: loop header
LB: loop body
LE: loop exit
PB: predicated region body
PF: predicated region fallthrough
CT: control target
= control target key end

     0   :  { %vm317_vm0 = vcmask 261120   ;;  %v601_v50 = vlaneseq  ;;  %v952_v63 = vmov 0   ;;  %vm686_vm3 = vcmask 257024   ;;  %s1285_s1 = inlined_call_operand.vmem [shape: bf16[288,32], index: 1, kind: input, shape index: {}]   ;;  %s1286_s0 = inlined_call_operand.vmem [shape: bf16[128,288], index: 0, kind: input, shape index: {}]   ;;  %s1287_s4 = inlined_call_operand.vmem [shape: f32[1,32], index: 4, kind: input, shape index: {}]   ;;  %s1288_s2 = inlined_call_operand.vmem [shape: f32[1,32], index: 2, kind: input, shape index: {}]   ;;  %s1289_s3 = inlined_call_operand.vmem [shape: f32[1,32], index: 3, kind: input, shape index: {}]   ;;  %s1290_s5 = inlined_call_operand.vmem [shape: bf16[128,32], index: 5, kind: output, shape index: {}]  }
   0x1   :  { %v902_v0 = vld [vmem:[%s1285_s1 + $0x78] sm:$0xff]   ;;  %v904_v2 = vld [vmem:[%s1285_s1 + $0x70] sm:$0xff]   ;;  %v906_v4 = vld [vmem:[%s1285_s1 + $0x68] sm:$0xff]  }
   0x2   :  { %v903_v1 = vld [vmem:[%s1285_s1 + $0x38] sm:$0xff]   ;;  %791 = vmatprep.subr.bf16.mxu0 %v902_v0  ;;  %885 = vmatprep.subr.bf16.mxu1 %v902_v0  ;;  %v905_v3 = vld [vmem:[%s1285_s1 + $0x30] sm:$0xff]   ;;  %v907_v5 = vld [vmem:[%s1285_s1 + $0x28] sm:$0xff]   ;;  %v602_v56 = vshrl.u32 %v601_v50, 7 }
   0x3   :  { %792 = vmatpush3.bf16.msra.mxu0 %v903_v1  ;;  %893 = vmatpush3.bf16.msra.mxu1 %v903_v1  ;;  %v908_v6 = vld [vmem:[%s1285_s1 + $0x60] sm:$0xff]   ;;  %v910_v8 = vld [vmem:[%s1285_s1 + $0x58] sm:$0xff]   ;;  %v912_v10 = vld [vmem:[%s1285_s1 + $0x50] sm:$0xff]  }
   0x4   :  { %793 = vmatprep.subr.bf16.mxu0 %v904_v2  ;;  %886 = vmatprep.subr.bf16.mxu1 %v904_v2  ;;  %v909_v7 = vld [vmem:[%s1285_s1 + $0x20] sm:$0xff]   ;;  %v911_v9 = vld [vmem:[%s1285_s1 + $0x18] sm:$0xff]   ;;  %v913_v13 = vld [vmem:[%s1285_s1 + $0x10] sm:$0xff]   ;;  %v603_v61 = vsub.s32 0, %v602_v56 }
   0x5   :  { %v920_v11 = vld [vmem:[%s1286_s0 + $0x4] ss:$12 sps:$4 sm:$0xff]   ;;  %v923_v12 = vld [vmem:[%s1286_s0 + $0x94] ss:$12 sps:$4 sm:$0xff]   ;;  %v914_v14 = vld [vmem:[%s1285_s1 + $0x48] sm:$0xff]  }
   0x6   :  { %374 = vmatprep.mubr.bf16.mxu0 %v920_v11  ;;  %422 = vmatprep.mubr.bf16.mxu1 %v923_v12  ;;  %v915_v15 = vld [vmem:[%s1285_s1 + $0x8] sm:$0xff]   ;;  %v916_v16 = vld [vmem:[%s1285_s1 + $0x40] sm:$0xff]   ;;  %v921_v20 = vld [vmem:[%s1286_s0 + $0x90] ss:$12 sps:$4 sm:$0xff]  }
   0x7   :  { %794 = vmatpush3.bf16.msra.mxu0 %v905_v3  ;;  %894 = vmatpush3.bf16.msra.mxu1 %v905_v3  ;;  %v917_v17 = vld [vmem:[%s1285_s1] sm:$0xff]   ;;  %v924_v19 = vld [vmem:[%s1285_s1 + $0x88] sm:$0xff]   ;;  %v935_v28 = vld [vmem:[%s1286_s0 + $0x30] ss:$12 sps:$4 sm:$0xff]  }
   0x8   :  { %795 = vmatprep.subr.bf16.mxu0 %v906_v4  ;;  %887 = vmatprep.subr.bf16.mxu1 %v906_v4  ;;  %v918_v18 = vld [vmem:[%s1286_s0] ss:$12 sps:$4 sm:$0xff]   ;;  %v925_v21 = vld [vmem:[%s1286_s0 + $0x1c] ss:$12 sps:$4 sm:$0xff]   ;;  %v929_v24 = vld [vmem:[%s1286_s0 + $0x18] ss:$12 sps:$4 sm:$0xff]  }
   0x9   :  { %v927_v22 = vld [vmem:[%s1286_s0 + $0xac] ss:$12 sps:$4 sm:$0xff]   ;;  %v931_v23 = vld [vmem:[%s1285_s1 + $0x80] sm:$0xff]   ;;  %v930_v25 = vld [vmem:[%s1286_s0 + $0xa8] ss:$12 sps:$4 sm:$0xff]  }
   0xa   :  { %v932_v26 = vld [vmem:[%s1286_s0 + $0x34] ss:$12 sps:$4 sm:$0xff]   ;;  %v937_v30 = vld [vmem:[%s1286_s0 + $0x4c] ss:$12 sps:$4 sm:$0xff]   ;;  %v941_v33 = vld [vmem:[%s1286_s0 + $0x50] ss:$12 sps:$4 sm:$0xff]  }
   0xb   :  { %796 = vmatpush3.bf16.msra.mxu0 %v907_v5  ;;  %895 = vmatpush3.bf16.msra.mxu1 %v907_v5  ;;  %v934_v27 = vld [vmem:[%s1286_s0 + $0x8] ss:$12 sps:$4 sm:$0xff]   ;;  %v936_v29 = vld [vmem:[%s1286_s0 + $0x20] ss:$12 sps:$4 sm:$0xff]   ;;  %v939_v31 = vld [vmem:[%s1286_s0 + $0x38] ss:$12 sps:$4 sm:$0xff]  }
   0xc   :  { %797 = vmatprep.subr.bf16.mxu0 %v908_v6  ;;  %888 = vmatprep.subr.bf16.mxu1 %v908_v6  ;;  %v940_v32 = vld [vmem:[%s1286_s0 + $0x48] ss:$12 sps:$4 sm:$0xff]   ;;  %v942_v34 = vld [vmem:[%s1286_s0 + $0x64] ss:$12 sps:$4 sm:$0xff]   ;;  %v945_v36 = vld [vmem:[%s1286_s0 + $0x60] ss:$12 sps:$4 sm:$0xff]  }
   0xd   :  { %v944_v35 = vld [vmem:[%s1286_s0 + $0x68] ss:$12 sps:$4 sm:$0xff]   ;;  %v946_v37 = vld [vmem:[%s1286_s0 + $0x80] ss:$12 sps:$4 sm:$0xff]   ;;  %v949_v39 = vld [vmem:[%s1286_s0 + $0x98] ss:$12 sps:$4 sm:$0xff]  }
   0xe   :  { %v947_v38 = vld [vmem:[%s1286_s0 + $0x7c] ss:$12 sps:$4 sm:$0xff]   ;;  %v950_v40 = vld [vmem:[%s1286_s0 + $0x78] ss:$12 sps:$4 sm:$0xff]   ;;  %v582_v53 = vld [vmem:[%s1287_s4] sm:$0x1] }
   0xf   :  { %798 = vmatpush3.bf16.msra.mxu0 %v909_v7  ;;  %896 = vmatpush3.bf16.msra.mxu1 %v909_v7  ;;  %v951_v41 = vld [vmem:[%s1286_s0 + $0xb0] ss:$12 sps:$4 sm:$0xff]   ;;  %vm583_vm1 = vcmp.gt.f32.partialorder %v582_v53, 0.5  ;;  %v1139_v3 = vld [vmem:[%s1288_s2] ss:$0 sm:$0xff] }
  0x10   :  { %799 = vmatprep.subr.bf16.mxu0 %v910_v8  ;;  %889 = vmatprep.subr.bf16.mxu1 %v910_v8  ;;  %v600_v0 = vsel %vm583_vm1, 1, %v952_v63  ;;  %v1144_v6 = vld [vmem:[%s1289_s3] ss:$0 sm:$0xff] }
  0x11   :  { %v1146_v7 = vrot.slane %v600_v0, %v603_v61 }
  0x13   :  { %800 = vmatpush3.bf16.msra.mxu0 %v911_v9  ;;  %897 = vmatpush3.bf16.msra.mxu1 %v911_v9  ;;  %vm605_vm2 = vcmp.eq.s32.totalorder %v1146_v7, 1 }
  0x14   :  { %801 = vmatprep.subr.bf16.mxu0 %v912_v10  ;;  %890 = vmatprep.subr.bf16.mxu1 %v912_v10 }
  0x17   :  { %802 = vmatpush3.bf16.msra.mxu0 %v913_v13  ;;  %898 = vmatpush3.bf16.msra.mxu1 %v913_v13 }
  0x18   :  { %803 = vmatprep.subr.bf16.mxu0 %v914_v14  ;;  %891 = vmatprep.subr.bf16.mxu1 %v914_v14 }
  0x1b   :  { %804 = vmatpush3.bf16.msra.mxu0 %v915_v15  ;;  %899 = vmatpush3.bf16.msra.mxu1 %v915_v15 }
  0x1c   :  { %805 = vmatprep.subr.bf16.mxu0 %v916_v16  ;;  %892 = vmatprep.subr.bf16.mxu1 %v916_v16 }
  0x1f   :  { %806 = vmatpush3.bf16.msra.mxu0 %v917_v17  ;;  %900 = vmatpush3.bf16.msra.mxu1 %v917_v17 }
  0x20   :  { %865 = vmatprep.subr.bf16.mxu1 %v924_v19 }
  0x22   :  { %375 = vmatmul.mubr.bf16.vlgmr.msra.gmra.mxu0 %v918_v18  ;;  %423 = vmatmul.mubr.bf16.vlgmr.msra.gmra.mxu1 %v921_v20 }
  0x23   :  { %866 = vmatpush3.bf16.msra.mxu1 %v924_v19  ;;  %382 = vmatprep.mubr.bf16.mxu0 %v925_v21 }
  0x24   :  { %430 = vmatprep.mubr.bf16.mxu1 %v927_v22  ;;  %867 = vmatprep.subr.bf16.mxu1 %v931_v23 }
  0x27   :  { %868 = vmatpush3.bf16.msra.mxu1 %v931_v23 }
  0x2a   :  { %383 = vmatmul.mubr.bf16.gmra.mxu0 %v929_v24  ;;  %431 = vmatmul.mubr.bf16.gmra.mxu1 %v930_v25 }
  0x2b   :  { %390 = vmatprep.mubr.bf16.mxu0 %v932_v26  ;;  %869 = vmatprep.mubr.msk.bf16.mxu1 %vm317_vm0, %v934_v27 }
  0x32   :  { %391 = vmatmul.mubr.bf16.gmra.mxu0 %v935_v28  ;;  %870 = vmatmul.mubr.msk.bf16.vlgmr.msra.gmra.mxu1 %vm317_vm0, %v936_v29 }
  0x33   :  { %398 = vmatprep.mubr.bf16.mxu0 %v937_v30  ;;  %873 = vmatprep.mubr.msk.bf16.mxu1 %vm317_vm0, %v939_v31 }
  0x3a   :  { %399 = vmatmul.mubr.bf16.gmra.mxu0 %v940_v32  ;;  %874 = vmatmul.mubr.msk.bf16.gmra.mxu1 %vm317_vm0, %v941_v33 }
  0x3b   :  { %406 = vmatprep.mubr.bf16.mxu0 %v942_v34  ;;  %877 = vmatprep.mubr.msk.bf16.mxu1 %vm317_vm0, %v944_v35 }
  0x42   :  { %407 = vmatmul.mubr.bf16.gmra.mxu0 %v945_v36  ;;  %878 = vmatmul.mubr.msk.bf16.gmra.mxu1 %vm317_vm0, %v946_v37 }
  0x43   :  { %414 = vmatprep.mubr.bf16.mxu0 %v947_v38  ;;  %881 = vmatprep.mubr.msk.bf16.mxu1 %vm317_vm0, %v949_v39 }
  0x4a   :  { %415 = vmatmul.mubr.bf16.gmra.mxu0 %v950_v40  ;;  %882 = vmatmul.mubr.msk.bf16.gmra.mxu1 %vm317_vm0, %v951_v41 }
  0xe2   :  { %v807_v42 = vpop.f32.mrf.mxu0  ;;  %v1117_v43 = vpop.f32.mrf.mxu1 }
  0xe4   :  { %v808_v44 = vpop.f32.mrf.mxu0  ;;  %v1119_v45 = vpop.f32.mrf.mxu1 }
  0xe5   :  { %v809_v4 = vadd.f32 %v808_v44, %v807_v42 }
  0xe6   :  { %v810_v46 = vpop.f32.mrf.mxu0  ;;  %v1121_v47 = vpop.f32.mrf.mxu1 }
  0xe8   :  { %v811_v48 = vpop.f32.mrf.mxu0  ;;  %v1123_v49 = vpop.f32.mrf.mxu1 }
  0xe9   :  { %v812_v18 = vadd.f32 %v811_v48, %v810_v46 }
  0xea   :  { %v813_v51 = vpop.f32.mrf.mxu0  ;;  %v1125_v52 = vpop.f32.mrf.mxu1 }
  0xec   :  { %v814_v54 = vpop.f32.mrf.mxu0  ;;  %v1130_v55 = vpop.f32.mrf.mxu1 }
  0xed   :  { %v815_v62 = vadd.f32 %v814_v54, %v813_v51 }
  0xee   :  { %v816_v57 = vpop.f32.mrf.mxu0  ;;  %v1132_v58 = vpop.f32.mrf.mxu1 }
  0xf0   :  { %v817_v59 = vpop.f32.mrf.mxu0  ;;  %v1134_v60 = vpop.f32.mrf.mxu1 }
  0xf1   :  { %v818_v10 = vadd.f32 %v817_v59, %v816_v57 }
  0xf2   :  { %v819_v1 = vpop.f32.mrf.mxu0  ;;  %v871_v2 = vpop.f32.mrf.mxu1 }
  0xf3   :  { %v482_v5 = vadd.f32 %v871_v2, %v815_v62 }
  0xf4   :  { %v820_v8 = vpop.f32.mrf.mxu0  ;;  %v473_v9 = vpop.f32.mrf.mxu1 }
  0xf5   :  { %v545_v11 = vmul.f32 %v1139_v3, %v482_v5  ;;  %v474_v12 = vadd.f32 %v809_v4, %v473_v9  ;;  %v821_v28 = vadd.f32 %v820_v8, %v819_v1 }
  0xf6   :  { %v822_v13 = vpop.f32.mrf.mxu0  ;;  %v872_v14 = vpop.f32.mrf.mxu1 }
  0xf7   :  { %v568_v15 = vadd.f32 %v1144_v6, %v545_v11  ;;  %v543_v16 = vmul.f32 %v1139_v3, %v474_v12  ;;  %v485_v17 = vadd.f32 %v872_v14, %v818_v10 }
  0xf8   :  { %v823_v19 = vpop.f32.mrf.mxu0  ;;  %v476_v20 = vpop.f32.mrf.mxu1 }
  0xf9   :  { %v586_v21 = vmax.f32 %v568_v15, 0.0  ;;  %v566_v22 = vadd.f32 %v1144_v6, %v543_v16  ;;  %v546_v23 = vmul.f32 %v1139_v3, %v485_v17  ;;  %v477_v24 = vadd.f32 %v812_v18, %v476_v20 }
  0xfa   :  { %v825_v25 = vpop.f32.mrf.mxu0  ;;  %v875_v26 = vpop.f32.mrf.mxu1  ;;  %v824_v46 = vadd.f32 %v823_v19, %v822_v13 }
  0xfb   :  { %v608_v27 = vsel %vm605_vm2, %v586_v21, %v568_v15  ;;  %v584_v29 = vmax.f32 %v566_v22, 0.0  ;;  %v569_v30 = vadd.f32 %v1144_v6, %v546_v23  ;;  %v544_v32 = vmul.f32 %v1139_v3, %v477_v24 }
  0xfc   :  { %v777_v31 = vpack.c.bf16 %v608_v27, %v608_v27  ;;  %v826_v33 = vpop.f32.mrf.mxu0  ;;  %v489_v34 = vpop.f32.mrf.mxu1 }
  0xfd   :  { %v606_v35 = vsel %vm605_vm2, %v584_v29, %v566_v22  ;;  %v587_v36 = vmax.f32 %v569_v30, 0.0  ;;  %v827_v37 = vadd.f32 %v826_v33, %v825_v25  ;;  %v490_v38 = vadd.f32 %v821_v28, %v489_v34 }
  0xfe   :  { %689 = vst.msk [vmem:[%s1290_s5 + $0x8] sm:$0xf] %vm686_vm3, %v777_v31  ;;  %v775_v39 = vpack.c.bf16 %v606_v35, %v606_v35  ;;  %v567_v40 = vadd.f32 %v1144_v6, %v544_v32  ;;  %v828_v41 = vpop.f32.mrf.mxu0  ;;  %v876_v42 = vpop.f32.mrf.mxu1  ;;  %v851_v31 = vadd.f32 %v1130_v55, %v1125_v52 }
  0xff   :  { %v609_v44 = vsel %vm605_vm2, %v587_v36, %v569_v30  ;;  %v498_v48 = vadd.f32 %v875_v26, %v827_v37  ;;  %v547_v50 = vmul.f32 %v1139_v3, %v490_v38  ;;  %v845_v30 = vadd.f32 %v1119_v45, %v1117_v43 }
 0x100   :  { %687 = vst.msk [vmem:[%s1290_s5] sm:$0xf] %vm686_vm3, %v775_v39  ;;  %v778_v51 = vpack.c.bf16 %v609_v44, %v609_v44  ;;  %v585_v53 = vmax.f32 %v567_v40, 0.0  ;;  %v829_v54 = vpop.f32.mrf.mxu0  ;;  %v492_v56 = vpop.f32.mrf.mxu1  ;;  %v854_v44 = vadd.f32 %v1134_v60, %v1132_v58  ;;  %v848_v58 = vadd.f32 %v1123_v49, %v1121_v47 }
 0x101   :  { %v549_v57 = vmul.f32 %v1139_v3, %v498_v48  ;;  %v570_v59 = vadd.f32 %v1144_v6, %v547_v50  ;;  %v830_v61 = vadd.f32 %v829_v54, %v828_v41  ;;  %v493_v62 = vadd.f32 %v824_v46, %v492_v56 }
 0x102   :  { %690 = vst.msk [vmem:[%s1290_s5 + $0xc] sm:$0xf] %vm686_vm3, %v778_v51  ;;  %v607_v63 = vsel %vm605_vm2, %v585_v53, %v567_v40  ;;  %v831_v0 = vpop.f32.mrf.mxu0  ;;  %v879_v1 = vpop.f32.mrf.mxu1 }
 0x103   :  { %v776_v2 = vpack.c.bf16 %v607_v63, %v607_v63  ;;  %v572_v4 = vadd.f32 %v1144_v6, %v549_v57  ;;  %v588_v5 = vmax.f32 %v570_v59, 0.0  ;;  %v501_v8 = vadd.f32 %v876_v42, %v830_v61 }
 0x104   :  { %v548_v9 = vmul.f32 %v1139_v3, %v493_v62  ;;  %v832_v10 = vpop.f32.mrf.mxu0  ;;  %v505_v11 = vpop.f32.mrf.mxu1 }
 0x105   :  { %688 = vst.msk [vmem:[%s1290_s5 + $0x4] sm:$0xf] %vm686_vm3, %v776_v2  ;;  %v590_v12 = vmax.f32 %v572_v4, 0.0  ;;  %v610_v13 = vsel %vm605_vm2, %v588_v5, %v570_v59  ;;  %v550_v14 = vmul.f32 %v1139_v3, %v501_v8  ;;  %v833_v15 = vadd.f32 %v832_v10, %v831_v0 }
 0x106   :  { %v779_v16 = vpack.c.bf16 %v610_v13, %v610_v13  ;;  %v571_v17 = vadd.f32 %v1144_v6, %v548_v9  ;;  %v834_v18 = vpop.f32.mrf.mxu0  ;;  %v880_v19 = vpop.f32.mrf.mxu1 }
 0x107   :  { %v612_v20 = vsel %vm605_vm2, %v590_v12, %v572_v4  ;;  %v573_v21 = vadd.f32 %v1144_v6, %v550_v14  ;;  %v506_v22 = vadd.f32 %v833_v15, %v505_v11 }
 0x108   :  { %v781_v23 = vpack.c.bf16 %v612_v20, %v612_v20  ;;  %691 = vst.msk [vmem:[%s1290_s5 + $0x10] sm:$0xf] %vm686_vm3, %v779_v16  ;;  %v589_v24 = vmax.f32 %v571_v17, 0.0  ;;  %v835_v25 = vpop.f32.mrf.mxu0  ;;  %v508_v26 = vpop.f32.mrf.mxu1 }
 0x109   :  { %v591_v27 = vmax.f32 %v573_v21, 0.0  ;;  %v551_v28 = vmul.f32 %v1139_v3, %v506_v22  ;;  %v836_v29 = vadd.f32 %v835_v25, %v834_v18 }
 0x10a   :  { %693 = vst.msk [vmem:[%s1290_s5 + $0x18] sm:$0xf] %vm686_vm3, %v781_v23  ;;  %v611_v32 = vsel %vm605_vm2, %v589_v24, %v571_v17  ;;  %v837_v33 = vpop.f32.mrf.mxu0  ;;  %v883_v34 = vpop.f32.mrf.mxu1 }
 0x10b   :  { %v613_v35 = vsel %vm605_vm2, %v591_v27, %v573_v21  ;;  %v780_v36 = vpack.c.bf16 %v611_v32, %v611_v32  ;;  %v574_v37 = vadd.f32 %v1144_v6, %v551_v28  ;;  %v509_v43 = vadd.f32 %v836_v29, %v508_v26 }
 0x10c   :  { %v782_v45 = vpack.c.bf16 %v613_v35, %v613_v35  ;;  %v530_v38 = vadd.f32 %v883_v34, %v851_v31  ;;  %v838_v52 = vpop.f32.mrf.mxu0  ;;  %v521_v55 = vpop.f32.mrf.mxu1 }
 0x10d   :  { %692 = vst.msk [vmem:[%s1290_s5 + $0x14] sm:$0xf] %vm686_vm3, %v780_v36  ;;  %v592_v39 = vmax.f32 %v574_v37, 0.0  ;;  %v552_v40 = vmul.f32 %v1139_v3, %v509_v43  ;;  %v839_v41 = vadd.f32 %v838_v52, %v837_v33  ;;  %v522_v42 = vadd.f32 %v845_v30, %v521_v55 }
 0x10e   :  { %694 = vst.msk [vmem:[%s1290_s5 + $0x1c] sm:$0xf] %vm686_vm3, %v782_v45  ;;  %v557_v46 = vmul.f32 %v1139_v3, %v530_v38  ;;  %v840_v48 = vpop.f32.mrf.mxu0  ;;  %v884_v50 = vpop.f32.mrf.mxu1 }
 0x10f   :  { %v614_v51 = vsel %vm605_vm2, %v592_v39, %v574_v37  ;;  %v575_v53 = vadd.f32 %v1144_v6, %v552_v40  ;;  %v514_v54 = vadd.f32 %v879_v1, %v839_v41  ;;  %v555_v56 = vmul.f32 %v1139_v3, %v522_v42 }
 0x110   :  { %v783_v60 = vpack.c.bf16 %v614_v51, %v614_v51  ;;  %v580_v57 = vadd.f32 %v1144_v6, %v557_v46  ;;  %v533_v59 = vadd.f32 %v884_v50, %v854_v44  ;;  %v841_v61 = vpop.f32.mrf.mxu0  ;;  %v524_v62 = vpop.f32.mrf.mxu1 }
 0x111   :  { %v593_v63 = vmax.f32 %v575_v53, 0.0  ;;  %v553_v0 = vmul.f32 %v1139_v3, %v514_v54  ;;  %v578_v2 = vadd.f32 %v1144_v6, %v555_v56  ;;  %v842_v4 = vadd.f32 %v841_v61, %v840_v48 }
 0x112   :  { %695 = vst.msk [vmem:[%s1290_s5 + $0x20] sm:$0xf] %vm686_vm3, %v783_v60  ;;  %v598_v1 = vmax.f32 %v580_v57, 0.0  ;;  %v558_v47 = vmul.f32 %v1139_v3, %v533_v59  ;;  %v525_v49 = vadd.f32 %v848_v58, %v524_v62 }
 0x113   :  { %v615_v5 = vsel %vm605_vm2, %v593_v63, %v575_v53  ;;  %v576_v8 = vadd.f32 %v1144_v6, %v553_v0  ;;  %v596_v9 = vmax.f32 %v578_v2, 0.0  ;;  %v517_v10 = vadd.f32 %v880_v19, %v842_v4 }
 0x114   :  { %v784_v11 = vpack.c.bf16 %v615_v5, %v615_v5  ;;  %v620_v12 = vsel %vm605_vm2, %v598_v1, %v580_v57  ;;  %v581_v13 = vadd.f32 %v1144_v6, %v558_v47  ;;  %v556_v14 = vmul.f32 %v1139_v3, %v525_v49 }
 0x115   :  { %v789_v15 = vpack.c.bf16 %v620_v12, %v620_v12  ;;  %v594_v16 = vmax.f32 %v576_v8, 0.0  ;;  %v618_v17 = vsel %vm605_vm2, %v596_v9, %v578_v2  ;;  %v554_v18 = vmul.f32 %v1139_v3, %v517_v10 }
 0x116   :  { %696 = vst.msk [vmem:[%s1290_s5 + $0x24] sm:$0xf] %vm686_vm3, %v784_v11  ;;  %v787_v19 = vpack.c.bf16 %v618_v17, %v618_v17  ;;  %v599_v20 = vmax.f32 %v581_v13, 0.0  ;;  %v579_v21 = vadd.f32 %v1144_v6, %v556_v14 }
 0x117   :  { %701 = vst.msk [vmem:[%s1290_s5 + $0x38] sm:$0xf] %vm686_vm3, %v789_v15  ;;  %v616_v22 = vsel %vm605_vm2, %v594_v16, %v576_v8  ;;  %v577_v23 = vadd.f32 %v1144_v6, %v554_v18 }
 0x118   :  { %v785_v3 = vpack.c.bf16 %v616_v22, %v616_v22  ;;  %699 = vst.msk [vmem:[%s1290_s5 + $0x30] sm:$0xf] %vm686_vm3, %v787_v19  ;;  %v621_v24 = vsel %vm605_vm2, %v599_v20, %v581_v13  ;;  %v597_v25 = vmax.f32 %v579_v21, 0.0 }
 0x119   :  { %v790_v26 = vpack.c.bf16 %v621_v24, %v621_v24  ;;  %v595_v27 = vmax.f32 %v577_v23, 0.0 }
 0x11a   :  { %697 = vst.msk [vmem:[%s1290_s5 + $0x28] sm:$0xf] %vm686_vm3, %v785_v3  ;;  %v619_v6 = vsel %vm605_vm2, %v597_v25, %v579_v21 }
 0x11b   :  { %702 = vst.msk [vmem:[%s1290_s5 + $0x3c] sm:$0xf] %vm686_vm3, %v790_v26  ;;  %v617_v28 = vsel %vm605_vm2, %v595_v27, %v577_v23  ;;  %v788_v29 = vpack.c.bf16 %v619_v6, %v619_v6 }
 0x11c   :  { %v786_v30 = vpack.c.bf16 %v617_v28, %v617_v28 }
 0x11d   :  { %700 = vst.msk [vmem:[%s1290_s5 + $0x34] sm:$0xf] %vm686_vm3, %v788_v29 }
 0x11e   :  { %698 = vst.msk [vmem:[%s1290_s5 + $0x2c] sm:$0xf] %vm686_vm3, %v786_v30 }

// kernel: _lambda_.20
= control target key start
LH: loop header
LB: loop body
LE: loop exit
PB: predicated region body
PF: predicated region fallthrough
CT: control target
= control target key end

     0   :  { %vm320_vm0 = vcmask 261120   ;;  %v652_v52 = vlaneseq  ;;  %vm737_vm3 = vcmask 257024   ;;  %s1436_s1 = inlined_call_operand.vmem [shape: bf16[288,32], index: 1, kind: input, shape index: {}]   ;;  %s1437_s0 = inlined_call_operand.vmem [shape: bf16[128,288], index: 0, kind: input, shape index: {}]   ;;  %s1438_s4 = inlined_call_operand.vmem [shape: f32[1,32], index: 4, kind: input, shape index: {}]   ;;  %s1439_s2 = inlined_call_operand.vmem [shape: f32[1,32], index: 2, kind: input, shape index: {}]   ;;  %s1440_s5 = inlined_call_operand.vmem [shape: bf16[128,32], index: 5, kind: input, shape index: {}]   ;;  %s1441_s3 = inlined_call_operand.vmem [shape: f32[1,32], index: 3, kind: input, shape index: {}]   ;;  %s1442_s6 = inlined_call_operand.vmem [shape: bf16[128,32], index: 6, kind: output, shape index: {}]  }
   0x1   :  { %v992_v0 = vld [vmem:[%s1436_s1 + $0x78] sm:$0xff]   ;;  %v994_v2 = vld [vmem:[%s1436_s1 + $0x70] sm:$0xff]   ;;  %v996_v4 = vld [vmem:[%s1436_s1 + $0x68] sm:$0xff]  }
   0x2   :  { %v993_v1 = vld [vmem:[%s1436_s1 + $0x38] sm:$0xff]   ;;  %881 = vmatprep.subr.bf16.mxu0 %v992_v0  ;;  %975 = vmatprep.subr.bf16.mxu1 %v992_v0  ;;  %v995_v3 = vld [vmem:[%s1436_s1 + $0x30] sm:$0xff]   ;;  %v997_v5 = vld [vmem:[%s1436_s1 + $0x28] sm:$0xff]   ;;  %v653_v58 = vshrl.u32 %v652_v52, 7 }
   0x3   :  { %882 = vmatpush3.bf16.msra.mxu0 %v993_v1  ;;  %983 = vmatpush3.bf16.msra.mxu1 %v993_v1  ;;  %v998_v6 = vld [vmem:[%s1436_s1 + $0x60] sm:$0xff]   ;;  %v1000_v8 = vld [vmem:[%s1436_s1 + $0x58] sm:$0xff]   ;;  %v1002_v10 = vld [vmem:[%s1436_s1 + $0x50] sm:$0xff]  }
   0x4   :  { %883 = vmatprep.subr.bf16.mxu0 %v994_v2  ;;  %976 = vmatprep.subr.bf16.mxu1 %v994_v2  ;;  %v999_v7 = vld [vmem:[%s1436_s1 + $0x20] sm:$0xff]   ;;  %v1001_v9 = vld [vmem:[%s1436_s1 + $0x18] sm:$0xff]   ;;  %v1003_v13 = vld [vmem:[%s1436_s1 + $0x10] sm:$0xff]   ;;  %v654_v2 = vsub.s32 0, %v653_v58 }
   0x5   :  { %v1010_v11 = vld [vmem:[%s1437_s0 + $0x4] ss:$12 sps:$4 sm:$0xff]   ;;  %v1013_v12 = vld [vmem:[%s1437_s0 + $0x94] ss:$12 sps:$4 sm:$0xff]   ;;  %v1004_v14 = vld [vmem:[%s1436_s1 + $0x48] sm:$0xff]  }
   0x6   :  { %377 = vmatprep.mubr.bf16.mxu0 %v1010_v11  ;;  %425 = vmatprep.mubr.bf16.mxu1 %v1013_v12  ;;  %v1005_v15 = vld [vmem:[%s1436_s1 + $0x8] sm:$0xff]   ;;  %v1006_v16 = vld [vmem:[%s1436_s1 + $0x40] sm:$0xff]   ;;  %v1011_v20 = vld [vmem:[%s1437_s0 + $0x90] ss:$12 sps:$4 sm:$0xff]  }
   0x7   :  { %884 = vmatpush3.bf16.msra.mxu0 %v995_v3  ;;  %984 = vmatpush3.bf16.msra.mxu1 %v995_v3  ;;  %v1007_v17 = vld [vmem:[%s1436_s1] sm:$0xff]   ;;  %v1014_v19 = vld [vmem:[%s1436_s1 + $0x88] sm:$0xff]   ;;  %v1025_v28 = vld [vmem:[%s1437_s0 + $0x30] ss:$12 sps:$4 sm:$0xff]  }
   0x8   :  { %885 = vmatprep.subr.bf16.mxu0 %v996_v4  ;;  %977 = vmatprep.subr.bf16.mxu1 %v996_v4  ;;  %v1008_v18 = vld [vmem:[%s1437_s0] ss:$12 sps:$4 sm:$0xff]   ;;  %v1015_v21 = vld [vmem:[%s1437_s0 + $0x1c] ss:$12 sps:$4 sm:$0xff]   ;;  %v1019_v24 = vld [vmem:[%s1437_s0 + $0x18] ss:$12 sps:$4 sm:$0xff]  }
   0x9   :  { %v1017_v22 = vld [vmem:[%s1437_s0 + $0xac] ss:$12 sps:$4 sm:$0xff]   ;;  %v1021_v23 = vld [vmem:[%s1436_s1 + $0x80] sm:$0xff]   ;;  %v1020_v25 = vld [vmem:[%s1437_s0 + $0xa8] ss:$12 sps:$4 sm:$0xff]  }
   0xa   :  { %v1022_v26 = vld [vmem:[%s1437_s0 + $0x34] ss:$12 sps:$4 sm:$0xff]   ;;  %v1027_v30 = vld [vmem:[%s1437_s0 + $0x4c] ss:$12 sps:$4 sm:$0xff]   ;;  %v1031_v33 = vld [vmem:[%s1437_s0 + $0x50] ss:$12 sps:$4 sm:$0xff]  }
   0xb   :  { %886 = vmatpush3.bf16.msra.mxu0 %v997_v5  ;;  %985 = vmatpush3.bf16.msra.mxu1 %v997_v5  ;;  %v1024_v27 = vld [vmem:[%s1437_s0 + $0x8] ss:$12 sps:$4 sm:$0xff]   ;;  %v1026_v29 = vld [vmem:[%s1437_s0 + $0x20] ss:$12 sps:$4 sm:$0xff]   ;;  %v1029_v31 = vld [vmem:[%s1437_s0 + $0x38] ss:$12 sps:$4 sm:$0xff]  }
   0xc   :  { %887 = vmatprep.subr.bf16.mxu0 %v998_v6  ;;  %978 = vmatprep.subr.bf16.mxu1 %v998_v6  ;;  %v1030_v32 = vld [vmem:[%s1437_s0 + $0x48] ss:$12 sps:$4 sm:$0xff]   ;;  %v1032_v34 = vld [vmem:[%s1437_s0 + $0x64] ss:$12 sps:$4 sm:$0xff]   ;;  %v1035_v36 = vld [vmem:[%s1437_s0 + $0x60] ss:$12 sps:$4 sm:$0xff]  }
   0xd   :  { %v1034_v35 = vld [vmem:[%s1437_s0 + $0x68] ss:$12 sps:$4 sm:$0xff]   ;;  %v1036_v37 = vld [vmem:[%s1437_s0 + $0x80] ss:$12 sps:$4 sm:$0xff]   ;;  %v1039_v39 = vld [vmem:[%s1437_s0 + $0x98] ss:$12 sps:$4 sm:$0xff]  }
   0xe   :  { %v1037_v38 = vld [vmem:[%s1437_s0 + $0x7c] ss:$12 sps:$4 sm:$0xff]   ;;  %v1040_v40 = vld [vmem:[%s1437_s0 + $0x78] ss:$12 sps:$4 sm:$0xff]   ;;  %v633_v55 = vld [vmem:[%s1438_s4] sm:$0x1] }
   0xf   :  { %888 = vmatpush3.bf16.msra.mxu0 %v999_v7  ;;  %986 = vmatpush3.bf16.msra.mxu1 %v999_v7  ;;  %v1041_v41 = vld [vmem:[%s1437_s0 + $0xb0] ss:$12 sps:$4 sm:$0xff]   ;;  %vm634_vm1 = vcmp.gt.f32.partialorder %v633_v55, 0.5  ;;  %v1234_v0 = vld [vmem:[%s1439_s2] ss:$0 sm:$0xff]  ;;  %v874_v1 = vld [vmem:[%s1440_s5 + $0x8] sm:$0xff]  }
  0x10   :  { %889 = vmatprep.subr.bf16.mxu0 %v1000_v8  ;;  %979 = vmatprep.subr.bf16.mxu1 %v1000_v8  ;;  %v1042_v5 = vmov 0   ;;  %v1242_v7 = vld [vmem:[%s1441_s3] ss:$0 sm:$0xff] }
  0x11   :  { %v651_v6 = vsel %vm634_vm1, 1, %v1042_v5 }
  0x13   :  { %890 = vmatpush3.bf16.msra.mxu0 %v1001_v9  ;;  %987 = vmatpush3.bf16.msra.mxu1 %v1001_v9 }
  0x14   :  { %891 = vmatprep.subr.bf16.mxu0 %v1002_v10  ;;  %980 = vmatprep.subr.bf16.mxu1 %v1002_v10  ;;  %v843_v10 = vld [vmem:[%s1440_s5] sm:$0xff]  }
  0x17   :  { %892 = vmatpush3.bf16.msra.mxu0 %v1003_v13  ;;  %988 = vmatpush3.bf16.msra.mxu1 %v1003_v13  ;;  %v848_v13 = vunpack.c.l.bf16 %v874_v1 }
  0x18   :  { %893 = vmatprep.subr.bf16.mxu0 %v1004_v14  ;;  %981 = vmatprep.subr.bf16.mxu1 %v1004_v14 }
  0x1b   :  { %894 = vmatpush3.bf16.msra.mxu0 %v1005_v15  ;;  %989 = vmatpush3.bf16.msra.mxu1 %v1005_v15  ;;  %v1248_v15 = vrot.slane %v651_v6, %v654_v2 }
  0x1c   :  { %895 = vmatprep.subr.bf16.mxu0 %v1006_v16  ;;  %982 = vmatprep.subr.bf16.mxu1 %v1006_v16 }
  0x1d   :  { %vm656_vm2 = vcmp.eq.s32.totalorder %v1248_v15, 1 }
  0x1f   :  { %896 = vmatpush3.bf16.msra.mxu0 %v1007_v17  ;;  %990 = vmatpush3.bf16.msra.mxu1 %v1007_v17 }
  0x20   :  { %955 = vmatprep.subr.bf16.mxu1 %v1014_v19 }
  0x22   :  { %378 = vmatmul.mubr.bf16.vlgmr.msra.gmra.mxu0 %v1008_v18  ;;  %426 = vmatmul.mubr.bf16.vlgmr.msra.gmra.mxu1 %v1011_v20  ;;  %v844_v20 = vunpack.c.l.bf16 %v843_v10 }
  0x23   :  { %956 = vmatpush3.bf16.msra.mxu1 %v1014_v19  ;;  %385 = vmatprep.mubr.bf16.mxu0 %v1015_v21 }
  0x24   :  { %433 = vmatprep.mubr.bf16.mxu1 %v1017_v22  ;;  %957 = vmatprep.subr.bf16.mxu1 %v1021_v23 }
  0x27   :  { %958 = vmatpush3.bf16.msra.mxu1 %v1021_v23 }
  0x2a   :  { %386 = vmatmul.mubr.bf16.gmra.mxu0 %v1019_v24  ;;  %434 = vmatmul.mubr.bf16.gmra.mxu1 %v1020_v25 }
  0x2b   :  { %393 = vmatprep.mubr.bf16.mxu0 %v1022_v26  ;;  %959 = vmatprep.mubr.msk.bf16.mxu1 %vm320_vm0, %v1024_v27 }
  0x32   :  { %394 = vmatmul.mubr.bf16.gmra.mxu0 %v1025_v28  ;;  %960 = vmatmul.mubr.msk.bf16.vlgmr.msra.gmra.mxu1 %vm320_vm0, %v1026_v29  ;;  %v849_v28 = vunpack.c.h.bf16 %v874_v1 }
  0x33   :  { %401 = vmatprep.mubr.bf16.mxu0 %v1027_v30  ;;  %963 = vmatprep.mubr.msk.bf16.mxu1 %vm320_vm0, %v1029_v31 }
  0x3a   :  { %402 = vmatmul.mubr.bf16.gmra.mxu0 %v1030_v32  ;;  %964 = vmatmul.mubr.msk.bf16.gmra.mxu1 %vm320_vm0, %v1031_v33 }
  0x3b   :  { %409 = vmatprep.mubr.bf16.mxu0 %v1032_v34  ;;  %967 = vmatprep.mubr.msk.bf16.mxu1 %vm320_vm0, %v1034_v35  ;;  %v1259_v35 = vld [vmem:[%s1440_s5 + $0x10] sm:$0xff]  }
  0x3c   :  { %v852_v55 = vunpack.c.l.bf16 %v1259_v35 }
  0x42   :  { %410 = vmatmul.mubr.bf16.gmra.mxu0 %v1035_v36  ;;  %968 = vmatmul.mubr.msk.bf16.gmra.mxu1 %vm320_vm0, %v1036_v37 }
  0x43   :  { %417 = vmatprep.mubr.bf16.mxu0 %v1037_v38  ;;  %971 = vmatprep.mubr.msk.bf16.mxu1 %vm320_vm0, %v1039_v39  ;;  %v845_v38 = vunpack.c.h.bf16 %v843_v10 }
  0x4a   :  { %418 = vmatmul.mubr.bf16.gmra.mxu0 %v1040_v40  ;;  %972 = vmatmul.mubr.msk.bf16.gmra.mxu1 %vm320_vm0, %v1041_v41 }
  0xe2   :  { %v897_v42 = vpop.f32.mrf.mxu0  ;;  %v1212_v43 = vpop.f32.mrf.mxu1 }
  0xe4   :  { %v898_v44 = vpop.f32.mrf.mxu0  ;;  %v1214_v45 = vpop.f32.mrf.mxu1 }
  0xe5   :  { %v899_v3 = vadd.f32 %v898_v44, %v897_v42 }
  0xe6   :  { %v900_v46 = vpop.f32.mrf.mxu0  ;;  %v1216_v47 = vpop.f32.mrf.mxu1 }
  0xe8   :  { %v901_v48 = vpop.f32.mrf.mxu0  ;;  %v1218_v49 = vpop.f32.mrf.mxu1 }
  0xe9   :  { %v902_v22 = vadd.f32 %v901_v48, %v900_v46  ;;  %v1267_v48 = vld [vmem:[%s1440_s5 + $0x18] sm:$0xff]  }
  0xea   :  { %v903_v50 = vpop.f32.mrf.mxu0  ;;  %v1220_v51 = vpop.f32.mrf.mxu1 }
  0xec   :  { %v904_v53 = vpop.f32.mrf.mxu0  ;;  %v1222_v54 = vpop.f32.mrf.mxu1 }
  0xed   :  { %v905_v61 = vadd.f32 %v904_v53, %v903_v50 }
  0xee   :  { %v906_v56 = vpop.f32.mrf.mxu0  ;;  %v1227_v57 = vpop.f32.mrf.mxu1 }
  0xf0   :  { %v907_v59 = vpop.f32.mrf.mxu0  ;;  %v1229_v60 = vpop.f32.mrf.mxu1 }
  0xf1   :  { %v908_v11 = vadd.f32 %v907_v59, %v906_v56 }
  0xf2   :  { %v909_v62 = vpop.f32.mrf.mxu0  ;;  %v961_v63 = vpop.f32.mrf.mxu1 }
  0xf3   :  { %v485_v4 = vadd.f32 %v961_v63, %v905_v61 }
  0xf4   :  { %v910_v8 = vpop.f32.mrf.mxu0  ;;  %v476_v9 = vpop.f32.mrf.mxu1 }
  0xf5   :  { %v548_v12 = vmul.f32 %v1234_v0, %v485_v4  ;;  %v477_v14 = vadd.f32 %v899_v3, %v476_v9  ;;  %v911_v36 = vadd.f32 %v910_v8, %v909_v62  ;;  %v856_v3 = vunpack.c.l.bf16 %v1267_v48 }
  0xf6   :  { %v912_v16 = vpop.f32.mrf.mxu0  ;;  %v962_v17 = vpop.f32.mrf.mxu1 }
  0xf7   :  { %v571_v18 = vadd.f32 %v1242_v7, %v548_v12  ;;  %v546_v19 = vmul.f32 %v1234_v0, %v477_v14  ;;  %v488_v21 = vadd.f32 %v962_v17, %v908_v11 }
  0xf8   :  { %v913_v23 = vpop.f32.mrf.mxu0  ;;  %v479_v24 = vpop.f32.mrf.mxu1 }
  0xf9   :  { %v619_v25 = vadd.f32 %v848_v13, %v571_v18  ;;  %v569_v26 = vadd.f32 %v1242_v7, %v546_v19  ;;  %v549_v27 = vmul.f32 %v1234_v0, %v488_v21  ;;  %v480_v29 = vadd.f32 %v902_v22, %v479_v24  ;;  %v1295_v22 = vld [vmem:[%s1440_s5 + $0x20] sm:$0xff]  }
  0xfa   :  { %v915_v30 = vpop.f32.mrf.mxu0  ;;  %v965_v31 = vpop.f32.mrf.mxu1  ;;  %v914_v62 = vadd.f32 %v913_v23, %v912_v16  ;;  %v853_v21 = vunpack.c.h.bf16 %v1259_v35 }
  0xfb   :  { %v637_v32 = vmax.f32 %v619_v25, 0.0  ;;  %v617_v33 = vadd.f32 %v844_v20, %v569_v26  ;;  %v572_v34 = vadd.f32 %v1242_v7, %v549_v27  ;;  %v547_v37 = vmul.f32 %v1234_v0, %v480_v29 }
  0xfc   :  { %v916_v39 = vpop.f32.mrf.mxu0  ;;  %v492_v40 = vpop.f32.mrf.mxu1 }
  0xfd   :  { %v659_v41 = vsel %vm656_vm2, %v637_v32, %v619_v25  ;;  %v635_v42 = vmax.f32 %v617_v33, 0.0  ;;  %v620_v44 = vadd.f32 %v849_v28, %v572_v34  ;;  %v917_v46 = vadd.f32 %v916_v39, %v915_v30  ;;  %v1307_v28 = vld [vmem:[%s1440_s5 + $0x38] sm:$0xff]  }
  0xfe   :  { %v828_v50 = vpack.c.bf16 %v659_v41, %v659_v41  ;;  %v570_v52 = vadd.f32 %v1242_v7, %v547_v37  ;;  %v493_v53 = vadd.f32 %v911_v36, %v492_v40  ;;  %v918_v56 = vpop.f32.mrf.mxu0  ;;  %v966_v58 = vpop.f32.mrf.mxu1  ;;  %v857_v25 = vunpack.c.h.bf16 %v1267_v48 }
  0xff   :  { %v657_v59 = vsel %vm656_vm2, %v635_v42, %v617_v33  ;;  %v638_v61 = vmax.f32 %v620_v44, 0.0  ;;  %v501_v63 = vadd.f32 %v965_v31, %v917_v46  ;;  %v1314_v33 = vld [vmem:[%s1440_s5 + $0x30] sm:$0xff]   ;;  %v860_v36 = vunpack.c.l.bf16 %v1295_v22  ;;  %v1329_v46 = vld [vmem:[%s1440_s5 + $0x28] sm:$0xff]  }
 0x100   :  { %740 = vst.msk [vmem:[%s1442_s6 + $0x8] sm:$0xf] %vm737_vm3, %v828_v50  ;;  %v826_v1 = vpack.c.bf16 %v657_v59, %v657_v59  ;;  %v618_v2 = vadd.f32 %v845_v38, %v570_v52  ;;  %v550_v4 = vmul.f32 %v1234_v0, %v493_v53  ;;  %v919_v5 = vpop.f32.mrf.mxu0  ;;  %v495_v6 = vpop.f32.mrf.mxu1  ;;  %v861_v39 = vunpack.c.h.bf16 %v1295_v22 }
 0x101   :  { %v660_v8 = vsel %vm656_vm2, %v638_v61, %v620_v44  ;;  %v552_v9 = vmul.f32 %v1234_v0, %v501_v63  ;;  %v920_v10 = vadd.f32 %v919_v5, %v918_v56  ;;  %v496_v11 = vadd.f32 %v914_v62, %v495_v6 }
 0x102   :  { %738 = vst.msk [vmem:[%s1442_s6] sm:$0xf] %vm737_vm3, %v826_v1  ;;  %v829_v12 = vpack.c.bf16 %v660_v8, %v660_v8  ;;  %v636_v13 = vmax.f32 %v618_v2, 0.0  ;;  %v573_v14 = vadd.f32 %v1242_v7, %v550_v4  ;;  %v921_v16 = vpop.f32.mrf.mxu0  ;;  %v1287_v17 = vpop.f32.mrf.mxu1  ;;  %v872_v44 = vunpack.c.l.bf16 %v1307_v28 }
 0x103   :  { %v575_v18 = vadd.f32 %v1242_v7, %v552_v9  ;;  %v504_v19 = vadd.f32 %v966_v58, %v920_v10  ;;  %v551_v20 = vmul.f32 %v1234_v0, %v496_v11  ;;  %v941_v48 = vadd.f32 %v1222_v54, %v1220_v51 }
 0x104   :  { %741 = vst.msk [vmem:[%s1442_s6 + $0xc] sm:$0xf] %vm737_vm3, %v829_v12  ;;  %v658_v23 = vsel %vm656_vm2, %v636_v13, %v618_v2  ;;  %v621_v24 = vadd.f32 %v852_v55, %v573_v14  ;;  %v922_v26 = vpop.f32.mrf.mxu0  ;;  %v508_v27 = vpop.f32.mrf.mxu1  ;;  %v868_v56 = vunpack.c.l.bf16 %v1314_v33  ;;  %v864_v54 = vunpack.c.l.bf16 %v1329_v46 }
 0x105   :  { %v827_v29 = vpack.c.bf16 %v658_v23, %v658_v23  ;;  %v623_v30 = vadd.f32 %v856_v3, %v575_v18  ;;  %v553_v31 = vmul.f32 %v1234_v0, %v504_v19  ;;  %v574_v32 = vadd.f32 %v1242_v7, %v551_v20 }
 0x106   :  { %v639_v34 = vmax.f32 %v621_v24, 0.0  ;;  %v923_v35 = vadd.f32 %v922_v26, %v921_v16  ;;  %v924_v37 = vpop.f32.mrf.mxu0  ;;  %v1317_v38 = vpop.f32.mrf.mxu1  ;;  %v935_v4 = vadd.f32 %v1214_v45, %v1212_v43  ;;  %v944_v9 = vadd.f32 %v1229_v60, %v1227_v57 }
 0x107   :  { %739 = vst.msk [vmem:[%s1442_s6 + $0x4] sm:$0xf] %vm737_vm3, %v827_v29  ;;  %v641_v40 = vmax.f32 %v623_v30, 0.0  ;;  %v576_v41 = vadd.f32 %v1242_v7, %v553_v31  ;;  %v622_v42 = vadd.f32 %v853_v21, %v574_v32  ;;  %v873_v23 = vunpack.c.h.bf16 %v1307_v28 }
 0x108   :  { %v661_v50 = vsel %vm656_vm2, %v639_v34, %v621_v24  ;;  %v509_v52 = vadd.f32 %v923_v35, %v508_v27  ;;  %v925_v53 = vpop.f32.mrf.mxu0  ;;  %v511_v55 = vpop.f32.mrf.mxu1  ;;  %v938_v29 = vadd.f32 %v1218_v49, %v1216_v47  ;;  %v869_v34 = vunpack.c.h.bf16 %v1314_v33 }
 0x109   :  { %v663_v58 = vsel %vm656_vm2, %v641_v40, %v623_v30  ;;  %v830_v59 = vpack.c.bf16 %v661_v50, %v661_v50  ;;  %v624_v61 = vadd.f32 %v857_v25, %v576_v41  ;;  %v640_v62 = vmax.f32 %v622_v42, 0.0 }
 0x10a   :  { %v832_v63 = vpack.c.bf16 %v663_v58, %v663_v58  ;;  %v554_v1 = vmul.f32 %v1234_v0, %v509_v52  ;;  %v926_v2 = vadd.f32 %v925_v53, %v924_v37  ;;  %v927_v3 = vpop.f32.mrf.mxu0  ;;  %v973_v51 = vpop.f32.mrf.mxu1 }
 0x10b   :  { %742 = vst.msk [vmem:[%s1442_s6 + $0x10] sm:$0xf] %vm737_vm3, %v830_v59  ;;  %v642_v5 = vmax.f32 %v624_v61, 0.0  ;;  %v662_v6 = vsel %vm656_vm2, %v640_v62, %v622_v42  ;;  %v533_v8 = vadd.f32 %v973_v51, %v941_v48  ;;  %v865_v59 = vunpack.c.h.bf16 %v1329_v46 }
 0x10c   :  { %744 = vst.msk [vmem:[%s1442_s6 + $0x18] sm:$0xf] %vm737_vm3, %v832_v63  ;;  %v831_v10 = vpack.c.bf16 %v662_v6, %v662_v6  ;;  %v577_v43 = vadd.f32 %v1242_v7, %v554_v1  ;;  %v512_v45 = vadd.f32 %v926_v2, %v511_v55  ;;  %v928_v11 = vpop.f32.mrf.mxu0  ;;  %v524_v12 = vpop.f32.mrf.mxu1 }
 0x10d   :  { %v664_v13 = vsel %vm656_vm2, %v642_v5, %v624_v61  ;;  %v560_v14 = vmul.f32 %v1234_v0, %v533_v8  ;;  %v929_v16 = vadd.f32 %v928_v11, %v927_v3  ;;  %v525_v18 = vadd.f32 %v935_v4, %v524_v12 }
 0x10e   :  { %v833_v19 = vpack.c.bf16 %v664_v13, %v664_v13  ;;  %743 = vst.msk [vmem:[%s1442_s6 + $0x14] sm:$0xf] %vm737_vm3, %v831_v10  ;;  %v625_v57 = vadd.f32 %v860_v36, %v577_v43  ;;  %v555_v60 = vmul.f32 %v1234_v0, %v512_v45  ;;  %v930_v20 = vpop.f32.mrf.mxu0  ;;  %v974_v21 = vpop.f32.mrf.mxu1 }
 0x10f   :  { %v583_v24 = vadd.f32 %v1242_v7, %v560_v14  ;;  %v517_v25 = vadd.f32 %v1287_v17, %v929_v16  ;;  %v558_v26 = vmul.f32 %v1234_v0, %v525_v18  ;;  %v536_v27 = vadd.f32 %v974_v21, %v944_v9 }
 0x110   :  { %745 = vst.msk [vmem:[%s1442_s6 + $0x1c] sm:$0xf] %vm737_vm3, %v833_v19  ;;  %v643_v30 = vmax.f32 %v625_v57, 0.0  ;;  %v578_v31 = vadd.f32 %v1242_v7, %v555_v60  ;;  %v931_v32 = vpop.f32.mrf.mxu0  ;;  %v527_v28 = vpop.f32.mrf.mxu1 }
 0x111   :  { %v631_v35 = vadd.f32 %v872_v44, %v583_v24  ;;  %v556_v17 = vmul.f32 %v1234_v0, %v517_v25  ;;  %v581_v36 = vadd.f32 %v1242_v7, %v558_v26  ;;  %v561_v37 = vmul.f32 %v1234_v0, %v536_v27 }
 0x112   :  { %v665_v47 = vsel %vm656_vm2, %v643_v30, %v625_v57  ;;  %v626_v49 = vadd.f32 %v861_v39, %v578_v31  ;;  %v932_v40 = vadd.f32 %v931_v32, %v930_v20  ;;  %v528_v41 = vadd.f32 %v938_v29, %v527_v28 }
 0x113   :  { %v834_v42 = vpack.c.bf16 %v665_v47, %v665_v47  ;;  %v649_v48 = vmax.f32 %v631_v35, 0.0  ;;  %v579_v50 = vadd.f32 %v1242_v7, %v556_v17  ;;  %v629_v33 = vadd.f32 %v868_v56, %v581_v36 }
 0x114   :  { %v644_v44 = vmax.f32 %v626_v49, 0.0  ;;  %v584_v52 = vadd.f32 %v1242_v7, %v561_v37  ;;  %v520_v53 = vadd.f32 %v1317_v38, %v932_v40  ;;  %v559_v55 = vmul.f32 %v1234_v0, %v528_v41 }
 0x115   :  { %746 = vst.msk [vmem:[%s1442_s6 + $0x20] sm:$0xf] %vm737_vm3, %v834_v42  ;;  %v671_v22 = vsel %vm656_vm2, %v649_v48, %v631_v35  ;;  %v627_v39 = vadd.f32 %v864_v54, %v579_v50  ;;  %v647_v58 = vmax.f32 %v629_v33, 0.0 }
 0x116   :  { %v666_v56 = vsel %vm656_vm2, %v644_v44, %v626_v49  ;;  %v840_v61 = vpack.c.bf16 %v671_v22, %v671_v22  ;;  %v632_v62 = vadd.f32 %v873_v23, %v584_v52  ;;  %v557_v38 = vmul.f32 %v1234_v0, %v520_v53 }
 0x117   :  { %v835_v63 = vpack.c.bf16 %v666_v56, %v666_v56  ;;  %v645_v1 = vmax.f32 %v627_v39, 0.0  ;;  %v669_v2 = vsel %vm656_vm2, %v647_v58, %v629_v33  ;;  %v582_v3 = vadd.f32 %v1242_v7, %v559_v55 }
 0x118   :  { %752 = vst.msk [vmem:[%s1442_s6 + $0x38] sm:$0xf] %vm737_vm3, %v840_v61  ;;  %v838_v46 = vpack.c.bf16 %v669_v2, %v669_v2  ;;  %v650_v51 = vmax.f32 %v632_v62, 0.0  ;;  %v580_v54 = vadd.f32 %v1242_v7, %v557_v38 }
 0x119   :  { %747 = vst.msk [vmem:[%s1442_s6 + $0x24] sm:$0xf] %vm737_vm3, %v835_v63  ;;  %v667_v0 = vsel %vm656_vm2, %v645_v1, %v627_v39  ;;  %v630_v4 = vadd.f32 %v869_v34, %v582_v3 }
 0x11a   :  { %v836_v5 = vpack.c.bf16 %v667_v0, %v667_v0  ;;  %750 = vst.msk [vmem:[%s1442_s6 + $0x30] sm:$0xf] %vm737_vm3, %v838_v46  ;;  %v672_v6 = vsel %vm656_vm2, %v650_v51, %v632_v62  ;;  %v628_v8 = vadd.f32 %v865_v59, %v580_v54 }
 0x11b   :  { %v841_v7 = vpack.c.bf16 %v672_v6, %v672_v6  ;;  %v648_v9 = vmax.f32 %v630_v4, 0.0 }
 0x11c   :  { %748 = vst.msk [vmem:[%s1442_s6 + $0x28] sm:$0xf] %vm737_vm3, %v836_v5  ;;  %v646_v10 = vmax.f32 %v628_v8, 0.0 }
 0x11d   :  { %753 = vst.msk [vmem:[%s1442_s6 + $0x3c] sm:$0xf] %vm737_vm3, %v841_v7  ;;  %v670_v43 = vsel %vm656_vm2, %v648_v9, %v630_v4 }
 0x11e   :  { %v668_v45 = vsel %vm656_vm2, %v646_v10, %v628_v8  ;;  %v839_v11 = vpack.c.bf16 %v670_v43, %v670_v43 }
 0x11f   :  { %v837_v12 = vpack.c.bf16 %v668_v45, %v668_v45 }
 0x120   :  { %751 = vst.msk [vmem:[%s1442_s6 + $0x34] sm:$0xf] %vm737_vm3, %v839_v11 }
 0x121   :  { %749 = vst.msk [vmem:[%s1442_s6 + $0x2c] sm:$0xf] %vm737_vm3, %v837_v12 }

// kernel: _lambda_.18
= control target key start
LH: loop header
LB: loop body
LE: loop exit
PB: predicated region body
PF: predicated region fallthrough
CT: control target
= control target key end

     0   :  { %v1809_v0 = vmov 0   ;;  %vm449_vm0 = vcmask 154624   ;;  %vm546_vm1 = vcmask 1040384   ;;  %vm547_vm2 = vcmask 1041408   ;;  %s2644_s1 = inlined_call_operand.vmem [shape: bf16[147,32], index: 1, kind: input, shape index: {}]   ;;  %s2645_s0 = inlined_call_operand.vmem [shape: bf16[512,147], index: 0, kind: input, shape index: {}]   ;;  %s2646_s4 = inlined_call_operand.vmem [shape: f32[1,32], index: 4, kind: input, shape index: {}]   ;;  %s2647_s2 = inlined_call_operand.vmem [shape: f32[1,32], index: 2, kind: input, shape index: {}]   ;;  %s2648_s3 = inlined_call_operand.vmem [shape: f32[1,32], index: 3, kind: input, shape index: {}]   ;;  %s2649_s5 = inlined_call_operand.vmem [shape: bf16[512,32], index: 5, kind: output, shape index: {}]  }
   0x1   :  { %553 = vmatprep.subr.bf16.mxu0 %v1809_v0  ;;  %1681 = vmatprep.subr.bf16.mxu1 %v1809_v0  ;;  %v1703_v1 = vld [vmem:[%s2644_s1 + $0x38] sm:$0xff]   ;;  %v1704_v2 = vld [vmem:[%s2644_s1 + $0x30] sm:$0xff]   ;;  %v1705_v3 = vld [vmem:[%s2644_s1 + $0x28] sm:$0xff]   ;;  %v1810_v10 = vmov 65535   ;;  %vm1376_vm5 = vcmask 257024  }
   0x2   :  { %554 = vmatpush1.bf16.msra.mxu0 %v1703_v1  ;;  %1691 = vmatpush1.bf16.msra.mxu1 %v1703_v1  ;;  %v1706_v4 = vld [vmem:[%s2644_s1 + $0x20] sm:$0xff]   ;;  %v1707_v7 = vld [vmem:[%s2644_s1 + $0x18] sm:$0xff]   ;;  %v1708_v8 = vld [vmem:[%s2644_s1 + $0x10] sm:$0xff]   ;;  %v548_v11 = vsel %vm546_vm1, 4294967295, %v1810_v10 }
   0x3   :  { %555 = vmatprep.subr.bf16.mxu0 %v1809_v0  ;;  %1682 = vmatprep.subr.bf16.mxu1 %v1809_v0  ;;  %v1715_v5 = vld [vmem:[%s2645_s0 + $0x4] ss:$8 sps:$4 sm:$0xff]   ;;  %v1711_v13 = vld [vmem:[%s2644_s1 + $0x48] ss:$0 sps:$4 sm:$0x33]   ;;  %v549_v14 = vsel %vm547_vm2, %v548_v11, 0 }
   0x4   :  { %1519 = vmatprep.mubr.msk.bf16.mxu0 %vm449_vm0, %v1715_v5  ;;  %v1718_v6 = vld [vmem:[%s2645_s0 + $0x104] ss:$8 sps:$4 sm:$0xff]   ;;  %v551_v15 = vand.u32 %v1711_v13, %v549_v14  ;;  %v1713_v17 = vld [vmem:[%s2645_s0] ss:$8 sps:$4 sm:$0xff]   ;;  %v1719_v19 = vld [vmem:[%s2645_s0 + $0x14] ss:$8 sps:$4 sm:$0xff]  }
   0x5   :  { %1535 = vmatprep.mubr.msk.bf16.mxu1 %vm449_vm0, %v1718_v6  ;;  %v1709_v9 = vld [vmem:[%s2644_s1 + $0x8] sm:$0xff]   ;;  %v1710_v12 = vld [vmem:[%s2644_s1] sm:$0xff]   ;;  %v1721_v20 = vld [vmem:[%s2645_s0 + $0x114] ss:$8 sps:$4 sm:$0xff]  }
   0x6   :  { %556 = vmatpush1.bf16.msra.mxu0 %v1704_v2  ;;  %1692 = vmatpush1.bf16.msra.mxu1 %v1704_v2  ;;  %v1712_v16 = vld [vmem:[%s2644_s1 + $0x40] sm:$0xff]   ;;  %v1723_v21 = vld [vmem:[%s2645_s0 + $0x10] ss:$8 sps:$4 sm:$0xff]   ;;  %v1731_v27 = vld [vmem:[%s2645_s0 + $0x34] ss:$8 sps:$4 sm:$0xff]  }
   0x7   :  { %557 = vmatprep.subr.bf16.mxu0 %v1809_v0  ;;  %1683 = vmatprep.subr.bf16.mxu1 %v1809_v0  ;;  %v1716_v18 = vld [vmem:[%s2645_s0 + $0x100] ss:$8 sps:$4 sm:$0xff]   ;;  %v1724_v22 = vld [vmem:[%s2645_s0 + $0x110] ss:$8 sps:$4 sm:$0xff]   ;;  %v1725_v23 = vld [vmem:[%s2645_s0 + $0x24] ss:$8 sps:$4 sm:$0xff]  }
   0x8   :  { %v1727_v24 = vld [vmem:[%s2645_s0 + $0x124] ss:$8 sps:$4 sm:$0xff]   ;;  %v1729_v25 = vld [vmem:[%s2645_s0 + $0x20] ss:$8 sps:$4 sm:$0xff]   ;;  %v1733_v28 = vld [vmem:[%s2645_s0 + $0x134] ss:$8 sps:$4 sm:$0xff]  }
   0x9   :  { %v1730_v26 = vld [vmem:[%s2645_s0 + $0x120] ss:$8 sps:$4 sm:$0xff]   ;;  %v1735_v29 = vld [vmem:[%s2645_s0 + $0x30] ss:$8 sps:$4 sm:$0xff]   ;;  %v1737_v31 = vld [vmem:[%s2645_s0 + $0x44] ss:$8 sps:$4 sm:$0xff]  }
   0xa   :  { %558 = vmatpush1.bf16.msra.mxu0 %v1705_v3  ;;  %1693 = vmatpush1.bf16.msra.mxu1 %v1705_v3  ;;  %v1736_v30 = vld [vmem:[%s2645_s0 + $0x130] ss:$8 sps:$4 sm:$0xff]   ;;  %v1739_v32 = vld [vmem:[%s2645_s0 + $0x144] ss:$8 sps:$4 sm:$0xff]   ;;  %v1741_v33 = vld [vmem:[%s2645_s0 + $0x40] ss:$8 sps:$4 sm:$0xff]  }
   0xb   :  { %559 = vmatprep.subr.bf16.mxu0 %v1809_v0  ;;  %1684 = vmatprep.subr.bf16.mxu1 %v1809_v0  ;;  %v1742_v34 = vld [vmem:[%s2645_s0 + $0x140] ss:$8 sps:$4 sm:$0xff]   ;;  %v1743_v35 = vld [vmem:[%s2645_s0 + $0x54] ss:$8 sps:$4 sm:$0xff]   ;;  %v1747_v37 = vld [vmem:[%s2645_s0 + $0x50] ss:$8 sps:$4 sm:$0xff]  }
   0xc   :  { %v1745_v36 = vld [vmem:[%s2645_s0 + $0x154] ss:$8 sps:$4 sm:$0xff]   ;;  %v1748_v38 = vld [vmem:[%s2645_s0 + $0x150] ss:$8 sps:$4 sm:$0xff]   ;;  %v1749_v39 = vld [vmem:[%s2645_s0 + $0x64] ss:$8 sps:$4 sm:$0xff]  }
   0xd   :  { %v1751_v40 = vld [vmem:[%s2645_s0 + $0x164] ss:$8 sps:$4 sm:$0xff]   ;;  %v1753_v41 = vld [vmem:[%s2645_s0 + $0x60] ss:$8 sps:$4 sm:$0xff]   ;;  %v1755_v43 = vld [vmem:[%s2645_s0 + $0x74] ss:$8 sps:$4 sm:$0xff]  }
   0xe   :  { %560 = vmatpush1.bf16.msra.mxu0 %v1706_v4  ;;  %1694 = vmatpush1.bf16.msra.mxu1 %v1706_v4  ;;  %v1754_v42 = vld [vmem:[%s2645_s0 + $0x160] ss:$8 sps:$4 sm:$0xff]   ;;  %v1757_v44 = vld [vmem:[%s2645_s0 + $0x174] ss:$8 sps:$4 sm:$0xff]   ;;  %v1759_v45 = vld [vmem:[%s2645_s0 + $0x70] ss:$8 sps:$4 sm:$0xff]  }
   0xf   :  { %561 = vmatprep.subr.bf16.mxu0 %v1809_v0  ;;  %1685 = vmatprep.subr.bf16.mxu1 %v1809_v0  ;;  %v1760_v46 = vld [vmem:[%s2645_s0 + $0x170] ss:$8 sps:$4 sm:$0xff]   ;;  %v1761_v47 = vld [vmem:[%s2645_s0 + $0x84] ss:$8 sps:$4 sm:$0xff]   ;;  %v1765_v49 = vld [vmem:[%s2645_s0 + $0x80] ss:$8 sps:$4 sm:$0xff]  }
  0x10   :  { %v1763_v48 = vld [vmem:[%s2645_s0 + $0x184] ss:$8 sps:$4 sm:$0xff]   ;;  %v1766_v50 = vld [vmem:[%s2645_s0 + $0x180] ss:$8 sps:$4 sm:$0xff]   ;;  %v1767_v51 = vld [vmem:[%s2645_s0 + $0x94] ss:$8 sps:$4 sm:$0xff]  }
  0x11   :  { %v1769_v52 = vld [vmem:[%s2645_s0 + $0x194] ss:$8 sps:$4 sm:$0xff]   ;;  %v1771_v53 = vld [vmem:[%s2645_s0 + $0x90] ss:$8 sps:$4 sm:$0xff]   ;;  %v1773_v55 = vld [vmem:[%s2645_s0 + $0xa4] ss:$8 sps:$4 sm:$0xff]  }
  0x12   :  { %562 = vmatpush1.bf16.msra.mxu0 %v1707_v7  ;;  %1695 = vmatpush1.bf16.msra.mxu1 %v1707_v7  ;;  %v1772_v54 = vld [vmem:[%s2645_s0 + $0x190] ss:$8 sps:$4 sm:$0xff]   ;;  %v1775_v56 = vld [vmem:[%s2645_s0 + $0x1a4] ss:$8 sps:$4 sm:$0xff]   ;;  %v1777_v57 = vld [vmem:[%s2645_s0 + $0xa0] ss:$8 sps:$4 sm:$0xff]  }
  0x13   :  { %563 = vmatprep.subr.bf16.mxu0 %v1809_v0  ;;  %1686 = vmatprep.subr.bf16.mxu1 %v1809_v0  ;;  %v1778_v58 = vld [vmem:[%s2645_s0 + $0x1a0] ss:$8 sps:$4 sm:$0xff]   ;;  %v1779_v59 = vld [vmem:[%s2645_s0 + $0xb4] ss:$8 sps:$4 sm:$0xff]   ;;  %v1783_v61 = vld [vmem:[%s2645_s0 + $0xb0] ss:$8 sps:$4 sm:$0xff]  }
  0x14   :  { %v1781_v60 = vld [vmem:[%s2645_s0 + $0x1b4] ss:$8 sps:$4 sm:$0xff]   ;;  %v1784_v62 = vld [vmem:[%s2645_s0 + $0x1b0] ss:$8 sps:$4 sm:$0xff]   ;;  %v1785_v63 = vld [vmem:[%s2645_s0 + $0xc4] ss:$8 sps:$4 sm:$0xff]  }
  0x15   :  { %v1787_v1 = vld [vmem:[%s2645_s0 + $0x1c4] ss:$8 sps:$4 sm:$0xff]   ;;  %v1789_v2 = vld [vmem:[%s2645_s0 + $0xc0] ss:$8 sps:$4 sm:$0xff]   ;;  %v1791_v4 = vld [vmem:[%s2645_s0 + $0xd4] ss:$8 sps:$4 sm:$0xff]  }
  0x16   :  { %564 = vmatpush1.bf16.msra.mxu0 %v1708_v8  ;;  %1696 = vmatpush1.bf16.msra.mxu1 %v1708_v8  ;;  %v1790_v3 = vld [vmem:[%s2645_s0 + $0x1c0] ss:$8 sps:$4 sm:$0xff]   ;;  %v1793_v5 = vld [vmem:[%s2645_s0 + $0x1d4] ss:$8 sps:$4 sm:$0xff]   ;;  %v1795_v6 = vld [vmem:[%s2645_s0 + $0xd0] ss:$8 sps:$4 sm:$0xff]  }
  0x17   :  { %565 = vmatprep.subr.bf16.mxu0 %v1809_v0  ;;  %1687 = vmatprep.subr.bf16.mxu1 %v1809_v0  ;;  %v1796_v7 = vld [vmem:[%s2645_s0 + $0x1d0] ss:$8 sps:$4 sm:$0xff]   ;;  %v1797_v8 = vld [vmem:[%s2645_s0 + $0xe4] ss:$8 sps:$4 sm:$0xff]   ;;  %v1801_v10 = vld [vmem:[%s2645_s0 + $0xe0] ss:$8 sps:$4 sm:$0xff]  }
  0x18   :  { %v1802_v11 = vld [vmem:[%s2645_s0 + $0x1e0] ss:$8 sps:$4 sm:$0xff]   ;;  %v1805_v13 = vld [vmem:[%s2645_s0 + $0x1f4] ss:$8 sps:$4 sm:$0xff]   ;;  %v1807_v14 = vld [vmem:[%s2645_s0 + $0xf0] ss:$8 sps:$4 sm:$0xff]  }
  0x1a   :  { %566 = vmatpush1.bf16.msra.mxu0 %v1709_v9  ;;  %1697 = vmatpush1.bf16.msra.mxu1 %v1709_v9  ;;  %v1799_v9 = vld [vmem:[%s2645_s0 + $0x1e4] ss:$8 sps:$4 sm:$0xff]  }
  0x1b   :  { %567 = vmatprep.subr.bf16.mxu0 %v1809_v0  ;;  %1688 = vmatprep.subr.bf16.mxu1 %v1809_v0 }
  0x1e   :  { %568 = vmatpush1.bf16.msra.mxu0 %v1710_v12  ;;  %1698 = vmatpush1.bf16.msra.mxu1 %v1710_v12  ;;  %v1803_v12 = vld [vmem:[%s2645_s0 + $0xf4] ss:$8 sps:$4 sm:$0xff]  }
  0x1f   :  { %581 = vmatprep.subr.bf16.mxu0 %v1809_v0  ;;  %1689 = vmatprep.subr.bf16.mxu1 %v1809_v0 }
  0x22   :  { %582 = vmatpush2.bf16.msra.mxu0 %v551_v15  ;;  %1699 = vmatpush2.bf16.msra.mxu1 %v551_v15  ;;  %v1808_v15 = vld [vmem:[%s2645_s0 + $0x1f0] ss:$8 sps:$4 sm:$0xff]  }
  0x23   :  { %583 = vmatprep.subr.bf16.mxu0 %v1809_v0  ;;  %1690 = vmatprep.subr.bf16.mxu1 %v1809_v0 }
  0x26   :  { %584 = vmatpush2.bf16.msra.mxu0 %v1712_v16  ;;  %1700 = vmatpush2.bf16.msra.mxu1 %v1712_v16  ;;  %v1051_v16 = vlaneseq }
  0x29   :  { %586 = vmatmul.mubr.bf16.vlgmr.msra.gmra.mxu0 %v1713_v17  ;;  %714 = vmatmul.mubr.bf16.vlgmr.msra.gmra.mxu1 %v1716_v18  ;;  %v984_v17 = vld [vmem:[%s2646_s4] sm:$0x1]  ;;  %v1052_v18 = vshrl.u32 %v1051_v16, 7 }
  0x2a   :  { %1520 = vmatprep.mubr.msk.bf16.mxu0 %vm449_vm0, %v1719_v19  ;;  %1536 = vmatprep.mubr.msk.bf16.mxu1 %vm449_vm0, %v1721_v20  ;;  %vm985_vm3 = vcmp.gt.f32.partialorder %v984_v17, 0.5 }
  0x2b   :  { %v1053_v19 = vsub.s32 0, %v1052_v18  ;;  %v1050_v20 = vsel %vm985_vm3, 1, %v1809_v0 }
  0x31   :  { %594 = vmatmul.mubr.bf16.gmra.mxu0 %v1723_v21  ;;  %722 = vmatmul.mubr.bf16.gmra.mxu1 %v1724_v22  ;;  %v2122_v21 = vld [vmem:[%s2647_s2] ss:$0 sm:$0xff] }
  0x32   :  { %1521 = vmatprep.mubr.msk.bf16.mxu0 %vm449_vm0, %v1725_v23  ;;  %1537 = vmatprep.mubr.msk.bf16.mxu1 %vm449_vm0, %v1727_v24  ;;  %v2127_v23 = vld [vmem:[%s2648_s3] ss:$0 sm:$0xff]  ;;  %v2129_v24 = vrot.slane %v1050_v20, %v1053_v19 }
  0x34   :  { %vm1055_vm4 = vcmp.eq.s32.totalorder %v2129_v24, 1 }
  0x39   :  { %602 = vmatmul.mubr.bf16.gmra.mxu0 %v1729_v25  ;;  %730 = vmatmul.mubr.bf16.gmra.mxu1 %v1730_v26 }
  0x3a   :  { %1522 = vmatprep.mubr.msk.bf16.mxu0 %vm449_vm0, %v1731_v27  ;;  %1538 = vmatprep.mubr.msk.bf16.mxu1 %vm449_vm0, %v1733_v28 }
  0x41   :  { %610 = vmatmul.mubr.bf16.gmra.mxu0 %v1735_v29  ;;  %738 = vmatmul.mubr.bf16.gmra.mxu1 %v1736_v30 }
  0x42   :  { %1523 = vmatprep.mubr.msk.bf16.mxu0 %vm449_vm0, %v1737_v31  ;;  %1539 = vmatprep.mubr.msk.bf16.mxu1 %vm449_vm0, %v1739_v32 }
  0x49   :  { %618 = vmatmul.mubr.bf16.gmra.mxu0 %v1741_v33  ;;  %746 = vmatmul.mubr.bf16.gmra.mxu1 %v1742_v34 }
  0x4a   :  { %1524 = vmatprep.mubr.msk.bf16.mxu0 %vm449_vm0, %v1743_v35  ;;  %1540 = vmatprep.mubr.msk.bf16.mxu1 %vm449_vm0, %v1745_v36 }
  0x51   :  { %626 = vmatmul.mubr.bf16.gmra.mxu0 %v1747_v37  ;;  %754 = vmatmul.mubr.bf16.gmra.mxu1 %v1748_v38 }
  0x52   :  { %1525 = vmatprep.mubr.msk.bf16.mxu0 %vm449_vm0, %v1749_v39  ;;  %1541 = vmatprep.mubr.msk.bf16.mxu1 %vm449_vm0, %v1751_v40 }
  0x59   :  { %634 = vmatmul.mubr.bf16.gmra.mxu0 %v1753_v41  ;;  %762 = vmatmul.mubr.bf16.gmra.mxu1 %v1754_v42 }
  0x5a   :  { %1526 = vmatprep.mubr.msk.bf16.mxu0 %vm449_vm0, %v1755_v43  ;;  %1542 = vmatprep.mubr.msk.bf16.mxu1 %vm449_vm0, %v1757_v44 }
  0x61   :  { %642 = vmatmul.mubr.bf16.gmra.mxu0 %v1759_v45  ;;  %770 = vmatmul.mubr.bf16.gmra.mxu1 %v1760_v46 }
  0x62   :  { %1527 = vmatprep.mubr.msk.bf16.mxu0 %vm449_vm0, %v1761_v47  ;;  %1543 = vmatprep.mubr.msk.bf16.mxu1 %vm449_vm0, %v1763_v48 }
  0x69   :  { %650 = vmatmul.mubr.bf16.gmra.mxu0 %v1765_v49  ;;  %778 = vmatmul.mubr.bf16.gmra.mxu1 %v1766_v50 }
  0x6a   :  { %1528 = vmatprep.mubr.msk.bf16.mxu0 %vm449_vm0, %v1767_v51  ;;  %1544 = vmatprep.mubr.msk.bf16.mxu1 %vm449_vm0, %v1769_v52 }
  0x71   :  { %658 = vmatmul.mubr.bf16.gmra.mxu0 %v1771_v53  ;;  %786 = vmatmul.mubr.bf16.gmra.mxu1 %v1772_v54 }
  0x72   :  { %1529 = vmatprep.mubr.msk.bf16.mxu0 %vm449_vm0, %v1773_v55  ;;  %1545 = vmatprep.mubr.msk.bf16.mxu1 %vm449_vm0, %v1775_v56 }
  0x79   :  { %666 = vmatmul.mubr.bf16.gmra.mxu0 %v1777_v57  ;;  %794 = vmatmul.mubr.bf16.gmra.mxu1 %v1778_v58 }
  0x7a   :  { %1530 = vmatprep.mubr.msk.bf16.mxu0 %vm449_vm0, %v1779_v59  ;;  %1546 = vmatprep.mubr.msk.bf16.mxu1 %vm449_vm0, %v1781_v60 }
  0x81   :  { %674 = vmatmul.mubr.bf16.gmra.mxu0 %v1783_v61  ;;  %802 = vmatmul.mubr.bf16.gmra.mxu1 %v1784_v62 }
  0x82   :  { %1531 = vmatprep.mubr.msk.bf16.mxu0 %vm449_vm0, %v1785_v63  ;;  %1547 = vmatprep.mubr.msk.bf16.mxu1 %vm449_vm0, %v1787_v1 }
  0x89   :  { %682 = vmatmul.mubr.bf16.gmra.mxu0 %v1789_v2  ;;  %810 = vmatmul.mubr.bf16.gmra.mxu1 %v1790_v3 }
  0x8a   :  { %1532 = vmatprep.mubr.msk.bf16.mxu0 %vm449_vm0, %v1791_v4  ;;  %1548 = vmatprep.mubr.msk.bf16.mxu1 %vm449_vm0, %v1793_v5 }
  0x91   :  { %690 = vmatmul.mubr.bf16.gmra.mxu0 %v1795_v6  ;;  %818 = vmatmul.mubr.bf16.gmra.mxu1 %v1796_v7 }
  0x92   :  { %1533 = vmatprep.mubr.msk.bf16.mxu0 %vm449_vm0, %v1797_v8  ;;  %1549 = vmatprep.mubr.msk.bf16.mxu1 %vm449_vm0, %v1799_v9 }
  0x99   :  { %698 = vmatmul.mubr.bf16.gmra.mxu0 %v1801_v10  ;;  %826 = vmatmul.mubr.bf16.gmra.mxu1 %v1802_v11 }
  0x9a   :  { %1534 = vmatprep.mubr.msk.bf16.mxu0 %vm449_vm0, %v1803_v12  ;;  %1550 = vmatprep.mubr.msk.bf16.mxu1 %vm449_vm0, %v1805_v13 }
  0xa1   :  { %706 = vmatmul.mubr.bf16.gmra.mxu0 %v1807_v14  ;;  %834 = vmatmul.mubr.bf16.gmra.mxu1 %v1808_v15 }
  0xe9   :  { %v587_v22 = vpop.f32.mrf.mxu0  ;;  %v715_v25 = vpop.f32.mrf.mxu1 }
  0xea   :  { %v849_v26 = vmul.f32 %v2122_v21, %v587_v22  ;;  %v881_v27 = vmul.f32 %v2122_v21, %v715_v25 }
  0xeb   :  { %v589_v28 = vpop.f32.mrf.mxu0  ;;  %v717_v0 = vpop.f32.mrf.mxu1 }
  0xec   :  { %v920_v29 = vadd.f32 %v2127_v23, %v849_v26  ;;  %v952_v30 = vadd.f32 %v2127_v23, %v881_v27 }
  0xed   :  { %v590_v31 = vpop.f32.mrf.mxu0  ;;  %v718_v32 = vpop.f32.mrf.mxu1 }
  0xee   :  { %v986_v33 = vmax.f32 %v920_v29, 0.0  ;;  %v1018_v34 = vmax.f32 %v952_v30, 0.0  ;;  %v850_v35 = vmul.f32 %v2122_v21, %v590_v31  ;;  %v882_v36 = vmul.f32 %v2122_v21, %v718_v32 }
  0xef   :  { %v592_v37 = vpop.f32.mrf.mxu0  ;;  %v720_v38 = vpop.f32.mrf.mxu1 }
  0xf0   :  { %v1056_v39 = vsel %vm1055_vm4, %v986_v33, %v920_v29  ;;  %v1088_v40 = vsel %vm1055_vm4, %v1018_v34, %v952_v30  ;;  %v921_v41 = vadd.f32 %v2127_v23, %v850_v35  ;;  %v953_v42 = vadd.f32 %v2127_v23, %v882_v36 }
  0xf1   :  { %v1617_v43 = vpack.c.bf16 %v1056_v39, %v1056_v39  ;;  %v1649_v44 = vpack.c.bf16 %v1088_v40, %v1088_v40  ;;  %v595_v45 = vpop.f32.mrf.mxu0  ;;  %v723_v46 = vpop.f32.mrf.mxu1 }
  0xf2   :  { %v987_v47 = vmax.f32 %v921_v41, 0.0  ;;  %v1019_v48 = vmax.f32 %v953_v42, 0.0  ;;  %v851_v49 = vmul.f32 %v2122_v21, %v595_v45  ;;  %v883_v50 = vmul.f32 %v2122_v21, %v723_v46 }
  0xf3   :  { %1377 = vst.msk [vmem:[%s2649_s5] sm:$0xf] %vm1376_vm5, %v1617_v43  ;;  %1409 = vst.msk [vmem:[%s2649_s5 + $0x80] sm:$0xf] %vm1376_vm5, %v1649_v44  ;;  %v597_v51 = vpop.f32.mrf.mxu0  ;;  %v725_v52 = vpop.f32.mrf.mxu1 }
  0xf4   :  { %v1057_v53 = vsel %vm1055_vm4, %v987_v47, %v921_v41  ;;  %v1089_v54 = vsel %vm1055_vm4, %v1019_v48, %v953_v42  ;;  %v922_v55 = vadd.f32 %v2127_v23, %v851_v49  ;;  %v954_v56 = vadd.f32 %v2127_v23, %v883_v50 }
  0xf5   :  { %v1618_v57 = vpack.c.bf16 %v1057_v53, %v1057_v53  ;;  %v1650_v58 = vpack.c.bf16 %v1089_v54, %v1089_v54  ;;  %v598_v59 = vpop.f32.mrf.mxu0  ;;  %v726_v60 = vpop.f32.mrf.mxu1 }
  0xf6   :  { %v988_v61 = vmax.f32 %v922_v55, 0.0  ;;  %v1020_v62 = vmax.f32 %v954_v56, 0.0  ;;  %v852_v63 = vmul.f32 %v2122_v21, %v598_v59  ;;  %v884_v1 = vmul.f32 %v2122_v21, %v726_v60 }
  0xf7   :  { %1378 = vst.msk [vmem:[%s2649_s5 + $0x4] sm:$0xf] %vm1376_vm5, %v1618_v57  ;;  %1410 = vst.msk [vmem:[%s2649_s5 + $0x84] sm:$0xf] %vm1376_vm5, %v1650_v58  ;;  %v600_v2 = vpop.f32.mrf.mxu0  ;;  %v728_v3 = vpop.f32.mrf.mxu1 }
  0xf8   :  { %v1058_v4 = vsel %vm1055_vm4, %v988_v61, %v922_v55  ;;  %v1090_v5 = vsel %vm1055_vm4, %v1020_v62, %v954_v56  ;;  %v923_v6 = vadd.f32 %v2127_v23, %v852_v63  ;;  %v955_v7 = vadd.f32 %v2127_v23, %v884_v1 }
  0xf9   :  { %v1619_v8 = vpack.c.bf16 %v1058_v4, %v1058_v4  ;;  %v1651_v9 = vpack.c.bf16 %v1090_v5, %v1090_v5  ;;  %v603_v10 = vpop.f32.mrf.mxu0  ;;  %v731_v11 = vpop.f32.mrf.mxu1 }
  0xfa   :  { %v989_v12 = vmax.f32 %v923_v6, 0.0  ;;  %v1021_v13 = vmax.f32 %v955_v7, 0.0  ;;  %v853_v14 = vmul.f32 %v2122_v21, %v603_v10  ;;  %v885_v15 = vmul.f32 %v2122_v21, %v731_v11 }
  0xfb   :  { %1379 = vst.msk [vmem:[%s2649_s5 + $0x8] sm:$0xf] %vm1376_vm5, %v1619_v8  ;;  %1411 = vst.msk [vmem:[%s2649_s5 + $0x88] sm:$0xf] %vm1376_vm5, %v1651_v9  ;;  %v605_v16 = vpop.f32.mrf.mxu0  ;;  %v733_v17 = vpop.f32.mrf.mxu1 }
  0xfc   :  { %v1059_v18 = vsel %vm1055_vm4, %v989_v12, %v923_v6  ;;  %v1091_v19 = vsel %vm1055_vm4, %v1021_v13, %v955_v7  ;;  %v924_v20 = vadd.f32 %v2127_v23, %v853_v14  ;;  %v956_v22 = vadd.f32 %v2127_v23, %v885_v15 }
  0xfd   :  { %v1620_v25 = vpack.c.bf16 %v1059_v18, %v1059_v18  ;;  %v1652_v26 = vpack.c.bf16 %v1091_v19, %v1091_v19  ;;  %v606_v27 = vpop.f32.mrf.mxu0  ;;  %v734_v28 = vpop.f32.mrf.mxu1 }
  0xfe   :  { %v990_v0 = vmax.f32 %v924_v20, 0.0  ;;  %v1022_v29 = vmax.f32 %v956_v22, 0.0  ;;  %v854_v30 = vmul.f32 %v2122_v21, %v606_v27  ;;  %v886_v31 = vmul.f32 %v2122_v21, %v734_v28 }
  0xff   :  { %1380 = vst.msk [vmem:[%s2649_s5 + $0xc] sm:$0xf] %vm1376_vm5, %v1620_v25  ;;  %1412 = vst.msk [vmem:[%s2649_s5 + $0x8c] sm:$0xf] %vm1376_vm5, %v1652_v26  ;;  %v608_v32 = vpop.f32.mrf.mxu0  ;;  %v736_v33 = vpop.f32.mrf.mxu1 }
 0x100   :  { %v1060_v34 = vsel %vm1055_vm4, %v990_v0, %v924_v20  ;;  %v1092_v35 = vsel %vm1055_vm4, %v1022_v29, %v956_v22  ;;  %v925_v36 = vadd.f32 %v2127_v23, %v854_v30  ;;  %v957_v37 = vadd.f32 %v2127_v23, %v886_v31 }
 0x101   :  { %v1621_v38 = vpack.c.bf16 %v1060_v34, %v1060_v34  ;;  %v1653_v39 = vpack.c.bf16 %v1092_v35, %v1092_v35  ;;  %v611_v40 = vpop.f32.mrf.mxu0  ;;  %v739_v41 = vpop.f32.mrf.mxu1 }
 0x102   :  { %v991_v42 = vmax.f32 %v925_v36, 0.0  ;;  %v1023_v43 = vmax.f32 %v957_v37, 0.0  ;;  %v855_v44 = vmul.f32 %v2122_v21, %v611_v40  ;;  %v887_v45 = vmul.f32 %v2122_v21, %v739_v41 }
 0x103   :  { %1381 = vst.msk [vmem:[%s2649_s5 + $0x10] sm:$0xf] %vm1376_vm5, %v1621_v38  ;;  %1413 = vst.msk [vmem:[%s2649_s5 + $0x90] sm:$0xf] %vm1376_vm5, %v1653_v39  ;;  %v613_v46 = vpop.f32.mrf.mxu0  ;;  %v741_v47 = vpop.f32.mrf.mxu1 }
 0x104   :  { %v1061_v48 = vsel %vm1055_vm4, %v991_v42, %v925_v36  ;;  %v1093_v49 = vsel %vm1055_vm4, %v1023_v43, %v957_v37  ;;  %v926_v50 = vadd.f32 %v2127_v23, %v855_v44  ;;  %v958_v51 = vadd.f32 %v2127_v23, %v887_v45 }
 0x105   :  { %v1622_v52 = vpack.c.bf16 %v1061_v48, %v1061_v48  ;;  %v1654_v53 = vpack.c.bf16 %v1093_v49, %v1093_v49  ;;  %v614_v54 = vpop.f32.mrf.mxu0  ;;  %v742_v55 = vpop.f32.mrf.mxu1 }
 0x106   :  { %v992_v56 = vmax.f32 %v926_v50, 0.0  ;;  %v1024_v57 = vmax.f32 %v958_v51, 0.0  ;;  %v856_v58 = vmul.f32 %v2122_v21, %v614_v54  ;;  %v888_v59 = vmul.f32 %v2122_v21, %v742_v55 }
 0x107   :  { %1382 = vst.msk [vmem:[%s2649_s5 + $0x14] sm:$0xf] %vm1376_vm5, %v1622_v52  ;;  %1414 = vst.msk [vmem:[%s2649_s5 + $0x94] sm:$0xf] %vm1376_vm5, %v1654_v53  ;;  %v616_v60 = vpop.f32.mrf.mxu0  ;;  %v744_v61 = vpop.f32.mrf.mxu1 }
 0x108   :  { %v1062_v62 = vsel %vm1055_vm4, %v992_v56, %v926_v50  ;;  %v1094_v63 = vsel %vm1055_vm4, %v1024_v57, %v958_v51  ;;  %v927_v1 = vadd.f32 %v2127_v23, %v856_v58  ;;  %v959_v2 = vadd.f32 %v2127_v23, %v888_v59 }
 0x109   :  { %v1623_v3 = vpack.c.bf16 %v1062_v62, %v1062_v62  ;;  %v1655_v4 = vpack.c.bf16 %v1094_v63, %v1094_v63  ;;  %v619_v5 = vpop.f32.mrf.mxu0  ;;  %v747_v6 = vpop.f32.mrf.mxu1 }
 0x10a   :  { %v993_v7 = vmax.f32 %v927_v1, 0.0  ;;  %v1025_v8 = vmax.f32 %v959_v2, 0.0  ;;  %v857_v9 = vmul.f32 %v2122_v21, %v619_v5  ;;  %v889_v10 = vmul.f32 %v2122_v21, %v747_v6 }
 0x10b   :  { %1383 = vst.msk [vmem:[%s2649_s5 + $0x18] sm:$0xf] %vm1376_vm5, %v1623_v3  ;;  %1415 = vst.msk [vmem:[%s2649_s5 + $0x98] sm:$0xf] %vm1376_vm5, %v1655_v4  ;;  %v621_v11 = vpop.f32.mrf.mxu0  ;;  %v749_v12 = vpop.f32.mrf.mxu1 }
 0x10c   :  { %v1063_v13 = vsel %vm1055_vm4, %v993_v7, %v927_v1  ;;  %v1095_v14 = vsel %vm1055_vm4, %v1025_v8, %v959_v2  ;;  %v928_v15 = vadd.f32 %v2127_v23, %v857_v9  ;;  %v960_v16 = vadd.f32 %v2127_v23, %v889_v10 }
 0x10d   :  { %v1624_v17 = vpack.c.bf16 %v1063_v13, %v1063_v13  ;;  %v1656_v18 = vpack.c.bf16 %v1095_v14, %v1095_v14  ;;  %v622_v19 = vpop.f32.mrf.mxu0  ;;  %v750_v20 = vpop.f32.mrf.mxu1 }
 0x10e   :  { %v994_v22 = vmax.f32 %v928_v15, 0.0  ;;  %v1026_v25 = vmax.f32 %v960_v16, 0.0  ;;  %v858_v26 = vmul.f32 %v2122_v21, %v622_v19  ;;  %v890_v27 = vmul.f32 %v2122_v21, %v750_v20 }
 0x10f   :  { %1384 = vst.msk [vmem:[%s2649_s5 + $0x1c] sm:$0xf] %vm1376_vm5, %v1624_v17  ;;  %1416 = vst.msk [vmem:[%s2649_s5 + $0x9c] sm:$0xf] %vm1376_vm5, %v1656_v18  ;;  %v624_v28 = vpop.f32.mrf.mxu0  ;;  %v752_v0 = vpop.f32.mrf.mxu1 }
 0x110   :  { %v1064_v29 = vsel %vm1055_vm4, %v994_v22, %v928_v15  ;;  %v1096_v30 = vsel %vm1055_vm4, %v1026_v25, %v960_v16  ;;  %v929_v31 = vadd.f32 %v2127_v23, %v858_v26  ;;  %v961_v32 = vadd.f32 %v2127_v23, %v890_v27 }
 0x111   :  { %v1625_v33 = vpack.c.bf16 %v1064_v29, %v1064_v29  ;;  %v1657_v34 = vpack.c.bf16 %v1096_v30, %v1096_v30  ;;  %v627_v35 = vpop.f32.mrf.mxu0  ;;  %v755_v36 = vpop.f32.mrf.mxu1 }
 0x112   :  { %v995_v37 = vmax.f32 %v929_v31, 0.0  ;;  %v1027_v38 = vmax.f32 %v961_v32, 0.0  ;;  %v859_v39 = vmul.f32 %v2122_v21, %v627_v35  ;;  %v891_v40 = vmul.f32 %v2122_v21, %v755_v36 }
 0x113   :  { %1385 = vst.msk [vmem:[%s2649_s5 + $0x20] sm:$0xf] %vm1376_vm5, %v1625_v33  ;;  %1417 = vst.msk [vmem:[%s2649_s5 + $0xa0] sm:$0xf] %vm1376_vm5, %v1657_v34  ;;  %v629_v41 = vpop.f32.mrf.mxu0  ;;  %v757_v42 = vpop.f32.mrf.mxu1 }
 0x114   :  { %v1065_v43 = vsel %vm1055_vm4, %v995_v37, %v929_v31  ;;  %v1097_v44 = vsel %vm1055_vm4, %v1027_v38, %v961_v32  ;;  %v930_v45 = vadd.f32 %v2127_v23, %v859_v39  ;;  %v962_v46 = vadd.f32 %v2127_v23, %v891_v40 }
 0x115   :  { %v1626_v47 = vpack.c.bf16 %v1065_v43, %v1065_v43  ;;  %v1658_v48 = vpack.c.bf16 %v1097_v44, %v1097_v44  ;;  %v630_v49 = vpop.f32.mrf.mxu0  ;;  %v758_v50 = vpop.f32.mrf.mxu1 }
 0x116   :  { %v996_v51 = vmax.f32 %v930_v45, 0.0  ;;  %v1028_v52 = vmax.f32 %v962_v46, 0.0  ;;  %v860_v53 = vmul.f32 %v2122_v21, %v630_v49  ;;  %v892_v54 = vmul.f32 %v2122_v21, %v758_v50 }
 0x117   :  { %1386 = vst.msk [vmem:[%s2649_s5 + $0x24] sm:$0xf] %vm1376_vm5, %v1626_v47  ;;  %1418 = vst.msk [vmem:[%s2649_s5 + $0xa4] sm:$0xf] %vm1376_vm5, %v1658_v48  ;;  %v632_v55 = vpop.f32.mrf.mxu0  ;;  %v760_v56 = vpop.f32.mrf.mxu1 }
 0x118   :  { %v1066_v57 = vsel %vm1055_vm4, %v996_v51, %v930_v45  ;;  %v1098_v58 = vsel %vm1055_vm4, %v1028_v52, %v962_v46  ;;  %v931_v59 = vadd.f32 %v2127_v23, %v860_v53  ;;  %v963_v60 = vadd.f32 %v2127_v23, %v892_v54 }
 0x119   :  { %v1627_v61 = vpack.c.bf16 %v1066_v57, %v1066_v57  ;;  %v1659_v62 = vpack.c.bf16 %v1098_v58, %v1098_v58  ;;  %v635_v63 = vpop.f32.mrf.mxu0  ;;  %v763_v1 = vpop.f32.mrf.mxu1 }
 0x11a   :  { %v997_v2 = vmax.f32 %v931_v59, 0.0  ;;  %v1029_v3 = vmax.f32 %v963_v60, 0.0  ;;  %v861_v4 = vmul.f32 %v2122_v21, %v635_v63  ;;  %v893_v5 = vmul.f32 %v2122_v21, %v763_v1 }
 0x11b   :  { %1387 = vst.msk [vmem:[%s2649_s5 + $0x28] sm:$0xf] %vm1376_vm5, %v1627_v61  ;;  %1419 = vst.msk [vmem:[%s2649_s5 + $0xa8] sm:$0xf] %vm1376_vm5, %v1659_v62  ;;  %v637_v6 = vpop.f32.mrf.mxu0  ;;  %v765_v7 = vpop.f32.mrf.mxu1 }
 0x11c   :  { %v1067_v8 = vsel %vm1055_vm4, %v997_v2, %v931_v59  ;;  %v1099_v9 = vsel %vm1055_vm4, %v1029_v3, %v963_v60  ;;  %v932_v10 = vadd.f32 %v2127_v23, %v861_v4  ;;  %v964_v11 = vadd.f32 %v2127_v23, %v893_v5 }
 0x11d   :  { %v1628_v12 = vpack.c.bf16 %v1067_v8, %v1067_v8  ;;  %v1660_v13 = vpack.c.bf16 %v1099_v9, %v1099_v9  ;;  %v638_v14 = vpop.f32.mrf.mxu0  ;;  %v766_v15 = vpop.f32.mrf.mxu1 }
 0x11e   :  { %v998_v16 = vmax.f32 %v932_v10, 0.0  ;;  %v1030_v17 = vmax.f32 %v964_v11, 0.0  ;;  %v862_v18 = vmul.f32 %v2122_v21, %v638_v14  ;;  %v894_v19 = vmul.f32 %v2122_v21, %v766_v15 }
 0x11f   :  { %1388 = vst.msk [vmem:[%s2649_s5 + $0x2c] sm:$0xf] %vm1376_vm5, %v1628_v12  ;;  %1420 = vst.msk [vmem:[%s2649_s5 + $0xac] sm:$0xf] %vm1376_vm5, %v1660_v13  ;;  %v640_v20 = vpop.f32.mrf.mxu0  ;;  %v768_v22 = vpop.f32.mrf.mxu1 }
 0x120   :  { %v1068_v25 = vsel %vm1055_vm4, %v998_v16, %v932_v10  ;;  %v1100_v26 = vsel %vm1055_vm4, %v1030_v17, %v964_v11  ;;  %v933_v27 = vadd.f32 %v2127_v23, %v862_v18  ;;  %v965_v28 = vadd.f32 %v2127_v23, %v894_v19 }
 0x121   :  { %v1629_v0 = vpack.c.bf16 %v1068_v25, %v1068_v25  ;;  %v1661_v29 = vpack.c.bf16 %v1100_v26, %v1100_v26  ;;  %v643_v30 = vpop.f32.mrf.mxu0  ;;  %v771_v31 = vpop.f32.mrf.mxu1 }
 0x122   :  { %v999_v32 = vmax.f32 %v933_v27, 0.0  ;;  %v1031_v33 = vmax.f32 %v965_v28, 0.0  ;;  %v863_v34 = vmul.f32 %v2122_v21, %v643_v30  ;;  %v895_v35 = vmul.f32 %v2122_v21, %v771_v31 }
 0x123   :  { %1389 = vst.msk [vmem:[%s2649_s5 + $0x30] sm:$0xf] %vm1376_vm5, %v1629_v0  ;;  %1421 = vst.msk [vmem:[%s2649_s5 + $0xb0] sm:$0xf] %vm1376_vm5, %v1661_v29  ;;  %v645_v36 = vpop.f32.mrf.mxu0  ;;  %v773_v37 = vpop.f32.mrf.mxu1 }
 0x124   :  { %v1069_v38 = vsel %vm1055_vm4, %v999_v32, %v933_v27  ;;  %v1101_v39 = vsel %vm1055_vm4, %v1031_v33, %v965_v28  ;;  %v934_v40 = vadd.f32 %v2127_v23, %v863_v34  ;;  %v966_v41 = vadd.f32 %v2127_v23, %v895_v35 }
 0x125   :  { %v1630_v42 = vpack.c.bf16 %v1069_v38, %v1069_v38  ;;  %v1662_v43 = vpack.c.bf16 %v1101_v39, %v1101_v39  ;;  %v646_v44 = vpop.f32.mrf.mxu0  ;;  %v774_v45 = vpop.f32.mrf.mxu1 }
 0x126   :  { %v1000_v46 = vmax.f32 %v934_v40, 0.0  ;;  %v1032_v47 = vmax.f32 %v966_v41, 0.0  ;;  %v864_v48 = vmul.f32 %v2122_v21, %v646_v44  ;;  %v896_v49 = vmul.f32 %v2122_v21, %v774_v45 }
 0x127   :  { %1390 = vst.msk [vmem:[%s2649_s5 + $0x34] sm:$0xf] %vm1376_vm5, %v1630_v42  ;;  %1422 = vst.msk [vmem:[%s2649_s5 + $0xb4] sm:$0xf] %vm1376_vm5, %v1662_v43  ;;  %v648_v50 = vpop.f32.mrf.mxu0  ;;  %v776_v51 = vpop.f32.mrf.mxu1 }
 0x128   :  { %v1070_v52 = vsel %vm1055_vm4, %v1000_v46, %v934_v40  ;;  %v1102_v53 = vsel %vm1055_vm4, %v1032_v47, %v966_v41  ;;  %v935_v54 = vadd.f32 %v2127_v23, %v864_v48  ;;  %v967_v55 = vadd.f32 %v2127_v23, %v896_v49 }
 0x129   :  { %v1631_v56 = vpack.c.bf16 %v1070_v52, %v1070_v52  ;;  %v1663_v57 = vpack.c.bf16 %v1102_v53, %v1102_v53  ;;  %v651_v58 = vpop.f32.mrf.mxu0  ;;  %v779_v59 = vpop.f32.mrf.mxu1 }
 0x12a   :  { %v1001_v60 = vmax.f32 %v935_v54, 0.0  ;;  %v1033_v61 = vmax.f32 %v967_v55, 0.0  ;;  %v865_v62 = vmul.f32 %v2122_v21, %v651_v58  ;;  %v897_v63 = vmul.f32 %v2122_v21, %v779_v59 }
 0x12b   :  { %1391 = vst.msk [vmem:[%s2649_s5 + $0x38] sm:$0xf] %vm1376_vm5, %v1631_v56  ;;  %1423 = vst.msk [vmem:[%s2649_s5 + $0xb8] sm:$0xf] %vm1376_vm5, %v1663_v57  ;;  %v653_v1 = vpop.f32.mrf.mxu0  ;;  %v781_v2 = vpop.f32.mrf.mxu1 }
 0x12c   :  { %v1071_v3 = vsel %vm1055_vm4, %v1001_v60, %v935_v54  ;;  %v1103_v4 = vsel %vm1055_vm4, %v1033_v61, %v967_v55  ;;  %v936_v5 = vadd.f32 %v2127_v23, %v865_v62  ;;  %v968_v6 = vadd.f32 %v2127_v23, %v897_v63 }
 0x12d   :  { %v1632_v7 = vpack.c.bf16 %v1071_v3, %v1071_v3  ;;  %v1664_v8 = vpack.c.bf16 %v1103_v4, %v1103_v4  ;;  %v654_v9 = vpop.f32.mrf.mxu0  ;;  %v782_v10 = vpop.f32.mrf.mxu1 }
 0x12e   :  { %v1002_v11 = vmax.f32 %v936_v5, 0.0  ;;  %v1034_v12 = vmax.f32 %v968_v6, 0.0  ;;  %v866_v13 = vmul.f32 %v2122_v21, %v654_v9  ;;  %v898_v14 = vmul.f32 %v2122_v21, %v782_v10 }
 0x12f   :  { %1392 = vst.msk [vmem:[%s2649_s5 + $0x3c] sm:$0xf] %vm1376_vm5, %v1632_v7  ;;  %1424 = vst.msk [vmem:[%s2649_s5 + $0xbc] sm:$0xf] %vm1376_vm5, %v1664_v8  ;;  %v656_v15 = vpop.f32.mrf.mxu0  ;;  %v784_v16 = vpop.f32.mrf.mxu1 }
 0x130   :  { %v1072_v17 = vsel %vm1055_vm4, %v1002_v11, %v936_v5  ;;  %v1104_v18 = vsel %vm1055_vm4, %v1034_v12, %v968_v6  ;;  %v937_v19 = vadd.f32 %v2127_v23, %v866_v13  ;;  %v969_v20 = vadd.f32 %v2127_v23, %v898_v14 }
 0x131   :  { %v1633_v22 = vpack.c.bf16 %v1072_v17, %v1072_v17  ;;  %v1665_v25 = vpack.c.bf16 %v1104_v18, %v1104_v18  ;;  %v659_v26 = vpop.f32.mrf.mxu0  ;;  %v787_v27 = vpop.f32.mrf.mxu1 }
 0x132   :  { %v1003_v28 = vmax.f32 %v937_v19, 0.0  ;;  %v1035_v0 = vmax.f32 %v969_v20, 0.0  ;;  %v867_v29 = vmul.f32 %v2122_v21, %v659_v26  ;;  %v899_v30 = vmul.f32 %v2122_v21, %v787_v27 }
 0x133   :  { %1393 = vst.msk [vmem:[%s2649_s5 + $0x40] sm:$0xf] %vm1376_vm5, %v1633_v22  ;;  %1425 = vst.msk [vmem:[%s2649_s5 + $0xc0] sm:$0xf] %vm1376_vm5, %v1665_v25  ;;  %v661_v31 = vpop.f32.mrf.mxu0  ;;  %v789_v32 = vpop.f32.mrf.mxu1 }
 0x134   :  { %v1073_v33 = vsel %vm1055_vm4, %v1003_v28, %v937_v19  ;;  %v1105_v34 = vsel %vm1055_vm4, %v1035_v0, %v969_v20  ;;  %v938_v35 = vadd.f32 %v2127_v23, %v867_v29  ;;  %v970_v36 = vadd.f32 %v2127_v23, %v899_v30 }
 0x135   :  { %v1634_v37 = vpack.c.bf16 %v1073_v33, %v1073_v33  ;;  %v1666_v38 = vpack.c.bf16 %v1105_v34, %v1105_v34  ;;  %v662_v39 = vpop.f32.mrf.mxu0  ;;  %v790_v40 = vpop.f32.mrf.mxu1 }
 0x136   :  { %v1004_v41 = vmax.f32 %v938_v35, 0.0  ;;  %v1036_v42 = vmax.f32 %v970_v36, 0.0  ;;  %v868_v43 = vmul.f32 %v2122_v21, %v662_v39  ;;  %v900_v44 = vmul.f32 %v2122_v21, %v790_v40 }
 0x137   :  { %1394 = vst.msk [vmem:[%s2649_s5 + $0x44] sm:$0xf] %vm1376_vm5, %v1634_v37  ;;  %1426 = vst.msk [vmem:[%s2649_s5 + $0xc4] sm:$0xf] %vm1376_vm5, %v1666_v38  ;;  %v664_v45 = vpop.f32.mrf.mxu0  ;;  %v792_v46 = vpop.f32.mrf.mxu1 }
 0x138   :  { %v1074_v47 = vsel %vm1055_vm4, %v1004_v41, %v938_v35  ;;  %v1106_v48 = vsel %vm1055_vm4, %v1036_v42, %v970_v36  ;;  %v939_v49 = vadd.f32 %v2127_v23, %v868_v43  ;;  %v971_v50 = vadd.f32 %v2127_v23, %v900_v44 }
 0x139   :  { %v1635_v51 = vpack.c.bf16 %v1074_v47, %v1074_v47  ;;  %v1667_v52 = vpack.c.bf16 %v1106_v48, %v1106_v48  ;;  %v667_v53 = vpop.f32.mrf.mxu0  ;;  %v795_v54 = vpop.f32.mrf.mxu1 }
 0x13a   :  { %v1005_v55 = vmax.f32 %v939_v49, 0.0  ;;  %v1037_v56 = vmax.f32 %v971_v50, 0.0  ;;  %v869_v57 = vmul.f32 %v2122_v21, %v667_v53  ;;  %v901_v58 = vmul.f32 %v2122_v21, %v795_v54 }
 0x13b   :  { %1395 = vst.msk [vmem:[%s2649_s5 + $0x48] sm:$0xf] %vm1376_vm5, %v1635_v51  ;;  %1427 = vst.msk [vmem:[%s2649_s5 + $0xc8] sm:$0xf] %vm1376_vm5, %v1667_v52  ;;  %v669_v59 = vpop.f32.mrf.mxu0  ;;  %v797_v60 = vpop.f32.mrf.mxu1 }
 0x13c   :  { %v1075_v61 = vsel %vm1055_vm4, %v1005_v55, %v939_v49  ;;  %v1107_v62 = vsel %vm1055_vm4, %v1037_v56, %v971_v50  ;;  %v940_v63 = vadd.f32 %v2127_v23, %v869_v57  ;;  %v972_v1 = vadd.f32 %v2127_v23, %v901_v58 }
 0x13d   :  { %v1636_v2 = vpack.c.bf16 %v1075_v61, %v1075_v61  ;;  %v1668_v3 = vpack.c.bf16 %v1107_v62, %v1107_v62  ;;  %v670_v4 = vpop.f32.mrf.mxu0  ;;  %v798_v5 = vpop.f32.mrf.mxu1 }
 0x13e   :  { %v1006_v6 = vmax.f32 %v940_v63, 0.0  ;;  %v1038_v7 = vmax.f32 %v972_v1, 0.0  ;;  %v870_v8 = vmul.f32 %v2122_v21, %v670_v4  ;;  %v902_v9 = vmul.f32 %v2122_v21, %v798_v5 }
 0x13f   :  { %1396 = vst.msk [vmem:[%s2649_s5 + $0x4c] sm:$0xf] %vm1376_vm5, %v1636_v2  ;;  %1428 = vst.msk [vmem:[%s2649_s5 + $0xcc] sm:$0xf] %vm1376_vm5, %v1668_v3  ;;  %v672_v10 = vpop.f32.mrf.mxu0  ;;  %v800_v11 = vpop.f32.mrf.mxu1 }
 0x140   :  { %v1076_v12 = vsel %vm1055_vm4, %v1006_v6, %v940_v63  ;;  %v1108_v13 = vsel %vm1055_vm4, %v1038_v7, %v972_v1  ;;  %v941_v14 = vadd.f32 %v2127_v23, %v870_v8  ;;  %v973_v15 = vadd.f32 %v2127_v23, %v902_v9 }
 0x141   :  { %v1637_v16 = vpack.c.bf16 %v1076_v12, %v1076_v12  ;;  %v1669_v17 = vpack.c.bf16 %v1108_v13, %v1108_v13  ;;  %v675_v18 = vpop.f32.mrf.mxu0  ;;  %v803_v19 = vpop.f32.mrf.mxu1 }
 0x142   :  { %v1007_v20 = vmax.f32 %v941_v14, 0.0  ;;  %v1039_v22 = vmax.f32 %v973_v15, 0.0  ;;  %v871_v25 = vmul.f32 %v2122_v21, %v675_v18  ;;  %v903_v26 = vmul.f32 %v2122_v21, %v803_v19 }
 0x143   :  { %1397 = vst.msk [vmem:[%s2649_s5 + $0x50] sm:$0xf] %vm1376_vm5, %v1637_v16  ;;  %1429 = vst.msk [vmem:[%s2649_s5 + $0xd0] sm:$0xf] %vm1376_vm5, %v1669_v17  ;;  %v677_v27 = vpop.f32.mrf.mxu0  ;;  %v805_v28 = vpop.f32.mrf.mxu1 }
 0x144   :  { %v1077_v0 = vsel %vm1055_vm4, %v1007_v20, %v941_v14  ;;  %v1109_v29 = vsel %vm1055_vm4, %v1039_v22, %v973_v15  ;;  %v942_v30 = vadd.f32 %v2127_v23, %v871_v25  ;;  %v974_v31 = vadd.f32 %v2127_v23, %v903_v26 }
 0x145   :  { %v1638_v32 = vpack.c.bf16 %v1077_v0, %v1077_v0  ;;  %v1670_v33 = vpack.c.bf16 %v1109_v29, %v1109_v29  ;;  %v678_v34 = vpop.f32.mrf.mxu0  ;;  %v806_v35 = vpop.f32.mrf.mxu1 }
 0x146   :  { %v1008_v36 = vmax.f32 %v942_v30, 0.0  ;;  %v1040_v37 = vmax.f32 %v974_v31, 0.0  ;;  %v872_v38 = vmul.f32 %v2122_v21, %v678_v34  ;;  %v904_v39 = vmul.f32 %v2122_v21, %v806_v35 }
 0x147   :  { %1398 = vst.msk [vmem:[%s2649_s5 + $0x54] sm:$0xf] %vm1376_vm5, %v1638_v32  ;;  %1430 = vst.msk [vmem:[%s2649_s5 + $0xd4] sm:$0xf] %vm1376_vm5, %v1670_v33  ;;  %v680_v40 = vpop.f32.mrf.mxu0  ;;  %v808_v41 = vpop.f32.mrf.mxu1 }
 0x148   :  { %v1078_v42 = vsel %vm1055_vm4, %v1008_v36, %v942_v30  ;;  %v1110_v43 = vsel %vm1055_vm4, %v1040_v37, %v974_v31  ;;  %v943_v44 = vadd.f32 %v2127_v23, %v872_v38  ;;  %v975_v45 = vadd.f32 %v2127_v23, %v904_v39 }
 0x149   :  { %v1639_v46 = vpack.c.bf16 %v1078_v42, %v1078_v42  ;;  %v1671_v47 = vpack.c.bf16 %v1110_v43, %v1110_v43  ;;  %v683_v48 = vpop.f32.mrf.mxu0  ;;  %v811_v49 = vpop.f32.mrf.mxu1 }
 0x14a   :  { %v1009_v50 = vmax.f32 %v943_v44, 0.0  ;;  %v1041_v51 = vmax.f32 %v975_v45, 0.0  ;;  %v873_v52 = vmul.f32 %v2122_v21, %v683_v48  ;;  %v905_v53 = vmul.f32 %v2122_v21, %v811_v49 }
 0x14b   :  { %1399 = vst.msk [vmem:[%s2649_s5 + $0x58] sm:$0xf] %vm1376_vm5, %v1639_v46  ;;  %1431 = vst.msk [vmem:[%s2649_s5 + $0xd8] sm:$0xf] %vm1376_vm5, %v1671_v47  ;;  %v685_v54 = vpop.f32.mrf.mxu0  ;;  %v813_v55 = vpop.f32.mrf.mxu1 }
 0x14c   :  { %v1079_v56 = vsel %vm1055_vm4, %v1009_v50, %v943_v44  ;;  %v1111_v57 = vsel %vm1055_vm4, %v1041_v51, %v975_v45  ;;  %v944_v58 = vadd.f32 %v2127_v23, %v873_v52  ;;  %v976_v59 = vadd.f32 %v2127_v23, %v905_v53 }
 0x14d   :  { %v1640_v60 = vpack.c.bf16 %v1079_v56, %v1079_v56  ;;  %v1672_v61 = vpack.c.bf16 %v1111_v57, %v1111_v57  ;;  %v686_v62 = vpop.f32.mrf.mxu0  ;;  %v814_v63 = vpop.f32.mrf.mxu1 }
 0x14e   :  { %v1010_v1 = vmax.f32 %v944_v58, 0.0  ;;  %v1042_v2 = vmax.f32 %v976_v59, 0.0  ;;  %v874_v3 = vmul.f32 %v2122_v21, %v686_v62  ;;  %v906_v4 = vmul.f32 %v2122_v21, %v814_v63 }
 0x14f   :  { %1400 = vst.msk [vmem:[%s2649_s5 + $0x5c] sm:$0xf] %vm1376_vm5, %v1640_v60  ;;  %1432 = vst.msk [vmem:[%s2649_s5 + $0xdc] sm:$0xf] %vm1376_vm5, %v1672_v61  ;;  %v688_v5 = vpop.f32.mrf.mxu0  ;;  %v816_v6 = vpop.f32.mrf.mxu1 }
 0x150   :  { %v1080_v7 = vsel %vm1055_vm4, %v1010_v1, %v944_v58  ;;  %v1112_v8 = vsel %vm1055_vm4, %v1042_v2, %v976_v59  ;;  %v945_v9 = vadd.f32 %v2127_v23, %v874_v3  ;;  %v977_v10 = vadd.f32 %v2127_v23, %v906_v4 }
 0x151   :  { %v1641_v11 = vpack.c.bf16 %v1080_v7, %v1080_v7  ;;  %v1673_v12 = vpack.c.bf16 %v1112_v8, %v1112_v8  ;;  %v691_v13 = vpop.f32.mrf.mxu0  ;;  %v819_v14 = vpop.f32.mrf.mxu1 }
 0x152   :  { %v1011_v15 = vmax.f32 %v945_v9, 0.0  ;;  %v1043_v16 = vmax.f32 %v977_v10, 0.0  ;;  %v875_v17 = vmul.f32 %v2122_v21, %v691_v13  ;;  %v907_v18 = vmul.f32 %v2122_v21, %v819_v14 }
 0x153   :  { %1401 = vst.msk [vmem:[%s2649_s5 + $0x60] sm:$0xf] %vm1376_vm5, %v1641_v11  ;;  %1433 = vst.msk [vmem:[%s2649_s5 + $0xe0] sm:$0xf] %vm1376_vm5, %v1673_v12  ;;  %v693_v19 = vpop.f32.mrf.mxu0  ;;  %v821_v20 = vpop.f32.mrf.mxu1 }
 0x154   :  { %v1081_v22 = vsel %vm1055_vm4, %v1011_v15, %v945_v9  ;;  %v1113_v25 = vsel %vm1055_vm4, %v1043_v16, %v977_v10  ;;  %v946_v26 = vadd.f32 %v2127_v23, %v875_v17  ;;  %v978_v27 = vadd.f32 %v2127_v23, %v907_v18 }
 0x155   :  { %v1642_v28 = vpack.c.bf16 %v1081_v22, %v1081_v22  ;;  %v1674_v0 = vpack.c.bf16 %v1113_v25, %v1113_v25  ;;  %v694_v29 = vpop.f32.mrf.mxu0  ;;  %v822_v30 = vpop.f32.mrf.mxu1 }
 0x156   :  { %v1012_v31 = vmax.f32 %v946_v26, 0.0  ;;  %v1044_v32 = vmax.f32 %v978_v27, 0.0  ;;  %v876_v33 = vmul.f32 %v2122_v21, %v694_v29  ;;  %v908_v34 = vmul.f32 %v2122_v21, %v822_v30 }
 0x157   :  { %1402 = vst.msk [vmem:[%s2649_s5 + $0x64] sm:$0xf] %vm1376_vm5, %v1642_v28  ;;  %1434 = vst.msk [vmem:[%s2649_s5 + $0xe4] sm:$0xf] %vm1376_vm5, %v1674_v0  ;;  %v696_v35 = vpop.f32.mrf.mxu0  ;;  %v824_v36 = vpop.f32.mrf.mxu1 }
 0x158   :  { %v1082_v37 = vsel %vm1055_vm4, %v1012_v31, %v946_v26  ;;  %v1114_v38 = vsel %vm1055_vm4, %v1044_v32, %v978_v27  ;;  %v947_v39 = vadd.f32 %v2127_v23, %v876_v33  ;;  %v979_v40 = vadd.f32 %v2127_v23, %v908_v34 }
 0x159   :  { %v1643_v41 = vpack.c.bf16 %v1082_v37, %v1082_v37  ;;  %v1675_v42 = vpack.c.bf16 %v1114_v38, %v1114_v38  ;;  %v699_v43 = vpop.f32.mrf.mxu0  ;;  %v827_v44 = vpop.f32.mrf.mxu1 }
 0x15a   :  { %v1013_v45 = vmax.f32 %v947_v39, 0.0  ;;  %v1045_v46 = vmax.f32 %v979_v40, 0.0  ;;  %v877_v47 = vmul.f32 %v2122_v21, %v699_v43  ;;  %v909_v48 = vmul.f32 %v2122_v21, %v827_v44 }
 0x15b   :  { %1403 = vst.msk [vmem:[%s2649_s5 + $0x68] sm:$0xf] %vm1376_vm5, %v1643_v41  ;;  %1435 = vst.msk [vmem:[%s2649_s5 + $0xe8] sm:$0xf] %vm1376_vm5, %v1675_v42  ;;  %v701_v49 = vpop.f32.mrf.mxu0  ;;  %v829_v50 = vpop.f32.mrf.mxu1 }
 0x15c   :  { %v1083_v51 = vsel %vm1055_vm4, %v1013_v45, %v947_v39  ;;  %v1115_v52 = vsel %vm1055_vm4, %v1045_v46, %v979_v40  ;;  %v948_v53 = vadd.f32 %v2127_v23, %v877_v47  ;;  %v980_v54 = vadd.f32 %v2127_v23, %v909_v48 }
 0x15d   :  { %v1644_v55 = vpack.c.bf16 %v1083_v51, %v1083_v51  ;;  %v1676_v56 = vpack.c.bf16 %v1115_v52, %v1115_v52  ;;  %v702_v57 = vpop.f32.mrf.mxu0  ;;  %v830_v58 = vpop.f32.mrf.mxu1 }
 0x15e   :  { %v1014_v59 = vmax.f32 %v948_v53, 0.0  ;;  %v1046_v60 = vmax.f32 %v980_v54, 0.0  ;;  %v878_v61 = vmul.f32 %v2122_v21, %v702_v57  ;;  %v910_v62 = vmul.f32 %v2122_v21, %v830_v58 }
 0x15f   :  { %1404 = vst.msk [vmem:[%s2649_s5 + $0x6c] sm:$0xf] %vm1376_vm5, %v1644_v55  ;;  %1436 = vst.msk [vmem:[%s2649_s5 + $0xec] sm:$0xf] %vm1376_vm5, %v1676_v56  ;;  %v704_v63 = vpop.f32.mrf.mxu0  ;;  %v832_v1 = vpop.f32.mrf.mxu1 }
 0x160   :  { %v1084_v2 = vsel %vm1055_vm4, %v1014_v59, %v948_v53  ;;  %v1116_v3 = vsel %vm1055_vm4, %v1046_v60, %v980_v54  ;;  %v949_v4 = vadd.f32 %v2127_v23, %v878_v61  ;;  %v981_v5 = vadd.f32 %v2127_v23, %v910_v62 }
 0x161   :  { %v1645_v6 = vpack.c.bf16 %v1084_v2, %v1084_v2  ;;  %v1677_v7 = vpack.c.bf16 %v1116_v3, %v1116_v3  ;;  %v707_v8 = vpop.f32.mrf.mxu0  ;;  %v835_v9 = vpop.f32.mrf.mxu1 }
 0x162   :  { %v1015_v10 = vmax.f32 %v949_v4, 0.0  ;;  %v1047_v11 = vmax.f32 %v981_v5, 0.0  ;;  %v879_v12 = vmul.f32 %v2122_v21, %v707_v8  ;;  %v911_v13 = vmul.f32 %v2122_v21, %v835_v9 }
 0x163   :  { %1405 = vst.msk [vmem:[%s2649_s5 + $0x70] sm:$0xf] %vm1376_vm5, %v1645_v6  ;;  %1437 = vst.msk [vmem:[%s2649_s5 + $0xf0] sm:$0xf] %vm1376_vm5, %v1677_v7  ;;  %v709_v14 = vpop.f32.mrf.mxu0  ;;  %v837_v15 = vpop.f32.mrf.mxu1 }
 0x164   :  { %v1085_v16 = vsel %vm1055_vm4, %v1015_v10, %v949_v4  ;;  %v1117_v17 = vsel %vm1055_vm4, %v1047_v11, %v981_v5  ;;  %v950_v18 = vadd.f32 %v2127_v23, %v879_v12  ;;  %v982_v19 = vadd.f32 %v2127_v23, %v911_v13 }
 0x165   :  { %v1646_v20 = vpack.c.bf16 %v1085_v16, %v1085_v16  ;;  %v1678_v22 = vpack.c.bf16 %v1117_v17, %v1117_v17  ;;  %v710_v25 = vpop.f32.mrf.mxu0  ;;  %v838_v26 = vpop.f32.mrf.mxu1 }
 0x166   :  { %v1016_v27 = vmax.f32 %v950_v18, 0.0  ;;  %v1048_v28 = vmax.f32 %v982_v19, 0.0  ;;  %v880_v0 = vmul.f32 %v2122_v21, %v710_v25  ;;  %v912_v29 = vmul.f32 %v2122_v21, %v838_v26 }
 0x167   :  { %1406 = vst.msk [vmem:[%s2649_s5 + $0x74] sm:$0xf] %vm1376_vm5, %v1646_v20  ;;  %1438 = vst.msk [vmem:[%s2649_s5 + $0xf4] sm:$0xf] %vm1376_vm5, %v1678_v22  ;;  %v712_v30 = vpop.f32.mrf.mxu0  ;;  %v840_v31 = vpop.f32.mrf.mxu1 }
 0x168   :  { %v1086_v32 = vsel %vm1055_vm4, %v1016_v27, %v950_v18  ;;  %v1118_v33 = vsel %vm1055_vm4, %v1048_v28, %v982_v19  ;;  %v951_v21 = vadd.f32 %v2127_v23, %v880_v0  ;;  %v983_v34 = vadd.f32 %v2127_v23, %v912_v29 }
 0x169   :  { %v1647_v35 = vpack.c.bf16 %v1086_v32, %v1086_v32  ;;  %v1679_v36 = vpack.c.bf16 %v1118_v33, %v1118_v33 }
 0x16a   :  { %v1017_v37 = vmax.f32 %v951_v21, 0.0  ;;  %v1049_v38 = vmax.f32 %v983_v34, 0.0 }
 0x16b   :  { %1407 = vst.msk [vmem:[%s2649_s5 + $0x78] sm:$0xf] %vm1376_vm5, %v1647_v35  ;;  %1439 = vst.msk [vmem:[%s2649_s5 + $0xf8] sm:$0xf] %vm1376_vm5, %v1679_v36 }
 0x16c   :  { %v1087_v39 = vsel %vm1055_vm4, %v1017_v37, %v951_v21  ;;  %v1119_v23 = vsel %vm1055_vm4, %v1049_v38, %v983_v34 }
 0x16d   :  { %v1648_v40 = vpack.c.bf16 %v1087_v39, %v1087_v39  ;;  %v1680_v41 = vpack.c.bf16 %v1119_v23, %v1119_v23 }
 0x16f   :  { %1408 = vst.msk [vmem:[%s2649_s5 + $0x7c] sm:$0xf] %vm1376_vm5, %v1648_v40  ;;  %1440 = vst.msk [vmem:[%s2649_s5 + $0xfc] sm:$0xf] %vm1376_vm5, %v1680_v41 }

// kernel: _lambda_.23
= control target key start
LH: loop header
LB: loop body
LE: loop exit
PB: predicated region body
PF: predicated region fallthrough
CT: control target
= control target key end

     0   :  { %vm203_vm0 = vcmask 261120   ;;  %v337_v26 = vlaneseq  ;;  %v484_v41 = vmov 0   ;;  %s606_s1 = inlined_call_operand.vmem [shape: bf16[288,128], index: 1, kind: input, shape index: {}]   ;;  %s607_s0 = inlined_call_operand.vmem [shape: bf16[32,288], index: 0, kind: input, shape index: {}]   ;;  %s608_s4 = inlined_call_operand.vmem [shape: f32[1,128], index: 4, kind: input, shape index: {}]   ;;  %s609_s2 = inlined_call_operand.vmem [shape: f32[1,128], index: 2, kind: input, shape index: {}]   ;;  %s610_s3 = inlined_call_operand.vmem [shape: f32[1,128], index: 3, kind: input, shape index: {}]   ;;  %s611_s5 = inlined_call_operand.vmem [shape: bf16[32,128], index: 5, kind: output, shape index: {}]  }
   0x1   :  { %v458_v0 = vld [vmem:[%s606_s1 + $0x78] sm:$0xff]   ;;  %v460_v2 = vld [vmem:[%s606_s1 + $0x70] sm:$0xff]   ;;  %v462_v4 = vld [vmem:[%s606_s1 + $0x68] sm:$0xff]  }
   0x2   :  { %v459_v1 = vld [vmem:[%s606_s1 + $0x38] sm:$0xff]   ;;  %417 = vmatprep.subr.bf16.mxu0 %v458_v0  ;;  %v461_v3 = vld [vmem:[%s606_s1 + $0x30] sm:$0xff]   ;;  %v463_v5 = vld [vmem:[%s606_s1 + $0x28] sm:$0xff]   ;;  %v338_v30 = vshrl.u32 %v337_v26, 7 }
   0x3   :  { %418 = vmatpush3.bf16.msra.mxu0 %v459_v1  ;;  %v464_v6 = vld [vmem:[%s606_s1 + $0x60] sm:$0xff]   ;;  %v466_v8 = vld [vmem:[%s606_s1 + $0x58] sm:$0xff]   ;;  %v472_v9 = vld [vmem:[%s606_s1 + $0x88] sm:$0xff]  }
   0x4   :  { %419 = vmatprep.subr.bf16.mxu0 %v460_v2  ;;  %v465_v7 = vld [vmem:[%s606_s1 + $0x20] sm:$0xff]   ;;  %v467_v10 = vld [vmem:[%s606_s1 + $0x18] sm:$0xff]   ;;  %v468_v11 = vld [vmem:[%s606_s1 + $0x50] sm:$0xff]   ;;  %449 = vmatprep.subr.bf16.mxu1 %v472_v9  ;;  %v339_v37 = vsub.s32 0, %v338_v30 }
   0x5   :  { %v469_v12 = vld [vmem:[%s606_s1 + $0x10] sm:$0xff]   ;;  %450 = vmatpush3.bf16.msra.mxu1 %v472_v9  ;;  %v475_v13 = vld [vmem:[%s606_s1 + $0x80] sm:$0xff]   ;;  %v470_v14 = vld [vmem:[%s606_s1 + $0x48] sm:$0xff]  }
   0x6   :  { %451 = vmatprep.subr.bf16.mxu1 %v475_v13  ;;  %v478_v15 = vld [vmem:[%s607_s0 + $0x4] ss:$12 sps:$4 sm:$0xff]   ;;  %v479_v16 = vld [vmem:[%s607_s0 + $0x8] ss:$12 sps:$4 sm:$0xff]   ;;  %v480_v17 = vld [vmem:[%s607_s0 + $0x20] ss:$12 sps:$4 sm:$0xff]  }
   0x7   :  { %420 = vmatpush3.bf16.msra.mxu0 %v461_v3  ;;  %242 = vmatprep.mubr.bf16.mxu0 %v478_v15  ;;  %v471_v18 = vld [vmem:[%s606_s1 + $0x8] sm:$0xff]   ;;  %v473_v19 = vld [vmem:[%s606_s1 + $0x40] sm:$0xff]  }
   0x8   :  { %421 = vmatprep.subr.bf16.mxu0 %v462_v4  ;;  %453 = vmatprep.mubr.msk.bf16.mxu1 %vm203_vm0, %v479_v16  ;;  %v474_v20 = vld [vmem:[%s606_s1] sm:$0xff]   ;;  %v481_v22 = vld [vmem:[%s607_s0 + $0x1c] ss:$12 sps:$4 sm:$0xff]  }
   0x9   :  { %452 = vmatpush3.bf16.msra.mxu1 %v475_v13  ;;  %v476_v21 = vld [vmem:[%s607_s0] ss:$12 sps:$4 sm:$0xff]   ;;  %v483_v23 = vld [vmem:[%s607_s0 + $0x18] ss:$12 sps:$4 sm:$0xff]  }
   0xa   :  { %v330_v28 = vld [vmem:[%s608_s4] sm:$0x1] }
   0xb   :  { %422 = vmatpush3.bf16.msra.mxu0 %v463_v5  ;;  %v396_v34 = vld [vmem:[%s609_s2] ss:$0 sm:$0xff]  ;;  %vm331_vm1 = vcmp.gt.f32.partialorder %v330_v28, 0.5 }
   0xc   :  { %423 = vmatprep.subr.bf16.mxu0 %v464_v6  ;;  %454 = vmatmul.mubr.msk.bf16.vlgmr.msra.gmra.mxu1 %vm203_vm0, %v480_v17  ;;  %v397_v36 = vld [vmem:[%s610_s3] ss:$0 sm:$0xff]  ;;  %v336_v42 = vsel %vm331_vm1, 1, %v484_v41 }
   0xd   :  { %v340_v47 = vrot.slane %v336_v42, %v339_v37 }
   0xf   :  { %424 = vmatpush3.bf16.msra.mxu0 %v465_v7  ;;  %vm341_vm2 = vcmp.eq.s32.totalorder %v340_v47, 1 }
  0x10   :  { %425 = vmatprep.subr.bf16.mxu0 %v466_v8 }
  0x13   :  { %426 = vmatpush3.bf16.msra.mxu0 %v467_v10 }
  0x14   :  { %427 = vmatprep.subr.bf16.mxu0 %v468_v11 }
  0x17   :  { %428 = vmatpush3.bf16.msra.mxu0 %v469_v12 }
  0x18   :  { %429 = vmatprep.subr.bf16.mxu0 %v470_v14 }
  0x1b   :  { %430 = vmatpush3.bf16.msra.mxu0 %v471_v18 }
  0x1c   :  { %431 = vmatprep.subr.bf16.mxu0 %v473_v19 }
  0x1f   :  { %432 = vmatpush3.bf16.msra.mxu0 %v474_v20 }
  0x22   :  { %243 = vmatmul.mubr.bf16.vlgmr.msra.gmra.mxu0 %v476_v21 }
  0x23   :  { %250 = vmatprep.mubr.bf16.mxu0 %v481_v22 }
  0x2a   :  { %251 = vmatmul.mubr.bf16.gmra.mxu0 %v483_v23 }
  0xcc   :  { %v455_v24 = vpop.f32.mrf.mxu1 }
  0xce   :  { %v293_v25 = vpop.f32.mrf.mxu1 }
  0xd0   :  { %v456_v31 = vpop.f32.mrf.mxu1 }
  0xd2   :  { %v296_v39 = vpop.f32.mrf.mxu1 }
  0xe2   :  { %v433_v27 = vpop.f32.mrf.mxu0 }
  0xe4   :  { %v434_v29 = vpop.f32.mrf.mxu0 }
  0xe5   :  { %v435_v32 = vadd.f32 %v434_v29, %v433_v27 }
  0xe6   :  { %v436_v33 = vpop.f32.mrf.mxu0 }
  0xe7   :  { %v294_v35 = vadd.f32 %v435_v32, %v293_v25 }
  0xe8   :  { %v437_v38 = vpop.f32.mrf.mxu0 }
  0xe9   :  { %v315_v40 = vmul.f32 %v396_v34, %v294_v35  ;;  %v438_v43 = vadd.f32 %v437_v38, %v436_v33 }
  0xea   :  { %v439_v44 = vpop.f32.mrf.mxu0 }
  0xeb   :  { %v326_v45 = vadd.f32 %v397_v36, %v315_v40  ;;  %v297_v46 = vadd.f32 %v438_v43, %v296_v39 }
  0xec   :  { %v440_v48 = vpop.f32.mrf.mxu0 }
  0xed   :  { %v316_v49 = vmul.f32 %v396_v34, %v297_v46  ;;  %v441_v50 = vadd.f32 %v440_v48, %v439_v44  ;;  %v332_v52 = vmax.f32 %v326_v45, 0.0 }
  0xee   :  { %v442_v51 = vpop.f32.mrf.mxu0 }
  0xef   :  { %v327_v53 = vadd.f32 %v397_v36, %v316_v49  ;;  %v302_v54 = vadd.f32 %v455_v24, %v441_v50  ;;  %v342_v59 = vsel %vm341_vm2, %v332_v52, %v326_v45 }
  0xf0   :  { %v443_v55 = vpop.f32.mrf.mxu0 }
  0xf1   :  { %v333_v56 = vmax.f32 %v327_v53, 0.0  ;;  %v317_v57 = vmul.f32 %v396_v34, %v302_v54  ;;  %v444_v58 = vadd.f32 %v443_v55, %v442_v51 }
  0xf3   :  { %v343_v60 = vsel %vm341_vm2, %v333_v56, %v327_v53  ;;  %v328_v61 = vadd.f32 %v397_v36, %v317_v57  ;;  %v305_v62 = vadd.f32 %v456_v31, %v444_v58 }
  0xf4   :  { %v409_v63 = vpack.c.bf16 %v343_v60, %v342_v59 }
  0xf5   :  { %v318_v0 = vmul.f32 %v396_v34, %v305_v62  ;;  %v334_v1 = vmax.f32 %v328_v61, 0.0 }
  0xf6   :  { %410 = vst [vmem:[%s611_s5] sm:$0xff] %v409_v63  }
  0xf7   :  { %v329_v2 = vadd.f32 %v397_v36, %v318_v0  ;;  %v344_v4 = vsel %vm341_vm2, %v334_v1, %v328_v61 }
  0xf9   :  { %v335_v3 = vmax.f32 %v329_v2, 0.0 }
  0xfb   :  { %v345_v5 = vsel %vm341_vm2, %v335_v3, %v329_v2 }
  0xfc   :  { %v414_v6 = vpack.c.bf16 %v345_v5, %v344_v4 }
  0xfe   :  { %416 = vst [vmem:[%s611_s5 + $0x8] sm:$0xff] %v414_v6  }

// kernel: _lambda_.25
= control target key start
LH: loop header
LB: loop body
LE: loop exit
PB: predicated region body
PF: predicated region fallthrough
CT: control target
= control target key end

     0   :  { %vm371_vm0 = vcmask 523264   ;;  %v554_v54 = vlaneseq  ;;  %vm579_vm3 = vcmask 519168   ;;  %s969_s1 = inlined_call_operand.vmem [shape: bf16[576,64], index: 1, kind: input, shape index: {}]   ;;  %s970_s0 = inlined_call_operand.vmem [shape: bf16[32,576], index: 0, kind: input, shape index: {}]   ;;  %s971_s4 = inlined_call_operand.vmem [shape: f32[1,64], index: 4, kind: input, shape index: {}]   ;;  %s972_s2 = inlined_call_operand.vmem [shape: f32[1,64], index: 2, kind: input, shape index: {}]   ;;  %s973_s3 = inlined_call_operand.vmem [shape: f32[1,64], index: 3, kind: input, shape index: {}]   ;;  %s974_s5 = inlined_call_operand.vmem [shape: bf16[32,64], index: 5, kind: output, shape index: {}]  }
   0x1   :  { %v721_v0 = vld [vmem:[%s969_s1 + $0x78] sm:$0xff]   ;;  %v725_v4 = vld [vmem:[%s969_s1 + $0x70] sm:$0xff]   ;;  %v729_v8 = vld [vmem:[%s969_s1 + $0x68] sm:$0xff]  }
   0x2   :  { %v722_v1 = vld [vmem:[%s969_s1 + $0xf8] sm:$0xff]   ;;  %646 = vmatprep.subr.bf16.mxu0 %v721_v0  ;;  %v726_v5 = vld [vmem:[%s969_s1 + $0xf0] sm:$0xff]   ;;  %v730_v9 = vld [vmem:[%s969_s1 + $0xe8] sm:$0xff]   ;;  %v555_v60 = vshrl.u32 %v554_v54, 7 }
   0x3   :  { %v723_v2 = vld [vmem:[%s969_s1 + $0x38] sm:$0xff]   ;;  %674 = vmatprep.subr.bf16.mxu1 %v722_v1  ;;  %v727_v6 = vld [vmem:[%s969_s1 + $0x30] sm:$0xff]   ;;  %v731_v10 = vld [vmem:[%s969_s1 + $0x28] sm:$0xff]  }
   0x4   :  { %v724_v3 = vld [vmem:[%s969_s1 + $0xb8] sm:$0xff]   ;;  %647 = vmatpush3.bf16.msra.mxu0 %v723_v2  ;;  %v728_v7 = vld [vmem:[%s969_s1 + $0xb0] sm:$0xff]   ;;  %v732_v11 = vld [vmem:[%s969_s1 + $0xa8] sm:$0xff]  }
   0x5   :  { %675 = vmatpush3.bf16.msra.mxu1 %v724_v3  ;;  %648 = vmatprep.subr.bf16.mxu0 %v725_v4  ;;  %v733_v12 = vld [vmem:[%s969_s1 + $0x60] sm:$0xff]   ;;  %v737_v16 = vld [vmem:[%s969_s1 + $0x58] sm:$0xff]   ;;  %v741_v20 = vld [vmem:[%s969_s1 + $0x50] sm:$0xff]  }
   0x6   :  { %676 = vmatprep.subr.bf16.mxu1 %v726_v5  ;;  %v734_v13 = vld [vmem:[%s969_s1 + $0xe0] sm:$0xff]   ;;  %v738_v17 = vld [vmem:[%s969_s1 + $0xd8] sm:$0xff]   ;;  %v742_v21 = vld [vmem:[%s969_s1 + $0xd0] sm:$0xff]   ;;  %v556_v5 = vsub.s32 0, %v555_v60 }
   0x7   :  { %v735_v14 = vld [vmem:[%s969_s1 + $0x20] sm:$0xff]   ;;  %v739_v18 = vld [vmem:[%s969_s1 + $0x18] sm:$0xff]   ;;  %v743_v22 = vld [vmem:[%s969_s1 + $0x10] sm:$0xff]  }
   0x8   :  { %649 = vmatpush3.bf16.msra.mxu0 %v727_v6  ;;  %v736_v15 = vld [vmem:[%s969_s1 + $0xa0] sm:$0xff]   ;;  %v740_v19 = vld [vmem:[%s969_s1 + $0x98] sm:$0xff]   ;;  %v744_v23 = vld [vmem:[%s969_s1 + $0x90] sm:$0xff]  }
   0x9   :  { %677 = vmatpush3.bf16.msra.mxu1 %v728_v7  ;;  %650 = vmatprep.subr.bf16.mxu0 %v729_v8  ;;  %v745_v24 = vld [vmem:[%s969_s1 + $0x48] sm:$0xff]   ;;  %v749_v28 = vld [vmem:[%s969_s1 + $0x40] sm:$0xff]   ;;  %v759_v36 = vld [vmem:[%s969_s1 + $0x118] sm:$0xff]  }
   0xa   :  { %678 = vmatprep.subr.bf16.mxu1 %v730_v9  ;;  %v746_v25 = vld [vmem:[%s969_s1 + $0xc8] sm:$0xff]   ;;  %v750_v29 = vld [vmem:[%s969_s1 + $0xc0] sm:$0xff]   ;;  %v760_v37 = vld [vmem:[%s969_s1 + $0x110] sm:$0xff]   ;;  %v771_v9 = vmov 0  }
   0xb   :  { %v747_v26 = vld [vmem:[%s969_s1 + $0x8] sm:$0xff]   ;;  %v751_v30 = vld [vmem:[%s969_s1] sm:$0xff]  }
   0xc   :  { %651 = vmatpush3.bf16.msra.mxu0 %v731_v10  ;;  %v748_v27 = vld [vmem:[%s969_s1 + $0x88] sm:$0xff]   ;;  %v752_v31 = vld [vmem:[%s969_s1 + $0x80] sm:$0xff]  }
   0xd   :  { %679 = vmatpush3.bf16.msra.mxu1 %v732_v11  ;;  %652 = vmatprep.subr.bf16.mxu0 %v733_v12  ;;  %v753_v32 = vld [vmem:[%s970_s0] ss:$20 sps:$4 sm:$0xff]   ;;  %v755_v33 = vld [vmem:[%s970_s0 + $0x4] ss:$20 sps:$4 sm:$0xff]   ;;  %v756_v34 = vld [vmem:[%s970_s0 + $0x8] ss:$20 sps:$4 sm:$0xff]  }
   0xe   :  { %680 = vmatprep.subr.bf16.mxu1 %v734_v13  ;;  %v758_v35 = vld [vmem:[%s970_s0 + $0xc] ss:$20 sps:$4 sm:$0xff]   ;;  %410 = vmatprep.mubr.bf16.mxu0 %v755_v33  ;;  %v763_v39 = vld [vmem:[%s970_s0 + $0x34] ss:$20 sps:$4 sm:$0xff]   ;;  %v766_v42 = vld [vmem:[%s970_s0 + $0x30] ss:$20 sps:$4 sm:$0xff]  }
   0xf   :  { %459 = vmatprep.mubr.bf16.mxu1 %v758_v35  ;;  %v761_v38 = vld [vmem:[%s970_s0 + $0x2c] ss:$20 sps:$4 sm:$0xff]   ;;  %v765_v40 = vld [vmem:[%s970_s0 + $0x28] ss:$20 sps:$4 sm:$0xff]   ;;  %v769_v43 = vld [vmem:[%s970_s0 + $0x10] ss:$20 sps:$4 sm:$0xff]  }
  0x10   :  { %653 = vmatpush3.bf16.msra.mxu0 %v735_v14  ;;  %v767_v41 = vld [vmem:[%s969_s1 + $0x108] sm:$0xff]   ;;  %v768_v44 = vld [vmem:[%s969_s1 + $0x100] sm:$0xff]  }
  0x11   :  { %681 = vmatpush3.bf16.msra.mxu1 %v736_v15  ;;  %654 = vmatprep.subr.bf16.mxu0 %v737_v16  ;;  %v770_v45 = vld [vmem:[%s970_s0 + $0x38] ss:$20 sps:$4 sm:$0xff]   ;;  %v547_v58 = vld [vmem:[%s971_s4] sm:$0x1] }
  0x12   :  { %682 = vmatprep.subr.bf16.mxu1 %v738_v17  ;;  %vm548_vm1 = vcmp.gt.f32.partialorder %v547_v58, 0.5  ;;  %v636_v12 = vld [vmem:[%s972_s2] ss:$0 sm:$0xff] }
  0x13   :  { %v553_v10 = vsel %vm548_vm1, 1, %v771_v9  ;;  %v637_v17 = vld [vmem:[%s973_s3] ss:$0 sm:$0xff] }
  0x14   :  { %655 = vmatpush3.bf16.msra.mxu0 %v739_v18  ;;  %v557_v18 = vrot.slane %v553_v10, %v556_v5 }
  0x15   :  { %683 = vmatpush3.bf16.msra.mxu1 %v740_v19  ;;  %656 = vmatprep.subr.bf16.mxu0 %v741_v20 }
  0x16   :  { %684 = vmatprep.subr.bf16.mxu1 %v742_v21  ;;  %vm558_vm2 = vcmp.eq.s32.totalorder %v557_v18, 1 }
  0x18   :  { %657 = vmatpush3.bf16.msra.mxu0 %v743_v22 }
  0x19   :  { %685 = vmatpush3.bf16.msra.mxu1 %v744_v23  ;;  %658 = vmatprep.subr.bf16.mxu0 %v745_v24 }
  0x1a   :  { %686 = vmatprep.subr.bf16.mxu1 %v746_v25 }
  0x1c   :  { %659 = vmatpush3.bf16.msra.mxu0 %v747_v26 }
  0x1d   :  { %687 = vmatpush3.bf16.msra.mxu1 %v748_v27  ;;  %660 = vmatprep.subr.bf16.mxu0 %v749_v28 }
  0x1e   :  { %688 = vmatprep.subr.bf16.mxu1 %v750_v29 }
  0x20   :  { %661 = vmatpush3.bf16.msra.mxu0 %v751_v30 }
  0x21   :  { %689 = vmatpush3.bf16.msra.mxu1 %v752_v31  ;;  %708 = vmatprep.subr.bf16.mxu0 %v759_v36 }
  0x23   :  { %411 = vmatmul.mubr.bf16.vlgmr.msra.gmra.mxu0 %v753_v32 }
  0x24   :  { %460 = vmatmul.mubr.bf16.vlgmr.msra.gmra.mxu1 %v756_v34  ;;  %709 = vmatpush3.bf16.msra.mxu0 %v759_v36 }
  0x25   :  { %710 = vmatprep.subr.bf16.mxu0 %v760_v37  ;;  %418 = vmatprep.mubr.bf16.mxu0 %v761_v38 }
  0x26   :  { %467 = vmatprep.mubr.bf16.mxu1 %v763_v39 }
  0x28   :  { %711 = vmatpush3.bf16.msra.mxu0 %v760_v37 }
  0x29   :  { %712 = vmatprep.subr.bf16.mxu0 %v767_v41 }
  0x2b   :  { %419 = vmatmul.mubr.bf16.gmra.mxu0 %v765_v40 }
  0x2c   :  { %468 = vmatmul.mubr.bf16.gmra.mxu1 %v766_v42  ;;  %716 = vmatprep.mubr.msk.bf16.mxu0 %vm371_vm0, %v769_v43 }
  0x2d   :  { %713 = vmatpush3.bf16.msra.mxu0 %v767_v41 }
  0x2e   :  { %714 = vmatprep.subr.bf16.mxu0 %v768_v44 }
  0x31   :  { %715 = vmatpush3.bf16.msra.mxu0 %v768_v44 }
  0x34   :  { %717 = vmatmul.mubr.msk.bf16.vlgmr.msra.gmra.mxu0 %vm371_vm0, %v770_v45 }
  0xe3   :  { %v662_v46 = vpop.f32.mrf.mxu0 }
  0xe4   :  { %v690_v47 = vpop.f32.mrf.mxu1 }
  0xe5   :  { %v663_v48 = vpop.f32.mrf.mxu0 }
  0xe6   :  { %v691_v49 = vpop.f32.mrf.mxu1  ;;  %v664_v1 = vadd.f32 %v663_v48, %v662_v46 }
  0xe7   :  { %v665_v50 = vpop.f32.mrf.mxu0  ;;  %v692_v2 = vadd.f32 %v691_v49, %v690_v47 }
  0xe8   :  { %v693_v51 = vpop.f32.mrf.mxu1 }
  0xe9   :  { %v666_v52 = vpop.f32.mrf.mxu0  ;;  %v462_v16 = vadd.f32 %v692_v2, %v664_v1 }
  0xea   :  { %v694_v53 = vpop.f32.mrf.mxu1  ;;  %v667_v13 = vadd.f32 %v666_v52, %v665_v50 }
  0xeb   :  { %v668_v55 = vpop.f32.mrf.mxu0  ;;  %v695_v14 = vadd.f32 %v694_v53, %v693_v51 }
  0xec   :  { %v696_v56 = vpop.f32.mrf.mxu1 }
  0xed   :  { %v669_v57 = vpop.f32.mrf.mxu0  ;;  %v465_v27 = vadd.f32 %v695_v14, %v667_v13 }
  0xee   :  { %v697_v59 = vpop.f32.mrf.mxu1  ;;  %v670_v61 = vadd.f32 %v669_v57, %v668_v55 }
  0xef   :  { %v698_v62 = vadd.f32 %v697_v59, %v696_v56  ;;  %v671_v63 = vpop.f32.mrf.mxu0 }
  0xf0   :  { %v699_v0 = vpop.f32.mrf.mxu1 }
  0xf1   :  { %v672_v3 = vpop.f32.mrf.mxu0  ;;  %v470_v8 = vadd.f32 %v698_v62, %v670_v61 }
  0xf2   :  { %v700_v4 = vpop.f32.mrf.mxu1  ;;  %v673_v6 = vadd.f32 %v672_v3, %v671_v63 }
  0xf3   :  { %v701_v7 = vadd.f32 %v700_v4, %v699_v0 }
  0xf4   :  { %v718_v11 = vpop.f32.mrf.mxu0 }
  0xf5   :  { %v519_v15 = vadd.f32 %v718_v11, %v470_v8  ;;  %v473_v22 = vadd.f32 %v701_v7, %v673_v6 }
  0xf6   :  { %v510_v19 = vpop.f32.mrf.mxu0 }
  0xf7   :  { %v534_v20 = vmul.f32 %v636_v12, %v519_v15  ;;  %v511_v21 = vadd.f32 %v510_v19, %v462_v16 }
  0xf8   :  { %v719_v23 = vpop.f32.mrf.mxu0 }
  0xf9   :  { %v545_v24 = vadd.f32 %v637_v17, %v534_v20  ;;  %v532_v25 = vmul.f32 %v636_v12, %v511_v21  ;;  %v522_v26 = vadd.f32 %v719_v23, %v473_v22 }
  0xfa   :  { %v513_v28 = vpop.f32.mrf.mxu0 }
  0xfb   :  { %v551_v29 = vmax.f32 %v545_v24, 0.0  ;;  %v543_v30 = vadd.f32 %v637_v17, %v532_v25  ;;  %v535_v31 = vmul.f32 %v636_v12, %v522_v26  ;;  %v514_v32 = vadd.f32 %v513_v28, %v465_v27 }
  0xfd   :  { %v561_v33 = vsel %vm558_vm2, %v551_v29, %v545_v24  ;;  %v549_v34 = vmax.f32 %v543_v30, 0.0  ;;  %v546_v35 = vadd.f32 %v637_v17, %v535_v31  ;;  %v533_v36 = vmul.f32 %v636_v12, %v514_v32 }
  0xfe   :  { %v644_v37 = vpack.c.bf16 %v561_v33, %v561_v33 }
  0xff   :  { %v559_v38 = vsel %vm558_vm2, %v549_v34, %v543_v30  ;;  %v552_v39 = vmax.f32 %v546_v35, 0.0  ;;  %v544_v40 = vadd.f32 %v637_v17, %v533_v36 }
 0x100   :  { %582 = vst.msk [vmem:[%s974_s5 + $0x8] sm:$0xf] %vm579_vm3, %v644_v37  ;;  %v642_v41 = vpack.c.bf16 %v559_v38, %v559_v38 }
 0x101   :  { %v562_v42 = vsel %vm558_vm2, %v552_v39, %v546_v35  ;;  %v550_v43 = vmax.f32 %v544_v40, 0.0 }
 0x102   :  { %580 = vst.msk [vmem:[%s974_s5] sm:$0xf] %vm579_vm3, %v642_v41  ;;  %v645_v44 = vpack.c.bf16 %v562_v42, %v562_v42 }
 0x103   :  { %v560_v45 = vsel %vm558_vm2, %v550_v43, %v544_v40 }
 0x104   :  { %583 = vst.msk [vmem:[%s974_s5 + $0xc] sm:$0xf] %vm579_vm3, %v645_v44  ;;  %v643_v46 = vpack.c.bf16 %v560_v45, %v560_v45 }
 0x106   :  { %581 = vst.msk [vmem:[%s974_s5 + $0x4] sm:$0xf] %vm579_vm3, %v643_v46 }

// kernel: _lambda_.24
= control target key start
LH: loop header
LB: loop body
LE: loop exit
PB: predicated region body
PF: predicated region fallthrough
CT: control target
= control target key end

     0   :  { %vm374_vm0 = vcmask 523264   ;;  %v569_v56 = vlaneseq  ;;  %vm594_vm3 = vcmask 519168   ;;  %s1004_s1 = inlined_call_operand.vmem [shape: bf16[576,64], index: 1, kind: input, shape index: {}]   ;;  %s1005_s0 = inlined_call_operand.vmem [shape: bf16[32,576], index: 0, kind: input, shape index: {}]   ;;  %s1006_s4 = inlined_call_operand.vmem [shape: f32[1,64], index: 4, kind: input, shape index: {}]   ;;  %s1007_s2 = inlined_call_operand.vmem [shape: f32[1,64], index: 2, kind: input, shape index: {}]   ;;  %s1008_s5 = inlined_call_operand.vmem [shape: bf16[32,64], index: 5, kind: input, shape index: {}]   ;;  %s1009_s3 = inlined_call_operand.vmem [shape: f32[1,64], index: 3, kind: input, shape index: {}]   ;;  %s1010_s6 = inlined_call_operand.vmem [shape: bf16[32,64], index: 6, kind: output, shape index: {}]  }
   0x1   :  { %v745_v0 = vld [vmem:[%s1004_s1 + $0x78] sm:$0xff]   ;;  %v749_v4 = vld [vmem:[%s1004_s1 + $0x70] sm:$0xff]   ;;  %v753_v8 = vld [vmem:[%s1004_s1 + $0x68] sm:$0xff]  }
   0x2   :  { %v746_v1 = vld [vmem:[%s1004_s1 + $0xf8] sm:$0xff]   ;;  %670 = vmatprep.subr.bf16.mxu0 %v745_v0  ;;  %v750_v5 = vld [vmem:[%s1004_s1 + $0xf0] sm:$0xff]   ;;  %v754_v9 = vld [vmem:[%s1004_s1 + $0xe8] sm:$0xff]   ;;  %v570_v0 = vshrl.u32 %v569_v56, 7 }
   0x3   :  { %v747_v2 = vld [vmem:[%s1004_s1 + $0x38] sm:$0xff]   ;;  %698 = vmatprep.subr.bf16.mxu1 %v746_v1  ;;  %v751_v6 = vld [vmem:[%s1004_s1 + $0x30] sm:$0xff]   ;;  %v755_v10 = vld [vmem:[%s1004_s1 + $0x28] sm:$0xff]  }
   0x4   :  { %v748_v3 = vld [vmem:[%s1004_s1 + $0xb8] sm:$0xff]   ;;  %671 = vmatpush3.bf16.msra.mxu0 %v747_v2  ;;  %v752_v7 = vld [vmem:[%s1004_s1 + $0xb0] sm:$0xff]   ;;  %v756_v11 = vld [vmem:[%s1004_s1 + $0xa8] sm:$0xff]  }
   0x5   :  { %699 = vmatpush3.bf16.msra.mxu1 %v748_v3  ;;  %672 = vmatprep.subr.bf16.mxu0 %v749_v4  ;;  %v757_v12 = vld [vmem:[%s1004_s1 + $0x60] sm:$0xff]   ;;  %v761_v16 = vld [vmem:[%s1004_s1 + $0x58] sm:$0xff]   ;;  %v765_v20 = vld [vmem:[%s1004_s1 + $0x50] sm:$0xff]  }
   0x6   :  { %700 = vmatprep.subr.bf16.mxu1 %v750_v5  ;;  %v758_v13 = vld [vmem:[%s1004_s1 + $0xe0] sm:$0xff]   ;;  %v762_v17 = vld [vmem:[%s1004_s1 + $0xd8] sm:$0xff]   ;;  %v766_v21 = vld [vmem:[%s1004_s1 + $0xd0] sm:$0xff]  }
   0x7   :  { %v759_v14 = vld [vmem:[%s1004_s1 + $0x20] sm:$0xff]   ;;  %v763_v18 = vld [vmem:[%s1004_s1 + $0x18] sm:$0xff]   ;;  %v767_v22 = vld [vmem:[%s1004_s1 + $0x10] sm:$0xff]  }
   0x8   :  { %673 = vmatpush3.bf16.msra.mxu0 %v751_v6  ;;  %v760_v15 = vld [vmem:[%s1004_s1 + $0xa0] sm:$0xff]   ;;  %v764_v19 = vld [vmem:[%s1004_s1 + $0x98] sm:$0xff]   ;;  %v768_v23 = vld [vmem:[%s1004_s1 + $0x90] sm:$0xff]  }
   0x9   :  { %701 = vmatpush3.bf16.msra.mxu1 %v752_v7  ;;  %674 = vmatprep.subr.bf16.mxu0 %v753_v8  ;;  %v769_v24 = vld [vmem:[%s1004_s1 + $0x48] sm:$0xff]   ;;  %v773_v28 = vld [vmem:[%s1004_s1 + $0x40] sm:$0xff]   ;;  %v783_v36 = vld [vmem:[%s1004_s1 + $0x118] sm:$0xff]  }
   0xa   :  { %702 = vmatprep.subr.bf16.mxu1 %v754_v9  ;;  %v770_v25 = vld [vmem:[%s1004_s1 + $0xc8] sm:$0xff]   ;;  %v774_v29 = vld [vmem:[%s1004_s1 + $0xc0] sm:$0xff]   ;;  %v784_v37 = vld [vmem:[%s1004_s1 + $0x110] sm:$0xff]  }
   0xb   :  { %v771_v26 = vld [vmem:[%s1004_s1 + $0x8] sm:$0xff]   ;;  %v775_v30 = vld [vmem:[%s1004_s1] sm:$0xff]  }
   0xc   :  { %675 = vmatpush3.bf16.msra.mxu0 %v755_v10  ;;  %v772_v27 = vld [vmem:[%s1004_s1 + $0x88] sm:$0xff]   ;;  %v776_v31 = vld [vmem:[%s1004_s1 + $0x80] sm:$0xff]  }
   0xd   :  { %703 = vmatpush3.bf16.msra.mxu1 %v756_v11  ;;  %676 = vmatprep.subr.bf16.mxu0 %v757_v12  ;;  %v777_v32 = vld [vmem:[%s1005_s0] ss:$20 sps:$4 sm:$0xff]   ;;  %v779_v33 = vld [vmem:[%s1005_s0 + $0x4] ss:$20 sps:$4 sm:$0xff]   ;;  %v780_v34 = vld [vmem:[%s1005_s0 + $0x8] ss:$20 sps:$4 sm:$0xff]  }
   0xe   :  { %704 = vmatprep.subr.bf16.mxu1 %v758_v13  ;;  %v782_v35 = vld [vmem:[%s1005_s0 + $0xc] ss:$20 sps:$4 sm:$0xff]   ;;  %413 = vmatprep.mubr.bf16.mxu0 %v779_v33  ;;  %v787_v39 = vld [vmem:[%s1005_s0 + $0x34] ss:$20 sps:$4 sm:$0xff]   ;;  %v790_v42 = vld [vmem:[%s1005_s0 + $0x30] ss:$20 sps:$4 sm:$0xff]  }
   0xf   :  { %462 = vmatprep.mubr.bf16.mxu1 %v782_v35  ;;  %v785_v38 = vld [vmem:[%s1005_s0 + $0x2c] ss:$20 sps:$4 sm:$0xff]   ;;  %v789_v40 = vld [vmem:[%s1005_s0 + $0x28] ss:$20 sps:$4 sm:$0xff]   ;;  %v793_v43 = vld [vmem:[%s1005_s0 + $0x10] ss:$20 sps:$4 sm:$0xff]  }
  0x10   :  { %677 = vmatpush3.bf16.msra.mxu0 %v759_v14  ;;  %v791_v41 = vld [vmem:[%s1004_s1 + $0x108] sm:$0xff]   ;;  %v792_v44 = vld [vmem:[%s1004_s1 + $0x100] sm:$0xff]   ;;  %v795_v11 = vmov 0   ;;  %v571_v13 = vsub.s32 0, %v570_v0 }
  0x11   :  { %705 = vmatpush3.bf16.msra.mxu1 %v760_v15  ;;  %678 = vmatprep.subr.bf16.mxu0 %v761_v16  ;;  %v794_v45 = vld [vmem:[%s1005_s0 + $0x38] ss:$20 sps:$4 sm:$0xff]   ;;  %v562_v59 = vld [vmem:[%s1006_s4] sm:$0x1] }
  0x12   :  { %706 = vmatprep.subr.bf16.mxu1 %v762_v17  ;;  %vm563_vm1 = vcmp.gt.f32.partialorder %v562_v59, 0.5  ;;  %v651_v9 = vld [vmem:[%s1007_s2] ss:$0 sm:$0xff]  ;;  %v669_v10 = vld [vmem:[%s1008_s5 + $0x8] sm:$0xff]  }
  0x13   :  { %v568_v12 = vsel %vm563_vm1, 1, %v795_v11 }
  0x14   :  { %679 = vmatpush3.bf16.msra.mxu0 %v763_v18  ;;  %v662_v18 = vld [vmem:[%s1008_s5] sm:$0xff]  }
  0x15   :  { %707 = vmatpush3.bf16.msra.mxu1 %v764_v19  ;;  %680 = vmatprep.subr.bf16.mxu0 %v765_v20  ;;  %v652_v19 = vld [vmem:[%s1009_s3] ss:$0 sm:$0xff] }
  0x16   :  { %708 = vmatprep.subr.bf16.mxu1 %v766_v21 }
  0x18   :  { %681 = vmatpush3.bf16.msra.mxu0 %v767_v22  ;;  %v667_v22 = vunpack.c.l.bf16 %v669_v10 }
  0x19   :  { %709 = vmatpush3.bf16.msra.mxu1 %v768_v23  ;;  %682 = vmatprep.subr.bf16.mxu0 %v769_v24 }
  0x1a   :  { %710 = vmatprep.subr.bf16.mxu1 %v770_v25  ;;  %v572_v25 = vrot.slane %v568_v12, %v571_v13 }
  0x1c   :  { %683 = vmatpush3.bf16.msra.mxu0 %v771_v26  ;;  %v663_v26 = vunpack.c.l.bf16 %v662_v18  ;;  %vm573_vm2 = vcmp.eq.s32.totalorder %v572_v25, 1 }
  0x1d   :  { %711 = vmatpush3.bf16.msra.mxu1 %v772_v27  ;;  %684 = vmatprep.subr.bf16.mxu0 %v773_v28 }
  0x1e   :  { %712 = vmatprep.subr.bf16.mxu1 %v774_v29 }
  0x20   :  { %685 = vmatpush3.bf16.msra.mxu0 %v775_v30 }
  0x21   :  { %713 = vmatpush3.bf16.msra.mxu1 %v776_v31  ;;  %732 = vmatprep.subr.bf16.mxu0 %v783_v36 }
  0x23   :  { %414 = vmatmul.mubr.bf16.vlgmr.msra.gmra.mxu0 %v777_v32  ;;  %v668_v32 = vunpack.c.h.bf16 %v669_v10 }
  0x24   :  { %463 = vmatmul.mubr.bf16.vlgmr.msra.gmra.mxu1 %v780_v34  ;;  %733 = vmatpush3.bf16.msra.mxu0 %v783_v36 }
  0x25   :  { %734 = vmatprep.subr.bf16.mxu0 %v784_v37  ;;  %421 = vmatprep.mubr.bf16.mxu0 %v785_v38  ;;  %v664_v38 = vunpack.c.h.bf16 %v662_v18 }
  0x26   :  { %470 = vmatprep.mubr.bf16.mxu1 %v787_v39 }
  0x28   :  { %735 = vmatpush3.bf16.msra.mxu0 %v784_v37 }
  0x29   :  { %736 = vmatprep.subr.bf16.mxu0 %v791_v41 }
  0x2b   :  { %422 = vmatmul.mubr.bf16.gmra.mxu0 %v789_v40 }
  0x2c   :  { %471 = vmatmul.mubr.bf16.gmra.mxu1 %v790_v42  ;;  %740 = vmatprep.mubr.msk.bf16.mxu0 %vm374_vm0, %v793_v43 }
  0x2d   :  { %737 = vmatpush3.bf16.msra.mxu0 %v791_v41 }
  0x2e   :  { %738 = vmatprep.subr.bf16.mxu0 %v792_v44 }
  0x31   :  { %739 = vmatpush3.bf16.msra.mxu0 %v792_v44 }
  0x34   :  { %741 = vmatmul.mubr.msk.bf16.vlgmr.msra.gmra.mxu0 %vm374_vm0, %v794_v45 }
  0xe3   :  { %v686_v46 = vpop.f32.mrf.mxu0 }
  0xe4   :  { %v714_v47 = vpop.f32.mrf.mxu1 }
  0xe5   :  { %v687_v48 = vpop.f32.mrf.mxu0 }
  0xe6   :  { %v715_v49 = vpop.f32.mrf.mxu1  ;;  %v688_v1 = vadd.f32 %v687_v48, %v686_v46 }
  0xe7   :  { %v689_v50 = vpop.f32.mrf.mxu0  ;;  %v716_v2 = vadd.f32 %v715_v49, %v714_v47 }
  0xe8   :  { %v717_v51 = vpop.f32.mrf.mxu1 }
  0xe9   :  { %v690_v52 = vpop.f32.mrf.mxu0  ;;  %v465_v17 = vadd.f32 %v716_v2, %v688_v1 }
  0xea   :  { %v718_v53 = vpop.f32.mrf.mxu1  ;;  %v691_v14 = vadd.f32 %v690_v52, %v689_v50 }
  0xeb   :  { %v692_v54 = vpop.f32.mrf.mxu0  ;;  %v719_v15 = vadd.f32 %v718_v53, %v717_v51 }
  0xec   :  { %v720_v55 = vpop.f32.mrf.mxu1 }
  0xed   :  { %v693_v57 = vpop.f32.mrf.mxu0  ;;  %v468_v31 = vadd.f32 %v719_v15, %v691_v14 }
  0xee   :  { %v721_v58 = vpop.f32.mrf.mxu1  ;;  %v694_v60 = vadd.f32 %v693_v57, %v692_v54 }
  0xef   :  { %v722_v61 = vadd.f32 %v721_v58, %v720_v55  ;;  %v695_v62 = vpop.f32.mrf.mxu0 }
  0xf0   :  { %v723_v63 = vpop.f32.mrf.mxu1 }
  0xf1   :  { %v696_v3 = vpop.f32.mrf.mxu0  ;;  %v473_v7 = vadd.f32 %v722_v61, %v694_v60 }
  0xf2   :  { %v724_v4 = vpop.f32.mrf.mxu1  ;;  %v697_v5 = vadd.f32 %v696_v3, %v695_v62 }
  0xf3   :  { %v725_v6 = vadd.f32 %v724_v4, %v723_v63 }
  0xf4   :  { %v742_v8 = vpop.f32.mrf.mxu0 }
  0xf5   :  { %v522_v16 = vadd.f32 %v742_v8, %v473_v7  ;;  %v476_v24 = vadd.f32 %v725_v6, %v697_v5 }
  0xf6   :  { %v513_v20 = vpop.f32.mrf.mxu0 }
  0xf7   :  { %v537_v21 = vmul.f32 %v651_v9, %v522_v16  ;;  %v514_v23 = vadd.f32 %v513_v20, %v465_v17 }
  0xf8   :  { %v743_v27 = vpop.f32.mrf.mxu0 }
  0xf9   :  { %v548_v28 = vadd.f32 %v652_v19, %v537_v21  ;;  %v535_v29 = vmul.f32 %v651_v9, %v514_v23  ;;  %v525_v30 = vadd.f32 %v743_v27, %v476_v24 }
  0xfa   :  { %v516_v33 = vpop.f32.mrf.mxu0 }
  0xfb   :  { %v560_v34 = vadd.f32 %v667_v22, %v548_v28  ;;  %v546_v35 = vadd.f32 %v652_v19, %v535_v29  ;;  %v538_v36 = vmul.f32 %v651_v9, %v525_v30  ;;  %v517_v37 = vadd.f32 %v516_v33, %v468_v31 }
  0xfd   :  { %v566_v39 = vmax.f32 %v560_v34, 0.0  ;;  %v558_v40 = vadd.f32 %v663_v26, %v546_v35  ;;  %v549_v41 = vadd.f32 %v652_v19, %v538_v36  ;;  %v536_v42 = vmul.f32 %v651_v9, %v517_v37 }
  0xff   :  { %v576_v43 = vsel %vm573_vm2, %v566_v39, %v560_v34  ;;  %v564_v44 = vmax.f32 %v558_v40, 0.0  ;;  %v561_v45 = vadd.f32 %v668_v32, %v549_v41  ;;  %v547_v46 = vadd.f32 %v652_v19, %v536_v42 }
 0x100   :  { %v659_v47 = vpack.c.bf16 %v576_v43, %v576_v43 }
 0x101   :  { %v574_v48 = vsel %vm573_vm2, %v564_v44, %v558_v40  ;;  %v567_v49 = vmax.f32 %v561_v45, 0.0  ;;  %v559_v50 = vadd.f32 %v664_v38, %v547_v46 }
 0x102   :  { %597 = vst.msk [vmem:[%s1010_s6 + $0x8] sm:$0xf] %vm594_vm3, %v659_v47  ;;  %v657_v51 = vpack.c.bf16 %v574_v48, %v574_v48 }
 0x103   :  { %v577_v52 = vsel %vm573_vm2, %v567_v49, %v561_v45  ;;  %v565_v53 = vmax.f32 %v559_v50, 0.0 }
 0x104   :  { %595 = vst.msk [vmem:[%s1010_s6] sm:$0xf] %vm594_vm3, %v657_v51  ;;  %v660_v54 = vpack.c.bf16 %v577_v52, %v577_v52 }
 0x105   :  { %v575_v55 = vsel %vm573_vm2, %v565_v53, %v559_v50 }
 0x106   :  { %598 = vst.msk [vmem:[%s1010_s6 + $0xc] sm:$0xf] %vm594_vm3, %v660_v54  ;;  %v658_v56 = vpack.c.bf16 %v575_v55, %v575_v55 }
 0x108   :  { %596 = vst.msk [vmem:[%s1010_s6 + $0x4] sm:$0xf] %vm594_vm3, %v658_v56 }

// kernel: _lambda_.27
= control target key start
LH: loop header
LB: loop body
LE: loop exit
PB: predicated region body
PF: predicated region fallthrough
CT: control target
= control target key end

     0   :  { %vm473_vm0 = vcmask 523264   ;;  %s1120_s1 = inlined_call_operand.vmem [shape: bf16[576,256], index: 1, kind: input, shape index: {}]   ;;  %s1121_s0 = inlined_call_operand.vmem [shape: bf16[8,576], index: 0, kind: input, shape index: {}]   ;;  %s1122_s4 = inlined_call_operand.vmem [shape: f32[1,256], index: 4, kind: input, shape index: {}]   ;;  %s1123_s2 = inlined_call_operand.vmem [shape: f32[1,256], index: 2, kind: input, shape index: {}]   ;;  %s1124_s3 = inlined_call_operand.vmem [shape: f32[1,256], index: 3, kind: input, shape index: {}]   ;;  %s1125_s5 = inlined_call_operand.vmem [shape: bf16[8,256], index: 5, kind: output, shape index: {}]  }
   0x1   :  { %v739_v0 = vld [vmem:[%s1120_s1 + $0x74] ss:$8 sps:$4 sm:$0xff]   ;;  %v743_v2 = vld [vmem:[%s1120_s1 + $0x70] ss:$8 sps:$4 sm:$0xff]   ;;  %v745_v4 = vld [vmem:[%s1120_s1 + $0x64] ss:$8 sps:$4 sm:$0xff]  }
   0x2   :  { %v741_v1 = vld [vmem:[%s1120_s1 + $0x174] ss:$8 sps:$4 sm:$0xff]   ;;  %477 = vmatprep.subr.bf16.mxu0 %v739_v0  ;;  %v744_v3 = vld [vmem:[%s1120_s1 + $0x170] ss:$8 sps:$4 sm:$0xff]   ;;  %v747_v5 = vld [vmem:[%s1120_s1 + $0x164] ss:$8 sps:$4 sm:$0xff]  }
   0x3   :  { %518 = vmatprep.subr.bf16.mxu1 %v741_v1  ;;  %478 = vmatpush1.bf16.msra.mxu0 %v743_v2  ;;  %v749_v6 = vld [vmem:[%s1120_s1 + $0x60] ss:$8 sps:$4 sm:$0xff]   ;;  %v751_v8 = vld [vmem:[%s1120_s1 + $0x54] ss:$8 sps:$4 sm:$0xff]   ;;  %v755_v10 = vld [vmem:[%s1120_s1 + $0x50] ss:$8 sps:$4 sm:$0xff]  }
   0x4   :  { %519 = vmatpush1.bf16.msra.mxu1 %v744_v3  ;;  %479 = vmatprep.subr.bf16.mxu0 %v745_v4  ;;  %v750_v7 = vld [vmem:[%s1120_s1 + $0x160] ss:$8 sps:$4 sm:$0xff]   ;;  %v753_v9 = vld [vmem:[%s1120_s1 + $0x154] ss:$8 sps:$4 sm:$0xff]   ;;  %v756_v11 = vld [vmem:[%s1120_s1 + $0x150] ss:$8 sps:$4 sm:$0xff]  }
   0x5   :  { %520 = vmatprep.subr.bf16.mxu1 %v747_v5  ;;  %v757_v12 = vld [vmem:[%s1120_s1 + $0x44] ss:$8 sps:$4 sm:$0xff]   ;;  %v761_v14 = vld [vmem:[%s1120_s1 + $0x40] ss:$8 sps:$4 sm:$0xff]   ;;  %v763_v16 = vld [vmem:[%s1120_s1 + $0x34] ss:$8 sps:$4 sm:$0xff]  }
   0x6   :  { %v759_v13 = vld [vmem:[%s1120_s1 + $0x144] ss:$8 sps:$4 sm:$0xff]   ;;  %v762_v15 = vld [vmem:[%s1120_s1 + $0x140] ss:$8 sps:$4 sm:$0xff]   ;;  %v765_v17 = vld [vmem:[%s1120_s1 + $0x134] ss:$8 sps:$4 sm:$0xff]  }
   0x7   :  { %480 = vmatpush1.bf16.msra.mxu0 %v749_v6  ;;  %v767_v18 = vld [vmem:[%s1120_s1 + $0x30] ss:$8 sps:$4 sm:$0xff]   ;;  %v769_v20 = vld [vmem:[%s1120_s1 + $0x24] ss:$8 sps:$4 sm:$0xff]   ;;  %v773_v22 = vld [vmem:[%s1120_s1 + $0x20] ss:$8 sps:$4 sm:$0xff]  }
   0x8   :  { %521 = vmatpush1.bf16.msra.mxu1 %v750_v7  ;;  %481 = vmatprep.subr.bf16.mxu0 %v751_v8  ;;  %v768_v19 = vld [vmem:[%s1120_s1 + $0x130] ss:$8 sps:$4 sm:$0xff]   ;;  %v771_v21 = vld [vmem:[%s1120_s1 + $0x124] ss:$8 sps:$4 sm:$0xff]   ;;  %v774_v23 = vld [vmem:[%s1120_s1 + $0x120] ss:$8 sps:$4 sm:$0xff]  }
   0x9   :  { %522 = vmatprep.subr.bf16.mxu1 %v753_v9  ;;  %v775_v24 = vld [vmem:[%s1120_s1 + $0x14] ss:$8 sps:$4 sm:$0xff]   ;;  %v779_v26 = vld [vmem:[%s1120_s1 + $0x10] ss:$8 sps:$4 sm:$0xff]   ;;  %v781_v28 = vld [vmem:[%s1120_s1 + $0x4] ss:$8 sps:$4 sm:$0xff]  }
   0xa   :  { %v777_v25 = vld [vmem:[%s1120_s1 + $0x114] ss:$8 sps:$4 sm:$0xff]   ;;  %v780_v27 = vld [vmem:[%s1120_s1 + $0x110] ss:$8 sps:$4 sm:$0xff]   ;;  %v783_v29 = vld [vmem:[%s1120_s1 + $0x104] ss:$8 sps:$4 sm:$0xff]  }
   0xb   :  { %482 = vmatpush1.bf16.msra.mxu0 %v755_v10  ;;  %v785_v30 = vld [vmem:[%s1120_s1] ss:$8 sps:$4 sm:$0xff]   ;;  %v787_v32 = vld [vmem:[%s1120_s1 + $0xf4] ss:$8 sps:$4 sm:$0xff]   ;;  %v791_v34 = vld [vmem:[%s1120_s1 + $0xf0] ss:$8 sps:$4 sm:$0xff]  }
   0xc   :  { %523 = vmatpush1.bf16.msra.mxu1 %v756_v11  ;;  %483 = vmatprep.subr.bf16.mxu0 %v757_v12  ;;  %v786_v31 = vld [vmem:[%s1120_s1 + $0x100] ss:$8 sps:$4 sm:$0xff]   ;;  %v789_v33 = vld [vmem:[%s1120_s1 + $0x1f4] ss:$8 sps:$4 sm:$0xff]   ;;  %v792_v35 = vld [vmem:[%s1120_s1 + $0x1f0] ss:$8 sps:$4 sm:$0xff]  }
   0xd   :  { %524 = vmatprep.subr.bf16.mxu1 %v759_v13  ;;  %v793_v36 = vld [vmem:[%s1120_s1 + $0xe4] ss:$8 sps:$4 sm:$0xff]   ;;  %v797_v38 = vld [vmem:[%s1120_s1 + $0xe0] ss:$8 sps:$4 sm:$0xff]   ;;  %v799_v40 = vld [vmem:[%s1120_s1 + $0xd4] ss:$8 sps:$4 sm:$0xff]  }
   0xe   :  { %v795_v37 = vld [vmem:[%s1120_s1 + $0x1e4] ss:$8 sps:$4 sm:$0xff]   ;;  %v798_v39 = vld [vmem:[%s1120_s1 + $0x1e0] ss:$8 sps:$4 sm:$0xff]   ;;  %v801_v41 = vld [vmem:[%s1120_s1 + $0x1d4] ss:$8 sps:$4 sm:$0xff]  }
   0xf   :  { %484 = vmatpush1.bf16.msra.mxu0 %v761_v14  ;;  %v803_v42 = vld [vmem:[%s1120_s1 + $0xd0] ss:$8 sps:$4 sm:$0xff]   ;;  %v805_v44 = vld [vmem:[%s1120_s1 + $0xc4] ss:$8 sps:$4 sm:$0xff]   ;;  %v809_v46 = vld [vmem:[%s1120_s1 + $0xc0] ss:$8 sps:$4 sm:$0xff]  }
  0x10   :  { %525 = vmatpush1.bf16.msra.mxu1 %v762_v15  ;;  %485 = vmatprep.subr.bf16.mxu0 %v763_v16  ;;  %v804_v43 = vld [vmem:[%s1120_s1 + $0x1d0] ss:$8 sps:$4 sm:$0xff]   ;;  %v807_v45 = vld [vmem:[%s1120_s1 + $0x1c4] ss:$8 sps:$4 sm:$0xff]   ;;  %v810_v48 = vld [vmem:[%s1120_s1 + $0x1c0] ss:$8 sps:$4 sm:$0xff]  }
  0x11   :  { %526 = vmatprep.subr.bf16.mxu1 %v765_v17  ;;  %v21_v47 = vld [vmem:[%s1121_s0] sm:$0xff]  ;;  %v22_v50 = vld [vmem:[%s1121_s0 + $0x8] sm:$0xff]  ;;  %v811_v51 = vld [vmem:[%s1120_s1 + $0xb4] ss:$8 sps:$4 sm:$0xff]   ;;  %v852_v10 = vmov 0  }
  0x12   :  { %v659_v49 = vcombine.high %v21_v47, %v21_v47  ;;  %v661_v52 = vcombine.high %v22_v50, %v22_v50  ;;  %v813_v53 = vld [vmem:[%s1120_s1 + $0x1b4] ss:$8 sps:$4 sm:$0xff]   ;;  %v815_v54 = vld [vmem:[%s1120_s1 + $0xb0] ss:$8 sps:$4 sm:$0xff]   ;;  %v817_v56 = vld [vmem:[%s1120_s1 + $0xa4] ss:$8 sps:$4 sm:$0xff]   ;;  %v658_v5 = vcombine.low %v21_v47, %v21_v47  ;;  %v660_v6 = vcombine.low %v22_v50, %v22_v50 }
  0x13   :  { %486 = vmatpush1.bf16.msra.mxu0 %v767_v18  ;;  %v816_v55 = vld [vmem:[%s1120_s1 + $0x1b0] ss:$8 sps:$4 sm:$0xff]   ;;  %v819_v57 = vld [vmem:[%s1120_s1 + $0x1a4] ss:$8 sps:$4 sm:$0xff]   ;;  %v821_v58 = vld [vmem:[%s1120_s1 + $0xa0] ss:$8 sps:$4 sm:$0xff]  }
  0x14   :  { %527 = vmatpush1.bf16.msra.mxu1 %v768_v19  ;;  %487 = vmatprep.subr.bf16.mxu0 %v769_v20  ;;  %v822_v59 = vld [vmem:[%s1120_s1 + $0x1a0] ss:$8 sps:$4 sm:$0xff]   ;;  %v823_v60 = vld [vmem:[%s1120_s1 + $0x94] ss:$8 sps:$4 sm:$0xff]   ;;  %v827_v62 = vld [vmem:[%s1120_s1 + $0x90] ss:$8 sps:$4 sm:$0xff]   ;;  %v602_v20 = vlaneseq }
  0x15   :  { %528 = vmatprep.subr.bf16.mxu1 %v771_v21  ;;  %509 = vmatprep.mubr.bf16.mxu0 %v659_v49  ;;  %v825_v61 = vld [vmem:[%s1120_s1 + $0x194] ss:$8 sps:$4 sm:$0xff]   ;;  %v828_v63 = vld [vmem:[%s1120_s1 + $0x190] ss:$8 sps:$4 sm:$0xff]   ;;  %v829_v0 = vld [vmem:[%s1120_s1 + $0x84] ss:$8 sps:$4 sm:$0xff]  }
  0x16   :  { %550 = vmatprep.mubr.bf16.mxu1 %v661_v52  ;;  %v831_v1 = vld [vmem:[%s1120_s1 + $0x184] ss:$8 sps:$4 sm:$0xff]   ;;  %v833_v2 = vld [vmem:[%s1120_s1 + $0x80] ss:$8 sps:$4 sm:$0xff]   ;;  %v842_v4 = vld [vmem:[%s1120_s1 + $0x234] ss:$8 sps:$4 sm:$0xff]  }
  0x17   :  { %488 = vmatpush1.bf16.msra.mxu0 %v773_v22  ;;  %v834_v3 = vld [vmem:[%s1120_s1 + $0x180] ss:$8 sps:$4 sm:$0xff]   ;;  %v840_v7 = vld [vmem:[%s1120_s1 + $0x230] ss:$8 sps:$4 sm:$0xff]   ;;  %v845_v8 = vld [vmem:[%s1120_s1 + $0x224] ss:$8 sps:$4 sm:$0xff]  }
  0x18   :  { %529 = vmatpush1.bf16.msra.mxu1 %v774_v23  ;;  %489 = vmatprep.subr.bf16.mxu0 %v775_v24  ;;  %v843_v9 = vld [vmem:[%s1120_s1 + $0x220] ss:$8 sps:$4 sm:$0xff]   ;;  %v848_v11 = vld [vmem:[%s1120_s1 + $0x214] ss:$8 sps:$4 sm:$0xff]   ;;  %v846_v12 = vld [vmem:[%s1120_s1 + $0x210] ss:$8 sps:$4 sm:$0xff]  }
  0x19   :  { %530 = vmatprep.subr.bf16.mxu1 %v777_v25  ;;  %v851_v13 = vld [vmem:[%s1120_s1 + $0x204] ss:$8 sps:$4 sm:$0xff]   ;;  %v849_v14 = vld [vmem:[%s1120_s1 + $0x200] ss:$8 sps:$4 sm:$0xff]   ;;  %v837_v15 = vld [vmem:[%s1121_s0 + $0x10] ss:$0 sps:$4 sm:$0xff]  }
  0x1a   :  { %v603_v25 = vshrl.u32 %v602_v20, 7 }
  0x1b   :  { %490 = vmatpush1.bf16.msra.mxu0 %v779_v26  ;;  %v628_v26 = vld [vmem:[%s1122_s4] sm:$0x3] }
  0x1c   :  { %531 = vmatpush1.bf16.msra.mxu1 %v780_v27  ;;  %491 = vmatprep.subr.bf16.mxu0 %v781_v28  ;;  %v604_v27 = vsub.s32 0, %v603_v25  ;;  %v600_v28 = vld [vmem:[%s1123_s2] sm:$0x3]  ;;  %vm629_vm1 = vcmp.gt.f32.partialorder %v628_v26, 0.5 }
  0x1d   :  { %532 = vmatprep.subr.bf16.mxu1 %v783_v29  ;;  %v608_v29 = vsub.s32 1, %v603_v25 }
  0x1f   :  { %492 = vmatpush1.bf16.msra.mxu0 %v785_v30  ;;  %v614_v30 = vld [vmem:[%s1124_s3] sm:$0x3] }
  0x20   :  { %533 = vmatpush1.bf16.msra.mxu1 %v786_v31  ;;  %493 = vmatprep.subr.bf16.mxu0 %v787_v32  ;;  %v605_v32 = vrot.slane %v600_v28, %v604_v27 }
  0x21   :  { %534 = vmatprep.subr.bf16.mxu1 %v789_v33  ;;  %v632_v33 = vsel %vm629_vm1, 1, %v852_v10 }
  0x23   :  { %494 = vmatpush2.bf16.msra.mxu0 %v791_v34 }
  0x24   :  { %535 = vmatpush2.bf16.msra.mxu1 %v792_v35  ;;  %495 = vmatprep.subr.bf16.mxu0 %v793_v36 }
  0x25   :  { %536 = vmatprep.subr.bf16.mxu1 %v795_v37  ;;  %v619_v37 = vrot.slane %v614_v30, %v604_v27 }
  0x27   :  { %496 = vmatpush2.bf16.msra.mxu0 %v797_v38  ;;  %v609_v38 = vrot.slane %v600_v28, %v608_v29 }
  0x28   :  { %537 = vmatpush2.bf16.msra.mxu1 %v798_v39  ;;  %497 = vmatprep.subr.bf16.mxu0 %v799_v40 }
  0x29   :  { %538 = vmatprep.subr.bf16.mxu1 %v801_v41 }
  0x2b   :  { %498 = vmatpush2.bf16.msra.mxu0 %v803_v42  ;;  %v623_v42 = vrot.slane %v614_v30, %v608_v29 }
  0x2c   :  { %539 = vmatpush2.bf16.msra.mxu1 %v804_v43  ;;  %499 = vmatprep.subr.bf16.mxu0 %v805_v44  ;;  %v636_v43 = vrot.slane %v632_v33, %v604_v27  ;;  %v640_v44 = vrot.slane %v632_v33, %v608_v29 }
  0x2d   :  { %540 = vmatprep.subr.bf16.mxu1 %v807_v45 }
  0x2e   :  { %vm641_vm2 = vcmp.eq.s32.totalorder %v636_v43, 1  ;;  %vm642_vm3 = vcmp.eq.s32.totalorder %v640_v44, 1 }
  0x2f   :  { %500 = vmatpush2.bf16.msra.mxu0 %v809_v46 }
  0x30   :  { %541 = vmatpush2.bf16.msra.mxu1 %v810_v48  ;;  %501 = vmatprep.subr.bf16.mxu0 %v811_v51 }
  0x31   :  { %542 = vmatprep.subr.bf16.mxu1 %v813_v53 }
  0x33   :  { %502 = vmatpush2.bf16.msra.mxu0 %v815_v54 }
  0x34   :  { %543 = vmatpush2.bf16.msra.mxu1 %v816_v55  ;;  %503 = vmatprep.subr.bf16.mxu0 %v817_v56 }
  0x35   :  { %544 = vmatprep.subr.bf16.mxu1 %v819_v57 }
  0x37   :  { %504 = vmatpush2.bf16.msra.mxu0 %v821_v58 }
  0x38   :  { %545 = vmatpush2.bf16.msra.mxu1 %v822_v59  ;;  %505 = vmatprep.subr.bf16.mxu0 %v823_v60 }
  0x39   :  { %546 = vmatprep.subr.bf16.mxu1 %v825_v61 }
  0x3b   :  { %506 = vmatpush2.bf16.msra.mxu0 %v827_v62 }
  0x3c   :  { %547 = vmatpush2.bf16.msra.mxu1 %v828_v63  ;;  %507 = vmatprep.subr.bf16.mxu0 %v829_v0 }
  0x3d   :  { %548 = vmatprep.subr.bf16.mxu1 %v831_v1 }
  0x3f   :  { %508 = vmatpush2.bf16.msra.mxu0 %v833_v2 }
  0x40   :  { %549 = vmatpush2.bf16.msra.mxu1 %v834_v3  ;;  %567 = vmatprep.subr.bf16.mxu0 %v842_v4 }
  0x42   :  { %510 = vmatmul.mubr.bf16.vlgmr.msra.gmra.mxu0 %v658_v5 }
  0x43   :  { %551 = vmatmul.mubr.bf16.vlgmr.msra.gmra.mxu1 %v660_v6  ;;  %568 = vmatpush1.bf16.msra.mxu0 %v840_v7 }
  0x44   :  { %591 = vmatprep.mubr.bf16.mxu0 %v852_v10  ;;  %569 = vmatprep.subr.bf16.mxu0 %v845_v8 }
  0x47   :  { %570 = vmatpush1.bf16.msra.mxu0 %v843_v9 }
  0x48   :  { %571 = vmatprep.subr.bf16.mxu0 %v848_v11 }
  0x4b   :  { %572 = vmatpush1.bf16.msra.mxu0 %v846_v12 }
  0x4c   :  { %573 = vmatprep.subr.bf16.mxu0 %v851_v13 }
  0x4f   :  { %574 = vmatpush1.bf16.msra.mxu0 %v849_v14 }
  0x52   :  { %735 = vmatmul.mubr.msk.bf16.vlgmr.msra.gmra.mxu0 %vm473_vm0, %v837_v15 }
 0x102   :  { %v511_v16 = vpop.f32.mrf.mxu0 }
 0x103   :  { %v552_v17 = vpop.f32.mrf.mxu1 }
 0x104   :  { %v513_v18 = vpop.f32.mrf.mxu0  ;;  %v553_v31 = vadd.f32 %v552_v17, %v511_v16 }
 0x105   :  { %v554_v19 = vpop.f32.mrf.mxu1 }
 0x106   :  { %v515_v21 = vpop.f32.mrf.mxu0  ;;  %v555_v35 = vadd.f32 %v554_v19, %v513_v18 }
 0x107   :  { %v556_v22 = vpop.f32.mrf.mxu1 }
 0x108   :  { %v516_v23 = vpop.f32.mrf.mxu0 }
 0x109   :  { %v557_v24 = vpop.f32.mrf.mxu1 }
 0x112   :  { %v593_v34 = vpop.f32.mrf.mxu0 }
 0x113   :  { %v594_v36 = vadd.f32 %v593_v34, %v553_v31 }
 0x114   :  { %v595_v39 = vpop.f32.mrf.mxu0 }
 0x115   :  { %v612_v40 = vmul.f32 %v605_v32, %v594_v36  ;;  %v596_v41 = vadd.f32 %v595_v39, %v555_v35 }
 0x116   :  { %v597_v45 = vpop.f32.mrf.mxu0 }
 0x117   :  { %v626_v46 = vadd.f32 %v619_v37, %v612_v40  ;;  %v613_v47 = vmul.f32 %v609_v38, %v596_v41 }
 0x118   :  { %v598_v48 = vpop.f32.mrf.mxu0 }
 0x119   :  { %v630_v49 = vmax.f32 %v626_v46, 0.0  ;;  %v627_v50 = vadd.f32 %v623_v42, %v613_v47 }
 0x11b   :  { %v631_v51 = vmax.f32 %v627_v50, 0.0  ;;  %v643_v52 = vsel %vm641_vm2, %v630_v49, %v626_v46 }
 0x11d   :  { %v644_v53 = vsel %vm642_vm3, %v631_v51, %v627_v50 }
 0x11e   :  { %v737_v54 = vpack.c.bf16 %v644_v53, %v643_v52 }
 0x120   :  { %653 = vst [vmem:[%s1125_s5] sm:$0xff] %v737_v54 }

// kernel: _lambda_.28
= control target key start
LH: loop header
LB: loop body
LE: loop exit
PB: predicated region body
PF: predicated region fallthrough
CT: control target
= control target key end

     0   :  { %vm1157_vm0 = vmmov 0   ;;  %s1440_s1 = inlined_call_operand.vmem [shape: bf16[1152,128], index: 1, kind: input, shape index: {}]   ;;  %s1441_s0 = inlined_call_operand.vmem [shape: bf16[8,1152], index: 0, kind: input, shape index: {}]   ;;  %s1442_s4 = inlined_call_operand.vmem [shape: f32[1,128], index: 4, kind: input, shape index: {}]   ;;  %s1443_s2 = inlined_call_operand.vmem [shape: f32[1,128], index: 2, kind: input, shape index: {}]   ;;  %s1444_s5 = inlined_call_operand.vmem [shape: bf16[8,128], index: 5, kind: input, shape index: {}]   ;;  %s1445_s3 = inlined_call_operand.vmem [shape: f32[1,128], index: 3, kind: input, shape index: {}]   ;;  %s1446_s6 = inlined_call_operand.vmem [shape: bf16[8,128], index: 6, kind: output, shape index: {}]  }
   0x1   :  { %v1075_v0 = vld [vmem:[%s1440_s1 + $0x78] sm:$0xff]   ;;  %v1079_v4 = vld [vmem:[%s1440_s1 + $0x70] sm:$0xff]   ;;  %v1083_v8 = vld [vmem:[%s1440_s1 + $0x68] sm:$0xff]  }
   0x2   :  { %v1076_v1 = vld [vmem:[%s1440_s1 + $0xf8] sm:$0xff]   ;;  %955 = vmatprep.subr.bf16.mxu0 %v1075_v0  ;;  %v1080_v5 = vld [vmem:[%s1440_s1 + $0xf0] sm:$0xff]   ;;  %v1084_v9 = vld [vmem:[%s1440_s1 + $0xe8] sm:$0xff]  }
   0x3   :  { %v1077_v2 = vld [vmem:[%s1440_s1 + $0x38] sm:$0xff]   ;;  %977 = vmatprep.subr.bf16.mxu1 %v1076_v1  ;;  %v1081_v6 = vld [vmem:[%s1440_s1 + $0x30] sm:$0xff]   ;;  %v1085_v10 = vld [vmem:[%s1440_s1 + $0x28] sm:$0xff]  }
   0x4   :  { %v1078_v3 = vld [vmem:[%s1440_s1 + $0xb8] sm:$0xff]   ;;  %956 = vmatpush3.bf16.msra.mxu0 %v1077_v2  ;;  %v1082_v7 = vld [vmem:[%s1440_s1 + $0xb0] sm:$0xff]   ;;  %v1086_v11 = vld [vmem:[%s1440_s1 + $0xa8] sm:$0xff]  }
   0x5   :  { %978 = vmatpush3.bf16.msra.mxu1 %v1078_v3  ;;  %957 = vmatprep.subr.bf16.mxu0 %v1079_v4  ;;  %v1087_v12 = vld [vmem:[%s1440_s1 + $0x60] sm:$0xff]   ;;  %v1091_v16 = vld [vmem:[%s1440_s1 + $0x58] sm:$0xff]   ;;  %v1095_v20 = vld [vmem:[%s1440_s1 + $0x50] sm:$0xff]  }
   0x6   :  { %979 = vmatprep.subr.bf16.mxu1 %v1080_v5  ;;  %v1088_v13 = vld [vmem:[%s1440_s1 + $0xe0] sm:$0xff]   ;;  %v1092_v17 = vld [vmem:[%s1440_s1 + $0xd8] sm:$0xff]   ;;  %v1096_v21 = vld [vmem:[%s1440_s1 + $0xd0] sm:$0xff]  }
   0x7   :  { %v1089_v14 = vld [vmem:[%s1440_s1 + $0x20] sm:$0xff]   ;;  %v1093_v18 = vld [vmem:[%s1440_s1 + $0x18] sm:$0xff]   ;;  %v1097_v22 = vld [vmem:[%s1440_s1 + $0x10] sm:$0xff]  }
   0x8   :  { %958 = vmatpush3.bf16.msra.mxu0 %v1081_v6  ;;  %v1090_v15 = vld [vmem:[%s1440_s1 + $0xa0] sm:$0xff]   ;;  %v1094_v19 = vld [vmem:[%s1440_s1 + $0x98] sm:$0xff]   ;;  %v1098_v23 = vld [vmem:[%s1440_s1 + $0x90] sm:$0xff]  }
   0x9   :  { %980 = vmatpush3.bf16.msra.mxu1 %v1082_v7  ;;  %959 = vmatprep.subr.bf16.mxu0 %v1083_v8  ;;  %v1099_v24 = vld [vmem:[%s1440_s1 + $0x48] sm:$0xff]   ;;  %v1103_v28 = vld [vmem:[%s1440_s1 + $0x40] sm:$0xff]   ;;  %v1111_v38 = vld [vmem:[%s1440_s1 + $0x178] sm:$0xff]  }
   0xa   :  { %981 = vmatprep.subr.bf16.mxu1 %v1084_v9  ;;  %v1100_v25 = vld [vmem:[%s1440_s1 + $0xc8] sm:$0xff]   ;;  %v1104_v29 = vld [vmem:[%s1440_s1 + $0xc0] sm:$0xff]   ;;  %v1112_v39 = vld [vmem:[%s1440_s1 + $0x138] sm:$0xff]  }
   0xb   :  { %v1101_v26 = vld [vmem:[%s1440_s1 + $0x8] sm:$0xff]   ;;  %v1105_v30 = vld [vmem:[%s1440_s1] sm:$0xff]   ;;  %v1113_v40 = vld [vmem:[%s1440_s1 + $0x1f8] sm:$0xff]  }
   0xc   :  { %960 = vmatpush3.bf16.msra.mxu0 %v1085_v10  ;;  %v1102_v27 = vld [vmem:[%s1440_s1 + $0x88] sm:$0xff]   ;;  %v1106_v31 = vld [vmem:[%s1440_s1 + $0x80] sm:$0xff]   ;;  %v1114_v41 = vld [vmem:[%s1440_s1 + $0x1b8] sm:$0xff]  }
   0xd   :  { %982 = vmatpush3.bf16.msra.mxu1 %v1086_v11  ;;  %961 = vmatprep.subr.bf16.mxu0 %v1087_v12  ;;  %v24_v32 = vld [vmem:[%s1441_s0] sm:$0xff]  ;;  %v25_v33 = vld [vmem:[%s1441_s0 + $0x8] sm:$0xff]  ;;  %v1115_v42 = vld [vmem:[%s1440_s1 + $0x170] sm:$0xff]  }
   0xe   :  { %983 = vmatprep.subr.bf16.mxu1 %v1088_v13  ;;  %v872_v34 = vcombine.low %v24_v32, %v24_v32  ;;  %v873_v35 = vcombine.high %v24_v32, %v24_v32  ;;  %v874_v36 = vcombine.low %v25_v33, %v25_v33  ;;  %v875_v37 = vcombine.high %v25_v33, %v25_v33  ;;  %v1116_v43 = vld [vmem:[%s1440_s1 + $0x130] sm:$0xff]   ;;  %v1119_v46 = vld [vmem:[%s1440_s1 + $0x168] sm:$0xff]   ;;  %v1123_v50 = vld [vmem:[%s1440_s1 + $0x160] sm:$0xff]  }
   0xf   :  { %v1117_v44 = vld [vmem:[%s1440_s1 + $0x1f0] sm:$0xff]   ;;  %v1120_v47 = vld [vmem:[%s1440_s1 + $0x128] sm:$0xff]   ;;  %v1124_v51 = vld [vmem:[%s1440_s1 + $0x120] sm:$0xff]   ;;  %v1156_v13 = vmov 0.0  }
  0x10   :  { %962 = vmatpush3.bf16.msra.mxu0 %v1089_v14  ;;  %669 = vmatprep.mubr.bf16.mxu0 %v873_v35  ;;  %v1118_v45 = vld [vmem:[%s1440_s1 + $0x1b0] sm:$0xff]   ;;  %v1121_v48 = vld [vmem:[%s1440_s1 + $0x1e8] sm:$0xff]   ;;  %v1125_v52 = vld [vmem:[%s1440_s1 + $0x1e0] sm:$0xff]  }
  0x11   :  { %984 = vmatpush3.bf16.msra.mxu1 %v1090_v15  ;;  %963 = vmatprep.subr.bf16.mxu0 %v1091_v16  ;;  %v1122_v49 = vld [vmem:[%s1440_s1 + $0x1a8] sm:$0xff]   ;;  %v1126_v53 = vld [vmem:[%s1440_s1 + $0x1a0] sm:$0xff]   ;;  %v1127_v54 = vld [vmem:[%s1440_s1 + $0x158] sm:$0xff]  }
  0x12   :  { %985 = vmatprep.subr.bf16.mxu1 %v1092_v17  ;;  %709 = vmatprep.mubr.bf16.mxu1 %v875_v37  ;;  %v1128_v55 = vld [vmem:[%s1440_s1 + $0x118] sm:$0xff]   ;;  %v1131_v58 = vld [vmem:[%s1440_s1 + $0x150] sm:$0xff]   ;;  %v1135_v62 = vld [vmem:[%s1440_s1 + $0x148] sm:$0xff]  }
  0x13   :  { %v1129_v56 = vld [vmem:[%s1440_s1 + $0x1d8] sm:$0xff]   ;;  %v1132_v59 = vld [vmem:[%s1440_s1 + $0x110] sm:$0xff]   ;;  %v1136_v63 = vld [vmem:[%s1440_s1 + $0x108] sm:$0xff]  }
  0x14   :  { %964 = vmatpush3.bf16.msra.mxu0 %v1093_v18  ;;  %v1130_v57 = vld [vmem:[%s1440_s1 + $0x198] sm:$0xff]   ;;  %v1133_v60 = vld [vmem:[%s1440_s1 + $0x1d0] sm:$0xff]   ;;  %v1137_v0 = vld [vmem:[%s1440_s1 + $0x1c8] sm:$0xff]  }
  0x15   :  { %986 = vmatpush3.bf16.msra.mxu1 %v1094_v19  ;;  %965 = vmatprep.subr.bf16.mxu0 %v1095_v20  ;;  %v1134_v61 = vld [vmem:[%s1440_s1 + $0x190] sm:$0xff]   ;;  %v1138_v1 = vld [vmem:[%s1440_s1 + $0x188] sm:$0xff]   ;;  %v1139_v2 = vld [vmem:[%s1440_s1 + $0x140] sm:$0xff]  }
  0x16   :  { %987 = vmatprep.subr.bf16.mxu1 %v1096_v21  ;;  %v1140_v3 = vld [vmem:[%s1440_s1 + $0x100] sm:$0xff]   ;;  %v26_v5 = vld [vmem:[%s1441_s0 + $0x10] sm:$0xff]  ;;  %v27_v9 = vld [vmem:[%s1441_s0 + $0x18] sm:$0xff] }
  0x17   :  { %v1141_v4 = vld [vmem:[%s1440_s1 + $0x1c0] sm:$0xff]   ;;  %v877_v6 = vcombine.high %v26_v5, %v26_v5  ;;  %v876_v8 = vcombine.low %v26_v5, %v26_v5  ;;  %v878_v10 = vcombine.low %v27_v9, %v27_v9  ;;  %v879_v11 = vcombine.high %v27_v9, %v27_v9  ;;  %v1147_v12 = vld [vmem:[%s1440_s1 + $0x238] sm:$0xff]   ;;  %v1148_v14 = vld [vmem:[%s1440_s1 + $0x230] sm:$0xff]  }
  0x18   :  { %966 = vmatpush3.bf16.msra.mxu0 %v1097_v22  ;;  %v1144_v7 = vld [vmem:[%s1440_s1 + $0x180] sm:$0xff]   ;;  %v1149_v15 = vld [vmem:[%s1440_s1 + $0x228] sm:$0xff]   ;;  %v1151_v17 = vld [vmem:[%s1440_s1 + $0x218] sm:$0xff]  }
  0x19   :  { %988 = vmatpush3.bf16.msra.mxu1 %v1098_v23  ;;  %967 = vmatprep.subr.bf16.mxu0 %v1099_v24  ;;  %v1150_v16 = vld [vmem:[%s1440_s1 + $0x220] sm:$0xff]   ;;  %v1152_v18 = vld [vmem:[%s1440_s1 + $0x210] sm:$0xff]   ;;  %v1153_v19 = vld [vmem:[%s1440_s1 + $0x208] sm:$0xff]  }
  0x1a   :  { %989 = vmatprep.subr.bf16.mxu1 %v1100_v25  ;;  %v1154_v20 = vld [vmem:[%s1440_s1 + $0x200] sm:$0xff]  }
  0x1b   :  { %v1155_v21 = vld [vmem:[%s1441_s0 + $0x20] ss:$0 sps:$4 sm:$0xff]  }
  0x1c   :  { %968 = vmatpush3.bf16.msra.mxu0 %v1101_v26 }
  0x1d   :  { %990 = vmatpush3.bf16.msra.mxu1 %v1102_v27  ;;  %969 = vmatprep.subr.bf16.mxu0 %v1103_v28 }
  0x1e   :  { %991 = vmatprep.subr.bf16.mxu1 %v1104_v29 }
  0x20   :  { %970 = vmatpush3.bf16.msra.mxu0 %v1105_v30 }
  0x21   :  { %992 = vmatpush3.bf16.msra.mxu1 %v1106_v31  ;;  %999 = vmatprep.subr.bf16.mxu0 %v1111_v38 }
  0x22   :  { %1021 = vmatprep.subr.bf16.mxu1 %v1113_v40 }
  0x23   :  { %670 = vmatmul.mubr.bf16.vlgmr.msra.gmra.mxu0 %v872_v34 }
  0x24   :  { %710 = vmatmul.mubr.bf16.vlgmr.msra.gmra.mxu1 %v874_v36  ;;  %1000 = vmatpush3.bf16.msra.mxu0 %v1112_v39 }
  0x25   :  { %1022 = vmatpush3.bf16.msra.mxu1 %v1114_v41  ;;  %1001 = vmatprep.subr.bf16.mxu0 %v1115_v42  ;;  %v860_v41 = vlaneseq }
  0x26   :  { %1023 = vmatprep.subr.bf16.mxu1 %v1117_v44  ;;  %749 = vmatprep.mubr.bf16.mxu0 %v877_v6 }
  0x27   :  { %789 = vmatprep.mubr.bf16.mxu1 %v879_v11 }
  0x28   :  { %1002 = vmatpush3.bf16.msra.mxu0 %v1116_v43 }
  0x29   :  { %1024 = vmatpush3.bf16.msra.mxu1 %v1118_v45  ;;  %1003 = vmatprep.subr.bf16.mxu0 %v1119_v46  ;;  %v856_v45 = vld [vmem:[%s1442_s4] sm:$0x1]  ;;  %v861_v46 = vshrl.u32 %v860_v41, 7 }
  0x2a   :  { %1025 = vmatprep.subr.bf16.mxu1 %v1121_v48  ;;  %vm857_vm1 = vcmp.gt.f32.partialorder %v856_v45, 0.5 }
  0x2c   :  { %1004 = vmatpush3.bf16.msra.mxu0 %v1120_v47 }
  0x2d   :  { %1026 = vmatpush3.bf16.msra.mxu1 %v1122_v49  ;;  %1005 = vmatprep.subr.bf16.mxu0 %v1123_v50  ;;  %v953_v49 = vld [vmem:[%s1443_s2] ss:$0 sm:$0xff] }
  0x2e   :  { %1027 = vmatprep.subr.bf16.mxu1 %v1125_v52  ;;  %v853_v50 = vld [vmem:[%s1444_s5] sm:$0xf] }
  0x30   :  { %1006 = vmatpush3.bf16.msra.mxu0 %v1124_v51  ;;  %v862_v51 = vsub.s32 0, %v861_v46 }
  0x31   :  { %1028 = vmatpush3.bf16.msra.mxu1 %v1126_v53  ;;  %1007 = vmatprep.subr.bf16.mxu0 %v1127_v54  ;;  %v1158_v53 = vmov 0  }
  0x32   :  { %1029 = vmatprep.subr.bf16.mxu1 %v1129_v56  ;;  %v859_v54 = vsel %vm857_vm1, 1, %v1158_v53 }
  0x34   :  { %1008 = vmatpush3.bf16.msra.mxu0 %v1128_v55  ;;  %v954_v55 = vld [vmem:[%s1445_s3] ss:$0 sm:$0xff] }
  0x35   :  { %1030 = vmatpush3.bf16.msra.mxu1 %v1130_v57  ;;  %1009 = vmatprep.subr.bf16.mxu0 %v1131_v58  ;;  %v854_v58 = vunpack.c.l.bf16 %v853_v50 }
  0x36   :  { %1031 = vmatprep.subr.bf16.mxu1 %v1133_v60 }
  0x38   :  { %1010 = vmatpush3.bf16.msra.mxu0 %v1132_v59  ;;  %v863_v59 = vrot.slane %v859_v54, %v862_v51 }
  0x39   :  { %1032 = vmatpush3.bf16.msra.mxu1 %v1134_v61  ;;  %1011 = vmatprep.subr.bf16.mxu0 %v1135_v62 }
  0x3a   :  { %1033 = vmatprep.subr.bf16.mxu1 %v1137_v0  ;;  %vm864_vm2 = vcmp.eq.s32.totalorder %v863_v59, 1 }
  0x3c   :  { %1012 = vmatpush3.bf16.msra.mxu0 %v1136_v63 }
  0x3d   :  { %1034 = vmatpush3.bf16.msra.mxu1 %v1138_v1  ;;  %1013 = vmatprep.subr.bf16.mxu0 %v1139_v2 }
  0x3e   :  { %1035 = vmatprep.subr.bf16.mxu1 %v1141_v4 }
  0x40   :  { %1014 = vmatpush3.bf16.msra.mxu0 %v1140_v3 }
  0x41   :  { %1036 = vmatpush3.bf16.msra.mxu1 %v1144_v7  ;;  %1052 = vmatprep.subr.bf16.mxu0 %v1156_v13 }
  0x43   :  { %750 = vmatmul.mubr.bf16.vlgmr.msra.gmra.mxu0 %v876_v8 }
  0x44   :  { %1053 = vmatpush3.bf16.msra.mxu0 %v1147_v12  ;;  %790 = vmatmul.mubr.bf16.vlgmr.msra.gmra.mxu1 %v878_v10 }
  0x45   :  { %1054 = vmatprep.subr.bf16.mxu0 %v1156_v13  ;;  %1068 = vmatprep.mubr.msk.bf16.mxu0 %vm1157_vm0, %v1156_v13 }
  0x48   :  { %1055 = vmatpush3.bf16.msra.mxu0 %v1148_v14 }
  0x49   :  { %1056 = vmatprep.subr.bf16.mxu0 %v1156_v13 }
  0x4c   :  { %1057 = vmatpush3.bf16.msra.mxu0 %v1149_v15 }
  0x4d   :  { %1058 = vmatprep.subr.bf16.mxu0 %v1156_v13 }
  0x50   :  { %1059 = vmatpush3.bf16.msra.mxu0 %v1150_v16 }
  0x51   :  { %1060 = vmatprep.subr.bf16.mxu0 %v1156_v13 }
  0x54   :  { %1061 = vmatpush3.bf16.msra.mxu0 %v1151_v17 }
  0x55   :  { %1062 = vmatprep.subr.bf16.mxu0 %v1156_v13 }
  0x58   :  { %1063 = vmatpush3.bf16.msra.mxu0 %v1152_v18 }
  0x59   :  { %1064 = vmatprep.subr.bf16.mxu0 %v1156_v13 }
  0x5c   :  { %1065 = vmatpush3.bf16.msra.mxu0 %v1153_v19 }
  0x5d   :  { %1066 = vmatprep.subr.bf16.mxu0 %v1156_v13 }
  0x60   :  { %1067 = vmatpush3.bf16.msra.mxu0 %v1154_v20 }
  0x63   :  { %1069 = vmatmul.mubr.bf16.vlgmr.msra.gmra.mxu0 %v1155_v21 }
  0xe3   :  { %v971_v22 = vpop.f32.mrf.mxu0 }
  0xe4   :  { %v993_v23 = vpop.f32.mrf.mxu1 }
  0xe5   :  { %v972_v24 = vpop.f32.mrf.mxu0 }
  0xe6   :  { %v994_v25 = vpop.f32.mrf.mxu1  ;;  %v973_v38 = vadd.f32 %v972_v24, %v971_v22 }
  0xe7   :  { %v974_v26 = vpop.f32.mrf.mxu0  ;;  %v995_v39 = vadd.f32 %v994_v25, %v993_v23 }
  0xe8   :  { %v996_v27 = vpop.f32.mrf.mxu1 }
  0xe9   :  { %v975_v28 = vpop.f32.mrf.mxu0  ;;  %v712_v42 = vadd.f32 %v995_v39, %v973_v38 }
  0xea   :  { %v997_v29 = vpop.f32.mrf.mxu1 }
 0x103   :  { %v1015_v30 = vpop.f32.mrf.mxu0 }
 0x104   :  { %v1037_v31 = vpop.f32.mrf.mxu1 }
 0x105   :  { %v1016_v32 = vpop.f32.mrf.mxu0 }
 0x106   :  { %v1038_v33 = vpop.f32.mrf.mxu1  ;;  %v1017_v40 = vadd.f32 %v1016_v32, %v1015_v30 }
 0x107   :  { %v1018_v34 = vpop.f32.mrf.mxu0  ;;  %v1039_v44 = vadd.f32 %v1038_v33, %v1037_v31 }
 0x108   :  { %v1040_v35 = vpop.f32.mrf.mxu1  ;;  %v752_v43 = vadd.f32 %v1017_v40, %v712_v42 }
 0x109   :  { %v1019_v36 = vpop.f32.mrf.mxu0 }
 0x10a   :  { %v1041_v37 = vpop.f32.mrf.mxu1  ;;  %v792_v47 = vadd.f32 %v1039_v44, %v752_v43 }
 0x123   :  { %v831_v48 = vpop.f32.mrf.mxu0 }
 0x124   :  { %v832_v52 = vadd.f32 %v831_v48, %v792_v47 }
 0x125   :  { %v1070_v56 = vpop.f32.mrf.mxu0 }
 0x126   :  { %v844_v57 = vmul.f32 %v953_v49, %v832_v52 }
 0x127   :  { %v834_v60 = vpop.f32.mrf.mxu0 }
 0x128   :  { %v852_v61 = vadd.f32 %v954_v55, %v844_v57 }
 0x129   :  { %v1071_v62 = vpop.f32.mrf.mxu0 }
 0x12a   :  { %v855_v63 = vadd.f32 %v854_v58, %v852_v61 }
 0x12c   :  { %v858_v0 = vmax.f32 %v855_v63, 0.0 }
 0x12e   :  { %v865_v1 = vsel %vm864_vm2, %v858_v0, %v855_v63 }
 0x12f   :  { %v866_v2 = vpack.c.bf16 %v865_v1, %v865_v1 }
 0x131   :  { %867 = vst [vmem:[%s1446_s6] sm:$0xf] %v866_v2 }

// kernel: _lambda_.29
= control target key start
LH: loop header
LB: loop body
LE: loop exit
PB: predicated region body
PF: predicated region fallthrough
CT: control target
= control target key end

     0   :  { %vm1151_vm0 = vmmov 0   ;;  %s1426_s1 = inlined_call_operand.vmem [shape: bf16[1152,128], index: 1, kind: input, shape index: {}]   ;;  %s1427_s0 = inlined_call_operand.vmem [shape: bf16[8,1152], index: 0, kind: input, shape index: {}]   ;;  %s1428_s4 = inlined_call_operand.vmem [shape: f32[1,128], index: 4, kind: input, shape index: {}]   ;;  %s1429_s2 = inlined_call_operand.vmem [shape: f32[1,128], index: 2, kind: input, shape index: {}]   ;;  %s1430_s3 = inlined_call_operand.vmem [shape: f32[1,128], index: 3, kind: input, shape index: {}]   ;;  %s1431_s5 = inlined_call_operand.vmem [shape: bf16[8,128], index: 5, kind: output, shape index: {}]  }
   0x1   :  { %v1069_v0 = vld [vmem:[%s1426_s1 + $0x78] sm:$0xff]   ;;  %v1073_v4 = vld [vmem:[%s1426_s1 + $0x70] sm:$0xff]   ;;  %v1077_v8 = vld [vmem:[%s1426_s1 + $0x68] sm:$0xff]  }
   0x2   :  { %v1070_v1 = vld [vmem:[%s1426_s1 + $0xf8] sm:$0xff]   ;;  %949 = vmatprep.subr.bf16.mxu0 %v1069_v0  ;;  %v1074_v5 = vld [vmem:[%s1426_s1 + $0xf0] sm:$0xff]   ;;  %v1078_v9 = vld [vmem:[%s1426_s1 + $0xe8] sm:$0xff]  }
   0x3   :  { %v1071_v2 = vld [vmem:[%s1426_s1 + $0x38] sm:$0xff]   ;;  %971 = vmatprep.subr.bf16.mxu1 %v1070_v1  ;;  %v1075_v6 = vld [vmem:[%s1426_s1 + $0x30] sm:$0xff]   ;;  %v1079_v10 = vld [vmem:[%s1426_s1 + $0x28] sm:$0xff]  }
   0x4   :  { %v1072_v3 = vld [vmem:[%s1426_s1 + $0xb8] sm:$0xff]   ;;  %950 = vmatpush3.bf16.msra.mxu0 %v1071_v2  ;;  %v1076_v7 = vld [vmem:[%s1426_s1 + $0xb0] sm:$0xff]   ;;  %v1080_v11 = vld [vmem:[%s1426_s1 + $0xa8] sm:$0xff]  }
   0x5   :  { %972 = vmatpush3.bf16.msra.mxu1 %v1072_v3  ;;  %951 = vmatprep.subr.bf16.mxu0 %v1073_v4  ;;  %v1081_v12 = vld [vmem:[%s1426_s1 + $0x60] sm:$0xff]   ;;  %v1085_v16 = vld [vmem:[%s1426_s1 + $0x58] sm:$0xff]   ;;  %v1089_v20 = vld [vmem:[%s1426_s1 + $0x50] sm:$0xff]  }
   0x6   :  { %973 = vmatprep.subr.bf16.mxu1 %v1074_v5  ;;  %v1082_v13 = vld [vmem:[%s1426_s1 + $0xe0] sm:$0xff]   ;;  %v1086_v17 = vld [vmem:[%s1426_s1 + $0xd8] sm:$0xff]   ;;  %v1090_v21 = vld [vmem:[%s1426_s1 + $0xd0] sm:$0xff]  }
   0x7   :  { %v1083_v14 = vld [vmem:[%s1426_s1 + $0x20] sm:$0xff]   ;;  %v1087_v18 = vld [vmem:[%s1426_s1 + $0x18] sm:$0xff]   ;;  %v1091_v22 = vld [vmem:[%s1426_s1 + $0x10] sm:$0xff]  }
   0x8   :  { %952 = vmatpush3.bf16.msra.mxu0 %v1075_v6  ;;  %v1084_v15 = vld [vmem:[%s1426_s1 + $0xa0] sm:$0xff]   ;;  %v1088_v19 = vld [vmem:[%s1426_s1 + $0x98] sm:$0xff]   ;;  %v1092_v23 = vld [vmem:[%s1426_s1 + $0x90] sm:$0xff]  }
   0x9   :  { %974 = vmatpush3.bf16.msra.mxu1 %v1076_v7  ;;  %953 = vmatprep.subr.bf16.mxu0 %v1077_v8  ;;  %v1093_v24 = vld [vmem:[%s1426_s1 + $0x48] sm:$0xff]   ;;  %v1097_v28 = vld [vmem:[%s1426_s1 + $0x40] sm:$0xff]   ;;  %v1105_v38 = vld [vmem:[%s1426_s1 + $0x178] sm:$0xff]  }
   0xa   :  { %975 = vmatprep.subr.bf16.mxu1 %v1078_v9  ;;  %v1094_v25 = vld [vmem:[%s1426_s1 + $0xc8] sm:$0xff]   ;;  %v1098_v29 = vld [vmem:[%s1426_s1 + $0xc0] sm:$0xff]   ;;  %v1106_v39 = vld [vmem:[%s1426_s1 + $0x138] sm:$0xff]  }
   0xb   :  { %v1095_v26 = vld [vmem:[%s1426_s1 + $0x8] sm:$0xff]   ;;  %v1099_v30 = vld [vmem:[%s1426_s1] sm:$0xff]   ;;  %v1107_v40 = vld [vmem:[%s1426_s1 + $0x1f8] sm:$0xff]  }
   0xc   :  { %954 = vmatpush3.bf16.msra.mxu0 %v1079_v10  ;;  %v1096_v27 = vld [vmem:[%s1426_s1 + $0x88] sm:$0xff]   ;;  %v1100_v31 = vld [vmem:[%s1426_s1 + $0x80] sm:$0xff]   ;;  %v1108_v41 = vld [vmem:[%s1426_s1 + $0x1b8] sm:$0xff]  }
   0xd   :  { %976 = vmatpush3.bf16.msra.mxu1 %v1080_v11  ;;  %955 = vmatprep.subr.bf16.mxu0 %v1081_v12  ;;  %v21_v32 = vld [vmem:[%s1427_s0] sm:$0xff]  ;;  %v22_v33 = vld [vmem:[%s1427_s0 + $0x8] sm:$0xff]  ;;  %v1109_v42 = vld [vmem:[%s1426_s1 + $0x170] sm:$0xff]  }
   0xe   :  { %977 = vmatprep.subr.bf16.mxu1 %v1082_v13  ;;  %v866_v34 = vcombine.low %v21_v32, %v21_v32  ;;  %v867_v35 = vcombine.high %v21_v32, %v21_v32  ;;  %v868_v36 = vcombine.low %v22_v33, %v22_v33  ;;  %v869_v37 = vcombine.high %v22_v33, %v22_v33  ;;  %v1110_v43 = vld [vmem:[%s1426_s1 + $0x130] sm:$0xff]   ;;  %v1113_v46 = vld [vmem:[%s1426_s1 + $0x168] sm:$0xff]   ;;  %v1117_v50 = vld [vmem:[%s1426_s1 + $0x160] sm:$0xff]  }
   0xf   :  { %v1111_v44 = vld [vmem:[%s1426_s1 + $0x1f0] sm:$0xff]   ;;  %v1114_v47 = vld [vmem:[%s1426_s1 + $0x128] sm:$0xff]   ;;  %v1118_v51 = vld [vmem:[%s1426_s1 + $0x120] sm:$0xff]   ;;  %v1150_v13 = vmov 0.0  }
  0x10   :  { %956 = vmatpush3.bf16.msra.mxu0 %v1083_v14  ;;  %666 = vmatprep.mubr.bf16.mxu0 %v867_v35  ;;  %v1112_v45 = vld [vmem:[%s1426_s1 + $0x1b0] sm:$0xff]   ;;  %v1115_v48 = vld [vmem:[%s1426_s1 + $0x1e8] sm:$0xff]   ;;  %v1119_v52 = vld [vmem:[%s1426_s1 + $0x1e0] sm:$0xff]  }
  0x11   :  { %978 = vmatpush3.bf16.msra.mxu1 %v1084_v15  ;;  %957 = vmatprep.subr.bf16.mxu0 %v1085_v16  ;;  %v1116_v49 = vld [vmem:[%s1426_s1 + $0x1a8] sm:$0xff]   ;;  %v1120_v53 = vld [vmem:[%s1426_s1 + $0x1a0] sm:$0xff]   ;;  %v1121_v54 = vld [vmem:[%s1426_s1 + $0x158] sm:$0xff]  }
  0x12   :  { %979 = vmatprep.subr.bf16.mxu1 %v1086_v17  ;;  %706 = vmatprep.mubr.bf16.mxu1 %v869_v37  ;;  %v1122_v55 = vld [vmem:[%s1426_s1 + $0x118] sm:$0xff]   ;;  %v1125_v58 = vld [vmem:[%s1426_s1 + $0x150] sm:$0xff]   ;;  %v1129_v62 = vld [vmem:[%s1426_s1 + $0x148] sm:$0xff]  }
  0x13   :  { %v1123_v56 = vld [vmem:[%s1426_s1 + $0x1d8] sm:$0xff]   ;;  %v1126_v59 = vld [vmem:[%s1426_s1 + $0x110] sm:$0xff]   ;;  %v1130_v63 = vld [vmem:[%s1426_s1 + $0x108] sm:$0xff]  }
  0x14   :  { %958 = vmatpush3.bf16.msra.mxu0 %v1087_v18  ;;  %v1124_v57 = vld [vmem:[%s1426_s1 + $0x198] sm:$0xff]   ;;  %v1127_v60 = vld [vmem:[%s1426_s1 + $0x1d0] sm:$0xff]   ;;  %v1131_v0 = vld [vmem:[%s1426_s1 + $0x1c8] sm:$0xff]  }
  0x15   :  { %980 = vmatpush3.bf16.msra.mxu1 %v1088_v19  ;;  %959 = vmatprep.subr.bf16.mxu0 %v1089_v20  ;;  %v1128_v61 = vld [vmem:[%s1426_s1 + $0x190] sm:$0xff]   ;;  %v1132_v1 = vld [vmem:[%s1426_s1 + $0x188] sm:$0xff]   ;;  %v1133_v2 = vld [vmem:[%s1426_s1 + $0x140] sm:$0xff]  }
  0x16   :  { %981 = vmatprep.subr.bf16.mxu1 %v1090_v21  ;;  %v1134_v3 = vld [vmem:[%s1426_s1 + $0x100] sm:$0xff]   ;;  %v23_v5 = vld [vmem:[%s1427_s0 + $0x10] sm:$0xff]  ;;  %v24_v9 = vld [vmem:[%s1427_s0 + $0x18] sm:$0xff] }
  0x17   :  { %v1135_v4 = vld [vmem:[%s1426_s1 + $0x1c0] sm:$0xff]   ;;  %v871_v6 = vcombine.high %v23_v5, %v23_v5  ;;  %v870_v8 = vcombine.low %v23_v5, %v23_v5  ;;  %v872_v10 = vcombine.low %v24_v9, %v24_v9  ;;  %v873_v11 = vcombine.high %v24_v9, %v24_v9  ;;  %v1141_v12 = vld [vmem:[%s1426_s1 + $0x238] sm:$0xff]   ;;  %v1142_v14 = vld [vmem:[%s1426_s1 + $0x230] sm:$0xff]  }
  0x18   :  { %960 = vmatpush3.bf16.msra.mxu0 %v1091_v22  ;;  %v1138_v7 = vld [vmem:[%s1426_s1 + $0x180] sm:$0xff]   ;;  %v1143_v15 = vld [vmem:[%s1426_s1 + $0x228] sm:$0xff]   ;;  %v1145_v17 = vld [vmem:[%s1426_s1 + $0x218] sm:$0xff]  }
  0x19   :  { %982 = vmatpush3.bf16.msra.mxu1 %v1092_v23  ;;  %961 = vmatprep.subr.bf16.mxu0 %v1093_v24  ;;  %v1144_v16 = vld [vmem:[%s1426_s1 + $0x220] sm:$0xff]   ;;  %v1146_v18 = vld [vmem:[%s1426_s1 + $0x210] sm:$0xff]   ;;  %v1147_v19 = vld [vmem:[%s1426_s1 + $0x208] sm:$0xff]  }
  0x1a   :  { %983 = vmatprep.subr.bf16.mxu1 %v1094_v25  ;;  %v1148_v20 = vld [vmem:[%s1426_s1 + $0x200] sm:$0xff]  }
  0x1b   :  { %v1149_v21 = vld [vmem:[%s1427_s0 + $0x20] ss:$0 sps:$4 sm:$0xff]  }
  0x1c   :  { %962 = vmatpush3.bf16.msra.mxu0 %v1095_v26 }
  0x1d   :  { %984 = vmatpush3.bf16.msra.mxu1 %v1096_v27  ;;  %963 = vmatprep.subr.bf16.mxu0 %v1097_v28 }
  0x1e   :  { %985 = vmatprep.subr.bf16.mxu1 %v1098_v29 }
  0x20   :  { %964 = vmatpush3.bf16.msra.mxu0 %v1099_v30 }
  0x21   :  { %986 = vmatpush3.bf16.msra.mxu1 %v1100_v31  ;;  %993 = vmatprep.subr.bf16.mxu0 %v1105_v38 }
  0x22   :  { %1015 = vmatprep.subr.bf16.mxu1 %v1107_v40  ;;  %v854_v40 = vlaneseq }
  0x23   :  { %667 = vmatmul.mubr.bf16.vlgmr.msra.gmra.mxu0 %v866_v34 }
  0x24   :  { %707 = vmatmul.mubr.bf16.vlgmr.msra.gmra.mxu1 %v868_v36  ;;  %994 = vmatpush3.bf16.msra.mxu0 %v1106_v39 }
  0x25   :  { %1016 = vmatpush3.bf16.msra.mxu1 %v1108_v41  ;;  %995 = vmatprep.subr.bf16.mxu0 %v1109_v42 }
  0x26   :  { %1017 = vmatprep.subr.bf16.mxu1 %v1111_v44  ;;  %746 = vmatprep.mubr.bf16.mxu0 %v871_v6  ;;  %v855_v44 = vshrl.u32 %v854_v40, 7 }
  0x27   :  { %786 = vmatprep.mubr.bf16.mxu1 %v873_v11 }
  0x28   :  { %996 = vmatpush3.bf16.msra.mxu0 %v1110_v43  ;;  %v850_v43 = vld [vmem:[%s1428_s4] sm:$0x1] }
  0x29   :  { %1018 = vmatpush3.bf16.msra.mxu1 %v1112_v45  ;;  %997 = vmatprep.subr.bf16.mxu0 %v1113_v46  ;;  %vm851_vm1 = vcmp.gt.f32.partialorder %v850_v43, 0.5 }
  0x2a   :  { %1019 = vmatprep.subr.bf16.mxu1 %v1115_v48 }
  0x2c   :  { %998 = vmatpush3.bf16.msra.mxu0 %v1114_v47  ;;  %v856_v47 = vsub.s32 0, %v855_v44 }
  0x2d   :  { %1020 = vmatpush3.bf16.msra.mxu1 %v1116_v49  ;;  %999 = vmatprep.subr.bf16.mxu0 %v1117_v50  ;;  %v1152_v49 = vmov 0  }
  0x2e   :  { %1021 = vmatprep.subr.bf16.mxu1 %v1119_v52  ;;  %v853_v50 = vsel %vm851_vm1, 1, %v1152_v49  ;;  %v947_v52 = vld [vmem:[%s1429_s2] ss:$0 sm:$0xff] }
  0x30   :  { %1000 = vmatpush3.bf16.msra.mxu0 %v1118_v51 }
  0x31   :  { %1022 = vmatpush3.bf16.msra.mxu1 %v1120_v53  ;;  %1001 = vmatprep.subr.bf16.mxu0 %v1121_v54  ;;  %v948_v54 = vld [vmem:[%s1430_s3] ss:$0 sm:$0xff] }
  0x32   :  { %1023 = vmatprep.subr.bf16.mxu1 %v1123_v56 }
  0x34   :  { %1002 = vmatpush3.bf16.msra.mxu0 %v1122_v55  ;;  %v857_v55 = vrot.slane %v853_v50, %v856_v47 }
  0x35   :  { %1024 = vmatpush3.bf16.msra.mxu1 %v1124_v57  ;;  %1003 = vmatprep.subr.bf16.mxu0 %v1125_v58 }
  0x36   :  { %1025 = vmatprep.subr.bf16.mxu1 %v1127_v60  ;;  %vm858_vm2 = vcmp.eq.s32.totalorder %v857_v55, 1 }
  0x38   :  { %1004 = vmatpush3.bf16.msra.mxu0 %v1126_v59 }
  0x39   :  { %1026 = vmatpush3.bf16.msra.mxu1 %v1128_v61  ;;  %1005 = vmatprep.subr.bf16.mxu0 %v1129_v62 }
  0x3a   :  { %1027 = vmatprep.subr.bf16.mxu1 %v1131_v0 }
  0x3c   :  { %1006 = vmatpush3.bf16.msra.mxu0 %v1130_v63 }
  0x3d   :  { %1028 = vmatpush3.bf16.msra.mxu1 %v1132_v1  ;;  %1007 = vmatprep.subr.bf16.mxu0 %v1133_v2 }
  0x3e   :  { %1029 = vmatprep.subr.bf16.mxu1 %v1135_v4 }
  0x40   :  { %1008 = vmatpush3.bf16.msra.mxu0 %v1134_v3 }
  0x41   :  { %1030 = vmatpush3.bf16.msra.mxu1 %v1138_v7  ;;  %1046 = vmatprep.subr.bf16.mxu0 %v1150_v13 }
  0x43   :  { %747 = vmatmul.mubr.bf16.vlgmr.msra.gmra.mxu0 %v870_v8 }
  0x44   :  { %1047 = vmatpush3.bf16.msra.mxu0 %v1141_v12  ;;  %787 = vmatmul.mubr.bf16.vlgmr.msra.gmra.mxu1 %v872_v10 }
  0x45   :  { %1048 = vmatprep.subr.bf16.mxu0 %v1150_v13  ;;  %1062 = vmatprep.mubr.msk.bf16.mxu0 %vm1151_vm0, %v1150_v13 }
  0x48   :  { %1049 = vmatpush3.bf16.msra.mxu0 %v1142_v14 }
  0x49   :  { %1050 = vmatprep.subr.bf16.mxu0 %v1150_v13 }
  0x4c   :  { %1051 = vmatpush3.bf16.msra.mxu0 %v1143_v15 }
  0x4d   :  { %1052 = vmatprep.subr.bf16.mxu0 %v1150_v13 }
  0x50   :  { %1053 = vmatpush3.bf16.msra.mxu0 %v1144_v16 }
  0x51   :  { %1054 = vmatprep.subr.bf16.mxu0 %v1150_v13 }
  0x54   :  { %1055 = vmatpush3.bf16.msra.mxu0 %v1145_v17 }
  0x55   :  { %1056 = vmatprep.subr.bf16.mxu0 %v1150_v13 }
  0x58   :  { %1057 = vmatpush3.bf16.msra.mxu0 %v1146_v18 }
  0x59   :  { %1058 = vmatprep.subr.bf16.mxu0 %v1150_v13 }
  0x5c   :  { %1059 = vmatpush3.bf16.msra.mxu0 %v1147_v19 }
  0x5d   :  { %1060 = vmatprep.subr.bf16.mxu0 %v1150_v13 }
  0x60   :  { %1061 = vmatpush3.bf16.msra.mxu0 %v1148_v20 }
  0x63   :  { %1063 = vmatmul.mubr.bf16.vlgmr.msra.gmra.mxu0 %v1149_v21 }
  0xe3   :  { %v965_v22 = vpop.f32.mrf.mxu0 }
  0xe4   :  { %v987_v23 = vpop.f32.mrf.mxu1 }
  0xe5   :  { %v966_v24 = vpop.f32.mrf.mxu0 }
  0xe6   :  { %v988_v25 = vpop.f32.mrf.mxu1  ;;  %v967_v38 = vadd.f32 %v966_v24, %v965_v22 }
  0xe7   :  { %v968_v26 = vpop.f32.mrf.mxu0  ;;  %v989_v39 = vadd.f32 %v988_v25, %v987_v23 }
  0xe8   :  { %v990_v27 = vpop.f32.mrf.mxu1 }
  0xe9   :  { %v969_v28 = vpop.f32.mrf.mxu0  ;;  %v709_v42 = vadd.f32 %v989_v39, %v967_v38 }
  0xea   :  { %v991_v29 = vpop.f32.mrf.mxu1 }
 0x103   :  { %v1009_v30 = vpop.f32.mrf.mxu0 }
 0x104   :  { %v1031_v31 = vpop.f32.mrf.mxu1 }
 0x105   :  { %v1010_v32 = vpop.f32.mrf.mxu0 }
 0x106   :  { %v1032_v33 = vpop.f32.mrf.mxu1  ;;  %v1011_v41 = vadd.f32 %v1010_v32, %v1009_v30 }
 0x107   :  { %v1012_v34 = vpop.f32.mrf.mxu0  ;;  %v1033_v46 = vadd.f32 %v1032_v33, %v1031_v31 }
 0x108   :  { %v1034_v35 = vpop.f32.mrf.mxu1  ;;  %v749_v45 = vadd.f32 %v1011_v41, %v709_v42 }
 0x109   :  { %v1013_v36 = vpop.f32.mrf.mxu0 }
 0x10a   :  { %v1035_v37 = vpop.f32.mrf.mxu1  ;;  %v789_v48 = vadd.f32 %v1033_v46, %v749_v45 }
 0x123   :  { %v828_v51 = vpop.f32.mrf.mxu0 }
 0x124   :  { %v829_v53 = vadd.f32 %v828_v51, %v789_v48 }
 0x125   :  { %v1064_v56 = vpop.f32.mrf.mxu0 }
 0x126   :  { %v841_v57 = vmul.f32 %v947_v52, %v829_v53 }
 0x127   :  { %v831_v58 = vpop.f32.mrf.mxu0 }
 0x128   :  { %v849_v59 = vadd.f32 %v948_v54, %v841_v57 }
 0x129   :  { %v1065_v60 = vpop.f32.mrf.mxu0 }
 0x12a   :  { %v852_v61 = vmax.f32 %v849_v59, 0.0 }
 0x12c   :  { %v859_v62 = vsel %vm858_vm2, %v852_v61, %v849_v59 }
 0x12d   :  { %v860_v63 = vpack.c.bf16 %v859_v62, %v859_v62 }
 0x12f   :  { %861 = vst [vmem:[%s1431_s5] sm:$0xf] %v860_v63 }

// kernel: _lambda_.32
= control target key start
LH: loop header
LB: loop body
LE: loop exit
PB: predicated region body
PF: predicated region fallthrough
CT: control target
= control target key end

     0   :  { %s4004_s1 = inlined_call_operand.vmem [shape: bf16[2304,256], index: 1, kind: input, shape index: {}]   ;;  %s4005_s0 = inlined_call_operand.vmem [shape: bf16[8,2304], index: 0, kind: input, shape index: {}]   ;;  %s4006_s2 = inlined_call_operand.vmem [shape: f32[1,256], index: 2, kind: input, shape index: {}]   ;;  %s4007_s4 = inlined_call_operand.vmem [shape: f32[1,256], index: 4, kind: input, shape index: {}]   ;;  %s4008_s3 = inlined_call_operand.vmem [shape: f32[1,256], index: 3, kind: input, shape index: {}]   ;;  %s4009_s5 = inlined_call_operand.vmem [shape: bf16[8,256], index: 5, kind: input, shape index: {}]   ;;  %s4010_s6 = inlined_call_operand.vmem [shape: bf16[8,256], index: 6, kind: output, shape index: {}]  }
   0x1   :  { %v2564_v0 = vld [vmem:[%s4004_s1 + $0x74] ss:$8 sps:$4 sm:$0xff]   ;;  %v2568_v2 = vld [vmem:[%s4004_s1 + $0x70] ss:$8 sps:$4 sm:$0xff]   ;;  %v2570_v4 = vld [vmem:[%s4004_s1 + $0x64] ss:$8 sps:$4 sm:$0xff]  }
   0x2   :  { %v2566_v1 = vld [vmem:[%s4004_s1 + $0x174] ss:$8 sps:$4 sm:$0xff]   ;;  %1823 = vmatprep.subr.bf16.mxu0 %v2564_v0  ;;  %v2569_v3 = vld [vmem:[%s4004_s1 + $0x170] ss:$8 sps:$4 sm:$0xff]   ;;  %v2572_v5 = vld [vmem:[%s4004_s1 + $0x164] ss:$8 sps:$4 sm:$0xff]  }
   0x3   :  { %1864 = vmatprep.subr.bf16.mxu1 %v2566_v1  ;;  %1824 = vmatpush1.bf16.msra.mxu0 %v2568_v2  ;;  %v2574_v6 = vld [vmem:[%s4004_s1 + $0x60] ss:$8 sps:$4 sm:$0xff]   ;;  %v2576_v8 = vld [vmem:[%s4004_s1 + $0x54] ss:$8 sps:$4 sm:$0xff]   ;;  %v2580_v10 = vld [vmem:[%s4004_s1 + $0x50] ss:$8 sps:$4 sm:$0xff]  }
   0x4   :  { %1865 = vmatpush1.bf16.msra.mxu1 %v2569_v3  ;;  %1825 = vmatprep.subr.bf16.mxu0 %v2570_v4  ;;  %v2575_v7 = vld [vmem:[%s4004_s1 + $0x160] ss:$8 sps:$4 sm:$0xff]   ;;  %v2578_v9 = vld [vmem:[%s4004_s1 + $0x154] ss:$8 sps:$4 sm:$0xff]   ;;  %v2581_v11 = vld [vmem:[%s4004_s1 + $0x150] ss:$8 sps:$4 sm:$0xff]  }
   0x5   :  { %1866 = vmatprep.subr.bf16.mxu1 %v2572_v5  ;;  %v2582_v12 = vld [vmem:[%s4004_s1 + $0x44] ss:$8 sps:$4 sm:$0xff]   ;;  %v2586_v14 = vld [vmem:[%s4004_s1 + $0x40] ss:$8 sps:$4 sm:$0xff]   ;;  %v2588_v16 = vld [vmem:[%s4004_s1 + $0x34] ss:$8 sps:$4 sm:$0xff]  }
   0x6   :  { %v2584_v13 = vld [vmem:[%s4004_s1 + $0x144] ss:$8 sps:$4 sm:$0xff]   ;;  %v2587_v15 = vld [vmem:[%s4004_s1 + $0x140] ss:$8 sps:$4 sm:$0xff]   ;;  %v2590_v17 = vld [vmem:[%s4004_s1 + $0x134] ss:$8 sps:$4 sm:$0xff]  }
   0x7   :  { %1826 = vmatpush1.bf16.msra.mxu0 %v2574_v6  ;;  %v2592_v18 = vld [vmem:[%s4004_s1 + $0x30] ss:$8 sps:$4 sm:$0xff]   ;;  %v2594_v20 = vld [vmem:[%s4004_s1 + $0x24] ss:$8 sps:$4 sm:$0xff]   ;;  %v2598_v22 = vld [vmem:[%s4004_s1 + $0x20] ss:$8 sps:$4 sm:$0xff]  }
   0x8   :  { %1867 = vmatpush1.bf16.msra.mxu1 %v2575_v7  ;;  %1827 = vmatprep.subr.bf16.mxu0 %v2576_v8  ;;  %v2593_v19 = vld [vmem:[%s4004_s1 + $0x130] ss:$8 sps:$4 sm:$0xff]   ;;  %v2596_v21 = vld [vmem:[%s4004_s1 + $0x124] ss:$8 sps:$4 sm:$0xff]   ;;  %v2599_v23 = vld [vmem:[%s4004_s1 + $0x120] ss:$8 sps:$4 sm:$0xff]  }
   0x9   :  { %1868 = vmatprep.subr.bf16.mxu1 %v2578_v9  ;;  %v2600_v24 = vld [vmem:[%s4004_s1 + $0x14] ss:$8 sps:$4 sm:$0xff]   ;;  %v2604_v26 = vld [vmem:[%s4004_s1 + $0x10] ss:$8 sps:$4 sm:$0xff]   ;;  %v2606_v28 = vld [vmem:[%s4004_s1 + $0x4] ss:$8 sps:$4 sm:$0xff]  }
   0xa   :  { %v2602_v25 = vld [vmem:[%s4004_s1 + $0x114] ss:$8 sps:$4 sm:$0xff]   ;;  %v2605_v27 = vld [vmem:[%s4004_s1 + $0x110] ss:$8 sps:$4 sm:$0xff]   ;;  %v2608_v29 = vld [vmem:[%s4004_s1 + $0x104] ss:$8 sps:$4 sm:$0xff]  }
   0xb   :  { %1828 = vmatpush1.bf16.msra.mxu0 %v2580_v10  ;;  %v2610_v30 = vld [vmem:[%s4004_s1] ss:$8 sps:$4 sm:$0xff]   ;;  %v2612_v32 = vld [vmem:[%s4004_s1 + $0xf4] ss:$8 sps:$4 sm:$0xff]   ;;  %v2616_v34 = vld [vmem:[%s4004_s1 + $0xf0] ss:$8 sps:$4 sm:$0xff]  }
   0xc   :  { %1869 = vmatpush1.bf16.msra.mxu1 %v2581_v11  ;;  %1829 = vmatprep.subr.bf16.mxu0 %v2582_v12  ;;  %v2611_v31 = vld [vmem:[%s4004_s1 + $0x100] ss:$8 sps:$4 sm:$0xff]   ;;  %v2614_v33 = vld [vmem:[%s4004_s1 + $0x1f4] ss:$8 sps:$4 sm:$0xff]   ;;  %v2617_v35 = vld [vmem:[%s4004_s1 + $0x1f0] ss:$8 sps:$4 sm:$0xff]  }
   0xd   :  { %1870 = vmatprep.subr.bf16.mxu1 %v2584_v13  ;;  %v2618_v36 = vld [vmem:[%s4004_s1 + $0xe4] ss:$8 sps:$4 sm:$0xff]   ;;  %v2622_v38 = vld [vmem:[%s4004_s1 + $0xe0] ss:$8 sps:$4 sm:$0xff]   ;;  %v2624_v40 = vld [vmem:[%s4004_s1 + $0xd4] ss:$8 sps:$4 sm:$0xff]  }
   0xe   :  { %v2620_v37 = vld [vmem:[%s4004_s1 + $0x1e4] ss:$8 sps:$4 sm:$0xff]   ;;  %v2623_v39 = vld [vmem:[%s4004_s1 + $0x1e0] ss:$8 sps:$4 sm:$0xff]   ;;  %v2626_v41 = vld [vmem:[%s4004_s1 + $0x1d4] ss:$8 sps:$4 sm:$0xff]  }
   0xf   :  { %1830 = vmatpush1.bf16.msra.mxu0 %v2586_v14  ;;  %v2628_v42 = vld [vmem:[%s4004_s1 + $0xd0] ss:$8 sps:$4 sm:$0xff]   ;;  %v2630_v44 = vld [vmem:[%s4004_s1 + $0xc4] ss:$8 sps:$4 sm:$0xff]   ;;  %v2634_v49 = vld [vmem:[%s4004_s1 + $0xc0] ss:$8 sps:$4 sm:$0xff]  }
  0x10   :  { %1871 = vmatpush1.bf16.msra.mxu1 %v2587_v15  ;;  %1831 = vmatprep.subr.bf16.mxu0 %v2588_v16  ;;  %v2629_v43 = vld [vmem:[%s4004_s1 + $0x1d0] ss:$8 sps:$4 sm:$0xff]   ;;  %v2632_v45 = vld [vmem:[%s4004_s1 + $0x1c4] ss:$8 sps:$4 sm:$0xff]   ;;  %v2635_v50 = vld [vmem:[%s4004_s1 + $0x1c0] ss:$8 sps:$4 sm:$0xff]  }
  0x11   :  { %1872 = vmatprep.subr.bf16.mxu1 %v2590_v17  ;;  %v23_v46 = vld [vmem:[%s4005_s0] sm:$0xff]  ;;  %v24_v48 = vld [vmem:[%s4005_s0 + $0x8] sm:$0xff]  ;;  %v2636_v52 = vld [vmem:[%s4004_s1 + $0xb4] ss:$8 sps:$4 sm:$0xff]  }
  0x12   :  { %v2256_v47 = vcombine.high %v23_v46, %v23_v46  ;;  %v2258_v51 = vcombine.high %v24_v48, %v24_v48  ;;  %v2638_v53 = vld [vmem:[%s4004_s1 + $0x1b4] ss:$8 sps:$4 sm:$0xff]   ;;  %v2640_v54 = vld [vmem:[%s4004_s1 + $0xb0] ss:$8 sps:$4 sm:$0xff]   ;;  %v2642_v56 = vld [vmem:[%s4004_s1 + $0xa4] ss:$8 sps:$4 sm:$0xff]   ;;  %v2255_v6 = vcombine.low %v23_v46, %v23_v46  ;;  %v2257_v7 = vcombine.low %v24_v48, %v24_v48 }
  0x13   :  { %1832 = vmatpush1.bf16.msra.mxu0 %v2592_v18  ;;  %v2641_v55 = vld [vmem:[%s4004_s1 + $0x1b0] ss:$8 sps:$4 sm:$0xff]   ;;  %v2644_v57 = vld [vmem:[%s4004_s1 + $0x1a4] ss:$8 sps:$4 sm:$0xff]   ;;  %v2646_v58 = vld [vmem:[%s4004_s1 + $0xa0] ss:$8 sps:$4 sm:$0xff]  }
  0x14   :  { %1873 = vmatpush1.bf16.msra.mxu1 %v2593_v19  ;;  %1833 = vmatprep.subr.bf16.mxu0 %v2594_v20  ;;  %v2647_v59 = vld [vmem:[%s4004_s1 + $0x1a0] ss:$8 sps:$4 sm:$0xff]   ;;  %v2648_v60 = vld [vmem:[%s4004_s1 + $0x94] ss:$8 sps:$4 sm:$0xff]   ;;  %v2652_v62 = vld [vmem:[%s4004_s1 + $0x90] ss:$8 sps:$4 sm:$0xff]  }
  0x15   :  { %1874 = vmatprep.subr.bf16.mxu1 %v2596_v21  ;;  %1855 = vmatprep.mubr.bf16.mxu0 %v2256_v47  ;;  %v2650_v61 = vld [vmem:[%s4004_s1 + $0x194] ss:$8 sps:$4 sm:$0xff]   ;;  %v2653_v63 = vld [vmem:[%s4004_s1 + $0x190] ss:$8 sps:$4 sm:$0xff]   ;;  %v2654_v0 = vld [vmem:[%s4004_s1 + $0x84] ss:$8 sps:$4 sm:$0xff]  }
  0x16   :  { %1896 = vmatprep.mubr.bf16.mxu1 %v2258_v51  ;;  %v2656_v1 = vld [vmem:[%s4004_s1 + $0x184] ss:$8 sps:$4 sm:$0xff]   ;;  %v2658_v2 = vld [vmem:[%s4004_s1 + $0x80] ss:$8 sps:$4 sm:$0xff]   ;;  %v2666_v4 = vld [vmem:[%s4004_s1 + $0x274] ss:$8 sps:$4 sm:$0xff]  }
  0x17   :  { %1834 = vmatpush1.bf16.msra.mxu0 %v2598_v22  ;;  %v2659_v3 = vld [vmem:[%s4004_s1 + $0x180] ss:$8 sps:$4 sm:$0xff]   ;;  %v2669_v5 = vld [vmem:[%s4004_s1 + $0x374] ss:$8 sps:$4 sm:$0xff]   ;;  %v2664_v8 = vld [vmem:[%s4004_s1 + $0x270] ss:$8 sps:$4 sm:$0xff]  }
  0x18   :  { %1875 = vmatpush1.bf16.msra.mxu1 %v2599_v23  ;;  %1835 = vmatprep.subr.bf16.mxu0 %v2600_v24  ;;  %v2667_v9 = vld [vmem:[%s4004_s1 + $0x370] ss:$8 sps:$4 sm:$0xff]   ;;  %v2672_v10 = vld [vmem:[%s4004_s1 + $0x264] ss:$8 sps:$4 sm:$0xff]   ;;  %v2670_v12 = vld [vmem:[%s4004_s1 + $0x260] ss:$8 sps:$4 sm:$0xff]  }
  0x19   :  { %1876 = vmatprep.subr.bf16.mxu1 %v2602_v25  ;;  %v2675_v11 = vld [vmem:[%s4004_s1 + $0x364] ss:$8 sps:$4 sm:$0xff]   ;;  %v2673_v13 = vld [vmem:[%s4004_s1 + $0x360] ss:$8 sps:$4 sm:$0xff]   ;;  %v2678_v14 = vld [vmem:[%s4004_s1 + $0x254] ss:$8 sps:$4 sm:$0xff]  }
  0x1a   :  { %v2681_v15 = vld [vmem:[%s4004_s1 + $0x354] ss:$8 sps:$4 sm:$0xff]   ;;  %v2676_v16 = vld [vmem:[%s4004_s1 + $0x250] ss:$8 sps:$4 sm:$0xff]   ;;  %v2684_v18 = vld [vmem:[%s4004_s1 + $0x244] ss:$8 sps:$4 sm:$0xff]  }
  0x1b   :  { %1836 = vmatpush1.bf16.msra.mxu0 %v2604_v26  ;;  %v2679_v17 = vld [vmem:[%s4004_s1 + $0x350] ss:$8 sps:$4 sm:$0xff]   ;;  %v2687_v19 = vld [vmem:[%s4004_s1 + $0x344] ss:$8 sps:$4 sm:$0xff]   ;;  %v2682_v20 = vld [vmem:[%s4004_s1 + $0x240] ss:$8 sps:$4 sm:$0xff]  }
  0x1c   :  { %1877 = vmatpush1.bf16.msra.mxu1 %v2605_v27  ;;  %1837 = vmatprep.subr.bf16.mxu0 %v2606_v28  ;;  %v2685_v21 = vld [vmem:[%s4004_s1 + $0x340] ss:$8 sps:$4 sm:$0xff]   ;;  %v2690_v22 = vld [vmem:[%s4004_s1 + $0x234] ss:$8 sps:$4 sm:$0xff]   ;;  %v2688_v24 = vld [vmem:[%s4004_s1 + $0x230] ss:$8 sps:$4 sm:$0xff]  }
  0x1d   :  { %1878 = vmatprep.subr.bf16.mxu1 %v2608_v29  ;;  %v2693_v23 = vld [vmem:[%s4004_s1 + $0x334] ss:$8 sps:$4 sm:$0xff]   ;;  %v2691_v25 = vld [vmem:[%s4004_s1 + $0x330] ss:$8 sps:$4 sm:$0xff]   ;;  %v2696_v26 = vld [vmem:[%s4004_s1 + $0x224] ss:$8 sps:$4 sm:$0xff]  }
  0x1e   :  { %v2699_v27 = vld [vmem:[%s4004_s1 + $0x324] ss:$8 sps:$4 sm:$0xff]   ;;  %v2694_v28 = vld [vmem:[%s4004_s1 + $0x220] ss:$8 sps:$4 sm:$0xff]   ;;  %v2729_v51 = vld [vmem:[%s4004_s1 + $0x3d4] ss:$8 sps:$4 sm:$0xff]  }
  0x1f   :  { %1838 = vmatpush1.bf16.msra.mxu0 %v2610_v30  ;;  %v2697_v29 = vld [vmem:[%s4004_s1 + $0x320] ss:$8 sps:$4 sm:$0xff]   ;;  %v2702_v30 = vld [vmem:[%s4004_s1 + $0x214] ss:$8 sps:$4 sm:$0xff]   ;;  %v2720_v46 = vld [vmem:[%s4004_s1 + $0x2e4] ss:$8 sps:$4 sm:$0xff]  }
  0x20   :  { %1879 = vmatpush1.bf16.msra.mxu1 %v2611_v31  ;;  %1839 = vmatprep.subr.bf16.mxu0 %v2612_v32  ;;  %v2705_v31 = vld [vmem:[%s4004_s1 + $0x314] ss:$8 sps:$4 sm:$0xff]   ;;  %v2723_v47 = vld [vmem:[%s4004_s1 + $0x3e4] ss:$8 sps:$4 sm:$0xff]   ;;  %v2718_v48 = vld [vmem:[%s4004_s1 + $0x2e0] ss:$8 sps:$4 sm:$0xff]  }
  0x21   :  { %1880 = vmatprep.subr.bf16.mxu1 %v2614_v33  ;;  %v3329_v32 = vld [vmem:[%s4005_s0 + $0x10] sm:$0xff] }
  0x22   :  { %v2700_v33 = vld [vmem:[%s4004_s1 + $0x210] ss:$8 sps:$4 sm:$0xff]  }
  0x23   :  { %1840 = vmatpush2.bf16.msra.mxu0 %v2616_v34  ;;  %v2703_v34 = vld [vmem:[%s4004_s1 + $0x310] ss:$8 sps:$4 sm:$0xff]  }
  0x24   :  { %1881 = vmatpush2.bf16.msra.mxu1 %v2617_v35  ;;  %1841 = vmatprep.subr.bf16.mxu0 %v2618_v36  ;;  %v2260_v35 = vcombine.high %v3329_v32, %v3329_v32  ;;  %v3342_v36 = vld [vmem:[%s4005_s0 + $0x18] sm:$0xff] }
  0x25   :  { %1882 = vmatprep.subr.bf16.mxu1 %v2620_v37  ;;  %v2708_v37 = vld [vmem:[%s4004_s1 + $0x204] ss:$8 sps:$4 sm:$0xff]  }
  0x27   :  { %1842 = vmatpush2.bf16.msra.mxu0 %v2622_v38  ;;  %v2262_v38 = vcombine.high %v3342_v36, %v3342_v36 }
  0x28   :  { %1883 = vmatpush2.bf16.msra.mxu1 %v2623_v39  ;;  %1843 = vmatprep.subr.bf16.mxu0 %v2624_v40  ;;  %v2711_v39 = vld [vmem:[%s4004_s1 + $0x304] ss:$8 sps:$4 sm:$0xff]   ;;  %v2706_v40 = vld [vmem:[%s4004_s1 + $0x200] ss:$8 sps:$4 sm:$0xff]  }
  0x29   :  { %1884 = vmatprep.subr.bf16.mxu1 %v2626_v41  ;;  %v2709_v41 = vld [vmem:[%s4004_s1 + $0x300] ss:$8 sps:$4 sm:$0xff]  }
  0x2b   :  { %1844 = vmatpush2.bf16.msra.mxu0 %v2628_v42  ;;  %v2714_v42 = vld [vmem:[%s4004_s1 + $0x2f4] ss:$8 sps:$4 sm:$0xff]  }
  0x2c   :  { %1885 = vmatpush2.bf16.msra.mxu1 %v2629_v43  ;;  %1845 = vmatprep.subr.bf16.mxu0 %v2630_v44  ;;  %v2717_v43 = vld [vmem:[%s4004_s1 + $0x3f4] ss:$8 sps:$4 sm:$0xff]   ;;  %v2712_v44 = vld [vmem:[%s4004_s1 + $0x2f0] ss:$8 sps:$4 sm:$0xff]  }
  0x2d   :  { %1886 = vmatprep.subr.bf16.mxu1 %v2632_v45  ;;  %v2715_v45 = vld [vmem:[%s4004_s1 + $0x3f0] ss:$8 sps:$4 sm:$0xff]  }
  0x2f   :  { %1846 = vmatpush2.bf16.msra.mxu0 %v2634_v49  ;;  %v2721_v49 = vld [vmem:[%s4004_s1 + $0x3e0] ss:$8 sps:$4 sm:$0xff]  }
  0x30   :  { %1887 = vmatpush2.bf16.msra.mxu1 %v2635_v50  ;;  %1847 = vmatprep.subr.bf16.mxu0 %v2636_v52  ;;  %v2726_v50 = vld [vmem:[%s4004_s1 + $0x2d4] ss:$8 sps:$4 sm:$0xff]   ;;  %v2724_v52 = vld [vmem:[%s4004_s1 + $0x2d0] ss:$8 sps:$4 sm:$0xff]  }
  0x31   :  { %1888 = vmatprep.subr.bf16.mxu1 %v2638_v53  ;;  %v2727_v53 = vld [vmem:[%s4004_s1 + $0x3d0] ss:$8 sps:$4 sm:$0xff]  }
  0x33   :  { %1848 = vmatpush2.bf16.msra.mxu0 %v2640_v54  ;;  %v2732_v54 = vld [vmem:[%s4004_s1 + $0x2c4] ss:$8 sps:$4 sm:$0xff]  }
  0x34   :  { %1889 = vmatpush2.bf16.msra.mxu1 %v2641_v55  ;;  %1849 = vmatprep.subr.bf16.mxu0 %v2642_v56  ;;  %v2735_v55 = vld [vmem:[%s4004_s1 + $0x3c4] ss:$8 sps:$4 sm:$0xff]   ;;  %v2730_v56 = vld [vmem:[%s4004_s1 + $0x2c0] ss:$8 sps:$4 sm:$0xff]  }
  0x35   :  { %1890 = vmatprep.subr.bf16.mxu1 %v2644_v57  ;;  %v2733_v57 = vld [vmem:[%s4004_s1 + $0x3c0] ss:$8 sps:$4 sm:$0xff]  }
  0x37   :  { %1850 = vmatpush2.bf16.msra.mxu0 %v2646_v58  ;;  %v2738_v58 = vld [vmem:[%s4004_s1 + $0x2b4] ss:$8 sps:$4 sm:$0xff]  }
  0x38   :  { %1891 = vmatpush2.bf16.msra.mxu1 %v2647_v59  ;;  %1851 = vmatprep.subr.bf16.mxu0 %v2648_v60  ;;  %v2741_v59 = vld [vmem:[%s4004_s1 + $0x3b4] ss:$8 sps:$4 sm:$0xff]   ;;  %v2736_v60 = vld [vmem:[%s4004_s1 + $0x2b0] ss:$8 sps:$4 sm:$0xff]  }
  0x39   :  { %1892 = vmatprep.subr.bf16.mxu1 %v2650_v61  ;;  %v2739_v61 = vld [vmem:[%s4004_s1 + $0x3b0] ss:$8 sps:$4 sm:$0xff]  }
  0x3b   :  { %1852 = vmatpush2.bf16.msra.mxu0 %v2652_v62  ;;  %v2744_v62 = vld [vmem:[%s4004_s1 + $0x2a4] ss:$8 sps:$4 sm:$0xff]  }
  0x3c   :  { %1893 = vmatpush2.bf16.msra.mxu1 %v2653_v63  ;;  %1853 = vmatprep.subr.bf16.mxu0 %v2654_v0  ;;  %v2747_v63 = vld [vmem:[%s4004_s1 + $0x3a4] ss:$8 sps:$4 sm:$0xff]   ;;  %v2742_v0 = vld [vmem:[%s4004_s1 + $0x2a0] ss:$8 sps:$4 sm:$0xff]  }
  0x3d   :  { %1894 = vmatprep.subr.bf16.mxu1 %v2656_v1  ;;  %v2745_v1 = vld [vmem:[%s4004_s1 + $0x3a0] ss:$8 sps:$4 sm:$0xff]  }
  0x3f   :  { %1854 = vmatpush2.bf16.msra.mxu0 %v2658_v2  ;;  %v2750_v2 = vld [vmem:[%s4004_s1 + $0x294] ss:$8 sps:$4 sm:$0xff]  }
  0x40   :  { %1895 = vmatpush2.bf16.msra.mxu1 %v2659_v3  ;;  %1905 = vmatprep.subr.bf16.mxu0 %v2666_v4  ;;  %v2753_v3 = vld [vmem:[%s4004_s1 + $0x394] ss:$8 sps:$4 sm:$0xff]   ;;  %v2748_v4 = vld [vmem:[%s4004_s1 + $0x290] ss:$8 sps:$4 sm:$0xff]  }
  0x41   :  { %1946 = vmatprep.subr.bf16.mxu1 %v2669_v5  ;;  %v2751_v5 = vld [vmem:[%s4004_s1 + $0x390] ss:$8 sps:$4 sm:$0xff]  }
  0x42   :  { %1856 = vmatmul.mubr.bf16.vlgmr.msra.gmra.mxu0 %v2255_v6  ;;  %v2756_v6 = vld [vmem:[%s4004_s1 + $0x284] ss:$8 sps:$4 sm:$0xff]  }
  0x43   :  { %1897 = vmatmul.mubr.bf16.vlgmr.msra.gmra.mxu1 %v2257_v7  ;;  %1906 = vmatpush1.bf16.msra.mxu0 %v2664_v8  ;;  %v2759_v7 = vld [vmem:[%s4004_s1 + $0x384] ss:$8 sps:$4 sm:$0xff]   ;;  %v2754_v8 = vld [vmem:[%s4004_s1 + $0x280] ss:$8 sps:$4 sm:$0xff]  }
  0x44   :  { %1947 = vmatpush1.bf16.msra.mxu1 %v2667_v9  ;;  %1907 = vmatprep.subr.bf16.mxu0 %v2672_v10  ;;  %v2757_v9 = vld [vmem:[%s4004_s1 + $0x380] ss:$8 sps:$4 sm:$0xff]   ;;  %v2764_v10 = vld [vmem:[%s4004_s1 + $0x474] ss:$8 sps:$4 sm:$0xff]  }
  0x45   :  { %1948 = vmatprep.subr.bf16.mxu1 %v2675_v11  ;;  %1937 = vmatprep.mubr.bf16.mxu0 %v2260_v35  ;;  %v2769_v11 = vld [vmem:[%s4004_s1 + $0x574] ss:$8 sps:$4 sm:$0xff]   ;;  %v2791_v35 = vld [vmem:[%s4004_s1 + $0x530] ss:$8 sps:$4 sm:$0xff]  }
  0x46   :  { %1978 = vmatprep.mubr.bf16.mxu1 %v2262_v38  ;;  %v2794_v38 = vld [vmem:[%s4004_s1 + $0x420] ss:$8 sps:$4 sm:$0xff]  }
  0x47   :  { %1908 = vmatpush1.bf16.msra.mxu0 %v2670_v12  ;;  %v2259_v12 = vcombine.low %v3329_v32, %v3329_v32  ;;  %v2790_v32 = vld [vmem:[%s4004_s1 + $0x434] ss:$8 sps:$4 sm:$0xff]  }
  0x48   :  { %1949 = vmatpush1.bf16.msra.mxu1 %v2673_v13  ;;  %1909 = vmatprep.subr.bf16.mxu0 %v2678_v14  ;;  %v2762_v13 = vld [vmem:[%s4004_s1 + $0x470] ss:$8 sps:$4 sm:$0xff]   ;;  %v2261_v14 = vcombine.low %v3342_v36, %v3342_v36  ;;  %v2796_v36 = vld [vmem:[%s4004_s1 + $0x424] ss:$8 sps:$4 sm:$0xff]  }
  0x49   :  { %1950 = vmatprep.subr.bf16.mxu1 %v2681_v15  ;;  %v2767_v15 = vld [vmem:[%s4004_s1 + $0x570] ss:$8 sps:$4 sm:$0xff]  }
  0x4b   :  { %1910 = vmatpush1.bf16.msra.mxu0 %v2676_v16  ;;  %v2772_v16 = vld [vmem:[%s4004_s1 + $0x464] ss:$8 sps:$4 sm:$0xff]  }
  0x4c   :  { %1951 = vmatpush1.bf16.msra.mxu1 %v2679_v17  ;;  %1911 = vmatprep.subr.bf16.mxu0 %v2684_v18  ;;  %v2775_v17 = vld [vmem:[%s4004_s1 + $0x564] ss:$8 sps:$4 sm:$0xff]  }
  0x4d   :  { %1952 = vmatprep.subr.bf16.mxu1 %v2687_v19  ;;  %v3479_v18 = vld [vmem:[%s4005_s0 + $0x20] sm:$0xff] }
  0x4e   :  { %v2264_v19 = vcombine.high %v3479_v18, %v3479_v18 }
  0x4f   :  { %1912 = vmatpush1.bf16.msra.mxu0 %v2682_v20  ;;  %v3486_v20 = vld [vmem:[%s4005_s0 + $0x28] sm:$0xff] }
  0x50   :  { %1953 = vmatpush1.bf16.msra.mxu1 %v2685_v21  ;;  %1913 = vmatprep.subr.bf16.mxu0 %v2690_v22  ;;  %v2770_v21 = vld [vmem:[%s4004_s1 + $0x460] ss:$8 sps:$4 sm:$0xff]  }
  0x51   :  { %1954 = vmatprep.subr.bf16.mxu1 %v2693_v23  ;;  %v2773_v22 = vld [vmem:[%s4004_s1 + $0x560] ss:$8 sps:$4 sm:$0xff]   ;;  %v2266_v23 = vcombine.high %v3486_v20, %v3486_v20 }
  0x53   :  { %1914 = vmatpush1.bf16.msra.mxu0 %v2688_v24  ;;  %v2778_v24 = vld [vmem:[%s4004_s1 + $0x454] ss:$8 sps:$4 sm:$0xff]  }
  0x54   :  { %1955 = vmatpush1.bf16.msra.mxu1 %v2691_v25  ;;  %1915 = vmatprep.subr.bf16.mxu0 %v2696_v26  ;;  %v2781_v25 = vld [vmem:[%s4004_s1 + $0x554] ss:$8 sps:$4 sm:$0xff]   ;;  %v2776_v26 = vld [vmem:[%s4004_s1 + $0x450] ss:$8 sps:$4 sm:$0xff]  }
  0x55   :  { %1956 = vmatprep.subr.bf16.mxu1 %v2699_v27  ;;  %v2779_v27 = vld [vmem:[%s4004_s1 + $0x550] ss:$8 sps:$4 sm:$0xff]  }
  0x57   :  { %1916 = vmatpush1.bf16.msra.mxu0 %v2694_v28  ;;  %v2784_v28 = vld [vmem:[%s4004_s1 + $0x444] ss:$8 sps:$4 sm:$0xff]  }
  0x58   :  { %1957 = vmatpush1.bf16.msra.mxu1 %v2697_v29  ;;  %1917 = vmatprep.subr.bf16.mxu0 %v2702_v30  ;;  %v2787_v29 = vld [vmem:[%s4004_s1 + $0x544] ss:$8 sps:$4 sm:$0xff]   ;;  %v2782_v30 = vld [vmem:[%s4004_s1 + $0x440] ss:$8 sps:$4 sm:$0xff]  }
  0x59   :  { %1958 = vmatprep.subr.bf16.mxu1 %v2705_v31  ;;  %v2785_v31 = vld [vmem:[%s4004_s1 + $0x540] ss:$8 sps:$4 sm:$0xff]  }
  0x5b   :  { %1918 = vmatpush1.bf16.msra.mxu0 %v2700_v33  ;;  %v2793_v33 = vld [vmem:[%s4004_s1 + $0x534] ss:$8 sps:$4 sm:$0xff]  }
  0x5c   :  { %1959 = vmatpush1.bf16.msra.mxu1 %v2703_v34  ;;  %1919 = vmatprep.subr.bf16.mxu0 %v2708_v37  ;;  %v2788_v34 = vld [vmem:[%s4004_s1 + $0x430] ss:$8 sps:$4 sm:$0xff]   ;;  %v2799_v37 = vld [vmem:[%s4004_s1 + $0x524] ss:$8 sps:$4 sm:$0xff]  }
  0x5d   :  { %1960 = vmatprep.subr.bf16.mxu1 %v2711_v39  ;;  %v2797_v39 = vld [vmem:[%s4004_s1 + $0x520] ss:$8 sps:$4 sm:$0xff]  }
  0x5f   :  { %1920 = vmatpush1.bf16.msra.mxu0 %v2706_v40  ;;  %v2802_v40 = vld [vmem:[%s4004_s1 + $0x414] ss:$8 sps:$4 sm:$0xff]  }
  0x60   :  { %1961 = vmatpush1.bf16.msra.mxu1 %v2709_v41  ;;  %1921 = vmatprep.subr.bf16.mxu0 %v2714_v42  ;;  %v2805_v41 = vld [vmem:[%s4004_s1 + $0x514] ss:$8 sps:$4 sm:$0xff]   ;;  %v2800_v42 = vld [vmem:[%s4004_s1 + $0x410] ss:$8 sps:$4 sm:$0xff]  }
  0x61   :  { %1962 = vmatprep.subr.bf16.mxu1 %v2717_v43  ;;  %v2803_v43 = vld [vmem:[%s4004_s1 + $0x510] ss:$8 sps:$4 sm:$0xff]  }
  0x63   :  { %1922 = vmatpush2.bf16.msra.mxu0 %v2712_v44  ;;  %v2808_v44 = vld [vmem:[%s4004_s1 + $0x404] ss:$8 sps:$4 sm:$0xff]  }
  0x64   :  { %1963 = vmatpush2.bf16.msra.mxu1 %v2715_v45  ;;  %1923 = vmatprep.subr.bf16.mxu0 %v2720_v46  ;;  %v2811_v45 = vld [vmem:[%s4004_s1 + $0x504] ss:$8 sps:$4 sm:$0xff]   ;;  %v2806_v46 = vld [vmem:[%s4004_s1 + $0x400] ss:$8 sps:$4 sm:$0xff]  }
  0x65   :  { %1964 = vmatprep.subr.bf16.mxu1 %v2723_v47  ;;  %v2809_v47 = vld [vmem:[%s4004_s1 + $0x500] ss:$8 sps:$4 sm:$0xff]  }
  0x67   :  { %1924 = vmatpush2.bf16.msra.mxu0 %v2718_v48  ;;  %v2814_v48 = vld [vmem:[%s4004_s1 + $0x4f4] ss:$8 sps:$4 sm:$0xff]  }
  0x68   :  { %1965 = vmatpush2.bf16.msra.mxu1 %v2721_v49  ;;  %1925 = vmatprep.subr.bf16.mxu0 %v2726_v50  ;;  %v2817_v49 = vld [vmem:[%s4004_s1 + $0x5f4] ss:$8 sps:$4 sm:$0xff]   ;;  %v2812_v50 = vld [vmem:[%s4004_s1 + $0x4f0] ss:$8 sps:$4 sm:$0xff]  }
  0x69   :  { %1966 = vmatprep.subr.bf16.mxu1 %v2729_v51  ;;  %v2815_v51 = vld [vmem:[%s4004_s1 + $0x5f0] ss:$8 sps:$4 sm:$0xff]  }
  0x6b   :  { %1926 = vmatpush2.bf16.msra.mxu0 %v2724_v52  ;;  %v2820_v52 = vld [vmem:[%s4004_s1 + $0x4e4] ss:$8 sps:$4 sm:$0xff]  }
  0x6c   :  { %1967 = vmatpush2.bf16.msra.mxu1 %v2727_v53  ;;  %1927 = vmatprep.subr.bf16.mxu0 %v2732_v54  ;;  %v2823_v53 = vld [vmem:[%s4004_s1 + $0x5e4] ss:$8 sps:$4 sm:$0xff]   ;;  %v2818_v54 = vld [vmem:[%s4004_s1 + $0x4e0] ss:$8 sps:$4 sm:$0xff]  }
  0x6d   :  { %1968 = vmatprep.subr.bf16.mxu1 %v2735_v55  ;;  %v2821_v55 = vld [vmem:[%s4004_s1 + $0x5e0] ss:$8 sps:$4 sm:$0xff]  }
  0x6f   :  { %1928 = vmatpush2.bf16.msra.mxu0 %v2730_v56  ;;  %v2826_v56 = vld [vmem:[%s4004_s1 + $0x4d4] ss:$8 sps:$4 sm:$0xff]  }
  0x70   :  { %1969 = vmatpush2.bf16.msra.mxu1 %v2733_v57  ;;  %1929 = vmatprep.subr.bf16.mxu0 %v2738_v58  ;;  %v2829_v57 = vld [vmem:[%s4004_s1 + $0x5d4] ss:$8 sps:$4 sm:$0xff]   ;;  %v2824_v58 = vld [vmem:[%s4004_s1 + $0x4d0] ss:$8 sps:$4 sm:$0xff]  }
  0x71   :  { %1970 = vmatprep.subr.bf16.mxu1 %v2741_v59  ;;  %v2827_v59 = vld [vmem:[%s4004_s1 + $0x5d0] ss:$8 sps:$4 sm:$0xff]  }
  0x73   :  { %1930 = vmatpush2.bf16.msra.mxu0 %v2736_v60  ;;  %v2832_v60 = vld [vmem:[%s4004_s1 + $0x4c4] ss:$8 sps:$4 sm:$0xff]  }
  0x74   :  { %1971 = vmatpush2.bf16.msra.mxu1 %v2739_v61  ;;  %1931 = vmatprep.subr.bf16.mxu0 %v2744_v62  ;;  %v2835_v61 = vld [vmem:[%s4004_s1 + $0x5c4] ss:$8 sps:$4 sm:$0xff]   ;;  %v2830_v62 = vld [vmem:[%s4004_s1 + $0x4c0] ss:$8 sps:$4 sm:$0xff]  }
  0x75   :  { %1972 = vmatprep.subr.bf16.mxu1 %v2747_v63  ;;  %v2833_v63 = vld [vmem:[%s4004_s1 + $0x5c0] ss:$8 sps:$4 sm:$0xff]  }
  0x77   :  { %1932 = vmatpush2.bf16.msra.mxu0 %v2742_v0  ;;  %v2838_v0 = vld [vmem:[%s4004_s1 + $0x4b4] ss:$8 sps:$4 sm:$0xff]  }
  0x78   :  { %1973 = vmatpush2.bf16.msra.mxu1 %v2745_v1  ;;  %1933 = vmatprep.subr.bf16.mxu0 %v2750_v2  ;;  %v2841_v1 = vld [vmem:[%s4004_s1 + $0x5b4] ss:$8 sps:$4 sm:$0xff]   ;;  %v2836_v2 = vld [vmem:[%s4004_s1 + $0x4b0] ss:$8 sps:$4 sm:$0xff]  }
  0x79   :  { %1974 = vmatprep.subr.bf16.mxu1 %v2753_v3  ;;  %v2839_v3 = vld [vmem:[%s4004_s1 + $0x5b0] ss:$8 sps:$4 sm:$0xff]  }
  0x7b   :  { %1934 = vmatpush2.bf16.msra.mxu0 %v2748_v4  ;;  %v2844_v4 = vld [vmem:[%s4004_s1 + $0x4a4] ss:$8 sps:$4 sm:$0xff]  }
  0x7c   :  { %1975 = vmatpush2.bf16.msra.mxu1 %v2751_v5  ;;  %1935 = vmatprep.subr.bf16.mxu0 %v2756_v6  ;;  %v2847_v5 = vld [vmem:[%s4004_s1 + $0x5a4] ss:$8 sps:$4 sm:$0xff]   ;;  %v2842_v6 = vld [vmem:[%s4004_s1 + $0x4a0] ss:$8 sps:$4 sm:$0xff]  }
  0x7d   :  { %1976 = vmatprep.subr.bf16.mxu1 %v2759_v7  ;;  %v2845_v7 = vld [vmem:[%s4004_s1 + $0x5a0] ss:$8 sps:$4 sm:$0xff]  }
  0x7f   :  { %1936 = vmatpush2.bf16.msra.mxu0 %v2754_v8  ;;  %v2850_v8 = vld [vmem:[%s4004_s1 + $0x494] ss:$8 sps:$4 sm:$0xff]  }
  0x80   :  { %1977 = vmatpush2.bf16.msra.mxu1 %v2757_v9  ;;  %1987 = vmatprep.subr.bf16.mxu0 %v2764_v10  ;;  %v2853_v9 = vld [vmem:[%s4004_s1 + $0x594] ss:$8 sps:$4 sm:$0xff]   ;;  %v2848_v10 = vld [vmem:[%s4004_s1 + $0x490] ss:$8 sps:$4 sm:$0xff]  }
  0x81   :  { %2028 = vmatprep.subr.bf16.mxu1 %v2769_v11  ;;  %v2851_v11 = vld [vmem:[%s4004_s1 + $0x590] ss:$8 sps:$4 sm:$0xff]  }
  0x82   :  { %1938 = vmatmul.mubr.bf16.vlgmr.msra.gmra.mxu0 %v2259_v12  ;;  %v2856_v12 = vld [vmem:[%s4004_s1 + $0x484] ss:$8 sps:$4 sm:$0xff]  }
  0x83   :  { %1979 = vmatmul.mubr.bf16.vlgmr.msra.gmra.mxu1 %v2261_v14  ;;  %1988 = vmatpush1.bf16.msra.mxu0 %v2762_v13  ;;  %v2859_v13 = vld [vmem:[%s4004_s1 + $0x584] ss:$8 sps:$4 sm:$0xff]   ;;  %v2854_v14 = vld [vmem:[%s4004_s1 + $0x480] ss:$8 sps:$4 sm:$0xff]  }
  0x84   :  { %2029 = vmatpush1.bf16.msra.mxu1 %v2767_v15  ;;  %1989 = vmatprep.subr.bf16.mxu0 %v2772_v16  ;;  %v2857_v15 = vld [vmem:[%s4004_s1 + $0x580] ss:$8 sps:$4 sm:$0xff]   ;;  %v2864_v16 = vld [vmem:[%s4004_s1 + $0x674] ss:$8 sps:$4 sm:$0xff]  }
  0x85   :  { %2030 = vmatprep.subr.bf16.mxu1 %v2775_v17  ;;  %2019 = vmatprep.mubr.bf16.mxu0 %v2264_v19  ;;  %v2869_v17 = vld [vmem:[%s4004_s1 + $0x774] ss:$8 sps:$4 sm:$0xff]   ;;  %v2862_v19 = vld [vmem:[%s4004_s1 + $0x670] ss:$8 sps:$4 sm:$0xff]  }
  0x86   :  { %2060 = vmatprep.mubr.bf16.mxu1 %v2266_v23  ;;  %v2265_v23 = vcombine.low %v3486_v20, %v3486_v20 }
  0x87   :  { %1990 = vmatpush1.bf16.msra.mxu0 %v2770_v21  ;;  %v2867_v21 = vld [vmem:[%s4004_s1 + $0x770] ss:$8 sps:$4 sm:$0xff]  }
  0x88   :  { %2031 = vmatpush1.bf16.msra.mxu1 %v2773_v22  ;;  %1991 = vmatprep.subr.bf16.mxu0 %v2778_v24  ;;  %v2263_v22 = vcombine.low %v3479_v18, %v3479_v18  ;;  %v3683_v24 = vld [vmem:[%s4005_s0 + $0x30] sm:$0xff]  ;;  %v2875_v18 = vld [vmem:[%s4004_s1 + $0x764] ss:$8 sps:$4 sm:$0xff]  }
  0x89   :  { %2032 = vmatprep.subr.bf16.mxu1 %v2781_v25  ;;  %v3688_v25 = vld [vmem:[%s4005_s0 + $0x38] sm:$0xff]  ;;  %v2268_v20 = vcombine.high %v3683_v24, %v3683_v24 }
  0x8b   :  { %1992 = vmatpush1.bf16.msra.mxu0 %v2776_v26  ;;  %v2872_v26 = vld [vmem:[%s4004_s1 + $0x664] ss:$8 sps:$4 sm:$0xff]  }
  0x8c   :  { %2033 = vmatpush1.bf16.msra.mxu1 %v2779_v27  ;;  %1993 = vmatprep.subr.bf16.mxu0 %v2784_v28  ;;  %v2270_v27 = vcombine.high %v3688_v25, %v3688_v25  ;;  %v2870_v28 = vld [vmem:[%s4004_s1 + $0x660] ss:$8 sps:$4 sm:$0xff]  }
  0x8d   :  { %2034 = vmatprep.subr.bf16.mxu1 %v2787_v29  ;;  %v2873_v29 = vld [vmem:[%s4004_s1 + $0x760] ss:$8 sps:$4 sm:$0xff]  }
  0x8f   :  { %1994 = vmatpush1.bf16.msra.mxu0 %v2782_v30  ;;  %v2878_v30 = vld [vmem:[%s4004_s1 + $0x654] ss:$8 sps:$4 sm:$0xff]  }
  0x90   :  { %2035 = vmatpush1.bf16.msra.mxu1 %v2785_v31  ;;  %1995 = vmatprep.subr.bf16.mxu0 %v2790_v32  ;;  %v2881_v31 = vld [vmem:[%s4004_s1 + $0x754] ss:$8 sps:$4 sm:$0xff]   ;;  %v2876_v32 = vld [vmem:[%s4004_s1 + $0x650] ss:$8 sps:$4 sm:$0xff]  }
  0x91   :  { %2036 = vmatprep.subr.bf16.mxu1 %v2793_v33  ;;  %v2879_v33 = vld [vmem:[%s4004_s1 + $0x750] ss:$8 sps:$4 sm:$0xff]  }
  0x93   :  { %1996 = vmatpush1.bf16.msra.mxu0 %v2788_v34  ;;  %v2884_v34 = vld [vmem:[%s4004_s1 + $0x644] ss:$8 sps:$4 sm:$0xff]  }
  0x94   :  { %2037 = vmatpush1.bf16.msra.mxu1 %v2791_v35  ;;  %1997 = vmatprep.subr.bf16.mxu0 %v2796_v36  ;;  %v2887_v35 = vld [vmem:[%s4004_s1 + $0x744] ss:$8 sps:$4 sm:$0xff]   ;;  %v2882_v36 = vld [vmem:[%s4004_s1 + $0x640] ss:$8 sps:$4 sm:$0xff]  }
  0x95   :  { %2038 = vmatprep.subr.bf16.mxu1 %v2799_v37  ;;  %v2885_v37 = vld [vmem:[%s4004_s1 + $0x740] ss:$8 sps:$4 sm:$0xff]  }
  0x97   :  { %1998 = vmatpush1.bf16.msra.mxu0 %v2794_v38  ;;  %v2890_v38 = vld [vmem:[%s4004_s1 + $0x634] ss:$8 sps:$4 sm:$0xff]  }
  0x98   :  { %2039 = vmatpush1.bf16.msra.mxu1 %v2797_v39  ;;  %1999 = vmatprep.subr.bf16.mxu0 %v2802_v40  ;;  %v2893_v39 = vld [vmem:[%s4004_s1 + $0x734] ss:$8 sps:$4 sm:$0xff]   ;;  %v2888_v40 = vld [vmem:[%s4004_s1 + $0x630] ss:$8 sps:$4 sm:$0xff]  }
  0x99   :  { %2040 = vmatprep.subr.bf16.mxu1 %v2805_v41  ;;  %v2891_v41 = vld [vmem:[%s4004_s1 + $0x730] ss:$8 sps:$4 sm:$0xff]  }
  0x9b   :  { %2000 = vmatpush1.bf16.msra.mxu0 %v2800_v42  ;;  %v2896_v42 = vld [vmem:[%s4004_s1 + $0x624] ss:$8 sps:$4 sm:$0xff]  }
  0x9c   :  { %2041 = vmatpush1.bf16.msra.mxu1 %v2803_v43  ;;  %2001 = vmatprep.subr.bf16.mxu0 %v2808_v44  ;;  %v2899_v43 = vld [vmem:[%s4004_s1 + $0x724] ss:$8 sps:$4 sm:$0xff]   ;;  %v2894_v44 = vld [vmem:[%s4004_s1 + $0x620] ss:$8 sps:$4 sm:$0xff]  }
  0x9d   :  { %2042 = vmatprep.subr.bf16.mxu1 %v2811_v45  ;;  %v2897_v45 = vld [vmem:[%s4004_s1 + $0x720] ss:$8 sps:$4 sm:$0xff]  }
  0x9f   :  { %2002 = vmatpush1.bf16.msra.mxu0 %v2806_v46  ;;  %v2902_v46 = vld [vmem:[%s4004_s1 + $0x614] ss:$8 sps:$4 sm:$0xff]  }
  0xa0   :  { %2043 = vmatpush1.bf16.msra.mxu1 %v2809_v47  ;;  %2003 = vmatprep.subr.bf16.mxu0 %v2814_v48  ;;  %v2905_v47 = vld [vmem:[%s4004_s1 + $0x714] ss:$8 sps:$4 sm:$0xff]   ;;  %v2900_v48 = vld [vmem:[%s4004_s1 + $0x610] ss:$8 sps:$4 sm:$0xff]  }
  0xa1   :  { %2044 = vmatprep.subr.bf16.mxu1 %v2817_v49  ;;  %v2903_v49 = vld [vmem:[%s4004_s1 + $0x710] ss:$8 sps:$4 sm:$0xff]  }
  0xa3   :  { %2004 = vmatpush2.bf16.msra.mxu0 %v2812_v50  ;;  %v2908_v50 = vld [vmem:[%s4004_s1 + $0x604] ss:$8 sps:$4 sm:$0xff]  }
  0xa4   :  { %2045 = vmatpush2.bf16.msra.mxu1 %v2815_v51  ;;  %2005 = vmatprep.subr.bf16.mxu0 %v2820_v52  ;;  %v2911_v51 = vld [vmem:[%s4004_s1 + $0x704] ss:$8 sps:$4 sm:$0xff]   ;;  %v2906_v52 = vld [vmem:[%s4004_s1 + $0x600] ss:$8 sps:$4 sm:$0xff]  }
  0xa5   :  { %2046 = vmatprep.subr.bf16.mxu1 %v2823_v53  ;;  %v2909_v53 = vld [vmem:[%s4004_s1 + $0x700] ss:$8 sps:$4 sm:$0xff]  }
  0xa7   :  { %2006 = vmatpush2.bf16.msra.mxu0 %v2818_v54  ;;  %v2914_v54 = vld [vmem:[%s4004_s1 + $0x6f4] ss:$8 sps:$4 sm:$0xff]  }
  0xa8   :  { %2047 = vmatpush2.bf16.msra.mxu1 %v2821_v55  ;;  %2007 = vmatprep.subr.bf16.mxu0 %v2826_v56  ;;  %v2917_v55 = vld [vmem:[%s4004_s1 + $0x7f4] ss:$8 sps:$4 sm:$0xff]   ;;  %v2912_v56 = vld [vmem:[%s4004_s1 + $0x6f0] ss:$8 sps:$4 sm:$0xff]  }
  0xa9   :  { %2048 = vmatprep.subr.bf16.mxu1 %v2829_v57  ;;  %v2915_v57 = vld [vmem:[%s4004_s1 + $0x7f0] ss:$8 sps:$4 sm:$0xff]  }
  0xab   :  { %2008 = vmatpush2.bf16.msra.mxu0 %v2824_v58  ;;  %v2920_v58 = vld [vmem:[%s4004_s1 + $0x6e4] ss:$8 sps:$4 sm:$0xff]  }
  0xac   :  { %2049 = vmatpush2.bf16.msra.mxu1 %v2827_v59  ;;  %2009 = vmatprep.subr.bf16.mxu0 %v2832_v60  ;;  %v2923_v59 = vld [vmem:[%s4004_s1 + $0x7e4] ss:$8 sps:$4 sm:$0xff]   ;;  %v2918_v60 = vld [vmem:[%s4004_s1 + $0x6e0] ss:$8 sps:$4 sm:$0xff]  }
  0xad   :  { %2050 = vmatprep.subr.bf16.mxu1 %v2835_v61  ;;  %v2921_v61 = vld [vmem:[%s4004_s1 + $0x7e0] ss:$8 sps:$4 sm:$0xff]  }
  0xaf   :  { %2010 = vmatpush2.bf16.msra.mxu0 %v2830_v62  ;;  %v2926_v62 = vld [vmem:[%s4004_s1 + $0x6d4] ss:$8 sps:$4 sm:$0xff]  }
  0xb0   :  { %2051 = vmatpush2.bf16.msra.mxu1 %v2833_v63  ;;  %2011 = vmatprep.subr.bf16.mxu0 %v2838_v0  ;;  %v2929_v63 = vld [vmem:[%s4004_s1 + $0x7d4] ss:$8 sps:$4 sm:$0xff]   ;;  %v2924_v0 = vld [vmem:[%s4004_s1 + $0x6d0] ss:$8 sps:$4 sm:$0xff]  }
  0xb1   :  { %2052 = vmatprep.subr.bf16.mxu1 %v2841_v1  ;;  %v2927_v1 = vld [vmem:[%s4004_s1 + $0x7d0] ss:$8 sps:$4 sm:$0xff]  }
  0xb3   :  { %2012 = vmatpush2.bf16.msra.mxu0 %v2836_v2  ;;  %v2932_v2 = vld [vmem:[%s4004_s1 + $0x6c4] ss:$8 sps:$4 sm:$0xff]  }
  0xb4   :  { %2053 = vmatpush2.bf16.msra.mxu1 %v2839_v3  ;;  %2013 = vmatprep.subr.bf16.mxu0 %v2844_v4  ;;  %v2935_v3 = vld [vmem:[%s4004_s1 + $0x7c4] ss:$8 sps:$4 sm:$0xff]   ;;  %v2930_v4 = vld [vmem:[%s4004_s1 + $0x6c0] ss:$8 sps:$4 sm:$0xff]  }
  0xb5   :  { %2054 = vmatprep.subr.bf16.mxu1 %v2847_v5  ;;  %v2933_v5 = vld [vmem:[%s4004_s1 + $0x7c0] ss:$8 sps:$4 sm:$0xff]  }
  0xb7   :  { %2014 = vmatpush2.bf16.msra.mxu0 %v2842_v6  ;;  %v2938_v6 = vld [vmem:[%s4004_s1 + $0x6b4] ss:$8 sps:$4 sm:$0xff]  }
  0xb8   :  { %2055 = vmatpush2.bf16.msra.mxu1 %v2845_v7  ;;  %2015 = vmatprep.subr.bf16.mxu0 %v2850_v8  ;;  %v2941_v7 = vld [vmem:[%s4004_s1 + $0x7b4] ss:$8 sps:$4 sm:$0xff]   ;;  %v2936_v8 = vld [vmem:[%s4004_s1 + $0x6b0] ss:$8 sps:$4 sm:$0xff]  }
  0xb9   :  { %2056 = vmatprep.subr.bf16.mxu1 %v2853_v9  ;;  %v2939_v9 = vld [vmem:[%s4004_s1 + $0x7b0] ss:$8 sps:$4 sm:$0xff]  }
  0xbb   :  { %2016 = vmatpush2.bf16.msra.mxu0 %v2848_v10  ;;  %v2944_v10 = vld [vmem:[%s4004_s1 + $0x6a4] ss:$8 sps:$4 sm:$0xff]  }
  0xbc   :  { %2057 = vmatpush2.bf16.msra.mxu1 %v2851_v11  ;;  %2017 = vmatprep.subr.bf16.mxu0 %v2856_v12  ;;  %v2947_v11 = vld [vmem:[%s4004_s1 + $0x7a4] ss:$8 sps:$4 sm:$0xff]   ;;  %v2942_v12 = vld [vmem:[%s4004_s1 + $0x6a0] ss:$8 sps:$4 sm:$0xff]  }
  0xbd   :  { %2058 = vmatprep.subr.bf16.mxu1 %v2859_v13  ;;  %v2945_v13 = vld [vmem:[%s4004_s1 + $0x7a0] ss:$8 sps:$4 sm:$0xff]  }
  0xbf   :  { %2018 = vmatpush2.bf16.msra.mxu0 %v2854_v14  ;;  %v2950_v14 = vld [vmem:[%s4004_s1 + $0x694] ss:$8 sps:$4 sm:$0xff]  }
  0xc0   :  { %2059 = vmatpush2.bf16.msra.mxu1 %v2857_v15  ;;  %2069 = vmatprep.subr.bf16.mxu0 %v2864_v16  ;;  %v2953_v15 = vld [vmem:[%s4004_s1 + $0x794] ss:$8 sps:$4 sm:$0xff]   ;;  %v2948_v16 = vld [vmem:[%s4004_s1 + $0x690] ss:$8 sps:$4 sm:$0xff]  }
  0xc1   :  { %2110 = vmatprep.subr.bf16.mxu1 %v2869_v17  ;;  %v2951_v17 = vld [vmem:[%s4004_s1 + $0x790] ss:$8 sps:$4 sm:$0xff]  }
  0xc2   :  { %2020 = vmatmul.mubr.bf16.vlgmr.msra.gmra.mxu0 %v2263_v22  ;;  %v2954_v22 = vld [vmem:[%s4004_s1 + $0x680] ss:$8 sps:$4 sm:$0xff]  }
  0xc3   :  { %2061 = vmatmul.mubr.bf16.vlgmr.msra.gmra.mxu1 %v2265_v23  ;;  %2070 = vmatpush1.bf16.msra.mxu0 %v2862_v19  ;;  %v2956_v19 = vld [vmem:[%s4004_s1 + $0x684] ss:$8 sps:$4 sm:$0xff]   ;;  %v2957_v23 = vld [vmem:[%s4004_s1 + $0x780] ss:$8 sps:$4 sm:$0xff]  }
  0xc4   :  { %2111 = vmatpush1.bf16.msra.mxu1 %v2867_v21  ;;  %2071 = vmatprep.subr.bf16.mxu0 %v2872_v26  ;;  %v2959_v21 = vld [vmem:[%s4004_s1 + $0x784] ss:$8 sps:$4 sm:$0xff]   ;;  %v2964_v26 = vld [vmem:[%s4004_s1 + $0x874] ss:$8 sps:$4 sm:$0xff]  }
  0xc5   :  { %2112 = vmatprep.subr.bf16.mxu1 %v2875_v18  ;;  %2101 = vmatprep.mubr.bf16.mxu0 %v2268_v20  ;;  %v3880_v18 = vld [vmem:[%s4005_s0 + $0x40] sm:$0xff]  ;;  %v2267_v20 = vcombine.low %v3683_v24, %v3683_v24 }
  0xc6   :  { %2142 = vmatprep.mubr.bf16.mxu1 %v2270_v27  ;;  %v2269_v27 = vcombine.low %v3688_v25, %v3688_v25  ;;  %v2967_v25 = vld [vmem:[%s4004_s1 + $0x860] ss:$8 sps:$4 sm:$0xff]  }
  0xc7   :  { %2072 = vmatpush1.bf16.msra.mxu0 %v2870_v28  ;;  %v2962_v28 = vld [vmem:[%s4004_s1 + $0x870] ss:$8 sps:$4 sm:$0xff]  }
  0xc8   :  { %2113 = vmatpush1.bf16.msra.mxu1 %v2873_v29  ;;  %2073 = vmatprep.subr.bf16.mxu0 %v2878_v30  ;;  %v2272_v29 = vcombine.high %v3880_v18, %v3880_v18  ;;  %v2969_v30 = vld [vmem:[%s4004_s1 + $0x864] ss:$8 sps:$4 sm:$0xff]  }
  0xc9   :  { %2114 = vmatprep.subr.bf16.mxu1 %v2881_v31 }
  0xcb   :  { %2074 = vmatpush1.bf16.msra.mxu0 %v2876_v32 }
  0xcc   :  { %2115 = vmatpush1.bf16.msra.mxu1 %v2879_v33  ;;  %2075 = vmatprep.subr.bf16.mxu0 %v2884_v34 }
  0xcd   :  { %2116 = vmatprep.subr.bf16.mxu1 %v2887_v35  ;;  %v2972_v35 = vld [vmem:[%s4004_s1 + $0x854] ss:$8 sps:$4 sm:$0xff]  }
  0xcf   :  { %2076 = vmatpush1.bf16.msra.mxu0 %v2882_v36 }
  0xd0   :  { %2117 = vmatpush1.bf16.msra.mxu1 %v2885_v37  ;;  %2077 = vmatprep.subr.bf16.mxu0 %v2890_v38 }
  0xd1   :  { %2118 = vmatprep.subr.bf16.mxu1 %v2893_v39  ;;  %v2970_v39 = vld [vmem:[%s4004_s1 + $0x850] ss:$8 sps:$4 sm:$0xff]  }
  0xd3   :  { %2078 = vmatpush1.bf16.msra.mxu0 %v2888_v40 }
  0xd4   :  { %2119 = vmatpush1.bf16.msra.mxu1 %v2891_v41  ;;  %2079 = vmatprep.subr.bf16.mxu0 %v2896_v42  ;;  %v2975_v41 = vld [vmem:[%s4004_s1 + $0x844] ss:$8 sps:$4 sm:$0xff]  }
  0xd5   :  { %2120 = vmatprep.subr.bf16.mxu1 %v2899_v43  ;;  %v2973_v43 = vld [vmem:[%s4004_s1 + $0x840] ss:$8 sps:$4 sm:$0xff]  }
  0xd7   :  { %2080 = vmatpush1.bf16.msra.mxu0 %v2894_v44  ;;  %v2978_v44 = vld [vmem:[%s4004_s1 + $0x834] ss:$8 sps:$4 sm:$0xff]  }
  0xd8   :  { %2121 = vmatpush1.bf16.msra.mxu1 %v2897_v45  ;;  %2081 = vmatprep.subr.bf16.mxu0 %v2902_v46  ;;  %v2976_v45 = vld [vmem:[%s4004_s1 + $0x830] ss:$8 sps:$4 sm:$0xff]   ;;  %v2981_v46 = vld [vmem:[%s4004_s1 + $0x824] ss:$8 sps:$4 sm:$0xff]  }
  0xd9   :  { %2122 = vmatprep.subr.bf16.mxu1 %v2905_v47  ;;  %v2979_v47 = vld [vmem:[%s4004_s1 + $0x820] ss:$8 sps:$4 sm:$0xff]  }
  0xdb   :  { %2082 = vmatpush1.bf16.msra.mxu0 %v2900_v48  ;;  %v2984_v48 = vld [vmem:[%s4004_s1 + $0x814] ss:$8 sps:$4 sm:$0xff]  }
  0xdc   :  { %2123 = vmatpush1.bf16.msra.mxu1 %v2903_v49  ;;  %2083 = vmatprep.subr.bf16.mxu0 %v2908_v50  ;;  %v2982_v49 = vld [vmem:[%s4004_s1 + $0x810] ss:$8 sps:$4 sm:$0xff]   ;;  %v2987_v50 = vld [vmem:[%s4004_s1 + $0x804] ss:$8 sps:$4 sm:$0xff]  }
  0xdd   :  { %2124 = vmatprep.subr.bf16.mxu1 %v2911_v51  ;;  %v2985_v51 = vld [vmem:[%s4004_s1 + $0x800] ss:$8 sps:$4 sm:$0xff]  }
  0xdf   :  { %2084 = vmatpush1.bf16.msra.mxu0 %v2906_v52  ;;  %v2990_v52 = vld [vmem:[%s4004_s1 + $0x8f4] ss:$8 sps:$4 sm:$0xff]  }
  0xe0   :  { %2125 = vmatpush1.bf16.msra.mxu1 %v2909_v53  ;;  %2085 = vmatprep.subr.bf16.mxu0 %v2914_v54  ;;  %v2988_v53 = vld [vmem:[%s4004_s1 + $0x8f0] ss:$8 sps:$4 sm:$0xff]   ;;  %v2993_v54 = vld [vmem:[%s4004_s1 + $0x8e4] ss:$8 sps:$4 sm:$0xff]  }
  0xe1   :  { %2126 = vmatprep.subr.bf16.mxu1 %v2917_v55  ;;  %v2991_v55 = vld [vmem:[%s4004_s1 + $0x8e0] ss:$8 sps:$4 sm:$0xff]  }
  0xe3   :  { %2086 = vmatpush2.bf16.msra.mxu0 %v2912_v56  ;;  %v2996_v56 = vld [vmem:[%s4004_s1 + $0x8d4] ss:$8 sps:$4 sm:$0xff]  }
  0xe4   :  { %2127 = vmatpush2.bf16.msra.mxu1 %v2915_v57  ;;  %2087 = vmatprep.subr.bf16.mxu0 %v2920_v58  ;;  %v2994_v57 = vld [vmem:[%s4004_s1 + $0x8d0] ss:$8 sps:$4 sm:$0xff]   ;;  %v2999_v58 = vld [vmem:[%s4004_s1 + $0x8c4] ss:$8 sps:$4 sm:$0xff]  }
  0xe5   :  { %2128 = vmatprep.subr.bf16.mxu1 %v2923_v59  ;;  %v2997_v59 = vld [vmem:[%s4004_s1 + $0x8c0] ss:$8 sps:$4 sm:$0xff]  }
  0xe7   :  { %2088 = vmatpush2.bf16.msra.mxu0 %v2918_v60  ;;  %v3002_v60 = vld [vmem:[%s4004_s1 + $0x8b4] ss:$8 sps:$4 sm:$0xff]  }
  0xe8   :  { %2129 = vmatpush2.bf16.msra.mxu1 %v2921_v61  ;;  %2089 = vmatprep.subr.bf16.mxu0 %v2926_v62  ;;  %v3000_v61 = vld [vmem:[%s4004_s1 + $0x8b0] ss:$8 sps:$4 sm:$0xff]   ;;  %v3005_v62 = vld [vmem:[%s4004_s1 + $0x8a4] ss:$8 sps:$4 sm:$0xff]  }
  0xe9   :  { %2130 = vmatprep.subr.bf16.mxu1 %v2929_v63  ;;  %v3003_v63 = vld [vmem:[%s4004_s1 + $0x8a0] ss:$8 sps:$4 sm:$0xff]  }
  0xeb   :  { %2090 = vmatpush2.bf16.msra.mxu0 %v2924_v0  ;;  %v3008_v0 = vld [vmem:[%s4004_s1 + $0x894] ss:$8 sps:$4 sm:$0xff]  }
  0xec   :  { %2131 = vmatpush2.bf16.msra.mxu1 %v2927_v1  ;;  %2091 = vmatprep.subr.bf16.mxu0 %v2932_v2  ;;  %v3006_v1 = vld [vmem:[%s4004_s1 + $0x890] ss:$8 sps:$4 sm:$0xff]   ;;  %v3011_v2 = vld [vmem:[%s4004_s1 + $0x884] ss:$8 sps:$4 sm:$0xff]  }
  0xed   :  { %2132 = vmatprep.subr.bf16.mxu1 %v2935_v3  ;;  %v3009_v3 = vld [vmem:[%s4004_s1 + $0x880] ss:$8 sps:$4 sm:$0xff]  }
  0xef   :  { %2092 = vmatpush2.bf16.msra.mxu0 %v2930_v4  ;;  %v2271_v4 = vcombine.low %v3880_v18, %v3880_v18 }
  0xf0   :  { %2133 = vmatpush2.bf16.msra.mxu1 %v2933_v5  ;;  %2093 = vmatprep.subr.bf16.mxu0 %v2938_v6 }
  0xf1   :  { %2134 = vmatprep.subr.bf16.mxu1 %v2941_v7 }
  0xf3   :  { %2094 = vmatpush2.bf16.msra.mxu0 %v2936_v8 }
  0xf4   :  { %2135 = vmatpush2.bf16.msra.mxu1 %v2939_v9  ;;  %2095 = vmatprep.subr.bf16.mxu0 %v2944_v10 }
  0xf5   :  { %2136 = vmatprep.subr.bf16.mxu1 %v2947_v11 }
  0xf7   :  { %2096 = vmatpush2.bf16.msra.mxu0 %v2942_v12 }
  0xf8   :  { %2137 = vmatpush2.bf16.msra.mxu1 %v2945_v13  ;;  %2097 = vmatprep.subr.bf16.mxu0 %v2950_v14 }
  0xf9   :  { %2138 = vmatprep.subr.bf16.mxu1 %v2953_v15 }
  0xfb   :  { %2098 = vmatpush2.bf16.msra.mxu0 %v2948_v16 }
  0xfc   :  { %2139 = vmatpush2.bf16.msra.mxu1 %v2951_v17  ;;  %2099 = vmatprep.subr.bf16.mxu0 %v2956_v19 }
  0xfd   :  { %2140 = vmatprep.subr.bf16.mxu1 %v2959_v21 }
  0xff   :  { %2100 = vmatpush2.bf16.msra.mxu0 %v2954_v22 }
 0x100   :  { %2141 = vmatpush2.bf16.msra.mxu1 %v2957_v23  ;;  %2151 = vmatprep.subr.bf16.mxu0 %v2964_v26 }
 0x102   :  { %v1857_v31 = vpop.f32.mrf.mxu0  ;;  %2102 = vmatmul.mubr.bf16.vlgmr.msra.gmra.mxu0 %v2267_v20 }
 0x103   :  { %v1898_v32 = vpop.f32.mrf.mxu1  ;;  %2143 = vmatmul.mubr.bf16.vlgmr.msra.gmra.mxu1 %v2269_v27  ;;  %2152 = vmatpush1.bf16.msra.mxu0 %v2962_v28 }
 0x104   :  { %v3894_v24 = vadd.f32 %v1898_v32, %v1857_v31  ;;  %2183 = vmatprep.mubr.bf16.mxu0 %v2272_v29  ;;  %v1859_v33 = vpop.f32.mrf.mxu0  ;;  %2153 = vmatprep.subr.bf16.mxu0 %v2969_v30 }
 0x105   :  { %v1900_v34 = vpop.f32.mrf.mxu1 }
 0x106   :  { %v3902_v36 = vadd.f32 %v1900_v34, %v1859_v33  ;;  %v1861_v37 = vpop.f32.mrf.mxu0 }
 0x107   :  { %v1902_v38 = vpop.f32.mrf.mxu1  ;;  %2154 = vmatpush1.bf16.msra.mxu0 %v2967_v25 }
 0x108   :  { %v1862_v40 = vpop.f32.mrf.mxu0  ;;  %2155 = vmatprep.subr.bf16.mxu0 %v2972_v35 }
 0x109   :  { %v1903_v42 = vpop.f32.mrf.mxu1 }
 0x10a   :  { %v2192_v42 = vld [vmem:[%s4006_s2] sm:$0x3] }
 0x10b   :  { %2156 = vmatpush1.bf16.msra.mxu0 %v2970_v39  ;;  %v2194_v39 = vlaneseq }
 0x10c   :  { %2157 = vmatprep.subr.bf16.mxu0 %v2975_v41 }
 0x10d   :  { %v2195_v40 = vshrl.u32 %v2194_v39, 7 }
 0x10f   :  { %2158 = vmatpush1.bf16.msra.mxu0 %v2973_v43  ;;  %v2196_v41 = vsub.s32 0, %v2195_v40 }
 0x110   :  { %2159 = vmatprep.subr.bf16.mxu0 %v2978_v44  ;;  %v2225_v44 = vld [vmem:[%s4007_s4] sm:$0x3] }
 0x111   :  { %vm2226_vm0 = vcmp.gt.f32.partialorder %v2225_v44, 0.5 }
 0x113   :  { %2160 = vmatpush1.bf16.msra.mxu0 %v2976_v45  ;;  %v2200_v45 = vsub.s32 1, %v2195_v40 }
 0x114   :  { %2161 = vmatprep.subr.bf16.mxu0 %v2981_v46  ;;  %v2206_v46 = vld [vmem:[%s4008_s3] sm:$0x3] }
 0x117   :  { %2162 = vmatpush1.bf16.msra.mxu0 %v2979_v47  ;;  %v2197_v47 = vrot.slane %v2192_v42, %v2196_v41 }
 0x118   :  { %2163 = vmatprep.subr.bf16.mxu0 %v2984_v48  ;;  %v2220_v48 = vld [vmem:[%s4009_s5] sm:$0xff] }
 0x11b   :  { %2164 = vmatpush1.bf16.msra.mxu0 %v2982_v49 }
 0x11c   :  { %2165 = vmatprep.subr.bf16.mxu0 %v2987_v50 }
 0x11f   :  { %2166 = vmatpush1.bf16.msra.mxu0 %v2985_v51 }
 0x120   :  { %2167 = vmatprep.subr.bf16.mxu0 %v2990_v52  ;;  %v2211_v52 = vrot.slane %v2206_v46, %v2196_v41 }
 0x123   :  { %2168 = vmatpush2.bf16.msra.mxu0 %v2988_v53  ;;  %v2201_v53 = vrot.slane %v2192_v42, %v2200_v45 }
 0x124   :  { %2169 = vmatprep.subr.bf16.mxu0 %v2993_v54  ;;  %v2221_v54 = vunpack.c.l.bf16 %v2220_v48 }
 0x127   :  { %2170 = vmatpush2.bf16.msra.mxu0 %v2991_v55 }
 0x128   :  { %2171 = vmatprep.subr.bf16.mxu0 %v2996_v56 }
 0x12b   :  { %2172 = vmatpush2.bf16.msra.mxu0 %v2994_v57  ;;  %v3014_v57 = vmov 0  }
 0x12c   :  { %2173 = vmatprep.subr.bf16.mxu0 %v2999_v58  ;;  %v2229_v58 = vsel %vm2226_vm0, 1, %v3014_v57 }
 0x12f   :  { %2174 = vmatpush2.bf16.msra.mxu0 %v2997_v59 }
 0x130   :  { %2175 = vmatprep.subr.bf16.mxu0 %v3002_v60  ;;  %v2215_v60 = vrot.slane %v2206_v46, %v2200_v45 }
 0x133   :  { %2176 = vmatpush2.bf16.msra.mxu0 %v3000_v61 }
 0x134   :  { %2177 = vmatprep.subr.bf16.mxu0 %v3005_v62 }
 0x137   :  { %2178 = vmatpush2.bf16.msra.mxu0 %v3003_v63 }
 0x138   :  { %2179 = vmatprep.subr.bf16.mxu0 %v3008_v0  ;;  %v2222_v0 = vunpack.c.h.bf16 %v2220_v48 }
 0x13b   :  { %2180 = vmatpush2.bf16.msra.mxu0 %v3006_v1  ;;  %v2233_v1 = vrot.slane %v2229_v58, %v2196_v41 }
 0x13c   :  { %2181 = vmatprep.subr.bf16.mxu0 %v3011_v2  ;;  %v2237_v2 = vrot.slane %v2229_v58, %v2200_v45 }
 0x13d   :  { %vm2238_vm1 = vcmp.eq.s32.totalorder %v2233_v1, 1 }
 0x13e   :  { %vm2239_vm2 = vcmp.eq.s32.totalorder %v2237_v2, 1 }
 0x13f   :  { %2182 = vmatpush2.bf16.msra.mxu0 %v3009_v3 }
 0x142   :  { %v1939_v5 = vpop.f32.mrf.mxu0  ;;  %2184 = vmatmul.mubr.bf16.vlgmr.msra.gmra.mxu0 %v2271_v4 }
 0x143   :  { %v1980_v6 = vpop.f32.mrf.mxu1  ;;  %v1940_v7 = vadd.f32 %v1939_v5, %v3894_v24 }
 0x144   :  { %v1941_v8 = vpop.f32.mrf.mxu0 }
 0x145   :  { %v1982_v9 = vpop.f32.mrf.mxu1  ;;  %v1942_v10 = vadd.f32 %v1941_v8, %v3902_v36  ;;  %v1981_v11 = vadd.f32 %v1980_v6, %v1940_v7 }
 0x146   :  { %v1943_v12 = vpop.f32.mrf.mxu0 }
 0x147   :  { %v1984_v13 = vpop.f32.mrf.mxu1  ;;  %v1983_v14 = vadd.f32 %v1982_v9, %v1942_v10 }
 0x148   :  { %v1944_v15 = vpop.f32.mrf.mxu0 }
 0x149   :  { %v1985_v16 = vpop.f32.mrf.mxu1 }
 0x182   :  { %v2021_v17 = vpop.f32.mrf.mxu0 }
 0x183   :  { %v2062_v19 = vpop.f32.mrf.mxu1  ;;  %v2022_v21 = vadd.f32 %v2021_v17, %v1981_v11 }
 0x184   :  { %v2023_v22 = vpop.f32.mrf.mxu0 }
 0x185   :  { %v2064_v23 = vpop.f32.mrf.mxu1  ;;  %v2024_v26 = vadd.f32 %v2023_v22, %v1983_v14  ;;  %v2063_v18 = vadd.f32 %v2062_v19, %v2022_v21 }
 0x186   :  { %v2025_v20 = vpop.f32.mrf.mxu0 }
 0x187   :  { %v2066_v27 = vpop.f32.mrf.mxu1  ;;  %v2065_v28 = vadd.f32 %v2064_v23, %v2024_v26 }
 0x188   :  { %v2026_v29 = vpop.f32.mrf.mxu0 }
 0x189   :  { %v2067_v30 = vpop.f32.mrf.mxu1 }
 0x1c2   :  { %v2103_v31 = vpop.f32.mrf.mxu0 }
 0x1c3   :  { %v2144_v32 = vpop.f32.mrf.mxu1  ;;  %v2104_v24 = vadd.f32 %v2103_v31, %v2063_v18 }
 0x1c4   :  { %v2105_v25 = vpop.f32.mrf.mxu0 }
 0x1c5   :  { %v2146_v33 = vpop.f32.mrf.mxu1  ;;  %v2145_v34 = vadd.f32 %v2144_v32, %v2104_v24  ;;  %v2106_v43 = vadd.f32 %v2105_v25, %v2065_v28 }
 0x1c6   :  { %v2107_v35 = vpop.f32.mrf.mxu0 }
 0x1c7   :  { %v2148_v36 = vpop.f32.mrf.mxu1  ;;  %v2147_v50 = vadd.f32 %v2146_v33, %v2106_v43 }
 0x1c8   :  { %v2108_v37 = vpop.f32.mrf.mxu0 }
 0x1c9   :  { %v2149_v38 = vpop.f32.mrf.mxu1 }
 0x202   :  { %v2185_v49 = vpop.f32.mrf.mxu0 }
 0x203   :  { %v2186_v51 = vadd.f32 %v2185_v49, %v2145_v34 }
 0x204   :  { %v2187_v55 = vpop.f32.mrf.mxu0 }
 0x205   :  { %v2204_v56 = vmul.f32 %v2197_v47, %v2186_v51  ;;  %v2188_v59 = vadd.f32 %v2187_v55, %v2147_v50 }
 0x206   :  { %v2189_v61 = vpop.f32.mrf.mxu0 }
 0x207   :  { %v2218_v62 = vadd.f32 %v2211_v52, %v2204_v56  ;;  %v2205_v63 = vmul.f32 %v2201_v53, %v2188_v59 }
 0x208   :  { %v2190_v3 = vpop.f32.mrf.mxu0 }
 0x209   :  { %v2223_v4 = vadd.f32 %v2221_v54, %v2218_v62  ;;  %v2219_v5 = vadd.f32 %v2215_v60, %v2205_v63 }
 0x20b   :  { %v2227_v6 = vmax.f32 %v2223_v4, 0.0  ;;  %v2224_v7 = vadd.f32 %v2222_v0, %v2219_v5 }
 0x20d   :  { %v2228_v8 = vmax.f32 %v2224_v7, 0.0  ;;  %v2240_v9 = vsel %vm2238_vm1, %v2227_v6, %v2223_v4 }
 0x20f   :  { %v2241_v10 = vsel %vm2239_vm2, %v2228_v8, %v2224_v7 }
 0x210   :  { %v2562_v11 = vpack.c.bf16 %v2241_v10, %v2240_v9 }
 0x212   :  { %2250 = vst [vmem:[%s4010_s6] sm:$0xff] %v2562_v11 }

// kernel: _lambda_.31
= control target key start
LH: loop header
LB: loop body
LE: loop exit
PB: predicated region body
PF: predicated region fallthrough
CT: control target
= control target key end

     0   :  { %s4066_s1 = inlined_call_operand.vmem [shape: bf16[1152,512], index: 1, kind: input, shape index: {}]   ;;  %s4067_s0 = inlined_call_operand.vmem [shape: bf16[8,1152], index: 0, kind: input, shape index: {}]   ;;  %s4068_s4 = inlined_call_operand.vmem [shape: f32[1,512], index: 4, kind: input, shape index: {}]   ;;  %s4069_s2 = inlined_call_operand.vmem [shape: f32[1,512], index: 2, kind: input, shape index: {}]   ;;  %s4070_s3 = inlined_call_operand.vmem [shape: f32[1,512], index: 3, kind: input, shape index: {}]   ;;  %s4071_s5 = inlined_call_operand.vmem [shape: bf16[8,512], index: 5, kind: output, shape index: {}]  }
   0x1   :  { %v2603_v0 = vld [vmem:[%s4066_s1 + $0xe4] ss:$16 sps:$4 sm:$0xff]   ;;  %v2607_v2 = vld [vmem:[%s4066_s1 + $0xe0] ss:$16 sps:$4 sm:$0xff]   ;;  %v22_v48 = vld [vmem:[%s4067_s0 + $0x8] sm:$0xff] }
   0x2   :  { %v2605_v1 = vld [vmem:[%s4066_s1 + $0x2e4] ss:$16 sps:$4 sm:$0xff]   ;;  %1786 = vmatprep.subr.bf16.mxu0 %v2603_v0  ;;  %v2608_v3 = vld [vmem:[%s4066_s1 + $0x2e0] ss:$16 sps:$4 sm:$0xff]   ;;  %v3227_v51 = vcombine.high %v22_v48, %v22_v48 }
   0x3   :  { %1827 = vmatprep.subr.bf16.mxu1 %v2605_v1  ;;  %v2609_v4 = vld [vmem:[%s4066_s1 + $0xc4] ss:$16 sps:$4 sm:$0xff]   ;;  %1787 = vmatpush1.bf16.msra.mxu0 %v2607_v2  ;;  %v2613_v6 = vld [vmem:[%s4066_s1 + $0xc0] ss:$16 sps:$4 sm:$0xff]  }
   0x4   :  { %1828 = vmatpush1.bf16.msra.mxu1 %v2608_v3  ;;  %v2611_v5 = vld [vmem:[%s4066_s1 + $0x2c4] ss:$16 sps:$4 sm:$0xff]   ;;  %1788 = vmatprep.subr.bf16.mxu0 %v2609_v4  ;;  %v2614_v7 = vld [vmem:[%s4066_s1 + $0x2c0] ss:$16 sps:$4 sm:$0xff]  }
   0x5   :  { %1829 = vmatprep.subr.bf16.mxu1 %v2611_v5  ;;  %v2615_v8 = vld [vmem:[%s4066_s1 + $0xa4] ss:$16 sps:$4 sm:$0xff]   ;;  %v2619_v10 = vld [vmem:[%s4066_s1 + $0xa0] ss:$16 sps:$4 sm:$0xff]   ;;  %1859 = vmatprep.mubr.bf16.mxu1 %v3227_v51 }
   0x6   :  { %v2617_v9 = vld [vmem:[%s4066_s1 + $0x2a4] ss:$16 sps:$4 sm:$0xff]   ;;  %v2620_v11 = vld [vmem:[%s4066_s1 + $0x2a0] ss:$16 sps:$4 sm:$0xff]  }
   0x7   :  { %1789 = vmatpush1.bf16.msra.mxu0 %v2613_v6  ;;  %v2621_v12 = vld [vmem:[%s4066_s1 + $0x84] ss:$16 sps:$4 sm:$0xff]   ;;  %v2625_v14 = vld [vmem:[%s4066_s1 + $0x80] ss:$16 sps:$4 sm:$0xff]  }
   0x8   :  { %1830 = vmatpush1.bf16.msra.mxu1 %v2614_v7  ;;  %1790 = vmatprep.subr.bf16.mxu0 %v2615_v8  ;;  %v2623_v13 = vld [vmem:[%s4066_s1 + $0x284] ss:$16 sps:$4 sm:$0xff]   ;;  %v2626_v15 = vld [vmem:[%s4066_s1 + $0x280] ss:$16 sps:$4 sm:$0xff]   ;;  %v3287_v7 = vcombine.low %v22_v48, %v22_v48 }
   0x9   :  { %1831 = vmatprep.subr.bf16.mxu1 %v2617_v9  ;;  %v2627_v16 = vld [vmem:[%s4066_s1 + $0x64] ss:$16 sps:$4 sm:$0xff]   ;;  %v2631_v18 = vld [vmem:[%s4066_s1 + $0x60] ss:$16 sps:$4 sm:$0xff]  }
   0xa   :  { %v2629_v17 = vld [vmem:[%s4066_s1 + $0x264] ss:$16 sps:$4 sm:$0xff]   ;;  %v2632_v19 = vld [vmem:[%s4066_s1 + $0x260] ss:$16 sps:$4 sm:$0xff]  }
   0xb   :  { %1791 = vmatpush1.bf16.msra.mxu0 %v2619_v10  ;;  %v2633_v20 = vld [vmem:[%s4066_s1 + $0x44] ss:$16 sps:$4 sm:$0xff]   ;;  %v2637_v22 = vld [vmem:[%s4066_s1 + $0x40] ss:$16 sps:$4 sm:$0xff]  }
   0xc   :  { %1832 = vmatpush1.bf16.msra.mxu1 %v2620_v11  ;;  %1792 = vmatprep.subr.bf16.mxu0 %v2621_v12  ;;  %v2635_v21 = vld [vmem:[%s4066_s1 + $0x244] ss:$16 sps:$4 sm:$0xff]   ;;  %v2638_v23 = vld [vmem:[%s4066_s1 + $0x240] ss:$16 sps:$4 sm:$0xff]  }
   0xd   :  { %1833 = vmatprep.subr.bf16.mxu1 %v2623_v13  ;;  %v2639_v24 = vld [vmem:[%s4066_s1 + $0x24] ss:$16 sps:$4 sm:$0xff]   ;;  %v2643_v26 = vld [vmem:[%s4066_s1 + $0x20] ss:$16 sps:$4 sm:$0xff]  }
   0xe   :  { %v2641_v25 = vld [vmem:[%s4066_s1 + $0x224] ss:$16 sps:$4 sm:$0xff]   ;;  %v2644_v27 = vld [vmem:[%s4066_s1 + $0x220] ss:$16 sps:$4 sm:$0xff]  }
   0xf   :  { %1793 = vmatpush1.bf16.msra.mxu0 %v2625_v14  ;;  %v2645_v28 = vld [vmem:[%s4066_s1 + $0x4] ss:$16 sps:$4 sm:$0xff]   ;;  %v2649_v30 = vld [vmem:[%s4066_s1] ss:$16 sps:$4 sm:$0xff]  }
  0x10   :  { %1834 = vmatpush1.bf16.msra.mxu1 %v2626_v15  ;;  %1794 = vmatprep.subr.bf16.mxu0 %v2627_v16  ;;  %v2647_v29 = vld [vmem:[%s4066_s1 + $0x204] ss:$16 sps:$4 sm:$0xff]   ;;  %v2650_v31 = vld [vmem:[%s4066_s1 + $0x200] ss:$16 sps:$4 sm:$0xff]  }
  0x11   :  { %1835 = vmatprep.subr.bf16.mxu1 %v2629_v17  ;;  %v2651_v32 = vld [vmem:[%s4066_s1 + $0x1e4] ss:$16 sps:$4 sm:$0xff]   ;;  %v2655_v34 = vld [vmem:[%s4066_s1 + $0x1e0] ss:$16 sps:$4 sm:$0xff]  }
  0x12   :  { %v2653_v33 = vld [vmem:[%s4066_s1 + $0x3e4] ss:$16 sps:$4 sm:$0xff]   ;;  %v2656_v35 = vld [vmem:[%s4066_s1 + $0x3e0] ss:$16 sps:$4 sm:$0xff]  }
  0x13   :  { %1795 = vmatpush1.bf16.msra.mxu0 %v2631_v18  ;;  %v2657_v36 = vld [vmem:[%s4066_s1 + $0x1c4] ss:$16 sps:$4 sm:$0xff]   ;;  %v2661_v38 = vld [vmem:[%s4066_s1 + $0x1c0] ss:$16 sps:$4 sm:$0xff]  }
  0x14   :  { %1836 = vmatpush1.bf16.msra.mxu1 %v2632_v19  ;;  %1796 = vmatprep.subr.bf16.mxu0 %v2633_v20  ;;  %v2659_v37 = vld [vmem:[%s4066_s1 + $0x3c4] ss:$16 sps:$4 sm:$0xff]   ;;  %v2662_v39 = vld [vmem:[%s4066_s1 + $0x3c0] ss:$16 sps:$4 sm:$0xff]  }
  0x15   :  { %1837 = vmatprep.subr.bf16.mxu1 %v2635_v21  ;;  %v2663_v40 = vld [vmem:[%s4066_s1 + $0x1a4] ss:$16 sps:$4 sm:$0xff]   ;;  %v2667_v42 = vld [vmem:[%s4066_s1 + $0x1a0] ss:$16 sps:$4 sm:$0xff]  }
  0x16   :  { %v2665_v41 = vld [vmem:[%s4066_s1 + $0x3a4] ss:$16 sps:$4 sm:$0xff]   ;;  %v2668_v43 = vld [vmem:[%s4066_s1 + $0x3a0] ss:$16 sps:$4 sm:$0xff]  }
  0x17   :  { %1797 = vmatpush1.bf16.msra.mxu0 %v2637_v22  ;;  %v2669_v44 = vld [vmem:[%s4066_s1 + $0x184] ss:$16 sps:$4 sm:$0xff]   ;;  %v2673_v49 = vld [vmem:[%s4066_s1 + $0x180] ss:$16 sps:$4 sm:$0xff]  }
  0x18   :  { %1838 = vmatpush1.bf16.msra.mxu1 %v2638_v23  ;;  %1798 = vmatprep.subr.bf16.mxu0 %v2639_v24  ;;  %v2671_v45 = vld [vmem:[%s4066_s1 + $0x384] ss:$16 sps:$4 sm:$0xff]   ;;  %v2674_v50 = vld [vmem:[%s4066_s1 + $0x380] ss:$16 sps:$4 sm:$0xff]  }
  0x19   :  { %1839 = vmatprep.subr.bf16.mxu1 %v2641_v25  ;;  %v21_v46 = vld [vmem:[%s4067_s0] sm:$0xff] }
  0x1a   :  { %v3216_v47 = vcombine.high %v21_v46, %v21_v46  ;;  %v2675_v52 = vld [vmem:[%s4066_s1 + $0x164] ss:$16 sps:$4 sm:$0xff]   ;;  %v2679_v54 = vld [vmem:[%s4066_s1 + $0x160] ss:$16 sps:$4 sm:$0xff]   ;;  %v3285_v6 = vcombine.low %v21_v46, %v21_v46 }
  0x1b   :  { %1799 = vmatpush1.bf16.msra.mxu0 %v2643_v26  ;;  %v2677_v53 = vld [vmem:[%s4066_s1 + $0x364] ss:$16 sps:$4 sm:$0xff]   ;;  %v2680_v55 = vld [vmem:[%s4066_s1 + $0x360] ss:$16 sps:$4 sm:$0xff]  }
  0x1c   :  { %1840 = vmatpush1.bf16.msra.mxu1 %v2644_v27  ;;  %1800 = vmatprep.subr.bf16.mxu0 %v2645_v28  ;;  %v2681_v56 = vld [vmem:[%s4066_s1 + $0x144] ss:$16 sps:$4 sm:$0xff]   ;;  %v2685_v58 = vld [vmem:[%s4066_s1 + $0x140] ss:$16 sps:$4 sm:$0xff]  }
  0x1d   :  { %1841 = vmatprep.subr.bf16.mxu1 %v2647_v29  ;;  %1818 = vmatprep.mubr.bf16.mxu0 %v3216_v47  ;;  %v2683_v57 = vld [vmem:[%s4066_s1 + $0x344] ss:$16 sps:$4 sm:$0xff]   ;;  %v2686_v59 = vld [vmem:[%s4066_s1 + $0x340] ss:$16 sps:$4 sm:$0xff]  }
  0x1e   :  { %v2687_v60 = vld [vmem:[%s4066_s1 + $0x124] ss:$16 sps:$4 sm:$0xff]   ;;  %v2691_v62 = vld [vmem:[%s4066_s1 + $0x120] ss:$16 sps:$4 sm:$0xff]  }
  0x1f   :  { %1801 = vmatpush1.bf16.msra.mxu0 %v2649_v30  ;;  %v2689_v61 = vld [vmem:[%s4066_s1 + $0x324] ss:$16 sps:$4 sm:$0xff]   ;;  %v2692_v63 = vld [vmem:[%s4066_s1 + $0x320] ss:$16 sps:$4 sm:$0xff]  }
  0x20   :  { %1842 = vmatpush1.bf16.msra.mxu1 %v2650_v31  ;;  %1802 = vmatprep.subr.bf16.mxu0 %v2651_v32  ;;  %v2693_v0 = vld [vmem:[%s4066_s1 + $0x104] ss:$16 sps:$4 sm:$0xff]   ;;  %v2697_v2 = vld [vmem:[%s4066_s1 + $0x100] ss:$16 sps:$4 sm:$0xff]  }
  0x21   :  { %1843 = vmatprep.subr.bf16.mxu1 %v2653_v33  ;;  %v2695_v1 = vld [vmem:[%s4066_s1 + $0x304] ss:$16 sps:$4 sm:$0xff]   ;;  %v2698_v3 = vld [vmem:[%s4066_s1 + $0x300] ss:$16 sps:$4 sm:$0xff]   ;;  %v3371_v33 = vld [vmem:[%s4067_s0 + $0x18] sm:$0xff] }
  0x22   :  { %v2705_v4 = vld [vmem:[%s4066_s1 + $0x4e4] ss:$16 sps:$4 sm:$0xff]   ;;  %v2703_v8 = vld [vmem:[%s4066_s1 + $0x4e0] ss:$16 sps:$4 sm:$0xff]  }
  0x23   :  { %1803 = vmatpush2.bf16.msra.mxu0 %v2655_v34  ;;  %v2708_v5 = vld [vmem:[%s4066_s1 + $0x6e4] ss:$16 sps:$4 sm:$0xff]   ;;  %v2706_v9 = vld [vmem:[%s4066_s1 + $0x6e0] ss:$16 sps:$4 sm:$0xff]  }
  0x24   :  { %1844 = vmatpush2.bf16.msra.mxu1 %v2656_v35  ;;  %1804 = vmatprep.subr.bf16.mxu0 %v2657_v36  ;;  %v2711_v10 = vld [vmem:[%s4066_s1 + $0x4c4] ss:$16 sps:$4 sm:$0xff]   ;;  %v2709_v12 = vld [vmem:[%s4066_s1 + $0x4c0] ss:$16 sps:$4 sm:$0xff]  }
  0x25   :  { %1845 = vmatprep.subr.bf16.mxu1 %v2659_v37  ;;  %v2714_v11 = vld [vmem:[%s4066_s1 + $0x6c4] ss:$16 sps:$4 sm:$0xff]   ;;  %v2712_v13 = vld [vmem:[%s4066_s1 + $0x6c0] ss:$16 sps:$4 sm:$0xff]   ;;  %v3385_v37 = vcombine.high %v3371_v33, %v3371_v33 }
  0x26   :  { %v2717_v14 = vld [vmem:[%s4066_s1 + $0x4a4] ss:$16 sps:$4 sm:$0xff]   ;;  %v2715_v16 = vld [vmem:[%s4066_s1 + $0x4a0] ss:$16 sps:$4 sm:$0xff]  }
  0x27   :  { %1805 = vmatpush2.bf16.msra.mxu0 %v2661_v38  ;;  %v2720_v15 = vld [vmem:[%s4066_s1 + $0x6a4] ss:$16 sps:$4 sm:$0xff]   ;;  %v2718_v17 = vld [vmem:[%s4066_s1 + $0x6a0] ss:$16 sps:$4 sm:$0xff]  }
  0x28   :  { %1846 = vmatpush2.bf16.msra.mxu1 %v2662_v39  ;;  %1806 = vmatprep.subr.bf16.mxu0 %v2663_v40  ;;  %v2723_v18 = vld [vmem:[%s4066_s1 + $0x484] ss:$16 sps:$4 sm:$0xff]   ;;  %v2721_v20 = vld [vmem:[%s4066_s1 + $0x480] ss:$16 sps:$4 sm:$0xff]  }
  0x29   :  { %1847 = vmatprep.subr.bf16.mxu1 %v2665_v41  ;;  %v2726_v19 = vld [vmem:[%s4066_s1 + $0x684] ss:$16 sps:$4 sm:$0xff]   ;;  %v2724_v21 = vld [vmem:[%s4066_s1 + $0x680] ss:$16 sps:$4 sm:$0xff]  }
  0x2a   :  { %v2729_v22 = vld [vmem:[%s4066_s1 + $0x464] ss:$16 sps:$4 sm:$0xff]   ;;  %v2727_v24 = vld [vmem:[%s4066_s1 + $0x460] ss:$16 sps:$4 sm:$0xff]  }
  0x2b   :  { %1807 = vmatpush2.bf16.msra.mxu0 %v2667_v42  ;;  %v2732_v23 = vld [vmem:[%s4066_s1 + $0x664] ss:$16 sps:$4 sm:$0xff]   ;;  %v2730_v25 = vld [vmem:[%s4066_s1 + $0x660] ss:$16 sps:$4 sm:$0xff]  }
  0x2c   :  { %1848 = vmatpush2.bf16.msra.mxu1 %v2668_v43  ;;  %1808 = vmatprep.subr.bf16.mxu0 %v2669_v44  ;;  %v2735_v26 = vld [vmem:[%s4066_s1 + $0x444] ss:$16 sps:$4 sm:$0xff]   ;;  %v2733_v28 = vld [vmem:[%s4066_s1 + $0x440] ss:$16 sps:$4 sm:$0xff]  }
  0x2d   :  { %1849 = vmatprep.subr.bf16.mxu1 %v2671_v45  ;;  %v2738_v27 = vld [vmem:[%s4066_s1 + $0x644] ss:$16 sps:$4 sm:$0xff]   ;;  %v2736_v29 = vld [vmem:[%s4066_s1 + $0x640] ss:$16 sps:$4 sm:$0xff]  }
  0x2e   :  { %v2741_v30 = vld [vmem:[%s4066_s1 + $0x424] ss:$16 sps:$4 sm:$0xff]   ;;  %v2739_v34 = vld [vmem:[%s4066_s1 + $0x420] ss:$16 sps:$4 sm:$0xff]  }
  0x2f   :  { %1809 = vmatpush2.bf16.msra.mxu0 %v2673_v49  ;;  %v2744_v31 = vld [vmem:[%s4066_s1 + $0x624] ss:$16 sps:$4 sm:$0xff]   ;;  %v2742_v35 = vld [vmem:[%s4066_s1 + $0x620] ss:$16 sps:$4 sm:$0xff]  }
  0x30   :  { %1850 = vmatpush2.bf16.msra.mxu1 %v2674_v50  ;;  %1810 = vmatprep.subr.bf16.mxu0 %v2675_v52  ;;  %v3366_v32 = vld [vmem:[%s4067_s0 + $0x10] sm:$0xff] }
  0x31   :  { %1851 = vmatprep.subr.bf16.mxu1 %v2677_v53  ;;  %v3381_v36 = vcombine.high %v3366_v32, %v3366_v32  ;;  %v2747_v38 = vld [vmem:[%s4066_s1 + $0x404] ss:$16 sps:$4 sm:$0xff]   ;;  %v2745_v40 = vld [vmem:[%s4066_s1 + $0x400] ss:$16 sps:$4 sm:$0xff]  }
  0x32   :  { %v2750_v39 = vld [vmem:[%s4066_s1 + $0x604] ss:$16 sps:$4 sm:$0xff]   ;;  %v2748_v41 = vld [vmem:[%s4066_s1 + $0x600] ss:$16 sps:$4 sm:$0xff]  }
  0x33   :  { %1811 = vmatpush2.bf16.msra.mxu0 %v2679_v54  ;;  %v2753_v42 = vld [vmem:[%s4066_s1 + $0x5e4] ss:$16 sps:$4 sm:$0xff]   ;;  %v2751_v44 = vld [vmem:[%s4066_s1 + $0x5e0] ss:$16 sps:$4 sm:$0xff]   ;;  %v2198_v54 = vlaneseq }
  0x34   :  { %1852 = vmatpush2.bf16.msra.mxu1 %v2680_v55  ;;  %1812 = vmatprep.subr.bf16.mxu0 %v2681_v56  ;;  %v2756_v43 = vld [vmem:[%s4066_s1 + $0x7e4] ss:$16 sps:$4 sm:$0xff]   ;;  %v2754_v45 = vld [vmem:[%s4066_s1 + $0x7e0] ss:$16 sps:$4 sm:$0xff]  }
  0x35   :  { %1853 = vmatprep.subr.bf16.mxu1 %v2683_v57  ;;  %v2759_v46 = vld [vmem:[%s4066_s1 + $0x5c4] ss:$16 sps:$4 sm:$0xff]   ;;  %v2757_v49 = vld [vmem:[%s4066_s1 + $0x5c0] ss:$16 sps:$4 sm:$0xff]  }
  0x36   :  { %v2762_v48 = vld [vmem:[%s4066_s1 + $0x7c4] ss:$16 sps:$4 sm:$0xff]   ;;  %v2760_v50 = vld [vmem:[%s4066_s1 + $0x7c0] ss:$16 sps:$4 sm:$0xff]  }
  0x37   :  { %1813 = vmatpush2.bf16.msra.mxu0 %v2685_v58  ;;  %v2765_v52 = vld [vmem:[%s4066_s1 + $0x5a4] ss:$16 sps:$4 sm:$0xff]   ;;  %v2763_v55 = vld [vmem:[%s4066_s1 + $0x5a0] ss:$16 sps:$4 sm:$0xff]  }
  0x38   :  { %1854 = vmatpush2.bf16.msra.mxu1 %v2686_v59  ;;  %1814 = vmatprep.subr.bf16.mxu0 %v2687_v60  ;;  %v2768_v53 = vld [vmem:[%s4066_s1 + $0x7a4] ss:$16 sps:$4 sm:$0xff]   ;;  %v2766_v56 = vld [vmem:[%s4066_s1 + $0x7a0] ss:$16 sps:$4 sm:$0xff]   ;;  %v3443_v59 = vshrl.u32 %v2198_v54, 7 }
  0x39   :  { %1855 = vmatprep.subr.bf16.mxu1 %v2689_v61  ;;  %v2771_v57 = vld [vmem:[%s4066_s1 + $0x584] ss:$16 sps:$4 sm:$0xff]   ;;  %v2769_v60 = vld [vmem:[%s4066_s1 + $0x580] ss:$16 sps:$4 sm:$0xff]  }
  0x3a   :  { %v2774_v58 = vld [vmem:[%s4066_s1 + $0x784] ss:$16 sps:$4 sm:$0xff]   ;;  %v2772_v61 = vld [vmem:[%s4066_s1 + $0x780] ss:$16 sps:$4 sm:$0xff]  }
  0x3b   :  { %1815 = vmatpush2.bf16.msra.mxu0 %v2691_v62  ;;  %v3452_v62 = vsub.s32 2, %v3443_v59  ;;  %v2839_v54 = vld [vmem:[%s4066_s1 + $0x820] ss:$16 sps:$4 sm:$0xff]  }
  0x3c   :  { %1856 = vmatpush2.bf16.msra.mxu1 %v2692_v63  ;;  %1816 = vmatprep.subr.bf16.mxu0 %v2693_v0  ;;  %v2777_v63 = vld [vmem:[%s4066_s1 + $0x564] ss:$16 sps:$4 sm:$0xff]   ;;  %v2248_v0 = vld [vmem:[%s4068_s4] sm:$0xf] }
  0x3d   :  { %1857 = vmatprep.subr.bf16.mxu1 %v2695_v1  ;;  %v2780_v1 = vld [vmem:[%s4066_s1 + $0x764] ss:$16 sps:$4 sm:$0xff]   ;;  %vm2249_vm0 = vcmp.gt.f32.partialorder %v2248_v0, 0.5  ;;  %v3632_v0 = vld [vmem:[%s4067_s0 + $0x20] ss:$0 sps:$4 sm:$0xff]  }
  0x3f   :  { %1817 = vmatpush2.bf16.msra.mxu0 %v2697_v2  ;;  %v3464_v2 = vsub.s32 3, %v3443_v59 }
  0x40   :  { %1858 = vmatpush2.bf16.msra.mxu1 %v2698_v3  ;;  %1868 = vmatprep.subr.bf16.mxu0 %v2705_v4  ;;  %v3044_v3 = vmov 0  }
  0x41   :  { %1909 = vmatprep.subr.bf16.mxu1 %v2708_v5  ;;  %v3467_v4 = vsel %vm2249_vm0, 1, %v3044_v3  ;;  %v2775_v5 = vld [vmem:[%s4066_s1 + $0x560] ss:$16 sps:$4 sm:$0xff]  }
  0x42   :  { %1819 = vmatmul.mubr.bf16.vlgmr.msra.gmra.mxu0 %v3285_v6 }
  0x43   :  { %1860 = vmatmul.mubr.bf16.vlgmr.msra.gmra.mxu1 %v3287_v7  ;;  %1869 = vmatpush1.bf16.msra.mxu0 %v2703_v8  ;;  %v2266_v8 = vrot.slane %v3467_v4, %v3452_v62 }
  0x44   :  { %1910 = vmatpush1.bf16.msra.mxu1 %v2706_v9  ;;  %1870 = vmatprep.subr.bf16.mxu0 %v2711_v10  ;;  %v2270_v9 = vrot.slane %v3467_v4, %v3464_v2  ;;  %v2778_v10 = vld [vmem:[%s4066_s1 + $0x760] ss:$16 sps:$4 sm:$0xff]  }
  0x45   :  { %1911 = vmatprep.subr.bf16.mxu1 %v2714_v11  ;;  %1900 = vmatprep.mubr.bf16.mxu0 %v3381_v36  ;;  %v2783_v11 = vld [vmem:[%s4066_s1 + $0x544] ss:$16 sps:$4 sm:$0xff]   ;;  %vm2273_vm3 = vcmp.eq.s32.totalorder %v2266_v8, 1 }
  0x46   :  { %1941 = vmatprep.mubr.bf16.mxu1 %v3385_v37  ;;  %vm2274_vm4 = vcmp.eq.s32.totalorder %v2270_v9, 1 }
  0x47   :  { %1871 = vmatpush1.bf16.msra.mxu0 %v2709_v12  ;;  %v2786_v12 = vld [vmem:[%s4066_s1 + $0x744] ss:$16 sps:$4 sm:$0xff]  }
  0x48   :  { %1912 = vmatpush1.bf16.msra.mxu1 %v2712_v13  ;;  %1872 = vmatprep.subr.bf16.mxu0 %v2717_v14  ;;  %v2781_v13 = vld [vmem:[%s4066_s1 + $0x540] ss:$16 sps:$4 sm:$0xff]  }
  0x49   :  { %1913 = vmatprep.subr.bf16.mxu1 %v2720_v15  ;;  %v2784_v14 = vld [vmem:[%s4066_s1 + $0x740] ss:$16 sps:$4 sm:$0xff]   ;;  %v2789_v15 = vld [vmem:[%s4066_s1 + $0x524] ss:$16 sps:$4 sm:$0xff]  }
  0x4b   :  { %1873 = vmatpush1.bf16.msra.mxu0 %v2715_v16  ;;  %v2792_v16 = vld [vmem:[%s4066_s1 + $0x724] ss:$16 sps:$4 sm:$0xff]  }
  0x4c   :  { %1914 = vmatpush1.bf16.msra.mxu1 %v2718_v17  ;;  %1874 = vmatprep.subr.bf16.mxu0 %v2723_v18  ;;  %v2787_v17 = vld [vmem:[%s4066_s1 + $0x520] ss:$16 sps:$4 sm:$0xff]  }
  0x4d   :  { %1915 = vmatprep.subr.bf16.mxu1 %v2726_v19  ;;  %v2790_v18 = vld [vmem:[%s4066_s1 + $0x720] ss:$16 sps:$4 sm:$0xff]   ;;  %v2795_v19 = vld [vmem:[%s4066_s1 + $0x504] ss:$16 sps:$4 sm:$0xff]  }
  0x4f   :  { %1875 = vmatpush1.bf16.msra.mxu0 %v2721_v20  ;;  %v2798_v20 = vld [vmem:[%s4066_s1 + $0x704] ss:$16 sps:$4 sm:$0xff]  }
  0x50   :  { %1916 = vmatpush1.bf16.msra.mxu1 %v2724_v21  ;;  %1876 = vmatprep.subr.bf16.mxu0 %v2729_v22  ;;  %v2793_v21 = vld [vmem:[%s4066_s1 + $0x500] ss:$16 sps:$4 sm:$0xff]  }
  0x51   :  { %1917 = vmatprep.subr.bf16.mxu1 %v2732_v23  ;;  %v2796_v22 = vld [vmem:[%s4066_s1 + $0x700] ss:$16 sps:$4 sm:$0xff]   ;;  %v2805_v23 = vld [vmem:[%s4066_s1 + $0x8e4] ss:$16 sps:$4 sm:$0xff]  }
  0x53   :  { %1877 = vmatpush1.bf16.msra.mxu0 %v2727_v24  ;;  %v2808_v24 = vld [vmem:[%s4066_s1 + $0xec] ss:$16 sps:$4 sm:$0xff]  }
  0x54   :  { %1918 = vmatpush1.bf16.msra.mxu1 %v2730_v25  ;;  %1878 = vmatprep.subr.bf16.mxu0 %v2735_v26  ;;  %v3523_v25 = vcombine.low %v3366_v32, %v3366_v32  ;;  %v3527_v26 = vcombine.low %v3371_v33, %v3371_v33  ;;  %v2812_v32 = vld [vmem:[%s4066_s1 + $0xc8] ss:$16 sps:$4 sm:$0xff]   ;;  %v2817_v33 = vld [vmem:[%s4066_s1 + $0x8a4] ss:$16 sps:$4 sm:$0xff]  }
  0x55   :  { %1919 = vmatprep.subr.bf16.mxu1 %v2738_v27  ;;  %v2803_v27 = vld [vmem:[%s4066_s1 + $0x8e0] ss:$16 sps:$4 sm:$0xff]  }
  0x57   :  { %1879 = vmatpush1.bf16.msra.mxu0 %v2733_v28  ;;  %v2806_v28 = vld [vmem:[%s4066_s1 + $0xe8] ss:$16 sps:$4 sm:$0xff]  }
  0x58   :  { %1920 = vmatpush1.bf16.msra.mxu1 %v2736_v29  ;;  %1880 = vmatprep.subr.bf16.mxu0 %v2741_v30  ;;  %v2811_v29 = vld [vmem:[%s4066_s1 + $0x8c4] ss:$16 sps:$4 sm:$0xff]   ;;  %v2814_v30 = vld [vmem:[%s4066_s1 + $0xcc] ss:$16 sps:$4 sm:$0xff]  }
  0x59   :  { %1921 = vmatprep.subr.bf16.mxu1 %v2744_v31  ;;  %v2809_v31 = vld [vmem:[%s4066_s1 + $0x8c0] ss:$16 sps:$4 sm:$0xff]  }
  0x5b   :  { %1881 = vmatpush1.bf16.msra.mxu0 %v2739_v34  ;;  %v2820_v34 = vld [vmem:[%s4066_s1 + $0xac] ss:$16 sps:$4 sm:$0xff]  }
  0x5c   :  { %1922 = vmatpush1.bf16.msra.mxu1 %v2742_v35  ;;  %1882 = vmatprep.subr.bf16.mxu0 %v2747_v38  ;;  %v2815_v35 = vld [vmem:[%s4066_s1 + $0x8a0] ss:$16 sps:$4 sm:$0xff]   ;;  %v2818_v38 = vld [vmem:[%s4066_s1 + $0xa8] ss:$16 sps:$4 sm:$0xff]  }
  0x5d   :  { %1923 = vmatprep.subr.bf16.mxu1 %v2750_v39  ;;  %v2823_v39 = vld [vmem:[%s4066_s1 + $0x884] ss:$16 sps:$4 sm:$0xff]  }
  0x5f   :  { %1883 = vmatpush1.bf16.msra.mxu0 %v2745_v40  ;;  %v2821_v40 = vld [vmem:[%s4066_s1 + $0x880] ss:$16 sps:$4 sm:$0xff]  }
  0x60   :  { %1924 = vmatpush1.bf16.msra.mxu1 %v2748_v41  ;;  %1884 = vmatprep.subr.bf16.mxu0 %v2753_v42  ;;  %v2824_v41 = vld [vmem:[%s4066_s1 + $0x88] ss:$16 sps:$4 sm:$0xff]   ;;  %v2829_v42 = vld [vmem:[%s4066_s1 + $0x864] ss:$16 sps:$4 sm:$0xff]  }
  0x61   :  { %1925 = vmatprep.subr.bf16.mxu1 %v2756_v43  ;;  %v2832_v43 = vld [vmem:[%s4066_s1 + $0x6c] ss:$16 sps:$4 sm:$0xff]  }
  0x63   :  { %1885 = vmatpush2.bf16.msra.mxu0 %v2751_v44  ;;  %v2827_v44 = vld [vmem:[%s4066_s1 + $0x860] ss:$16 sps:$4 sm:$0xff]  }
  0x64   :  { %1926 = vmatpush2.bf16.msra.mxu1 %v2754_v45  ;;  %1886 = vmatprep.subr.bf16.mxu0 %v2759_v46  ;;  %v2830_v45 = vld [vmem:[%s4066_s1 + $0x68] ss:$16 sps:$4 sm:$0xff]   ;;  %v2835_v46 = vld [vmem:[%s4066_s1 + $0x844] ss:$16 sps:$4 sm:$0xff]  }
  0x65   :  { %1927 = vmatprep.subr.bf16.mxu1 %v2762_v48  ;;  %v2838_v48 = vld [vmem:[%s4066_s1 + $0x4c] ss:$16 sps:$4 sm:$0xff]  }
  0x67   :  { %1887 = vmatpush2.bf16.msra.mxu0 %v2757_v49  ;;  %v2833_v49 = vld [vmem:[%s4066_s1 + $0x840] ss:$16 sps:$4 sm:$0xff]  }
  0x68   :  { %1928 = vmatpush2.bf16.msra.mxu1 %v2760_v50  ;;  %1888 = vmatprep.subr.bf16.mxu0 %v2765_v52  ;;  %v2836_v50 = vld [vmem:[%s4066_s1 + $0x48] ss:$16 sps:$4 sm:$0xff]   ;;  %v2841_v52 = vld [vmem:[%s4066_s1 + $0x824] ss:$16 sps:$4 sm:$0xff]  }
  0x69   :  { %1929 = vmatprep.subr.bf16.mxu1 %v2768_v53  ;;  %v2844_v53 = vld [vmem:[%s4066_s1 + $0x2c] ss:$16 sps:$4 sm:$0xff]  }
  0x6b   :  { %1889 = vmatpush2.bf16.msra.mxu0 %v2763_v55  ;;  %v2842_v55 = vld [vmem:[%s4066_s1 + $0x28] ss:$16 sps:$4 sm:$0xff]  }
  0x6c   :  { %1930 = vmatpush2.bf16.msra.mxu1 %v2766_v56  ;;  %1890 = vmatprep.subr.bf16.mxu0 %v2771_v57  ;;  %v2847_v56 = vld [vmem:[%s4066_s1 + $0x804] ss:$16 sps:$4 sm:$0xff]   ;;  %v2850_v57 = vld [vmem:[%s4066_s1 + $0xc] ss:$16 sps:$4 sm:$0xff]  }
  0x6d   :  { %1931 = vmatprep.subr.bf16.mxu1 %v2774_v58  ;;  %v2845_v58 = vld [vmem:[%s4066_s1 + $0x800] ss:$16 sps:$4 sm:$0xff]  }
  0x6f   :  { %1891 = vmatpush2.bf16.msra.mxu0 %v2769_v60  ;;  %v2848_v60 = vld [vmem:[%s4066_s1 + $0x8] ss:$16 sps:$4 sm:$0xff]  }
  0x70   :  { %1932 = vmatpush2.bf16.msra.mxu1 %v2772_v61  ;;  %1892 = vmatprep.subr.bf16.mxu0 %v2777_v63  ;;  %v2854_v61 = vld [vmem:[%s4066_s1 + $0x1ec] ss:$16 sps:$4 sm:$0xff]  }
  0x71   :  { %1933 = vmatprep.subr.bf16.mxu1 %v2780_v1  ;;  %v2857_v63 = vld [vmem:[%s4066_s1 + $0x2ec] ss:$16 sps:$4 sm:$0xff]   ;;  %v2852_v1 = vld [vmem:[%s4066_s1 + $0x1e8] ss:$16 sps:$4 sm:$0xff]  }
  0x73   :  { %1893 = vmatpush2.bf16.msra.mxu0 %v2775_v5  ;;  %v2855_v5 = vld [vmem:[%s4066_s1 + $0x2e8] ss:$16 sps:$4 sm:$0xff]  }
  0x74   :  { %1934 = vmatpush2.bf16.msra.mxu1 %v2778_v10  ;;  %1894 = vmatprep.subr.bf16.mxu0 %v2783_v11  ;;  %v2860_v10 = vld [vmem:[%s4066_s1 + $0x1cc] ss:$16 sps:$4 sm:$0xff]  }
  0x75   :  { %1935 = vmatprep.subr.bf16.mxu1 %v2786_v12  ;;  %v2863_v11 = vld [vmem:[%s4066_s1 + $0x2cc] ss:$16 sps:$4 sm:$0xff]   ;;  %v2858_v12 = vld [vmem:[%s4066_s1 + $0x1c8] ss:$16 sps:$4 sm:$0xff]  }
  0x77   :  { %1895 = vmatpush2.bf16.msra.mxu0 %v2781_v13  ;;  %v2861_v13 = vld [vmem:[%s4066_s1 + $0x2c8] ss:$16 sps:$4 sm:$0xff]  }
  0x78   :  { %1936 = vmatpush2.bf16.msra.mxu1 %v2784_v14  ;;  %1896 = vmatprep.subr.bf16.mxu0 %v2789_v15  ;;  %v2866_v14 = vld [vmem:[%s4066_s1 + $0x1ac] ss:$16 sps:$4 sm:$0xff]  }
  0x79   :  { %1937 = vmatprep.subr.bf16.mxu1 %v2792_v16  ;;  %v2869_v15 = vld [vmem:[%s4066_s1 + $0x2ac] ss:$16 sps:$4 sm:$0xff]   ;;  %v2864_v16 = vld [vmem:[%s4066_s1 + $0x1a8] ss:$16 sps:$4 sm:$0xff]  }
  0x7b   :  { %1897 = vmatpush2.bf16.msra.mxu0 %v2787_v17  ;;  %v2867_v17 = vld [vmem:[%s4066_s1 + $0x2a8] ss:$16 sps:$4 sm:$0xff]  }
  0x7c   :  { %1938 = vmatpush2.bf16.msra.mxu1 %v2790_v18  ;;  %1898 = vmatprep.subr.bf16.mxu0 %v2795_v19  ;;  %v2872_v18 = vld [vmem:[%s4066_s1 + $0x18c] ss:$16 sps:$4 sm:$0xff]   ;;  %v2870_v19 = vld [vmem:[%s4066_s1 + $0x188] ss:$16 sps:$4 sm:$0xff]  }
  0x7d   :  { %1939 = vmatprep.subr.bf16.mxu1 %v2798_v20  ;;  %v2873_v20 = vld [vmem:[%s4066_s1 + $0x288] ss:$16 sps:$4 sm:$0xff]  }
  0x7f   :  { %1899 = vmatpush2.bf16.msra.mxu0 %v2793_v21  ;;  %v2878_v21 = vld [vmem:[%s4066_s1 + $0x16c] ss:$16 sps:$4 sm:$0xff]  }
  0x80   :  { %1940 = vmatpush2.bf16.msra.mxu1 %v2796_v22  ;;  %1950 = vmatprep.subr.bf16.mxu0 %v2805_v23  ;;  %v2881_v22 = vld [vmem:[%s4066_s1 + $0x26c] ss:$16 sps:$4 sm:$0xff]   ;;  %v2876_v23 = vld [vmem:[%s4066_s1 + $0x168] ss:$16 sps:$4 sm:$0xff]  }
  0x81   :  { %1991 = vmatprep.subr.bf16.mxu1 %v2808_v24  ;;  %v2879_v24 = vld [vmem:[%s4066_s1 + $0x268] ss:$16 sps:$4 sm:$0xff]  }
  0x82   :  { %1901 = vmatmul.mubr.bf16.vlgmr.msra.gmra.mxu0 %v3523_v25 }
  0x83   :  { %1942 = vmatmul.mubr.bf16.vlgmr.msra.gmra.mxu1 %v3527_v26  ;;  %1951 = vmatpush1.bf16.msra.mxu0 %v2803_v27  ;;  %v2884_v27 = vld [vmem:[%s4066_s1 + $0x14c] ss:$16 sps:$4 sm:$0xff]  }
  0x84   :  { %1992 = vmatpush1.bf16.msra.mxu1 %v2806_v28  ;;  %1952 = vmatprep.subr.bf16.mxu0 %v2811_v29  ;;  %v2887_v28 = vld [vmem:[%s4066_s1 + $0x24c] ss:$16 sps:$4 sm:$0xff]   ;;  %v2882_v29 = vld [vmem:[%s4066_s1 + $0x148] ss:$16 sps:$4 sm:$0xff]  }
  0x85   :  { %1993 = vmatprep.subr.bf16.mxu1 %v2814_v30  ;;  %1982 = vmatprep.mubr.bf16.mxu0 %v3044_v3  ;;  %v2885_v30 = vld [vmem:[%s4066_s1 + $0x248] ss:$16 sps:$4 sm:$0xff]  }
  0x86   :  { %2023 = vmatprep.mubr.bf16.mxu1 %v3216_v47  ;;  %v2826_v47 = vld [vmem:[%s4066_s1 + $0x8c] ss:$16 sps:$4 sm:$0xff]  }
  0x87   :  { %1953 = vmatpush1.bf16.msra.mxu0 %v2809_v31  ;;  %v2890_v31 = vld [vmem:[%s4066_s1 + $0x12c] ss:$16 sps:$4 sm:$0xff]  }
  0x88   :  { %1994 = vmatpush1.bf16.msra.mxu1 %v2812_v32  ;;  %1954 = vmatprep.subr.bf16.mxu0 %v2817_v33  ;;  %v2893_v32 = vld [vmem:[%s4066_s1 + $0x22c] ss:$16 sps:$4 sm:$0xff]   ;;  %v2888_v33 = vld [vmem:[%s4066_s1 + $0x128] ss:$16 sps:$4 sm:$0xff]  }
  0x89   :  { %1995 = vmatprep.subr.bf16.mxu1 %v2820_v34  ;;  %v2891_v34 = vld [vmem:[%s4066_s1 + $0x228] ss:$16 sps:$4 sm:$0xff]  }
  0x8b   :  { %1955 = vmatpush1.bf16.msra.mxu0 %v2815_v35  ;;  %v2896_v35 = vld [vmem:[%s4066_s1 + $0x10c] ss:$16 sps:$4 sm:$0xff]  }
  0x8c   :  { %1996 = vmatpush1.bf16.msra.mxu1 %v2818_v38  ;;  %1956 = vmatprep.subr.bf16.mxu0 %v2823_v39  ;;  %v2899_v38 = vld [vmem:[%s4066_s1 + $0x20c] ss:$16 sps:$4 sm:$0xff]   ;;  %v2894_v39 = vld [vmem:[%s4066_s1 + $0x108] ss:$16 sps:$4 sm:$0xff]  }
  0x8d   :  { %1997 = vmatprep.subr.bf16.mxu1 %v2826_v47  ;;  %v2897_v47 = vld [vmem:[%s4066_s1 + $0x208] ss:$16 sps:$4 sm:$0xff]  }
  0x8f   :  { %1957 = vmatpush1.bf16.msra.mxu0 %v2821_v40  ;;  %v2902_v40 = vld [vmem:[%s4066_s1 + $0x3ec] ss:$16 sps:$4 sm:$0xff]  }
  0x90   :  { %1998 = vmatpush1.bf16.msra.mxu1 %v2824_v41  ;;  %1958 = vmatprep.subr.bf16.mxu0 %v2829_v42  ;;  %v2905_v41 = vld [vmem:[%s4066_s1 + $0x4ec] ss:$16 sps:$4 sm:$0xff]   ;;  %v2900_v42 = vld [vmem:[%s4066_s1 + $0x3e8] ss:$16 sps:$4 sm:$0xff]  }
  0x91   :  { %1999 = vmatprep.subr.bf16.mxu1 %v2832_v43  ;;  %v2903_v43 = vld [vmem:[%s4066_s1 + $0x4e8] ss:$16 sps:$4 sm:$0xff]  }
  0x93   :  { %1959 = vmatpush1.bf16.msra.mxu0 %v2827_v44  ;;  %v2908_v44 = vld [vmem:[%s4066_s1 + $0x3cc] ss:$16 sps:$4 sm:$0xff]  }
  0x94   :  { %2000 = vmatpush1.bf16.msra.mxu1 %v2830_v45  ;;  %1960 = vmatprep.subr.bf16.mxu0 %v2835_v46  ;;  %v2911_v45 = vld [vmem:[%s4066_s1 + $0x4cc] ss:$16 sps:$4 sm:$0xff]   ;;  %v2906_v46 = vld [vmem:[%s4066_s1 + $0x3c8] ss:$16 sps:$4 sm:$0xff]  }
  0x95   :  { %2001 = vmatprep.subr.bf16.mxu1 %v2838_v48  ;;  %v2909_v48 = vld [vmem:[%s4066_s1 + $0x4c8] ss:$16 sps:$4 sm:$0xff]  }
  0x97   :  { %1961 = vmatpush1.bf16.msra.mxu0 %v2833_v49  ;;  %v2914_v49 = vld [vmem:[%s4066_s1 + $0x3ac] ss:$16 sps:$4 sm:$0xff]  }
  0x98   :  { %2002 = vmatpush1.bf16.msra.mxu1 %v2836_v50  ;;  %1962 = vmatprep.subr.bf16.mxu0 %v2841_v52  ;;  %v2912_v50 = vld [vmem:[%s4066_s1 + $0x3a8] ss:$16 sps:$4 sm:$0xff]  }
  0x99   :  { %2003 = vmatprep.subr.bf16.mxu1 %v2844_v53  ;;  %v2915_v52 = vld [vmem:[%s4066_s1 + $0x4a8] ss:$16 sps:$4 sm:$0xff]   ;;  %v2920_v53 = vld [vmem:[%s4066_s1 + $0x38c] ss:$16 sps:$4 sm:$0xff]  }
  0x9b   :  { %1963 = vmatpush1.bf16.msra.mxu0 %v2839_v54  ;;  %v2918_v54 = vld [vmem:[%s4066_s1 + $0x388] ss:$16 sps:$4 sm:$0xff]  }
  0x9c   :  { %2004 = vmatpush1.bf16.msra.mxu1 %v2842_v55  ;;  %1964 = vmatprep.subr.bf16.mxu0 %v2847_v56  ;;  %v2921_v55 = vld [vmem:[%s4066_s1 + $0x488] ss:$16 sps:$4 sm:$0xff]   ;;  %v2926_v56 = vld [vmem:[%s4066_s1 + $0x36c] ss:$16 sps:$4 sm:$0xff]  }
  0x9d   :  { %2005 = vmatprep.subr.bf16.mxu1 %v2850_v57  ;;  %v2929_v57 = vld [vmem:[%s4066_s1 + $0x46c] ss:$16 sps:$4 sm:$0xff]  }
  0x9f   :  { %1965 = vmatpush1.bf16.msra.mxu0 %v2845_v58  ;;  %v2924_v58 = vld [vmem:[%s4066_s1 + $0x368] ss:$16 sps:$4 sm:$0xff]  }
  0xa0   :  { %2006 = vmatpush1.bf16.msra.mxu1 %v2848_v60  ;;  %2032 = vmatprep.subr.bf16.mxu0 %v2857_v63  ;;  %v2927_v60 = vld [vmem:[%s4066_s1 + $0x468] ss:$16 sps:$4 sm:$0xff]   ;;  %v2935_v63 = vld [vmem:[%s4066_s1 + $0x44c] ss:$16 sps:$4 sm:$0xff]  }
  0xa1   :  { %2007 = vmatprep.subr.bf16.mxu1 %v2854_v61  ;;  %v2932_v61 = vld [vmem:[%s4066_s1 + $0x34c] ss:$16 sps:$4 sm:$0xff]  }
  0xa2   :  { %1983 = vmatmul.mubr.bf16.vlgmr.msra.gmra.mxu0 %v3632_v0 }
  0xa3   :  { %2033 = vmatpush1.bf16.msra.mxu0 %v2855_v5  ;;  %2064 = vmatprep.mubr.bf16.mxu0 %v3227_v51  ;;  %v2875_v51 = vld [vmem:[%s4066_s1 + $0x28c] ss:$16 sps:$4 sm:$0xff]   ;;  %v2933_v5 = vld [vmem:[%s4066_s1 + $0x448] ss:$16 sps:$4 sm:$0xff]  }
  0xa4   :  { %2008 = vmatpush2.bf16.msra.mxu1 %v2852_v1  ;;  %2034 = vmatprep.subr.bf16.mxu0 %v2863_v11  ;;  %v2930_v1 = vld [vmem:[%s4066_s1 + $0x348] ss:$16 sps:$4 sm:$0xff]   ;;  %v2941_v11 = vld [vmem:[%s4066_s1 + $0x42c] ss:$16 sps:$4 sm:$0xff]  }
  0xa5   :  { %2009 = vmatprep.subr.bf16.mxu1 %v2860_v10  ;;  %v2938_v10 = vld [vmem:[%s4066_s1 + $0x32c] ss:$16 sps:$4 sm:$0xff]  }
  0xa7   :  { %2035 = vmatpush1.bf16.msra.mxu0 %v2861_v13  ;;  %v2939_v13 = vld [vmem:[%s4066_s1 + $0x428] ss:$16 sps:$4 sm:$0xff]  }
  0xa8   :  { %2010 = vmatpush2.bf16.msra.mxu1 %v2858_v12  ;;  %2036 = vmatprep.subr.bf16.mxu0 %v2869_v15  ;;  %v2936_v12 = vld [vmem:[%s4066_s1 + $0x328] ss:$16 sps:$4 sm:$0xff]   ;;  %v2947_v15 = vld [vmem:[%s4066_s1 + $0x40c] ss:$16 sps:$4 sm:$0xff]  }
  0xa9   :  { %2011 = vmatprep.subr.bf16.mxu1 %v2866_v14  ;;  %v2944_v14 = vld [vmem:[%s4066_s1 + $0x30c] ss:$16 sps:$4 sm:$0xff]  }
  0xab   :  { %2037 = vmatpush1.bf16.msra.mxu0 %v2867_v17  ;;  %v2945_v17 = vld [vmem:[%s4066_s1 + $0x408] ss:$16 sps:$4 sm:$0xff]  }
  0xac   :  { %2012 = vmatpush2.bf16.msra.mxu1 %v2864_v16  ;;  %2038 = vmatprep.subr.bf16.mxu0 %v2875_v51  ;;  %v2942_v16 = vld [vmem:[%s4066_s1 + $0x308] ss:$16 sps:$4 sm:$0xff]   ;;  %v2953_v51 = vld [vmem:[%s4066_s1 + $0x6ec] ss:$16 sps:$4 sm:$0xff]  }
  0xad   :  { %2013 = vmatprep.subr.bf16.mxu1 %v2872_v18  ;;  %v2950_v18 = vld [vmem:[%s4066_s1 + $0x5ec] ss:$16 sps:$4 sm:$0xff]  }
  0xaf   :  { %2039 = vmatpush1.bf16.msra.mxu0 %v2873_v20  ;;  %v2951_v20 = vld [vmem:[%s4066_s1 + $0x6e8] ss:$16 sps:$4 sm:$0xff]  }
  0xb0   :  { %2014 = vmatpush2.bf16.msra.mxu1 %v2870_v19  ;;  %2040 = vmatprep.subr.bf16.mxu0 %v2881_v22  ;;  %v2948_v19 = vld [vmem:[%s4066_s1 + $0x5e8] ss:$16 sps:$4 sm:$0xff]   ;;  %v2959_v22 = vld [vmem:[%s4066_s1 + $0x6cc] ss:$16 sps:$4 sm:$0xff]  }
  0xb1   :  { %2015 = vmatprep.subr.bf16.mxu1 %v2878_v21  ;;  %v2956_v21 = vld [vmem:[%s4066_s1 + $0x5cc] ss:$16 sps:$4 sm:$0xff]  }
  0xb3   :  { %2041 = vmatpush1.bf16.msra.mxu0 %v2879_v24  ;;  %v2957_v24 = vld [vmem:[%s4066_s1 + $0x6c8] ss:$16 sps:$4 sm:$0xff]  }
  0xb4   :  { %2016 = vmatpush2.bf16.msra.mxu1 %v2876_v23  ;;  %2042 = vmatprep.subr.bf16.mxu0 %v2887_v28  ;;  %v2954_v23 = vld [vmem:[%s4066_s1 + $0x5c8] ss:$16 sps:$4 sm:$0xff]  }
  0xb5   :  { %2017 = vmatprep.subr.bf16.mxu1 %v2884_v27  ;;  %v2962_v27 = vld [vmem:[%s4066_s1 + $0x5ac] ss:$16 sps:$4 sm:$0xff]   ;;  %v2960_v28 = vld [vmem:[%s4066_s1 + $0x5a8] ss:$16 sps:$4 sm:$0xff]  }
  0xb7   :  { %2043 = vmatpush1.bf16.msra.mxu0 %v2885_v30  ;;  %v2968_v30 = vld [vmem:[%s4066_s1 + $0x58c] ss:$16 sps:$4 sm:$0xff]  }
  0xb8   :  { %2018 = vmatpush2.bf16.msra.mxu1 %v2882_v29  ;;  %2044 = vmatprep.subr.bf16.mxu0 %v2893_v32  ;;  %v2963_v29 = vld [vmem:[%s4066_s1 + $0x6a8] ss:$16 sps:$4 sm:$0xff]  }
  0xb9   :  { %2019 = vmatprep.subr.bf16.mxu1 %v2890_v31  ;;  %v2966_v31 = vld [vmem:[%s4066_s1 + $0x588] ss:$16 sps:$4 sm:$0xff]  }
  0xba   :  { %v2969_v32 = vld [vmem:[%s4066_s1 + $0x688] ss:$16 sps:$4 sm:$0xff]  }
  0xbb   :  { %2045 = vmatpush1.bf16.msra.mxu0 %v2891_v34  ;;  %v2977_v34 = vld [vmem:[%s4066_s1 + $0x66c] ss:$16 sps:$4 sm:$0xff]  }
  0xbc   :  { %2020 = vmatpush2.bf16.msra.mxu1 %v2888_v33  ;;  %2046 = vmatprep.subr.bf16.mxu0 %v2899_v38  ;;  %v2974_v33 = vld [vmem:[%s4066_s1 + $0x56c] ss:$16 sps:$4 sm:$0xff]   ;;  %v2975_v38 = vld [vmem:[%s4066_s1 + $0x668] ss:$16 sps:$4 sm:$0xff]  }
  0xbd   :  { %2021 = vmatprep.subr.bf16.mxu1 %v2896_v35  ;;  %v2972_v35 = vld [vmem:[%s4066_s1 + $0x568] ss:$16 sps:$4 sm:$0xff]  }
  0xbf   :  { %2047 = vmatpush1.bf16.msra.mxu0 %v2897_v47  ;;  %v2983_v47 = vld [vmem:[%s4066_s1 + $0x64c] ss:$16 sps:$4 sm:$0xff]  }
  0xc0   :  { %2022 = vmatpush2.bf16.msra.mxu1 %v2894_v39  ;;  %2048 = vmatprep.subr.bf16.mxu0 %v2902_v40  ;;  %v2980_v39 = vld [vmem:[%s4066_s1 + $0x54c] ss:$16 sps:$4 sm:$0xff]   ;;  %v2978_v40 = vld [vmem:[%s4066_s1 + $0x548] ss:$16 sps:$4 sm:$0xff]  }
  0xc1   :  { %2073 = vmatprep.subr.bf16.mxu1 %v2905_v41  ;;  %v2981_v41 = vld [vmem:[%s4066_s1 + $0x648] ss:$16 sps:$4 sm:$0xff]  }
  0xc3   :  { %2024 = vmatmul.mubr.bf16.vlgmr.msra.gmra.mxu1 %v3285_v6  ;;  %2049 = vmatpush2.bf16.msra.mxu0 %v2900_v42  ;;  %v2917_v6 = vld [vmem:[%s4066_s1 + $0x4ac] ss:$16 sps:$4 sm:$0xff]  }
  0xc4   :  { %2074 = vmatpush1.bf16.msra.mxu1 %v2903_v43  ;;  %2050 = vmatprep.subr.bf16.mxu0 %v2908_v44  ;;  %v2986_v42 = vld [vmem:[%s4066_s1 + $0x52c] ss:$16 sps:$4 sm:$0xff]   ;;  %v2984_v44 = vld [vmem:[%s4066_s1 + $0x528] ss:$16 sps:$4 sm:$0xff]  }
  0xc5   :  { %2075 = vmatprep.subr.bf16.mxu1 %v2911_v45  ;;  %2105 = vmatprep.mubr.bf16.mxu1 %v3381_v36  ;;  %v2923_v36 = vld [vmem:[%s4066_s1 + $0x48c] ss:$16 sps:$4 sm:$0xff]   ;;  %v2987_v45 = vld [vmem:[%s4066_s1 + $0x628] ss:$16 sps:$4 sm:$0xff]  }
  0xc6   :  { %v2989_v43 = vld [vmem:[%s4066_s1 + $0x62c] ss:$16 sps:$4 sm:$0xff]  }
  0xc7   :  { %2051 = vmatpush2.bf16.msra.mxu0 %v2906_v46  ;;  %v2992_v46 = vld [vmem:[%s4066_s1 + $0x50c] ss:$16 sps:$4 sm:$0xff]  }
  0xc8   :  { %2076 = vmatpush1.bf16.msra.mxu1 %v2909_v48  ;;  %2052 = vmatprep.subr.bf16.mxu0 %v2914_v49  ;;  %v2995_v48 = vld [vmem:[%s4066_s1 + $0x60c] ss:$16 sps:$4 sm:$0xff]   ;;  %v2990_v49 = vld [vmem:[%s4066_s1 + $0x508] ss:$16 sps:$4 sm:$0xff]  }
  0xc9   :  { %2077 = vmatprep.subr.bf16.mxu1 %v2917_v6  ;;  %v2993_v6 = vld [vmem:[%s4066_s1 + $0x608] ss:$16 sps:$4 sm:$0xff]  }
  0xcb   :  { %2053 = vmatpush2.bf16.msra.mxu0 %v2912_v50  ;;  %v2998_v50 = vld [vmem:[%s4066_s1 + $0x7ec] ss:$16 sps:$4 sm:$0xff]  }
  0xcc   :  { %2078 = vmatpush1.bf16.msra.mxu1 %v2915_v52  ;;  %2054 = vmatprep.subr.bf16.mxu0 %v2920_v53  ;;  %v3001_v52 = vld [vmem:[%s4066_s1 + $0x8ec] ss:$16 sps:$4 sm:$0xff]   ;;  %v2996_v53 = vld [vmem:[%s4066_s1 + $0x7e8] ss:$16 sps:$4 sm:$0xff]  }
  0xcd   :  { %2079 = vmatprep.subr.bf16.mxu1 %v2923_v36  ;;  %v2999_v36 = vld [vmem:[%s4066_s1 + $0x8e8] ss:$16 sps:$4 sm:$0xff]  }
  0xcf   :  { %2055 = vmatpush2.bf16.msra.mxu0 %v2918_v54  ;;  %v3004_v54 = vld [vmem:[%s4066_s1 + $0x7cc] ss:$16 sps:$4 sm:$0xff]  }
  0xd0   :  { %2080 = vmatpush1.bf16.msra.mxu1 %v2921_v55  ;;  %2056 = vmatprep.subr.bf16.mxu0 %v2926_v56  ;;  %v3007_v55 = vld [vmem:[%s4066_s1 + $0x8cc] ss:$16 sps:$4 sm:$0xff]  }
  0xd1   :  { %2081 = vmatprep.subr.bf16.mxu1 %v2929_v57 }
  0xd3   :  { %2057 = vmatpush2.bf16.msra.mxu0 %v2924_v58 }
  0xd4   :  { %2082 = vmatpush1.bf16.msra.mxu1 %v2927_v60  ;;  %2058 = vmatprep.subr.bf16.mxu0 %v2932_v61  ;;  %v3002_v60 = vld [vmem:[%s4066_s1 + $0x7c8] ss:$16 sps:$4 sm:$0xff]  }
  0xd5   :  { %2083 = vmatprep.subr.bf16.mxu1 %v2935_v63  ;;  %v3005_v61 = vld [vmem:[%s4066_s1 + $0x8c8] ss:$16 sps:$4 sm:$0xff]  }
  0xd7   :  { %2059 = vmatpush2.bf16.msra.mxu0 %v2930_v1 }
  0xd8   :  { %2084 = vmatpush1.bf16.msra.mxu1 %v2933_v5  ;;  %2060 = vmatprep.subr.bf16.mxu0 %v2938_v10  ;;  %v3013_v5 = vld [vmem:[%s4066_s1 + $0x8ac] ss:$16 sps:$4 sm:$0xff]  }
  0xd9   :  { %2085 = vmatprep.subr.bf16.mxu1 %v2941_v11 }
  0xdb   :  { %2061 = vmatpush2.bf16.msra.mxu0 %v2936_v12 }
  0xdc   :  { %2086 = vmatpush1.bf16.msra.mxu1 %v2939_v13  ;;  %2062 = vmatprep.subr.bf16.mxu0 %v2944_v14  ;;  %v3008_v13 = vld [vmem:[%s4066_s1 + $0x7a8] ss:$16 sps:$4 sm:$0xff]  }
  0xdd   :  { %2087 = vmatprep.subr.bf16.mxu1 %v2947_v15  ;;  %v3011_v14 = vld [vmem:[%s4066_s1 + $0x8a8] ss:$16 sps:$4 sm:$0xff]  }
  0xdf   :  { %2063 = vmatpush2.bf16.msra.mxu0 %v2942_v16 }
  0xe0   :  { %2088 = vmatpush1.bf16.msra.mxu1 %v2945_v17  ;;  %2114 = vmatprep.subr.bf16.mxu0 %v2953_v51  ;;  %v3019_v17 = vld [vmem:[%s4066_s1 + $0x88c] ss:$16 sps:$4 sm:$0xff]   ;;  %v3017_v51 = vld [vmem:[%s4066_s1 + $0x888] ss:$16 sps:$4 sm:$0xff]  }
  0xe1   :  { %2089 = vmatprep.subr.bf16.mxu1 %v2950_v18  ;;  %v3014_v18 = vld [vmem:[%s4066_s1 + $0x788] ss:$16 sps:$4 sm:$0xff]  }
  0xe2   :  { %2065 = vmatmul.mubr.bf16.vlgmr.msra.gmra.mxu0 %v3287_v7  ;;  %v2965_v7 = vld [vmem:[%s4066_s1 + $0x6ac] ss:$16 sps:$4 sm:$0xff]  }
  0xe3   :  { %2115 = vmatpush1.bf16.msra.mxu0 %v2951_v20  ;;  %2146 = vmatprep.mubr.bf16.mxu0 %v3385_v37  ;;  %v2971_v37 = vld [vmem:[%s4066_s1 + $0x68c] ss:$16 sps:$4 sm:$0xff]  }
  0xe4   :  { %2090 = vmatpush2.bf16.msra.mxu1 %v2948_v19  ;;  %2116 = vmatprep.subr.bf16.mxu0 %v2959_v22  ;;  %v3022_v19 = vld [vmem:[%s4066_s1 + $0x76c] ss:$16 sps:$4 sm:$0xff]   ;;  %v3023_v22 = vld [vmem:[%s4066_s1 + $0x868] ss:$16 sps:$4 sm:$0xff]  }
  0xe5   :  { %2091 = vmatprep.subr.bf16.mxu1 %v2956_v21  ;;  %v3025_v20 = vld [vmem:[%s4066_s1 + $0x86c] ss:$16 sps:$4 sm:$0xff]   ;;  %v3020_v21 = vld [vmem:[%s4066_s1 + $0x768] ss:$16 sps:$4 sm:$0xff]  }
  0xe7   :  { %2117 = vmatpush1.bf16.msra.mxu0 %v2957_v24  ;;  %v3031_v24 = vld [vmem:[%s4066_s1 + $0x84c] ss:$16 sps:$4 sm:$0xff]  }
  0xe8   :  { %2092 = vmatpush2.bf16.msra.mxu1 %v2954_v23  ;;  %2118 = vmatprep.subr.bf16.mxu0 %v2965_v7  ;;  %v3028_v23 = vld [vmem:[%s4066_s1 + $0x74c] ss:$16 sps:$4 sm:$0xff]   ;;  %v3029_v7 = vld [vmem:[%s4066_s1 + $0x848] ss:$16 sps:$4 sm:$0xff]  }
  0xe9   :  { %2093 = vmatprep.subr.bf16.mxu1 %v2962_v27  ;;  %v3026_v27 = vld [vmem:[%s4066_s1 + $0x748] ss:$16 sps:$4 sm:$0xff]  }
  0xeb   :  { %2119 = vmatpush1.bf16.msra.mxu0 %v2963_v29  ;;  %v3037_v29 = vld [vmem:[%s4066_s1 + $0x82c] ss:$16 sps:$4 sm:$0xff]  }
  0xec   :  { %2094 = vmatpush2.bf16.msra.mxu1 %v2960_v28  ;;  %2120 = vmatprep.subr.bf16.mxu0 %v2971_v37  ;;  %v3034_v28 = vld [vmem:[%s4066_s1 + $0x72c] ss:$16 sps:$4 sm:$0xff]   ;;  %v3035_v37 = vld [vmem:[%s4066_s1 + $0x828] ss:$16 sps:$4 sm:$0xff]  }
  0xed   :  { %2095 = vmatprep.subr.bf16.mxu1 %v2968_v30  ;;  %v3032_v30 = vld [vmem:[%s4066_s1 + $0x728] ss:$16 sps:$4 sm:$0xff]  }
  0xef   :  { %2121 = vmatpush1.bf16.msra.mxu0 %v2969_v32  ;;  %v3043_v32 = vld [vmem:[%s4066_s1 + $0x80c] ss:$16 sps:$4 sm:$0xff]  }
  0xf0   :  { %2096 = vmatpush2.bf16.msra.mxu1 %v2966_v31  ;;  %2122 = vmatprep.subr.bf16.mxu0 %v2977_v34  ;;  %v3040_v31 = vld [vmem:[%s4066_s1 + $0x70c] ss:$16 sps:$4 sm:$0xff]   ;;  %v3041_v34 = vld [vmem:[%s4066_s1 + $0x808] ss:$16 sps:$4 sm:$0xff]  }
  0xf1   :  { %2097 = vmatprep.subr.bf16.mxu1 %v2974_v33  ;;  %v3038_v33 = vld [vmem:[%s4066_s1 + $0x708] ss:$16 sps:$4 sm:$0xff]  }
  0xf3   :  { %2123 = vmatpush1.bf16.msra.mxu0 %v2975_v38 }
  0xf4   :  { %2098 = vmatpush2.bf16.msra.mxu1 %v2972_v35  ;;  %2124 = vmatprep.subr.bf16.mxu0 %v2983_v47 }
  0xf5   :  { %2099 = vmatprep.subr.bf16.mxu1 %v2980_v39 }
  0xf7   :  { %2125 = vmatpush1.bf16.msra.mxu0 %v2981_v41 }
  0xf8   :  { %2100 = vmatpush2.bf16.msra.mxu1 %v2978_v40  ;;  %2126 = vmatprep.subr.bf16.mxu0 %v2989_v43 }
  0xf9   :  { %2101 = vmatprep.subr.bf16.mxu1 %v2986_v42 }
  0xfb   :  { %2127 = vmatpush1.bf16.msra.mxu0 %v2987_v45 }
  0xfc   :  { %2102 = vmatpush2.bf16.msra.mxu1 %v2984_v44  ;;  %2128 = vmatprep.subr.bf16.mxu0 %v2995_v48  ;;  %v2200_v44 = vsub.s32 0, %v3443_v59  ;;  %v4038_v48 = vld [vmem:[%s4070_s3] sm:$0xf] }
  0xfd   :  { %2103 = vmatprep.subr.bf16.mxu1 %v2992_v46  ;;  %v4031_v46 = vld [vmem:[%s4069_s2] sm:$0xf] }
  0xff   :  { %2129 = vmatpush1.bf16.msra.mxu0 %v2993_v6  ;;  %v2201_v6 = vrot.slane %v4031_v46, %v2200_v44 }
 0x100   :  { %2104 = vmatpush2.bf16.msra.mxu1 %v2990_v49  ;;  %2130 = vmatprep.subr.bf16.mxu0 %v2998_v50 }
 0x101   :  { %2155 = vmatprep.subr.bf16.mxu1 %v3001_v52 }
 0x102   :  { %v1820_v56 = vpop.f32.mrf.mxu0 }
 0x103   :  { %v1861_v57 = vpop.f32.mrf.mxu1  ;;  %2106 = vmatmul.mubr.bf16.vlgmr.msra.gmra.mxu1 %v3523_v25  ;;  %2131 = vmatpush2.bf16.msra.mxu0 %v2996_v53  ;;  %v3010_v25 = vld [vmem:[%s4066_s1 + $0x7ac] ss:$16 sps:$4 sm:$0xff]  }
 0x104   :  { %v3941_v58 = vadd.f32 %v1861_v57, %v1820_v56  ;;  %2156 = vmatpush1.bf16.msra.mxu1 %v2999_v36  ;;  %v1822_v63 = vpop.f32.mrf.mxu0  ;;  %2132 = vmatprep.subr.bf16.mxu0 %v3004_v54  ;;  %v2227_v36 = vrot.slane %v4038_v48, %v2200_v44 }
 0x105   :  { %v1863_v1 = vpop.f32.mrf.mxu1  ;;  %2157 = vmatprep.subr.bf16.mxu1 %v3007_v55  ;;  %2187 = vmatprep.mubr.bf16.mxu1 %v3044_v3  ;;  %v3016_v3 = vld [vmem:[%s4066_s1 + $0x78c] ss:$16 sps:$4 sm:$0xff]  }
 0x106   :  { %v3955_v10 = vadd.f32 %v1863_v1, %v1822_v63  ;;  %v1824_v11 = vpop.f32.mrf.mxu0 }
 0x107   :  { %v1865_v12 = vpop.f32.mrf.mxu1  ;;  %2133 = vmatpush2.bf16.msra.mxu0 %v3002_v60 }
 0x108   :  { %2158 = vmatpush1.bf16.msra.mxu1 %v3005_v61  ;;  %v1825_v15 = vpop.f32.mrf.mxu0  ;;  %2134 = vmatprep.subr.bf16.mxu0 %v3010_v25 }
 0x109   :  { %v1866_v16 = vpop.f32.mrf.mxu1  ;;  %2159 = vmatprep.subr.bf16.mxu1 %v3013_v5 }
 0x10b   :  { %2135 = vmatpush2.bf16.msra.mxu0 %v3008_v13 }
 0x10c   :  { %2160 = vmatpush1.bf16.msra.mxu1 %v3011_v14  ;;  %2136 = vmatprep.subr.bf16.mxu0 %v3016_v3 }
 0x10d   :  { %2161 = vmatprep.subr.bf16.mxu1 %v3019_v17 }
 0x10f   :  { %2137 = vmatpush2.bf16.msra.mxu0 %v3014_v18 }
 0x110   :  { %2162 = vmatpush1.bf16.msra.mxu1 %v3017_v51  ;;  %2138 = vmatprep.subr.bf16.mxu0 %v3022_v19 }
 0x111   :  { %2163 = vmatprep.subr.bf16.mxu1 %v3025_v20 }
 0x113   :  { %2139 = vmatpush2.bf16.msra.mxu0 %v3020_v21 }
 0x114   :  { %2164 = vmatpush1.bf16.msra.mxu1 %v3023_v22  ;;  %2140 = vmatprep.subr.bf16.mxu0 %v3028_v23 }
 0x115   :  { %2165 = vmatprep.subr.bf16.mxu1 %v3031_v24 }
 0x117   :  { %2141 = vmatpush2.bf16.msra.mxu0 %v3026_v27 }
 0x118   :  { %2166 = vmatpush1.bf16.msra.mxu1 %v3029_v7  ;;  %2142 = vmatprep.subr.bf16.mxu0 %v3034_v28 }
 0x119   :  { %2167 = vmatprep.subr.bf16.mxu1 %v3037_v29 }
 0x11b   :  { %2143 = vmatpush2.bf16.msra.mxu0 %v3032_v30 }
 0x11c   :  { %2168 = vmatpush1.bf16.msra.mxu1 %v3035_v37  ;;  %2144 = vmatprep.subr.bf16.mxu0 %v3040_v31 }
 0x11d   :  { %2169 = vmatprep.subr.bf16.mxu1 %v3043_v32  ;;  %v2209_v32 = vrot.slane %v4031_v46, %v3452_v62 }
 0x11f   :  { %2145 = vmatpush2.bf16.msra.mxu0 %v3038_v33 }
 0x120   :  { %2170 = vmatpush1.bf16.msra.mxu1 %v3041_v34 }
 0x122   :  { %2147 = vmatmul.mubr.bf16.vlgmr.msra.gmra.mxu0 %v3527_v26  ;;  %v2204_v26 = vsub.s32 1, %v3443_v59 }
 0x123   :  { %2188 = vmatmul.mubr.bf16.vlgmr.msra.gmra.mxu1 %v3632_v0 }
 0x124   :  { %v2205_v54 = vrot.slane %v4031_v46, %v2204_v26  ;;  %v2231_v57 = vrot.slane %v4038_v48, %v2204_v26  ;;  %v2262_v60 = vrot.slane %v3467_v4, %v2204_v26 }
 0x126   :  { %vm2272_vm2 = vcmp.eq.s32.totalorder %v2262_v60, 1 }
 0x142   :  { %v1902_v35 = vpop.f32.mrf.mxu0 }
 0x143   :  { %v1943_v38 = vpop.f32.mrf.mxu1  ;;  %v1903_v45 = vadd.f32 %v1902_v35, %v3941_v58  ;;  %v2258_v58 = vrot.slane %v3467_v4, %v2200_v44  ;;  %v2239_v44 = vrot.slane %v4038_v48, %v3464_v2 }
 0x144   :  { %v1904_v39 = vpop.f32.mrf.mxu0 }
 0x145   :  { %v1945_v47 = vpop.f32.mrf.mxu1  ;;  %v1905_v0 = vadd.f32 %v1904_v39, %v3955_v10  ;;  %v1944_v49 = vadd.f32 %v1943_v38, %v1903_v45  ;;  %vm2271_vm1 = vcmp.eq.s32.totalorder %v2258_v58, 1  ;;  %v2235_v38 = vrot.slane %v4038_v48, %v3452_v62 }
 0x146   :  { %v1906_v40 = vpop.f32.mrf.mxu0 }
 0x147   :  { %v1947_v41 = vpop.f32.mrf.mxu1  ;;  %v1946_v52 = vadd.f32 %v1945_v47, %v1905_v0  ;;  %v2213_v47 = vrot.slane %v4031_v46, %v3464_v2 }
 0x148   :  { %v1907_v42 = vpop.f32.mrf.mxu0 }
 0x149   :  { %v1948_v43 = vpop.f32.mrf.mxu1 }
 0x162   :  { %v1984_v50 = vpop.f32.mrf.mxu0 }
 0x163   :  { %v1985_v53 = vadd.f32 %v1984_v50, %v1944_v49 }
 0x164   :  { %v1986_v55 = vpop.f32.mrf.mxu0 }
 0x165   :  { %v2218_v56 = vmul.f32 %v2201_v6, %v1985_v53  ;;  %v1987_v59 = vadd.f32 %v1986_v55, %v1946_v52 }
 0x166   :  { %v1988_v61 = vpop.f32.mrf.mxu0 }
 0x167   :  { %v2244_v63 = vadd.f32 %v2227_v36, %v2218_v56  ;;  %v2219_v1 = vmul.f32 %v2205_v54, %v1987_v59 }
 0x168   :  { %v1989_v25 = vpop.f32.mrf.mxu0 }
 0x169   :  { %v2250_v5 = vmax.f32 %v2244_v63, 0.0  ;;  %v2245_v10 = vadd.f32 %v2231_v57, %v2219_v1 }
 0x16b   :  { %v2251_v11 = vmax.f32 %v2245_v10, 0.0  ;;  %v2275_v12 = vsel %vm2271_vm1, %v2250_v5, %v2244_v63 }
 0x16d   :  { %v2276_v13 = vsel %vm2272_vm2, %v2251_v11, %v2245_v10 }
 0x16e   :  { %v2600_v14 = vpack.c.bf16 %v2276_v13, %v2275_v12 }
 0x170   :  { %2295 = vst [vmem:[%s4071_s5] sm:$0xff] %v2600_v14 }
 0x183   :  { %v2025_v15 = vpop.f32.mrf.mxu1 }
 0x185   :  { %v2027_v16 = vpop.f32.mrf.mxu1 }
 0x187   :  { %v2029_v3 = vpop.f32.mrf.mxu1 }
 0x189   :  { %v2030_v17 = vpop.f32.mrf.mxu1 }
 0x1a2   :  { %v2066_v18 = vpop.f32.mrf.mxu0 }
 0x1a3   :  { %v2067_v27 = vadd.f32 %v2066_v18, %v2025_v15 }
 0x1a4   :  { %v2068_v51 = vpop.f32.mrf.mxu0 }
 0x1a5   :  { %v2069_v7 = vadd.f32 %v2068_v51, %v2027_v16 }
 0x1a6   :  { %v2070_v19 = vpop.f32.mrf.mxu0 }
 0x1a8   :  { %v2071_v20 = vpop.f32.mrf.mxu0 }
 0x1c3   :  { %v2107_v21 = vpop.f32.mrf.mxu1 }
 0x1c4   :  { %v2108_v28 = vadd.f32 %v2107_v21, %v2067_v27 }
 0x1c5   :  { %v2109_v22 = vpop.f32.mrf.mxu1 }
 0x1c6   :  { %v2110_v37 = vadd.f32 %v2109_v22, %v2069_v7 }
 0x1c7   :  { %v2111_v23 = vpop.f32.mrf.mxu1 }
 0x1c9   :  { %v2112_v24 = vpop.f32.mrf.mxu1 }
 0x1e2   :  { %v2148_v29 = vpop.f32.mrf.mxu0 }
 0x1e3   :  { %v2189_v30 = vpop.f32.mrf.mxu1  ;;  %v2149_v31 = vadd.f32 %v2148_v29, %v2108_v28 }
 0x1e4   :  { %v2150_v33 = vpop.f32.mrf.mxu0 }
 0x1e5   :  { %v2191_v34 = vpop.f32.mrf.mxu1  ;;  %v2190_v35 = vadd.f32 %v2189_v30, %v2149_v31  ;;  %v2151_v39 = vadd.f32 %v2150_v33, %v2110_v37 }
 0x1e6   :  { %v2152_v40 = vpop.f32.mrf.mxu0 }
 0x1e7   :  { %v2193_v41 = vpop.f32.mrf.mxu1  ;;  %v2220_v42 = vmul.f32 %v2209_v32, %v2190_v35  ;;  %v2192_v43 = vadd.f32 %v2191_v34, %v2151_v39 }
 0x1e8   :  { %v2153_v45 = vpop.f32.mrf.mxu0 }
 0x1e9   :  { %v2194_v26 = vpop.f32.mrf.mxu1  ;;  %v2246_v0 = vadd.f32 %v2235_v38, %v2220_v42  ;;  %v2221_v49 = vmul.f32 %v2213_v47, %v2192_v43 }
 0x1eb   :  { %v2252_v6 = vmax.f32 %v2246_v0, 0.0  ;;  %v2247_v50 = vadd.f32 %v2239_v44, %v2221_v49 }
 0x1ed   :  { %v2277_v46 = vsel %vm2273_vm3, %v2252_v6, %v2246_v0  ;;  %v2253_v52 = vmax.f32 %v2247_v50, 0.0 }
 0x1ef   :  { %v2278_v53 = vsel %vm2274_vm4, %v2253_v52, %v2247_v50 }
 0x1f0   :  { %v2601_v36 = vpack.c.bf16 %v2278_v53, %v2277_v46 }
 0x1f2   :  { %2296 = vst [vmem:[%s4071_s5 + $0x8] sm:$0xff] %v2601_v36 }

// kernel: _lambda_.35
= control target key start
LH: loop header
LB: loop body
LE: loop exit
PB: predicated region body
PF: predicated region fallthrough
CT: control target
= control target key end

     0   :  { %v73_v3 = vlaneseq  ;;  %v556_v5 = vmov 1983009808   ;;  %v557_v7 = vmov 0.0   ;;  %vm558_vm0 = vmmov 0   ;;  %s787_s0 = inlined_call_operand.vmem [shape: f32[2,264], index: 0, kind: input, shape index: {}]   ;;  %s788_s1 = inlined_call_operand.vmem [shape: f32[264,64], index: 1, kind: input, shape index: {}]   ;;  %s789_s2 = inlined_call_operand.vmem [shape: f32[1,64], index: 2, kind: input, shape index: {}]   ;;  %s790_s3 = inlined_call_operand.vmem [shape: f32[64,64], index: 3, kind: input, shape index: {}]   ;;  %s791_s4 = inlined_call_operand.vmem [shape: f32[1,64], index: 4, kind: input, shape index: {}]   ;;  %s792_s5 = inlined_call_operand.vmem [shape: f32[64,3], index: 5, kind: input, shape index: {}]   ;;  %s793_s6 = inlined_call_operand.vmem [shape: f32[1,3], index: 6, kind: input, shape index: {}]   ;;  %s794_s7 = inlined_call_operand.hbm [shape: f32[2,3], index: 7, kind: output, shape index: {}]  }
   0x1   :  { %v59_v0 = vld [vmem:[%s788_s1 + $0xf8] sm:$0xff]  ;;  %v58_v2 = vld [vmem:[%s788_s1 + $0xf0] sm:$0xff]  ;;  %v71_v6 = vunpack.c.l.s4 %v556_v5  ;;  %486 = vmatprep.subr.mxu1 %v557_v7  ;;  %v57_v8 = vld [vmem:[%s788_s1 + $0xe8] sm:$0xff]  ;;  %488 = vmatprep.mubr.msk.f32.mxu1 %vm558_vm0, %v557_v7 }
   0x2   :  { %v43_v1 = vld [vmem:[%s788_s1 + $0x78] sm:$0xff]  ;;  %431 = vmatprep.subr.mxu0 %v59_v0  ;;  %v42_v4 = vld [vmem:[%s788_s1 + $0x70] sm:$0xff]  ;;  %v41_v9 = vld [vmem:[%s788_s1 + $0x68] sm:$0xff]  ;;  %v74_v11 = vshrl.u32 %v73_v3, 7 }
   0x3   :  { %432 = vmatpush3.msra.mxu0 %v43_v1  ;;  %v72_v10 = vunpack.c.0.s8 %v71_v6  ;;  %v56_v12 = vld [vmem:[%s788_s1 + $0xe0] sm:$0xff]  ;;  %v55_v14 = vld [vmem:[%s788_s1 + $0xd8] sm:$0xff]  ;;  %v54_v17 = vld [vmem:[%s788_s1 + $0xd0] sm:$0xff] }
   0x4   :  { %433 = vmatprep.subr.mxu0 %v58_v2  ;;  %v40_v13 = vld [vmem:[%s788_s1 + $0x60] sm:$0xff]  ;;  %v39_v15 = vld [vmem:[%s788_s1 + $0x58] sm:$0xff]  ;;  %v38_v18 = vld [vmem:[%s788_s1 + $0x50] sm:$0xff] }
   0x5   :  { %434 = vmatpush3.msra.mxu0 %v42_v4  ;;  %v75_v16 = vsub.s32 %v72_v10, %v74_v11  ;;  %v53_v19 = vld [vmem:[%s788_s1 + $0xc8] sm:$0xff]  ;;  %v27_v20 = vld [vmem:[%s787_s0] sm:$0x3f] }
   0x6   :  { %435 = vmatprep.subr.mxu0 %v57_v8  ;;  %v37_v21 = vld [vmem:[%s788_s1 + $0x48] sm:$0xff]  ;;  %v69_v22 = vcombine.high %v27_v20, %v27_v20  ;;  %v60_v24 = vld [vmem:[%s788_s1 + $0x100] sm:$0xff] }
   0x7   :  { %436 = vmatpush3.msra.mxu0 %v41_v9  ;;  %v76_v23 = vrot.slane %v27_v20, %v75_v16  ;;  %v52_v25 = vld [vmem:[%s788_s1 + $0xc0] sm:$0xff]  ;;  %487 = vmatpush3.msra.mxu1 %v60_v24 }
   0x8   :  { %437 = vmatprep.subr.mxu0 %v56_v12 }
   0x9   :  { %438 = vmatpush3.msra.mxu0 %v40_v13 }
   0xa   :  { %439 = vmatprep.subr.mxu0 %v55_v14 }
   0xb   :  { %440 = vmatpush3.msra.mxu0 %v39_v15 }
   0xc   :  { %441 = vmatprep.subr.mxu0 %v54_v17 }
   0xd   :  { %442 = vmatpush3.msra.mxu0 %v38_v18 }
   0xe   :  { %12 = vsyncpa [#allocation3], 0  ;;  %443 = vmatprep.subr.mxu0 %v53_v19  ;;  %v36_v26 = vld [vmem:[%s788_s1 + $0x40] sm:$0xff]  ;;  %v83_v27 = vrot.slane %v69_v22, %v75_v16  ;;  %v84_v28 = vcombine.high %v76_v23, %v76_v23  ;;  %vm87_vm1 = vcmask 64512   ;;  %491 = vmatprep.subr.mxu1 %v557_v7  ;;  %v51_v29 = vld [vmem:[%s788_s1 + $0xb8] sm:$0xff]  ;;  %vm246_vm2 = vcmask 523264  }
   0xf   :  { %444 = vmatpush3.msra.mxu0 %v37_v21  ;;  %v238_v30 = vld [vmem:[%s790_s3 + $0x38] sm:$0xff]  ;;  %v50_v32 = vld [vmem:[%s788_s1 + $0xb0] sm:$0xff]  ;;  %v49_v35 = vld [vmem:[%s788_s1 + $0xa8] sm:$0xff]  ;;  %s559_s8 = smov [#allocation2]   ;;  %vm409_vm3 = vcmask 17408  }
  0x10   :  { %445 = vmatprep.subr.mxu0 %v52_v25  ;;  %v35_v31 = vld [vmem:[%s788_s1 + $0x38] sm:$0xff]  ;;  %154 = vmatprep.mubr.f32.mxu0 %v84_v28  ;;  %v237_v33 = vld [vmem:[%s790_s3 + $0x30] sm:$0xff]  ;;  %v33_v36 = vld [vmem:[%s788_s1 + $0x28] sm:$0xff]  ;;  %s417_s9 = sshll.u32 %s559_s8, 4  ;;  %s418_s9 = int_to_ptr.vmem [resolvable:$true] %s417_s9 }
  0x11   :  { %446 = vmatpush3.msra.mxu0 %v36_v26  ;;  %489 = vmatmul.mubr.msk.f32.vlgmr.msra.gmra.mxu1 %vm87_vm1, %v83_v27  ;;  %v34_v34 = vld [vmem:[%s788_s1 + $0x30] sm:$0xff]  ;;  %v48_v37 = vld [vmem:[%s788_s1 + $0xa0] sm:$0xff]  ;;  %v47_v39 = vld [vmem:[%s788_s1 + $0x98] sm:$0xff]  ;;  %p539_p1 = scmp.lt.s32.totalorder %s418_s9, %s418_s9 }
  0x12   :  { %447 = vmatprep.subr.mxu0 %v51_v29  ;;  %492 = vmatpush3.msra.mxu1 %v238_v30  ;;  %v32_v38 = vld [vmem:[%s788_s1 + $0x20] sm:$0xff]  ;;  %v31_v40 = vld [vmem:[%s788_s1 + $0x18] sm:$0xff]  ;;  %v46_v41 = vld [vmem:[%s788_s1 + $0x90] sm:$0xff] }
  0x13   :  { %448 = vmatpush3.msra.mxu0 %v35_v31  ;;  %493 = vmatprep.subr.mxu1 %v557_v7  ;;  %v30_v42 = vld [vmem:[%s788_s1 + $0x10] sm:$0xff]  ;;  %v45_v43 = vld [vmem:[%s788_s1 + $0x88] sm:$0xff]  ;;  %v44_v45 = vld [vmem:[%s788_s1 + $0x80] sm:$0xff] }
  0x14   :  { %449 = vmatprep.subr.mxu0 %v50_v32  ;;  %494 = vmatpush3.msra.mxu1 %v237_v33  ;;  %v29_v44 = vld [vmem:[%s788_s1 + $0x8] sm:$0xff]  ;;  %v28_v46 = vld [vmem:[%s788_s1] sm:$0xff]  ;;  %v234_v49 = vld [vmem:[%s790_s3 + $0x18] sm:$0xff] }
  0x15   :  { %450 = vmatpush3.msra.mxu0 %v34_v34  ;;  %495 = vmatprep.subr.mxu1 %v557_v7  ;;  %v236_v47 = vld [vmem:[%s790_s3 + $0x28] sm:$0xff]  ;;  %v235_v48 = vld [vmem:[%s790_s3 + $0x20] sm:$0xff]  ;;  %v233_v50 = vld [vmem:[%s790_s3 + $0x10] sm:$0xff] }
  0x16   :  { %451 = vmatprep.subr.mxu0 %v49_v35  ;;  %507 = vmatprep.mubr.msk.f32.mxu1 %vm558_vm0, %v557_v7  ;;  %v232_v51 = vld [vmem:[%s790_s3 + $0x8] sm:$0xff]  ;;  %v231_v52 = vld [vmem:[%s790_s3] sm:$0xff]  ;;  %v328_v62 = vld [vmem:[%s792_s5 + $0x38] sm:$0xff] }
  0x17   :  { %452 = vmatpush3.msra.mxu0 %v33_v36  ;;  %496 = vmatpush3.msra.mxu1 %v236_v47  ;;  %v425_v57 = vld [vmem:[%s789_s2] ss:$0 sm:$0xff]  ;;  %v327_v63 = vld [vmem:[%s792_s5 + $0x30] sm:$0xff]  ;;  %v326_v0 = vld [vmem:[%s792_s5 + $0x28] sm:$0xff] }
  0x18   :  { %453 = vmatprep.subr.mxu0 %v48_v37  ;;  %497 = vmatprep.subr.mxu1 %v557_v7  ;;  %v325_v1 = vld [vmem:[%s792_s5 + $0x20] sm:$0xff]  ;;  %v324_v2 = vld [vmem:[%s792_s5 + $0x18] sm:$0xff]  ;;  %v323_v3 = vld [vmem:[%s792_s5 + $0x10] sm:$0xff] }
  0x19   :  { %454 = vmatpush3.msra.mxu0 %v32_v38  ;;  %498 = vmatpush3.msra.mxu1 %v235_v48  ;;  %v322_v4 = vld [vmem:[%s792_s5 + $0x8] sm:$0xff]  ;;  %v321_v5 = vld [vmem:[%s792_s5] sm:$0xff]  ;;  %s534_s5 = scalar_lea.vmem %s418_s9, 32 }
  0x1a   :  { %455 = vmatprep.subr.mxu0 %v47_v39  ;;  %499 = vmatprep.subr.mxu1 %v557_v7  ;;  %v427_v6 = vld [vmem:[%s791_s4] ss:$0 sm:$0xff]  ;;  %p535_p0 = scmp.ne.s32.totalorder %s418_s9, %s534_s5  ;;  %p540_p2 = scmp.lt.s32.totalorder %s534_s5, %s534_s5 }
  0x1b   :  { %456 = vmatpush3.msra.mxu0 %v31_v40  ;;  %500 = vmatpush3.msra.mxu1 %v234_v49  ;;  %v429_v12 = vld [vmem:[%s793_s6] ss:$0 sm:$0xff] }
  0x1c   :  { %457 = vmatprep.subr.mxu0 %v46_v41  ;;  %501 = vmatprep.subr.mxu1 %v557_v7  ;;  %p541_p3 = por %p540_p2, %p539_p1 }
  0x1d   :  { %458 = vmatpush3.msra.mxu0 %v30_v42  ;;  %502 = vmatpush3.msra.mxu1 %v233_v50 }
  0x1e   :  { %459 = vmatprep.subr.mxu0 %v45_v43  ;;  %503 = vmatprep.subr.mxu1 %v557_v7  ;;  %p542_p4 = pnand %p541_p3, %p535_p0 }
  0x1f   :  { %460 = vmatpush3.msra.mxu0 %v29_v44  ;;  %504 = vmatpush3.msra.mxu1 %v232_v51 }
  0x20   :  { %461 = vmatprep.subr.mxu0 %v44_v45  ;;  %505 = vmatprep.subr.mxu1 %v557_v7 }
  0x21   :  { %462 = vmatpush3.msra.mxu0 %v28_v46  ;;  %506 = vmatpush3.msra.mxu1 %v231_v52 }
  0x22   :  { %155 = vmatmul.mubr.f32.vlgmr.msra.gmra.mxu0 %v76_v23  ;;  %510 = vmatprep.subr.mxu1 %v557_v7 }
  0xd1   :  { %v226_v53 = vpop.f32.mrf.mxu1 }
  0xd3   :  { %v490_v54 = vpop.f32.mrf.mxu1 }
  0xe2   :  { %v463_v55 = vpop.f32.mrf.mxu0 }
  0xe4   :  { %v464_v56 = vpop.f32.mrf.mxu0 }
  0xe5   :  { %v465_v58 = vadd.f32 %v464_v56, %v463_v55 }
  0xe7   :  { %v157_v59 = vadd.f32 %v465_v58, %v425_v57 }
  0xe9   :  { %v227_v60 = vadd.f32 %v226_v53, %v157_v59 }
  0xeb   :  { %v230_v61 = vmax.f32 %v227_v60, 0.0 }
  0xed   :  { %508 = vmatmul.mubr.msk.f32.vlgmr.msra.gmra.mxu1 %vm246_vm2, %v230_v61 }
  0xee   :  { %511 = vmatpush3.msra.mxu1 %v328_v62  ;;  %526 = vmatprep.mubr.msk.f32.mxu1 %vm558_vm0, %v557_v7 }
  0xef   :  { %512 = vmatprep.subr.mxu1 %v557_v7 }
  0xf0   :  { %513 = vmatpush3.msra.mxu1 %v327_v63 }
  0xf1   :  { %514 = vmatprep.subr.mxu1 %v557_v7 }
  0xf2   :  { %515 = vmatpush3.msra.mxu1 %v326_v0 }
  0xf3   :  { %516 = vmatprep.subr.mxu1 %v557_v7 }
  0xf4   :  { %517 = vmatpush3.msra.mxu1 %v325_v1 }
  0xf5   :  { %518 = vmatprep.subr.mxu1 %v557_v7 }
  0xf6   :  { %519 = vmatpush3.msra.mxu1 %v324_v2 }
  0xf7   :  { %520 = vmatprep.subr.mxu1 %v557_v7 }
  0xf8   :  { %521 = vmatpush3.msra.mxu1 %v323_v3 }
  0xf9   :  { %522 = vmatprep.subr.mxu1 %v557_v7 }
  0xfa   :  { %523 = vmatpush3.msra.mxu1 %v322_v4 }
  0xfb   :  { %524 = vmatprep.subr.mxu1 %v557_v7 }
  0xfc   :  { %525 = vmatpush3.msra.mxu1 %v321_v5 }
 0x1ad   :  { %v316_v8 = vpop.f32.mrf.mxu1 }
 0x1ae   :  { %v317_v9 = vadd.f32 %v427_v6, %v316_v8 }
 0x1af   :  { %v509_v10 = vpop.f32.mrf.mxu1 }
 0x1b0   :  { %v320_v11 = vmax.f32 %v317_v9, 0.0 }
 0x1b2   :  { %527 = vmatmul.mubr.msk.f32.vlgmr.msra.gmra.mxu1 %vm246_vm2, %v320_v11 }
 0x272   :  { %v405_v7 = vpop.f32.mrf.mxu1 }
 0x273   :  { %v406_v13 = vadd.f32 %v429_v12, %v405_v7 }
 0x274   :  { %v528_v14 = vpop.f32.mrf.mxu1 }
 0x275   :  { %410 = vst.msk [vmem:[#allocation2] sm:$0x3] %vm409_vm3, %v406_v13 }
 0x276   :  { %545 = shalt.err (!%p542_p4)
}
 0x277   :  { %420 = dma.vmem_to_hbm [thread:$0]  %s418_s9, 32, %s794_s7, [#allocation3]  }
 0x278   :  { %554 = dma.done.wait [#allocation3], 32  }
 0x279   :  { %555 = vsyncadd [#allocation3], 4294967264 }
 0x27a   :  { %424 = vsyncpa [#allocation3], 1 }

// kernel: _lambda_.33
= control target key start
LH: loop header
LB: loop body
LE: loop exit
PB: predicated region body
PF: predicated region fallthrough
CT: control target
= control target key end

     0   :  { %s3988_s1 = inlined_call_operand.vmem [shape: bf16[2304,256], index: 1, kind: input, shape index: {}]   ;;  %s3989_s0 = inlined_call_operand.vmem [shape: bf16[8,2304], index: 0, kind: input, shape index: {}]   ;;  %s3990_s4 = inlined_call_operand.vmem [shape: f32[1,256], index: 4, kind: input, shape index: {}]   ;;  %s3991_s2 = inlined_call_operand.vmem [shape: f32[1,256], index: 2, kind: input, shape index: {}]   ;;  %s3992_s3 = inlined_call_operand.vmem [shape: f32[1,256], index: 3, kind: input, shape index: {}]   ;;  %s3993_s5 = inlined_call_operand.vmem [shape: bf16[8,256], index: 5, kind: output, shape index: {}]  }
   0x1   :  { %v2556_v0 = vld [vmem:[%s3988_s1 + $0x74] ss:$8 sps:$4 sm:$0xff]   ;;  %v2560_v2 = vld [vmem:[%s3988_s1 + $0x70] ss:$8 sps:$4 sm:$0xff]   ;;  %v2562_v4 = vld [vmem:[%s3988_s1 + $0x64] ss:$8 sps:$4 sm:$0xff]  }
   0x2   :  { %v2558_v1 = vld [vmem:[%s3988_s1 + $0x174] ss:$8 sps:$4 sm:$0xff]   ;;  %1820 = vmatprep.subr.bf16.mxu0 %v2556_v0  ;;  %v2561_v3 = vld [vmem:[%s3988_s1 + $0x170] ss:$8 sps:$4 sm:$0xff]   ;;  %v2564_v5 = vld [vmem:[%s3988_s1 + $0x164] ss:$8 sps:$4 sm:$0xff]  }
   0x3   :  { %1861 = vmatprep.subr.bf16.mxu1 %v2558_v1  ;;  %1821 = vmatpush1.bf16.msra.mxu0 %v2560_v2  ;;  %v2566_v6 = vld [vmem:[%s3988_s1 + $0x60] ss:$8 sps:$4 sm:$0xff]   ;;  %v2568_v8 = vld [vmem:[%s3988_s1 + $0x54] ss:$8 sps:$4 sm:$0xff]   ;;  %v2572_v10 = vld [vmem:[%s3988_s1 + $0x50] ss:$8 sps:$4 sm:$0xff]  }
   0x4   :  { %1862 = vmatpush1.bf16.msra.mxu1 %v2561_v3  ;;  %1822 = vmatprep.subr.bf16.mxu0 %v2562_v4  ;;  %v2567_v7 = vld [vmem:[%s3988_s1 + $0x160] ss:$8 sps:$4 sm:$0xff]   ;;  %v2570_v9 = vld [vmem:[%s3988_s1 + $0x154] ss:$8 sps:$4 sm:$0xff]   ;;  %v2573_v11 = vld [vmem:[%s3988_s1 + $0x150] ss:$8 sps:$4 sm:$0xff]  }
   0x5   :  { %1863 = vmatprep.subr.bf16.mxu1 %v2564_v5  ;;  %v2574_v12 = vld [vmem:[%s3988_s1 + $0x44] ss:$8 sps:$4 sm:$0xff]   ;;  %v2578_v14 = vld [vmem:[%s3988_s1 + $0x40] ss:$8 sps:$4 sm:$0xff]   ;;  %v2580_v16 = vld [vmem:[%s3988_s1 + $0x34] ss:$8 sps:$4 sm:$0xff]  }
   0x6   :  { %v2576_v13 = vld [vmem:[%s3988_s1 + $0x144] ss:$8 sps:$4 sm:$0xff]   ;;  %v2579_v15 = vld [vmem:[%s3988_s1 + $0x140] ss:$8 sps:$4 sm:$0xff]   ;;  %v2582_v17 = vld [vmem:[%s3988_s1 + $0x134] ss:$8 sps:$4 sm:$0xff]  }
   0x7   :  { %1823 = vmatpush1.bf16.msra.mxu0 %v2566_v6  ;;  %v2584_v18 = vld [vmem:[%s3988_s1 + $0x30] ss:$8 sps:$4 sm:$0xff]   ;;  %v2586_v20 = vld [vmem:[%s3988_s1 + $0x24] ss:$8 sps:$4 sm:$0xff]   ;;  %v2590_v22 = vld [vmem:[%s3988_s1 + $0x20] ss:$8 sps:$4 sm:$0xff]  }
   0x8   :  { %1864 = vmatpush1.bf16.msra.mxu1 %v2567_v7  ;;  %1824 = vmatprep.subr.bf16.mxu0 %v2568_v8  ;;  %v2585_v19 = vld [vmem:[%s3988_s1 + $0x130] ss:$8 sps:$4 sm:$0xff]   ;;  %v2588_v21 = vld [vmem:[%s3988_s1 + $0x124] ss:$8 sps:$4 sm:$0xff]   ;;  %v2591_v23 = vld [vmem:[%s3988_s1 + $0x120] ss:$8 sps:$4 sm:$0xff]  }
   0x9   :  { %1865 = vmatprep.subr.bf16.mxu1 %v2570_v9  ;;  %v2592_v24 = vld [vmem:[%s3988_s1 + $0x14] ss:$8 sps:$4 sm:$0xff]   ;;  %v2596_v26 = vld [vmem:[%s3988_s1 + $0x10] ss:$8 sps:$4 sm:$0xff]   ;;  %v2598_v28 = vld [vmem:[%s3988_s1 + $0x4] ss:$8 sps:$4 sm:$0xff]  }
   0xa   :  { %v2594_v25 = vld [vmem:[%s3988_s1 + $0x114] ss:$8 sps:$4 sm:$0xff]   ;;  %v2597_v27 = vld [vmem:[%s3988_s1 + $0x110] ss:$8 sps:$4 sm:$0xff]   ;;  %v2600_v29 = vld [vmem:[%s3988_s1 + $0x104] ss:$8 sps:$4 sm:$0xff]  }
   0xb   :  { %1825 = vmatpush1.bf16.msra.mxu0 %v2572_v10  ;;  %v2602_v30 = vld [vmem:[%s3988_s1] ss:$8 sps:$4 sm:$0xff]   ;;  %v2604_v32 = vld [vmem:[%s3988_s1 + $0xf4] ss:$8 sps:$4 sm:$0xff]   ;;  %v2608_v34 = vld [vmem:[%s3988_s1 + $0xf0] ss:$8 sps:$4 sm:$0xff]  }
   0xc   :  { %1866 = vmatpush1.bf16.msra.mxu1 %v2573_v11  ;;  %1826 = vmatprep.subr.bf16.mxu0 %v2574_v12  ;;  %v2603_v31 = vld [vmem:[%s3988_s1 + $0x100] ss:$8 sps:$4 sm:$0xff]   ;;  %v2606_v33 = vld [vmem:[%s3988_s1 + $0x1f4] ss:$8 sps:$4 sm:$0xff]   ;;  %v2609_v35 = vld [vmem:[%s3988_s1 + $0x1f0] ss:$8 sps:$4 sm:$0xff]  }
   0xd   :  { %1867 = vmatprep.subr.bf16.mxu1 %v2576_v13  ;;  %v2610_v36 = vld [vmem:[%s3988_s1 + $0xe4] ss:$8 sps:$4 sm:$0xff]   ;;  %v2614_v38 = vld [vmem:[%s3988_s1 + $0xe0] ss:$8 sps:$4 sm:$0xff]   ;;  %v2616_v40 = vld [vmem:[%s3988_s1 + $0xd4] ss:$8 sps:$4 sm:$0xff]  }
   0xe   :  { %v2612_v37 = vld [vmem:[%s3988_s1 + $0x1e4] ss:$8 sps:$4 sm:$0xff]   ;;  %v2615_v39 = vld [vmem:[%s3988_s1 + $0x1e0] ss:$8 sps:$4 sm:$0xff]   ;;  %v2618_v41 = vld [vmem:[%s3988_s1 + $0x1d4] ss:$8 sps:$4 sm:$0xff]  }
   0xf   :  { %1827 = vmatpush1.bf16.msra.mxu0 %v2578_v14  ;;  %v2620_v42 = vld [vmem:[%s3988_s1 + $0xd0] ss:$8 sps:$4 sm:$0xff]   ;;  %v2622_v44 = vld [vmem:[%s3988_s1 + $0xc4] ss:$8 sps:$4 sm:$0xff]   ;;  %v2626_v49 = vld [vmem:[%s3988_s1 + $0xc0] ss:$8 sps:$4 sm:$0xff]  }
  0x10   :  { %1868 = vmatpush1.bf16.msra.mxu1 %v2579_v15  ;;  %1828 = vmatprep.subr.bf16.mxu0 %v2580_v16  ;;  %v2621_v43 = vld [vmem:[%s3988_s1 + $0x1d0] ss:$8 sps:$4 sm:$0xff]   ;;  %v2624_v45 = vld [vmem:[%s3988_s1 + $0x1c4] ss:$8 sps:$4 sm:$0xff]   ;;  %v2627_v50 = vld [vmem:[%s3988_s1 + $0x1c0] ss:$8 sps:$4 sm:$0xff]  }
  0x11   :  { %1869 = vmatprep.subr.bf16.mxu1 %v2582_v17  ;;  %v20_v46 = vld [vmem:[%s3989_s0] sm:$0xff]  ;;  %v21_v48 = vld [vmem:[%s3989_s0 + $0x8] sm:$0xff]  ;;  %v2628_v52 = vld [vmem:[%s3988_s1 + $0xb4] ss:$8 sps:$4 sm:$0xff]  }
  0x12   :  { %v2248_v47 = vcombine.high %v20_v46, %v20_v46  ;;  %v2250_v51 = vcombine.high %v21_v48, %v21_v48  ;;  %v2630_v53 = vld [vmem:[%s3988_s1 + $0x1b4] ss:$8 sps:$4 sm:$0xff]   ;;  %v2632_v54 = vld [vmem:[%s3988_s1 + $0xb0] ss:$8 sps:$4 sm:$0xff]   ;;  %v2634_v56 = vld [vmem:[%s3988_s1 + $0xa4] ss:$8 sps:$4 sm:$0xff]   ;;  %v2247_v6 = vcombine.low %v20_v46, %v20_v46  ;;  %v2249_v7 = vcombine.low %v21_v48, %v21_v48 }
  0x13   :  { %1829 = vmatpush1.bf16.msra.mxu0 %v2584_v18  ;;  %v2633_v55 = vld [vmem:[%s3988_s1 + $0x1b0] ss:$8 sps:$4 sm:$0xff]   ;;  %v2636_v57 = vld [vmem:[%s3988_s1 + $0x1a4] ss:$8 sps:$4 sm:$0xff]   ;;  %v2638_v58 = vld [vmem:[%s3988_s1 + $0xa0] ss:$8 sps:$4 sm:$0xff]  }
  0x14   :  { %1870 = vmatpush1.bf16.msra.mxu1 %v2585_v19  ;;  %1830 = vmatprep.subr.bf16.mxu0 %v2586_v20  ;;  %v2639_v59 = vld [vmem:[%s3988_s1 + $0x1a0] ss:$8 sps:$4 sm:$0xff]   ;;  %v2640_v60 = vld [vmem:[%s3988_s1 + $0x94] ss:$8 sps:$4 sm:$0xff]   ;;  %v2644_v62 = vld [vmem:[%s3988_s1 + $0x90] ss:$8 sps:$4 sm:$0xff]  }
  0x15   :  { %1871 = vmatprep.subr.bf16.mxu1 %v2588_v21  ;;  %1852 = vmatprep.mubr.bf16.mxu0 %v2248_v47  ;;  %v2642_v61 = vld [vmem:[%s3988_s1 + $0x194] ss:$8 sps:$4 sm:$0xff]   ;;  %v2645_v63 = vld [vmem:[%s3988_s1 + $0x190] ss:$8 sps:$4 sm:$0xff]   ;;  %v2646_v0 = vld [vmem:[%s3988_s1 + $0x84] ss:$8 sps:$4 sm:$0xff]  }
  0x16   :  { %1893 = vmatprep.mubr.bf16.mxu1 %v2250_v51  ;;  %v2648_v1 = vld [vmem:[%s3988_s1 + $0x184] ss:$8 sps:$4 sm:$0xff]   ;;  %v2650_v2 = vld [vmem:[%s3988_s1 + $0x80] ss:$8 sps:$4 sm:$0xff]   ;;  %v2658_v4 = vld [vmem:[%s3988_s1 + $0x274] ss:$8 sps:$4 sm:$0xff]  }
  0x17   :  { %1831 = vmatpush1.bf16.msra.mxu0 %v2590_v22  ;;  %v2651_v3 = vld [vmem:[%s3988_s1 + $0x180] ss:$8 sps:$4 sm:$0xff]   ;;  %v2661_v5 = vld [vmem:[%s3988_s1 + $0x374] ss:$8 sps:$4 sm:$0xff]   ;;  %v2656_v8 = vld [vmem:[%s3988_s1 + $0x270] ss:$8 sps:$4 sm:$0xff]  }
  0x18   :  { %1872 = vmatpush1.bf16.msra.mxu1 %v2591_v23  ;;  %1832 = vmatprep.subr.bf16.mxu0 %v2592_v24  ;;  %v2659_v9 = vld [vmem:[%s3988_s1 + $0x370] ss:$8 sps:$4 sm:$0xff]   ;;  %v2664_v10 = vld [vmem:[%s3988_s1 + $0x264] ss:$8 sps:$4 sm:$0xff]   ;;  %v2662_v12 = vld [vmem:[%s3988_s1 + $0x260] ss:$8 sps:$4 sm:$0xff]  }
  0x19   :  { %1873 = vmatprep.subr.bf16.mxu1 %v2594_v25  ;;  %v2667_v11 = vld [vmem:[%s3988_s1 + $0x364] ss:$8 sps:$4 sm:$0xff]   ;;  %v2665_v13 = vld [vmem:[%s3988_s1 + $0x360] ss:$8 sps:$4 sm:$0xff]   ;;  %v2670_v14 = vld [vmem:[%s3988_s1 + $0x254] ss:$8 sps:$4 sm:$0xff]  }
  0x1a   :  { %v2673_v15 = vld [vmem:[%s3988_s1 + $0x354] ss:$8 sps:$4 sm:$0xff]   ;;  %v2668_v16 = vld [vmem:[%s3988_s1 + $0x250] ss:$8 sps:$4 sm:$0xff]   ;;  %v2676_v18 = vld [vmem:[%s3988_s1 + $0x244] ss:$8 sps:$4 sm:$0xff]  }
  0x1b   :  { %1833 = vmatpush1.bf16.msra.mxu0 %v2596_v26  ;;  %v2671_v17 = vld [vmem:[%s3988_s1 + $0x350] ss:$8 sps:$4 sm:$0xff]   ;;  %v2679_v19 = vld [vmem:[%s3988_s1 + $0x344] ss:$8 sps:$4 sm:$0xff]   ;;  %v2674_v20 = vld [vmem:[%s3988_s1 + $0x240] ss:$8 sps:$4 sm:$0xff]  }
  0x1c   :  { %1874 = vmatpush1.bf16.msra.mxu1 %v2597_v27  ;;  %1834 = vmatprep.subr.bf16.mxu0 %v2598_v28  ;;  %v2677_v21 = vld [vmem:[%s3988_s1 + $0x340] ss:$8 sps:$4 sm:$0xff]   ;;  %v2682_v22 = vld [vmem:[%s3988_s1 + $0x234] ss:$8 sps:$4 sm:$0xff]   ;;  %v2680_v24 = vld [vmem:[%s3988_s1 + $0x230] ss:$8 sps:$4 sm:$0xff]  }
  0x1d   :  { %1875 = vmatprep.subr.bf16.mxu1 %v2600_v29  ;;  %v2685_v23 = vld [vmem:[%s3988_s1 + $0x334] ss:$8 sps:$4 sm:$0xff]   ;;  %v2683_v25 = vld [vmem:[%s3988_s1 + $0x330] ss:$8 sps:$4 sm:$0xff]   ;;  %v2688_v26 = vld [vmem:[%s3988_s1 + $0x224] ss:$8 sps:$4 sm:$0xff]  }
  0x1e   :  { %v2691_v27 = vld [vmem:[%s3988_s1 + $0x324] ss:$8 sps:$4 sm:$0xff]   ;;  %v2686_v28 = vld [vmem:[%s3988_s1 + $0x220] ss:$8 sps:$4 sm:$0xff]   ;;  %v2721_v51 = vld [vmem:[%s3988_s1 + $0x3d4] ss:$8 sps:$4 sm:$0xff]  }
  0x1f   :  { %1835 = vmatpush1.bf16.msra.mxu0 %v2602_v30  ;;  %v2689_v29 = vld [vmem:[%s3988_s1 + $0x320] ss:$8 sps:$4 sm:$0xff]   ;;  %v2694_v30 = vld [vmem:[%s3988_s1 + $0x214] ss:$8 sps:$4 sm:$0xff]   ;;  %v2712_v46 = vld [vmem:[%s3988_s1 + $0x2e4] ss:$8 sps:$4 sm:$0xff]  }
  0x20   :  { %1876 = vmatpush1.bf16.msra.mxu1 %v2603_v31  ;;  %1836 = vmatprep.subr.bf16.mxu0 %v2604_v32  ;;  %v2697_v31 = vld [vmem:[%s3988_s1 + $0x314] ss:$8 sps:$4 sm:$0xff]   ;;  %v2715_v47 = vld [vmem:[%s3988_s1 + $0x3e4] ss:$8 sps:$4 sm:$0xff]   ;;  %v2710_v48 = vld [vmem:[%s3988_s1 + $0x2e0] ss:$8 sps:$4 sm:$0xff]  }
  0x21   :  { %1877 = vmatprep.subr.bf16.mxu1 %v2606_v33  ;;  %v3316_v32 = vld [vmem:[%s3989_s0 + $0x10] sm:$0xff] }
  0x22   :  { %v2692_v33 = vld [vmem:[%s3988_s1 + $0x210] ss:$8 sps:$4 sm:$0xff]  }
  0x23   :  { %1837 = vmatpush2.bf16.msra.mxu0 %v2608_v34  ;;  %v2695_v34 = vld [vmem:[%s3988_s1 + $0x310] ss:$8 sps:$4 sm:$0xff]  }
  0x24   :  { %1878 = vmatpush2.bf16.msra.mxu1 %v2609_v35  ;;  %1838 = vmatprep.subr.bf16.mxu0 %v2610_v36  ;;  %v2252_v35 = vcombine.high %v3316_v32, %v3316_v32  ;;  %v3329_v36 = vld [vmem:[%s3989_s0 + $0x18] sm:$0xff] }
  0x25   :  { %1879 = vmatprep.subr.bf16.mxu1 %v2612_v37  ;;  %v2700_v37 = vld [vmem:[%s3988_s1 + $0x204] ss:$8 sps:$4 sm:$0xff]  }
  0x27   :  { %1839 = vmatpush2.bf16.msra.mxu0 %v2614_v38  ;;  %v2254_v38 = vcombine.high %v3329_v36, %v3329_v36 }
  0x28   :  { %1880 = vmatpush2.bf16.msra.mxu1 %v2615_v39  ;;  %1840 = vmatprep.subr.bf16.mxu0 %v2616_v40  ;;  %v2703_v39 = vld [vmem:[%s3988_s1 + $0x304] ss:$8 sps:$4 sm:$0xff]   ;;  %v2698_v40 = vld [vmem:[%s3988_s1 + $0x200] ss:$8 sps:$4 sm:$0xff]  }
  0x29   :  { %1881 = vmatprep.subr.bf16.mxu1 %v2618_v41  ;;  %v2701_v41 = vld [vmem:[%s3988_s1 + $0x300] ss:$8 sps:$4 sm:$0xff]  }
  0x2b   :  { %1841 = vmatpush2.bf16.msra.mxu0 %v2620_v42  ;;  %v2706_v42 = vld [vmem:[%s3988_s1 + $0x2f4] ss:$8 sps:$4 sm:$0xff]  }
  0x2c   :  { %1882 = vmatpush2.bf16.msra.mxu1 %v2621_v43  ;;  %1842 = vmatprep.subr.bf16.mxu0 %v2622_v44  ;;  %v2709_v43 = vld [vmem:[%s3988_s1 + $0x3f4] ss:$8 sps:$4 sm:$0xff]   ;;  %v2704_v44 = vld [vmem:[%s3988_s1 + $0x2f0] ss:$8 sps:$4 sm:$0xff]  }
  0x2d   :  { %1883 = vmatprep.subr.bf16.mxu1 %v2624_v45  ;;  %v2707_v45 = vld [vmem:[%s3988_s1 + $0x3f0] ss:$8 sps:$4 sm:$0xff]  }
  0x2f   :  { %1843 = vmatpush2.bf16.msra.mxu0 %v2626_v49  ;;  %v2713_v49 = vld [vmem:[%s3988_s1 + $0x3e0] ss:$8 sps:$4 sm:$0xff]  }
  0x30   :  { %1884 = vmatpush2.bf16.msra.mxu1 %v2627_v50  ;;  %1844 = vmatprep.subr.bf16.mxu0 %v2628_v52  ;;  %v2718_v50 = vld [vmem:[%s3988_s1 + $0x2d4] ss:$8 sps:$4 sm:$0xff]   ;;  %v2716_v52 = vld [vmem:[%s3988_s1 + $0x2d0] ss:$8 sps:$4 sm:$0xff]  }
  0x31   :  { %1885 = vmatprep.subr.bf16.mxu1 %v2630_v53  ;;  %v2719_v53 = vld [vmem:[%s3988_s1 + $0x3d0] ss:$8 sps:$4 sm:$0xff]  }
  0x33   :  { %1845 = vmatpush2.bf16.msra.mxu0 %v2632_v54  ;;  %v2724_v54 = vld [vmem:[%s3988_s1 + $0x2c4] ss:$8 sps:$4 sm:$0xff]  }
  0x34   :  { %1886 = vmatpush2.bf16.msra.mxu1 %v2633_v55  ;;  %1846 = vmatprep.subr.bf16.mxu0 %v2634_v56  ;;  %v2727_v55 = vld [vmem:[%s3988_s1 + $0x3c4] ss:$8 sps:$4 sm:$0xff]   ;;  %v2722_v56 = vld [vmem:[%s3988_s1 + $0x2c0] ss:$8 sps:$4 sm:$0xff]  }
  0x35   :  { %1887 = vmatprep.subr.bf16.mxu1 %v2636_v57  ;;  %v2725_v57 = vld [vmem:[%s3988_s1 + $0x3c0] ss:$8 sps:$4 sm:$0xff]  }
  0x37   :  { %1847 = vmatpush2.bf16.msra.mxu0 %v2638_v58  ;;  %v2730_v58 = vld [vmem:[%s3988_s1 + $0x2b4] ss:$8 sps:$4 sm:$0xff]  }
  0x38   :  { %1888 = vmatpush2.bf16.msra.mxu1 %v2639_v59  ;;  %1848 = vmatprep.subr.bf16.mxu0 %v2640_v60  ;;  %v2733_v59 = vld [vmem:[%s3988_s1 + $0x3b4] ss:$8 sps:$4 sm:$0xff]   ;;  %v2728_v60 = vld [vmem:[%s3988_s1 + $0x2b0] ss:$8 sps:$4 sm:$0xff]  }
  0x39   :  { %1889 = vmatprep.subr.bf16.mxu1 %v2642_v61  ;;  %v2731_v61 = vld [vmem:[%s3988_s1 + $0x3b0] ss:$8 sps:$4 sm:$0xff]  }
  0x3b   :  { %1849 = vmatpush2.bf16.msra.mxu0 %v2644_v62  ;;  %v2736_v62 = vld [vmem:[%s3988_s1 + $0x2a4] ss:$8 sps:$4 sm:$0xff]  }
  0x3c   :  { %1890 = vmatpush2.bf16.msra.mxu1 %v2645_v63  ;;  %1850 = vmatprep.subr.bf16.mxu0 %v2646_v0  ;;  %v2739_v63 = vld [vmem:[%s3988_s1 + $0x3a4] ss:$8 sps:$4 sm:$0xff]   ;;  %v2734_v0 = vld [vmem:[%s3988_s1 + $0x2a0] ss:$8 sps:$4 sm:$0xff]  }
  0x3d   :  { %1891 = vmatprep.subr.bf16.mxu1 %v2648_v1  ;;  %v2737_v1 = vld [vmem:[%s3988_s1 + $0x3a0] ss:$8 sps:$4 sm:$0xff]  }
  0x3f   :  { %1851 = vmatpush2.bf16.msra.mxu0 %v2650_v2  ;;  %v2742_v2 = vld [vmem:[%s3988_s1 + $0x294] ss:$8 sps:$4 sm:$0xff]  }
  0x40   :  { %1892 = vmatpush2.bf16.msra.mxu1 %v2651_v3  ;;  %1902 = vmatprep.subr.bf16.mxu0 %v2658_v4  ;;  %v2745_v3 = vld [vmem:[%s3988_s1 + $0x394] ss:$8 sps:$4 sm:$0xff]   ;;  %v2740_v4 = vld [vmem:[%s3988_s1 + $0x290] ss:$8 sps:$4 sm:$0xff]  }
  0x41   :  { %1943 = vmatprep.subr.bf16.mxu1 %v2661_v5  ;;  %v2743_v5 = vld [vmem:[%s3988_s1 + $0x390] ss:$8 sps:$4 sm:$0xff]  }
  0x42   :  { %1853 = vmatmul.mubr.bf16.vlgmr.msra.gmra.mxu0 %v2247_v6  ;;  %v2748_v6 = vld [vmem:[%s3988_s1 + $0x284] ss:$8 sps:$4 sm:$0xff]  }
  0x43   :  { %1894 = vmatmul.mubr.bf16.vlgmr.msra.gmra.mxu1 %v2249_v7  ;;  %1903 = vmatpush1.bf16.msra.mxu0 %v2656_v8  ;;  %v2751_v7 = vld [vmem:[%s3988_s1 + $0x384] ss:$8 sps:$4 sm:$0xff]   ;;  %v2746_v8 = vld [vmem:[%s3988_s1 + $0x280] ss:$8 sps:$4 sm:$0xff]  }
  0x44   :  { %1944 = vmatpush1.bf16.msra.mxu1 %v2659_v9  ;;  %1904 = vmatprep.subr.bf16.mxu0 %v2664_v10  ;;  %v2749_v9 = vld [vmem:[%s3988_s1 + $0x380] ss:$8 sps:$4 sm:$0xff]   ;;  %v2756_v10 = vld [vmem:[%s3988_s1 + $0x474] ss:$8 sps:$4 sm:$0xff]  }
  0x45   :  { %1945 = vmatprep.subr.bf16.mxu1 %v2667_v11  ;;  %1934 = vmatprep.mubr.bf16.mxu0 %v2252_v35  ;;  %v2761_v11 = vld [vmem:[%s3988_s1 + $0x574] ss:$8 sps:$4 sm:$0xff]   ;;  %v2783_v35 = vld [vmem:[%s3988_s1 + $0x530] ss:$8 sps:$4 sm:$0xff]  }
  0x46   :  { %1975 = vmatprep.mubr.bf16.mxu1 %v2254_v38  ;;  %v2786_v38 = vld [vmem:[%s3988_s1 + $0x420] ss:$8 sps:$4 sm:$0xff]  }
  0x47   :  { %1905 = vmatpush1.bf16.msra.mxu0 %v2662_v12  ;;  %v2251_v12 = vcombine.low %v3316_v32, %v3316_v32  ;;  %v2782_v32 = vld [vmem:[%s3988_s1 + $0x434] ss:$8 sps:$4 sm:$0xff]  }
  0x48   :  { %1946 = vmatpush1.bf16.msra.mxu1 %v2665_v13  ;;  %1906 = vmatprep.subr.bf16.mxu0 %v2670_v14  ;;  %v2754_v13 = vld [vmem:[%s3988_s1 + $0x470] ss:$8 sps:$4 sm:$0xff]   ;;  %v2253_v14 = vcombine.low %v3329_v36, %v3329_v36  ;;  %v2788_v36 = vld [vmem:[%s3988_s1 + $0x424] ss:$8 sps:$4 sm:$0xff]  }
  0x49   :  { %1947 = vmatprep.subr.bf16.mxu1 %v2673_v15  ;;  %v2759_v15 = vld [vmem:[%s3988_s1 + $0x570] ss:$8 sps:$4 sm:$0xff]  }
  0x4b   :  { %1907 = vmatpush1.bf16.msra.mxu0 %v2668_v16  ;;  %v2764_v16 = vld [vmem:[%s3988_s1 + $0x464] ss:$8 sps:$4 sm:$0xff]  }
  0x4c   :  { %1948 = vmatpush1.bf16.msra.mxu1 %v2671_v17  ;;  %1908 = vmatprep.subr.bf16.mxu0 %v2676_v18  ;;  %v2767_v17 = vld [vmem:[%s3988_s1 + $0x564] ss:$8 sps:$4 sm:$0xff]  }
  0x4d   :  { %1949 = vmatprep.subr.bf16.mxu1 %v2679_v19  ;;  %v3466_v18 = vld [vmem:[%s3989_s0 + $0x20] sm:$0xff] }
  0x4e   :  { %v2256_v19 = vcombine.high %v3466_v18, %v3466_v18 }
  0x4f   :  { %1909 = vmatpush1.bf16.msra.mxu0 %v2674_v20  ;;  %v3473_v20 = vld [vmem:[%s3989_s0 + $0x28] sm:$0xff] }
  0x50   :  { %1950 = vmatpush1.bf16.msra.mxu1 %v2677_v21  ;;  %1910 = vmatprep.subr.bf16.mxu0 %v2682_v22  ;;  %v2762_v21 = vld [vmem:[%s3988_s1 + $0x460] ss:$8 sps:$4 sm:$0xff]  }
  0x51   :  { %1951 = vmatprep.subr.bf16.mxu1 %v2685_v23  ;;  %v2765_v22 = vld [vmem:[%s3988_s1 + $0x560] ss:$8 sps:$4 sm:$0xff]   ;;  %v2258_v23 = vcombine.high %v3473_v20, %v3473_v20 }
  0x53   :  { %1911 = vmatpush1.bf16.msra.mxu0 %v2680_v24  ;;  %v2770_v24 = vld [vmem:[%s3988_s1 + $0x454] ss:$8 sps:$4 sm:$0xff]  }
  0x54   :  { %1952 = vmatpush1.bf16.msra.mxu1 %v2683_v25  ;;  %1912 = vmatprep.subr.bf16.mxu0 %v2688_v26  ;;  %v2773_v25 = vld [vmem:[%s3988_s1 + $0x554] ss:$8 sps:$4 sm:$0xff]   ;;  %v2768_v26 = vld [vmem:[%s3988_s1 + $0x450] ss:$8 sps:$4 sm:$0xff]  }
  0x55   :  { %1953 = vmatprep.subr.bf16.mxu1 %v2691_v27  ;;  %v2771_v27 = vld [vmem:[%s3988_s1 + $0x550] ss:$8 sps:$4 sm:$0xff]  }
  0x57   :  { %1913 = vmatpush1.bf16.msra.mxu0 %v2686_v28  ;;  %v2776_v28 = vld [vmem:[%s3988_s1 + $0x444] ss:$8 sps:$4 sm:$0xff]  }
  0x58   :  { %1954 = vmatpush1.bf16.msra.mxu1 %v2689_v29  ;;  %1914 = vmatprep.subr.bf16.mxu0 %v2694_v30  ;;  %v2779_v29 = vld [vmem:[%s3988_s1 + $0x544] ss:$8 sps:$4 sm:$0xff]   ;;  %v2774_v30 = vld [vmem:[%s3988_s1 + $0x440] ss:$8 sps:$4 sm:$0xff]  }
  0x59   :  { %1955 = vmatprep.subr.bf16.mxu1 %v2697_v31  ;;  %v2777_v31 = vld [vmem:[%s3988_s1 + $0x540] ss:$8 sps:$4 sm:$0xff]  }
  0x5b   :  { %1915 = vmatpush1.bf16.msra.mxu0 %v2692_v33  ;;  %v2785_v33 = vld [vmem:[%s3988_s1 + $0x534] ss:$8 sps:$4 sm:$0xff]  }
  0x5c   :  { %1956 = vmatpush1.bf16.msra.mxu1 %v2695_v34  ;;  %1916 = vmatprep.subr.bf16.mxu0 %v2700_v37  ;;  %v2780_v34 = vld [vmem:[%s3988_s1 + $0x430] ss:$8 sps:$4 sm:$0xff]   ;;  %v2791_v37 = vld [vmem:[%s3988_s1 + $0x524] ss:$8 sps:$4 sm:$0xff]  }
  0x5d   :  { %1957 = vmatprep.subr.bf16.mxu1 %v2703_v39  ;;  %v2789_v39 = vld [vmem:[%s3988_s1 + $0x520] ss:$8 sps:$4 sm:$0xff]  }
  0x5f   :  { %1917 = vmatpush1.bf16.msra.mxu0 %v2698_v40  ;;  %v2794_v40 = vld [vmem:[%s3988_s1 + $0x414] ss:$8 sps:$4 sm:$0xff]  }
  0x60   :  { %1958 = vmatpush1.bf16.msra.mxu1 %v2701_v41  ;;  %1918 = vmatprep.subr.bf16.mxu0 %v2706_v42  ;;  %v2797_v41 = vld [vmem:[%s3988_s1 + $0x514] ss:$8 sps:$4 sm:$0xff]   ;;  %v2792_v42 = vld [vmem:[%s3988_s1 + $0x410] ss:$8 sps:$4 sm:$0xff]  }
  0x61   :  { %1959 = vmatprep.subr.bf16.mxu1 %v2709_v43  ;;  %v2795_v43 = vld [vmem:[%s3988_s1 + $0x510] ss:$8 sps:$4 sm:$0xff]  }
  0x63   :  { %1919 = vmatpush2.bf16.msra.mxu0 %v2704_v44  ;;  %v2800_v44 = vld [vmem:[%s3988_s1 + $0x404] ss:$8 sps:$4 sm:$0xff]  }
  0x64   :  { %1960 = vmatpush2.bf16.msra.mxu1 %v2707_v45  ;;  %1920 = vmatprep.subr.bf16.mxu0 %v2712_v46  ;;  %v2803_v45 = vld [vmem:[%s3988_s1 + $0x504] ss:$8 sps:$4 sm:$0xff]   ;;  %v2798_v46 = vld [vmem:[%s3988_s1 + $0x400] ss:$8 sps:$4 sm:$0xff]  }
  0x65   :  { %1961 = vmatprep.subr.bf16.mxu1 %v2715_v47  ;;  %v2801_v47 = vld [vmem:[%s3988_s1 + $0x500] ss:$8 sps:$4 sm:$0xff]  }
  0x67   :  { %1921 = vmatpush2.bf16.msra.mxu0 %v2710_v48  ;;  %v2806_v48 = vld [vmem:[%s3988_s1 + $0x4f4] ss:$8 sps:$4 sm:$0xff]  }
  0x68   :  { %1962 = vmatpush2.bf16.msra.mxu1 %v2713_v49  ;;  %1922 = vmatprep.subr.bf16.mxu0 %v2718_v50  ;;  %v2809_v49 = vld [vmem:[%s3988_s1 + $0x5f4] ss:$8 sps:$4 sm:$0xff]   ;;  %v2804_v50 = vld [vmem:[%s3988_s1 + $0x4f0] ss:$8 sps:$4 sm:$0xff]  }
  0x69   :  { %1963 = vmatprep.subr.bf16.mxu1 %v2721_v51  ;;  %v2807_v51 = vld [vmem:[%s3988_s1 + $0x5f0] ss:$8 sps:$4 sm:$0xff]  }
  0x6b   :  { %1923 = vmatpush2.bf16.msra.mxu0 %v2716_v52  ;;  %v2812_v52 = vld [vmem:[%s3988_s1 + $0x4e4] ss:$8 sps:$4 sm:$0xff]  }
  0x6c   :  { %1964 = vmatpush2.bf16.msra.mxu1 %v2719_v53  ;;  %1924 = vmatprep.subr.bf16.mxu0 %v2724_v54  ;;  %v2815_v53 = vld [vmem:[%s3988_s1 + $0x5e4] ss:$8 sps:$4 sm:$0xff]   ;;  %v2810_v54 = vld [vmem:[%s3988_s1 + $0x4e0] ss:$8 sps:$4 sm:$0xff]  }
  0x6d   :  { %1965 = vmatprep.subr.bf16.mxu1 %v2727_v55  ;;  %v2813_v55 = vld [vmem:[%s3988_s1 + $0x5e0] ss:$8 sps:$4 sm:$0xff]  }
  0x6f   :  { %1925 = vmatpush2.bf16.msra.mxu0 %v2722_v56  ;;  %v2818_v56 = vld [vmem:[%s3988_s1 + $0x4d4] ss:$8 sps:$4 sm:$0xff]  }
  0x70   :  { %1966 = vmatpush2.bf16.msra.mxu1 %v2725_v57  ;;  %1926 = vmatprep.subr.bf16.mxu0 %v2730_v58  ;;  %v2821_v57 = vld [vmem:[%s3988_s1 + $0x5d4] ss:$8 sps:$4 sm:$0xff]   ;;  %v2816_v58 = vld [vmem:[%s3988_s1 + $0x4d0] ss:$8 sps:$4 sm:$0xff]  }
  0x71   :  { %1967 = vmatprep.subr.bf16.mxu1 %v2733_v59  ;;  %v2819_v59 = vld [vmem:[%s3988_s1 + $0x5d0] ss:$8 sps:$4 sm:$0xff]  }
  0x73   :  { %1927 = vmatpush2.bf16.msra.mxu0 %v2728_v60  ;;  %v2824_v60 = vld [vmem:[%s3988_s1 + $0x4c4] ss:$8 sps:$4 sm:$0xff]  }
  0x74   :  { %1968 = vmatpush2.bf16.msra.mxu1 %v2731_v61  ;;  %1928 = vmatprep.subr.bf16.mxu0 %v2736_v62  ;;  %v2827_v61 = vld [vmem:[%s3988_s1 + $0x5c4] ss:$8 sps:$4 sm:$0xff]   ;;  %v2822_v62 = vld [vmem:[%s3988_s1 + $0x4c0] ss:$8 sps:$4 sm:$0xff]  }
  0x75   :  { %1969 = vmatprep.subr.bf16.mxu1 %v2739_v63  ;;  %v2825_v63 = vld [vmem:[%s3988_s1 + $0x5c0] ss:$8 sps:$4 sm:$0xff]  }
  0x77   :  { %1929 = vmatpush2.bf16.msra.mxu0 %v2734_v0  ;;  %v2830_v0 = vld [vmem:[%s3988_s1 + $0x4b4] ss:$8 sps:$4 sm:$0xff]  }
  0x78   :  { %1970 = vmatpush2.bf16.msra.mxu1 %v2737_v1  ;;  %1930 = vmatprep.subr.bf16.mxu0 %v2742_v2  ;;  %v2833_v1 = vld [vmem:[%s3988_s1 + $0x5b4] ss:$8 sps:$4 sm:$0xff]   ;;  %v2828_v2 = vld [vmem:[%s3988_s1 + $0x4b0] ss:$8 sps:$4 sm:$0xff]  }
  0x79   :  { %1971 = vmatprep.subr.bf16.mxu1 %v2745_v3  ;;  %v2831_v3 = vld [vmem:[%s3988_s1 + $0x5b0] ss:$8 sps:$4 sm:$0xff]  }
  0x7b   :  { %1931 = vmatpush2.bf16.msra.mxu0 %v2740_v4  ;;  %v2836_v4 = vld [vmem:[%s3988_s1 + $0x4a4] ss:$8 sps:$4 sm:$0xff]  }
  0x7c   :  { %1972 = vmatpush2.bf16.msra.mxu1 %v2743_v5  ;;  %1932 = vmatprep.subr.bf16.mxu0 %v2748_v6  ;;  %v2839_v5 = vld [vmem:[%s3988_s1 + $0x5a4] ss:$8 sps:$4 sm:$0xff]   ;;  %v2834_v6 = vld [vmem:[%s3988_s1 + $0x4a0] ss:$8 sps:$4 sm:$0xff]  }
  0x7d   :  { %1973 = vmatprep.subr.bf16.mxu1 %v2751_v7  ;;  %v2837_v7 = vld [vmem:[%s3988_s1 + $0x5a0] ss:$8 sps:$4 sm:$0xff]  }
  0x7f   :  { %1933 = vmatpush2.bf16.msra.mxu0 %v2746_v8  ;;  %v2842_v8 = vld [vmem:[%s3988_s1 + $0x494] ss:$8 sps:$4 sm:$0xff]  }
  0x80   :  { %1974 = vmatpush2.bf16.msra.mxu1 %v2749_v9  ;;  %1984 = vmatprep.subr.bf16.mxu0 %v2756_v10  ;;  %v2845_v9 = vld [vmem:[%s3988_s1 + $0x594] ss:$8 sps:$4 sm:$0xff]   ;;  %v2840_v10 = vld [vmem:[%s3988_s1 + $0x490] ss:$8 sps:$4 sm:$0xff]  }
  0x81   :  { %2025 = vmatprep.subr.bf16.mxu1 %v2761_v11  ;;  %v2843_v11 = vld [vmem:[%s3988_s1 + $0x590] ss:$8 sps:$4 sm:$0xff]  }
  0x82   :  { %1935 = vmatmul.mubr.bf16.vlgmr.msra.gmra.mxu0 %v2251_v12  ;;  %v2848_v12 = vld [vmem:[%s3988_s1 + $0x484] ss:$8 sps:$4 sm:$0xff]  }
  0x83   :  { %1976 = vmatmul.mubr.bf16.vlgmr.msra.gmra.mxu1 %v2253_v14  ;;  %1985 = vmatpush1.bf16.msra.mxu0 %v2754_v13  ;;  %v2851_v13 = vld [vmem:[%s3988_s1 + $0x584] ss:$8 sps:$4 sm:$0xff]   ;;  %v2846_v14 = vld [vmem:[%s3988_s1 + $0x480] ss:$8 sps:$4 sm:$0xff]  }
  0x84   :  { %2026 = vmatpush1.bf16.msra.mxu1 %v2759_v15  ;;  %1986 = vmatprep.subr.bf16.mxu0 %v2764_v16  ;;  %v2849_v15 = vld [vmem:[%s3988_s1 + $0x580] ss:$8 sps:$4 sm:$0xff]   ;;  %v2856_v16 = vld [vmem:[%s3988_s1 + $0x674] ss:$8 sps:$4 sm:$0xff]  }
  0x85   :  { %2027 = vmatprep.subr.bf16.mxu1 %v2767_v17  ;;  %2016 = vmatprep.mubr.bf16.mxu0 %v2256_v19  ;;  %v2861_v17 = vld [vmem:[%s3988_s1 + $0x774] ss:$8 sps:$4 sm:$0xff]   ;;  %v2854_v19 = vld [vmem:[%s3988_s1 + $0x670] ss:$8 sps:$4 sm:$0xff]  }
  0x86   :  { %2057 = vmatprep.mubr.bf16.mxu1 %v2258_v23  ;;  %v2257_v23 = vcombine.low %v3473_v20, %v3473_v20 }
  0x87   :  { %1987 = vmatpush1.bf16.msra.mxu0 %v2762_v21  ;;  %v2859_v21 = vld [vmem:[%s3988_s1 + $0x770] ss:$8 sps:$4 sm:$0xff]  }
  0x88   :  { %2028 = vmatpush1.bf16.msra.mxu1 %v2765_v22  ;;  %1988 = vmatprep.subr.bf16.mxu0 %v2770_v24  ;;  %v2255_v22 = vcombine.low %v3466_v18, %v3466_v18  ;;  %v3670_v24 = vld [vmem:[%s3989_s0 + $0x30] sm:$0xff]  ;;  %v2867_v18 = vld [vmem:[%s3988_s1 + $0x764] ss:$8 sps:$4 sm:$0xff]  }
  0x89   :  { %2029 = vmatprep.subr.bf16.mxu1 %v2773_v25  ;;  %v3675_v25 = vld [vmem:[%s3989_s0 + $0x38] sm:$0xff]  ;;  %v2260_v20 = vcombine.high %v3670_v24, %v3670_v24 }
  0x8b   :  { %1989 = vmatpush1.bf16.msra.mxu0 %v2768_v26  ;;  %v2864_v26 = vld [vmem:[%s3988_s1 + $0x664] ss:$8 sps:$4 sm:$0xff]  }
  0x8c   :  { %2030 = vmatpush1.bf16.msra.mxu1 %v2771_v27  ;;  %1990 = vmatprep.subr.bf16.mxu0 %v2776_v28  ;;  %v2262_v27 = vcombine.high %v3675_v25, %v3675_v25  ;;  %v2862_v28 = vld [vmem:[%s3988_s1 + $0x660] ss:$8 sps:$4 sm:$0xff]  }
  0x8d   :  { %2031 = vmatprep.subr.bf16.mxu1 %v2779_v29  ;;  %v2865_v29 = vld [vmem:[%s3988_s1 + $0x760] ss:$8 sps:$4 sm:$0xff]  }
  0x8f   :  { %1991 = vmatpush1.bf16.msra.mxu0 %v2774_v30  ;;  %v2870_v30 = vld [vmem:[%s3988_s1 + $0x654] ss:$8 sps:$4 sm:$0xff]  }
  0x90   :  { %2032 = vmatpush1.bf16.msra.mxu1 %v2777_v31  ;;  %1992 = vmatprep.subr.bf16.mxu0 %v2782_v32  ;;  %v2873_v31 = vld [vmem:[%s3988_s1 + $0x754] ss:$8 sps:$4 sm:$0xff]   ;;  %v2868_v32 = vld [vmem:[%s3988_s1 + $0x650] ss:$8 sps:$4 sm:$0xff]  }
  0x91   :  { %2033 = vmatprep.subr.bf16.mxu1 %v2785_v33  ;;  %v2871_v33 = vld [vmem:[%s3988_s1 + $0x750] ss:$8 sps:$4 sm:$0xff]  }
  0x93   :  { %1993 = vmatpush1.bf16.msra.mxu0 %v2780_v34  ;;  %v2876_v34 = vld [vmem:[%s3988_s1 + $0x644] ss:$8 sps:$4 sm:$0xff]  }
  0x94   :  { %2034 = vmatpush1.bf16.msra.mxu1 %v2783_v35  ;;  %1994 = vmatprep.subr.bf16.mxu0 %v2788_v36  ;;  %v2879_v35 = vld [vmem:[%s3988_s1 + $0x744] ss:$8 sps:$4 sm:$0xff]   ;;  %v2874_v36 = vld [vmem:[%s3988_s1 + $0x640] ss:$8 sps:$4 sm:$0xff]  }
  0x95   :  { %2035 = vmatprep.subr.bf16.mxu1 %v2791_v37  ;;  %v2877_v37 = vld [vmem:[%s3988_s1 + $0x740] ss:$8 sps:$4 sm:$0xff]  }
  0x97   :  { %1995 = vmatpush1.bf16.msra.mxu0 %v2786_v38  ;;  %v2882_v38 = vld [vmem:[%s3988_s1 + $0x634] ss:$8 sps:$4 sm:$0xff]  }
  0x98   :  { %2036 = vmatpush1.bf16.msra.mxu1 %v2789_v39  ;;  %1996 = vmatprep.subr.bf16.mxu0 %v2794_v40  ;;  %v2885_v39 = vld [vmem:[%s3988_s1 + $0x734] ss:$8 sps:$4 sm:$0xff]   ;;  %v2880_v40 = vld [vmem:[%s3988_s1 + $0x630] ss:$8 sps:$4 sm:$0xff]  }
  0x99   :  { %2037 = vmatprep.subr.bf16.mxu1 %v2797_v41  ;;  %v2883_v41 = vld [vmem:[%s3988_s1 + $0x730] ss:$8 sps:$4 sm:$0xff]  }
  0x9b   :  { %1997 = vmatpush1.bf16.msra.mxu0 %v2792_v42  ;;  %v2888_v42 = vld [vmem:[%s3988_s1 + $0x624] ss:$8 sps:$4 sm:$0xff]  }
  0x9c   :  { %2038 = vmatpush1.bf16.msra.mxu1 %v2795_v43  ;;  %1998 = vmatprep.subr.bf16.mxu0 %v2800_v44  ;;  %v2891_v43 = vld [vmem:[%s3988_s1 + $0x724] ss:$8 sps:$4 sm:$0xff]   ;;  %v2886_v44 = vld [vmem:[%s3988_s1 + $0x620] ss:$8 sps:$4 sm:$0xff]  }
  0x9d   :  { %2039 = vmatprep.subr.bf16.mxu1 %v2803_v45  ;;  %v2889_v45 = vld [vmem:[%s3988_s1 + $0x720] ss:$8 sps:$4 sm:$0xff]  }
  0x9f   :  { %1999 = vmatpush1.bf16.msra.mxu0 %v2798_v46  ;;  %v2894_v46 = vld [vmem:[%s3988_s1 + $0x614] ss:$8 sps:$4 sm:$0xff]  }
  0xa0   :  { %2040 = vmatpush1.bf16.msra.mxu1 %v2801_v47  ;;  %2000 = vmatprep.subr.bf16.mxu0 %v2806_v48  ;;  %v2897_v47 = vld [vmem:[%s3988_s1 + $0x714] ss:$8 sps:$4 sm:$0xff]   ;;  %v2892_v48 = vld [vmem:[%s3988_s1 + $0x610] ss:$8 sps:$4 sm:$0xff]  }
  0xa1   :  { %2041 = vmatprep.subr.bf16.mxu1 %v2809_v49  ;;  %v2895_v49 = vld [vmem:[%s3988_s1 + $0x710] ss:$8 sps:$4 sm:$0xff]  }
  0xa3   :  { %2001 = vmatpush2.bf16.msra.mxu0 %v2804_v50  ;;  %v2900_v50 = vld [vmem:[%s3988_s1 + $0x604] ss:$8 sps:$4 sm:$0xff]  }
  0xa4   :  { %2042 = vmatpush2.bf16.msra.mxu1 %v2807_v51  ;;  %2002 = vmatprep.subr.bf16.mxu0 %v2812_v52  ;;  %v2903_v51 = vld [vmem:[%s3988_s1 + $0x704] ss:$8 sps:$4 sm:$0xff]   ;;  %v2898_v52 = vld [vmem:[%s3988_s1 + $0x600] ss:$8 sps:$4 sm:$0xff]  }
  0xa5   :  { %2043 = vmatprep.subr.bf16.mxu1 %v2815_v53  ;;  %v2901_v53 = vld [vmem:[%s3988_s1 + $0x700] ss:$8 sps:$4 sm:$0xff]  }
  0xa7   :  { %2003 = vmatpush2.bf16.msra.mxu0 %v2810_v54  ;;  %v2906_v54 = vld [vmem:[%s3988_s1 + $0x6f4] ss:$8 sps:$4 sm:$0xff]  }
  0xa8   :  { %2044 = vmatpush2.bf16.msra.mxu1 %v2813_v55  ;;  %2004 = vmatprep.subr.bf16.mxu0 %v2818_v56  ;;  %v2909_v55 = vld [vmem:[%s3988_s1 + $0x7f4] ss:$8 sps:$4 sm:$0xff]   ;;  %v2904_v56 = vld [vmem:[%s3988_s1 + $0x6f0] ss:$8 sps:$4 sm:$0xff]  }
  0xa9   :  { %2045 = vmatprep.subr.bf16.mxu1 %v2821_v57  ;;  %v2907_v57 = vld [vmem:[%s3988_s1 + $0x7f0] ss:$8 sps:$4 sm:$0xff]  }
  0xab   :  { %2005 = vmatpush2.bf16.msra.mxu0 %v2816_v58  ;;  %v2912_v58 = vld [vmem:[%s3988_s1 + $0x6e4] ss:$8 sps:$4 sm:$0xff]  }
  0xac   :  { %2046 = vmatpush2.bf16.msra.mxu1 %v2819_v59  ;;  %2006 = vmatprep.subr.bf16.mxu0 %v2824_v60  ;;  %v2915_v59 = vld [vmem:[%s3988_s1 + $0x7e4] ss:$8 sps:$4 sm:$0xff]   ;;  %v2910_v60 = vld [vmem:[%s3988_s1 + $0x6e0] ss:$8 sps:$4 sm:$0xff]  }
  0xad   :  { %2047 = vmatprep.subr.bf16.mxu1 %v2827_v61  ;;  %v2913_v61 = vld [vmem:[%s3988_s1 + $0x7e0] ss:$8 sps:$4 sm:$0xff]  }
  0xaf   :  { %2007 = vmatpush2.bf16.msra.mxu0 %v2822_v62  ;;  %v2918_v62 = vld [vmem:[%s3988_s1 + $0x6d4] ss:$8 sps:$4 sm:$0xff]  }
  0xb0   :  { %2048 = vmatpush2.bf16.msra.mxu1 %v2825_v63  ;;  %2008 = vmatprep.subr.bf16.mxu0 %v2830_v0  ;;  %v2921_v63 = vld [vmem:[%s3988_s1 + $0x7d4] ss:$8 sps:$4 sm:$0xff]   ;;  %v2916_v0 = vld [vmem:[%s3988_s1 + $0x6d0] ss:$8 sps:$4 sm:$0xff]  }
  0xb1   :  { %2049 = vmatprep.subr.bf16.mxu1 %v2833_v1  ;;  %v2919_v1 = vld [vmem:[%s3988_s1 + $0x7d0] ss:$8 sps:$4 sm:$0xff]  }
  0xb3   :  { %2009 = vmatpush2.bf16.msra.mxu0 %v2828_v2  ;;  %v2924_v2 = vld [vmem:[%s3988_s1 + $0x6c4] ss:$8 sps:$4 sm:$0xff]  }
  0xb4   :  { %2050 = vmatpush2.bf16.msra.mxu1 %v2831_v3  ;;  %2010 = vmatprep.subr.bf16.mxu0 %v2836_v4  ;;  %v2927_v3 = vld [vmem:[%s3988_s1 + $0x7c4] ss:$8 sps:$4 sm:$0xff]   ;;  %v2922_v4 = vld [vmem:[%s3988_s1 + $0x6c0] ss:$8 sps:$4 sm:$0xff]  }
  0xb5   :  { %2051 = vmatprep.subr.bf16.mxu1 %v2839_v5  ;;  %v2925_v5 = vld [vmem:[%s3988_s1 + $0x7c0] ss:$8 sps:$4 sm:$0xff]  }
  0xb7   :  { %2011 = vmatpush2.bf16.msra.mxu0 %v2834_v6  ;;  %v2930_v6 = vld [vmem:[%s3988_s1 + $0x6b4] ss:$8 sps:$4 sm:$0xff]  }
  0xb8   :  { %2052 = vmatpush2.bf16.msra.mxu1 %v2837_v7  ;;  %2012 = vmatprep.subr.bf16.mxu0 %v2842_v8  ;;  %v2933_v7 = vld [vmem:[%s3988_s1 + $0x7b4] ss:$8 sps:$4 sm:$0xff]   ;;  %v2928_v8 = vld [vmem:[%s3988_s1 + $0x6b0] ss:$8 sps:$4 sm:$0xff]  }
  0xb9   :  { %2053 = vmatprep.subr.bf16.mxu1 %v2845_v9  ;;  %v2931_v9 = vld [vmem:[%s3988_s1 + $0x7b0] ss:$8 sps:$4 sm:$0xff]  }
  0xbb   :  { %2013 = vmatpush2.bf16.msra.mxu0 %v2840_v10  ;;  %v2936_v10 = vld [vmem:[%s3988_s1 + $0x6a4] ss:$8 sps:$4 sm:$0xff]  }
  0xbc   :  { %2054 = vmatpush2.bf16.msra.mxu1 %v2843_v11  ;;  %2014 = vmatprep.subr.bf16.mxu0 %v2848_v12  ;;  %v2939_v11 = vld [vmem:[%s3988_s1 + $0x7a4] ss:$8 sps:$4 sm:$0xff]   ;;  %v2934_v12 = vld [vmem:[%s3988_s1 + $0x6a0] ss:$8 sps:$4 sm:$0xff]  }
  0xbd   :  { %2055 = vmatprep.subr.bf16.mxu1 %v2851_v13  ;;  %v2937_v13 = vld [vmem:[%s3988_s1 + $0x7a0] ss:$8 sps:$4 sm:$0xff]  }
  0xbf   :  { %2015 = vmatpush2.bf16.msra.mxu0 %v2846_v14  ;;  %v2942_v14 = vld [vmem:[%s3988_s1 + $0x694] ss:$8 sps:$4 sm:$0xff]  }
  0xc0   :  { %2056 = vmatpush2.bf16.msra.mxu1 %v2849_v15  ;;  %2066 = vmatprep.subr.bf16.mxu0 %v2856_v16  ;;  %v2945_v15 = vld [vmem:[%s3988_s1 + $0x794] ss:$8 sps:$4 sm:$0xff]   ;;  %v2940_v16 = vld [vmem:[%s3988_s1 + $0x690] ss:$8 sps:$4 sm:$0xff]  }
  0xc1   :  { %2107 = vmatprep.subr.bf16.mxu1 %v2861_v17  ;;  %v2943_v17 = vld [vmem:[%s3988_s1 + $0x790] ss:$8 sps:$4 sm:$0xff]  }
  0xc2   :  { %2017 = vmatmul.mubr.bf16.vlgmr.msra.gmra.mxu0 %v2255_v22  ;;  %v2946_v22 = vld [vmem:[%s3988_s1 + $0x680] ss:$8 sps:$4 sm:$0xff]  }
  0xc3   :  { %2058 = vmatmul.mubr.bf16.vlgmr.msra.gmra.mxu1 %v2257_v23  ;;  %2067 = vmatpush1.bf16.msra.mxu0 %v2854_v19  ;;  %v2948_v19 = vld [vmem:[%s3988_s1 + $0x684] ss:$8 sps:$4 sm:$0xff]   ;;  %v2949_v23 = vld [vmem:[%s3988_s1 + $0x780] ss:$8 sps:$4 sm:$0xff]  }
  0xc4   :  { %2108 = vmatpush1.bf16.msra.mxu1 %v2859_v21  ;;  %2068 = vmatprep.subr.bf16.mxu0 %v2864_v26  ;;  %v2951_v21 = vld [vmem:[%s3988_s1 + $0x784] ss:$8 sps:$4 sm:$0xff]   ;;  %v2956_v26 = vld [vmem:[%s3988_s1 + $0x874] ss:$8 sps:$4 sm:$0xff]  }
  0xc5   :  { %2109 = vmatprep.subr.bf16.mxu1 %v2867_v18  ;;  %2098 = vmatprep.mubr.bf16.mxu0 %v2260_v20  ;;  %v3867_v18 = vld [vmem:[%s3989_s0 + $0x40] sm:$0xff]  ;;  %v2259_v20 = vcombine.low %v3670_v24, %v3670_v24 }
  0xc6   :  { %2139 = vmatprep.mubr.bf16.mxu1 %v2262_v27  ;;  %v2261_v27 = vcombine.low %v3675_v25, %v3675_v25  ;;  %v2959_v25 = vld [vmem:[%s3988_s1 + $0x860] ss:$8 sps:$4 sm:$0xff]  }
  0xc7   :  { %2069 = vmatpush1.bf16.msra.mxu0 %v2862_v28  ;;  %v2954_v28 = vld [vmem:[%s3988_s1 + $0x870] ss:$8 sps:$4 sm:$0xff]  }
  0xc8   :  { %2110 = vmatpush1.bf16.msra.mxu1 %v2865_v29  ;;  %2070 = vmatprep.subr.bf16.mxu0 %v2870_v30  ;;  %v2264_v29 = vcombine.high %v3867_v18, %v3867_v18  ;;  %v2961_v30 = vld [vmem:[%s3988_s1 + $0x864] ss:$8 sps:$4 sm:$0xff]  }
  0xc9   :  { %2111 = vmatprep.subr.bf16.mxu1 %v2873_v31 }
  0xcb   :  { %2071 = vmatpush1.bf16.msra.mxu0 %v2868_v32 }
  0xcc   :  { %2112 = vmatpush1.bf16.msra.mxu1 %v2871_v33  ;;  %2072 = vmatprep.subr.bf16.mxu0 %v2876_v34 }
  0xcd   :  { %2113 = vmatprep.subr.bf16.mxu1 %v2879_v35  ;;  %v2964_v35 = vld [vmem:[%s3988_s1 + $0x854] ss:$8 sps:$4 sm:$0xff]  }
  0xcf   :  { %2073 = vmatpush1.bf16.msra.mxu0 %v2874_v36 }
  0xd0   :  { %2114 = vmatpush1.bf16.msra.mxu1 %v2877_v37  ;;  %2074 = vmatprep.subr.bf16.mxu0 %v2882_v38 }
  0xd1   :  { %2115 = vmatprep.subr.bf16.mxu1 %v2885_v39  ;;  %v2962_v39 = vld [vmem:[%s3988_s1 + $0x850] ss:$8 sps:$4 sm:$0xff]  }
  0xd3   :  { %2075 = vmatpush1.bf16.msra.mxu0 %v2880_v40 }
  0xd4   :  { %2116 = vmatpush1.bf16.msra.mxu1 %v2883_v41  ;;  %2076 = vmatprep.subr.bf16.mxu0 %v2888_v42  ;;  %v2967_v41 = vld [vmem:[%s3988_s1 + $0x844] ss:$8 sps:$4 sm:$0xff]  }
  0xd5   :  { %2117 = vmatprep.subr.bf16.mxu1 %v2891_v43  ;;  %v2965_v43 = vld [vmem:[%s3988_s1 + $0x840] ss:$8 sps:$4 sm:$0xff]  }
  0xd7   :  { %2077 = vmatpush1.bf16.msra.mxu0 %v2886_v44  ;;  %v2970_v44 = vld [vmem:[%s3988_s1 + $0x834] ss:$8 sps:$4 sm:$0xff]  }
  0xd8   :  { %2118 = vmatpush1.bf16.msra.mxu1 %v2889_v45  ;;  %2078 = vmatprep.subr.bf16.mxu0 %v2894_v46  ;;  %v2968_v45 = vld [vmem:[%s3988_s1 + $0x830] ss:$8 sps:$4 sm:$0xff]   ;;  %v2973_v46 = vld [vmem:[%s3988_s1 + $0x824] ss:$8 sps:$4 sm:$0xff]  }
  0xd9   :  { %2119 = vmatprep.subr.bf16.mxu1 %v2897_v47  ;;  %v2971_v47 = vld [vmem:[%s3988_s1 + $0x820] ss:$8 sps:$4 sm:$0xff]  }
  0xdb   :  { %2079 = vmatpush1.bf16.msra.mxu0 %v2892_v48  ;;  %v2976_v48 = vld [vmem:[%s3988_s1 + $0x814] ss:$8 sps:$4 sm:$0xff]  }
  0xdc   :  { %2120 = vmatpush1.bf16.msra.mxu1 %v2895_v49  ;;  %2080 = vmatprep.subr.bf16.mxu0 %v2900_v50  ;;  %v2974_v49 = vld [vmem:[%s3988_s1 + $0x810] ss:$8 sps:$4 sm:$0xff]   ;;  %v2979_v50 = vld [vmem:[%s3988_s1 + $0x804] ss:$8 sps:$4 sm:$0xff]  }
  0xdd   :  { %2121 = vmatprep.subr.bf16.mxu1 %v2903_v51  ;;  %v2977_v51 = vld [vmem:[%s3988_s1 + $0x800] ss:$8 sps:$4 sm:$0xff]  }
  0xdf   :  { %2081 = vmatpush1.bf16.msra.mxu0 %v2898_v52  ;;  %v2982_v52 = vld [vmem:[%s3988_s1 + $0x8f4] ss:$8 sps:$4 sm:$0xff]  }
  0xe0   :  { %2122 = vmatpush1.bf16.msra.mxu1 %v2901_v53  ;;  %2082 = vmatprep.subr.bf16.mxu0 %v2906_v54  ;;  %v2980_v53 = vld [vmem:[%s3988_s1 + $0x8f0] ss:$8 sps:$4 sm:$0xff]   ;;  %v2985_v54 = vld [vmem:[%s3988_s1 + $0x8e4] ss:$8 sps:$4 sm:$0xff]  }
  0xe1   :  { %2123 = vmatprep.subr.bf16.mxu1 %v2909_v55  ;;  %v2983_v55 = vld [vmem:[%s3988_s1 + $0x8e0] ss:$8 sps:$4 sm:$0xff]  }
  0xe3   :  { %2083 = vmatpush2.bf16.msra.mxu0 %v2904_v56  ;;  %v2988_v56 = vld [vmem:[%s3988_s1 + $0x8d4] ss:$8 sps:$4 sm:$0xff]  }
  0xe4   :  { %2124 = vmatpush2.bf16.msra.mxu1 %v2907_v57  ;;  %2084 = vmatprep.subr.bf16.mxu0 %v2912_v58  ;;  %v2986_v57 = vld [vmem:[%s3988_s1 + $0x8d0] ss:$8 sps:$4 sm:$0xff]   ;;  %v2991_v58 = vld [vmem:[%s3988_s1 + $0x8c4] ss:$8 sps:$4 sm:$0xff]  }
  0xe5   :  { %2125 = vmatprep.subr.bf16.mxu1 %v2915_v59  ;;  %v2989_v59 = vld [vmem:[%s3988_s1 + $0x8c0] ss:$8 sps:$4 sm:$0xff]  }
  0xe7   :  { %2085 = vmatpush2.bf16.msra.mxu0 %v2910_v60  ;;  %v2994_v60 = vld [vmem:[%s3988_s1 + $0x8b4] ss:$8 sps:$4 sm:$0xff]  }
  0xe8   :  { %2126 = vmatpush2.bf16.msra.mxu1 %v2913_v61  ;;  %2086 = vmatprep.subr.bf16.mxu0 %v2918_v62  ;;  %v2992_v61 = vld [vmem:[%s3988_s1 + $0x8b0] ss:$8 sps:$4 sm:$0xff]   ;;  %v2997_v62 = vld [vmem:[%s3988_s1 + $0x8a4] ss:$8 sps:$4 sm:$0xff]  }
  0xe9   :  { %2127 = vmatprep.subr.bf16.mxu1 %v2921_v63  ;;  %v2995_v63 = vld [vmem:[%s3988_s1 + $0x8a0] ss:$8 sps:$4 sm:$0xff]  }
  0xeb   :  { %2087 = vmatpush2.bf16.msra.mxu0 %v2916_v0  ;;  %v3000_v0 = vld [vmem:[%s3988_s1 + $0x894] ss:$8 sps:$4 sm:$0xff]  }
  0xec   :  { %2128 = vmatpush2.bf16.msra.mxu1 %v2919_v1  ;;  %2088 = vmatprep.subr.bf16.mxu0 %v2924_v2  ;;  %v2998_v1 = vld [vmem:[%s3988_s1 + $0x890] ss:$8 sps:$4 sm:$0xff]   ;;  %v3003_v2 = vld [vmem:[%s3988_s1 + $0x884] ss:$8 sps:$4 sm:$0xff]  }
  0xed   :  { %2129 = vmatprep.subr.bf16.mxu1 %v2927_v3  ;;  %v3001_v3 = vld [vmem:[%s3988_s1 + $0x880] ss:$8 sps:$4 sm:$0xff]  }
  0xef   :  { %2089 = vmatpush2.bf16.msra.mxu0 %v2922_v4  ;;  %v2263_v4 = vcombine.low %v3867_v18, %v3867_v18 }
  0xf0   :  { %2130 = vmatpush2.bf16.msra.mxu1 %v2925_v5  ;;  %2090 = vmatprep.subr.bf16.mxu0 %v2930_v6 }
  0xf1   :  { %2131 = vmatprep.subr.bf16.mxu1 %v2933_v7 }
  0xf3   :  { %2091 = vmatpush2.bf16.msra.mxu0 %v2928_v8 }
  0xf4   :  { %2132 = vmatpush2.bf16.msra.mxu1 %v2931_v9  ;;  %2092 = vmatprep.subr.bf16.mxu0 %v2936_v10 }
  0xf5   :  { %2133 = vmatprep.subr.bf16.mxu1 %v2939_v11 }
  0xf7   :  { %2093 = vmatpush2.bf16.msra.mxu0 %v2934_v12 }
  0xf8   :  { %2134 = vmatpush2.bf16.msra.mxu1 %v2937_v13  ;;  %2094 = vmatprep.subr.bf16.mxu0 %v2942_v14 }
  0xf9   :  { %2135 = vmatprep.subr.bf16.mxu1 %v2945_v15 }
  0xfb   :  { %2095 = vmatpush2.bf16.msra.mxu0 %v2940_v16 }
  0xfc   :  { %2136 = vmatpush2.bf16.msra.mxu1 %v2943_v17  ;;  %2096 = vmatprep.subr.bf16.mxu0 %v2948_v19 }
  0xfd   :  { %2137 = vmatprep.subr.bf16.mxu1 %v2951_v21 }
  0xff   :  { %2097 = vmatpush2.bf16.msra.mxu0 %v2946_v22 }
 0x100   :  { %2138 = vmatpush2.bf16.msra.mxu1 %v2949_v23  ;;  %2148 = vmatprep.subr.bf16.mxu0 %v2956_v26 }
 0x102   :  { %v1854_v31 = vpop.f32.mrf.mxu0  ;;  %2099 = vmatmul.mubr.bf16.vlgmr.msra.gmra.mxu0 %v2259_v20 }
 0x103   :  { %v1895_v32 = vpop.f32.mrf.mxu1  ;;  %2140 = vmatmul.mubr.bf16.vlgmr.msra.gmra.mxu1 %v2261_v27  ;;  %2149 = vmatpush1.bf16.msra.mxu0 %v2954_v28 }
 0x104   :  { %v3881_v24 = vadd.f32 %v1895_v32, %v1854_v31  ;;  %2180 = vmatprep.mubr.bf16.mxu0 %v2264_v29  ;;  %v1856_v33 = vpop.f32.mrf.mxu0  ;;  %2150 = vmatprep.subr.bf16.mxu0 %v2961_v30 }
 0x105   :  { %v1897_v34 = vpop.f32.mrf.mxu1 }
 0x106   :  { %v3889_v36 = vadd.f32 %v1897_v34, %v1856_v33  ;;  %v1858_v37 = vpop.f32.mrf.mxu0 }
 0x107   :  { %v1899_v38 = vpop.f32.mrf.mxu1  ;;  %2151 = vmatpush1.bf16.msra.mxu0 %v2959_v25 }
 0x108   :  { %v1859_v40 = vpop.f32.mrf.mxu0  ;;  %2152 = vmatprep.subr.bf16.mxu0 %v2964_v35 }
 0x109   :  { %v1900_v42 = vpop.f32.mrf.mxu1 }
 0x10a   :  { %v2217_v42 = vld [vmem:[%s3990_s4] sm:$0x3] }
 0x10b   :  { %2153 = vmatpush1.bf16.msra.mxu0 %v2962_v39  ;;  %v2191_v39 = vlaneseq  ;;  %vm2218_vm0 = vcmp.gt.f32.partialorder %v2217_v42, 0.5 }
 0x10c   :  { %2154 = vmatprep.subr.bf16.mxu0 %v2967_v41 }
 0x10d   :  { %v2192_v40 = vshrl.u32 %v2191_v39, 7 }
 0x10f   :  { %2155 = vmatpush1.bf16.msra.mxu0 %v2965_v43  ;;  %v2193_v41 = vsub.s32 0, %v2192_v40  ;;  %v2189_v43 = vld [vmem:[%s3991_s2] sm:$0x3] }
 0x110   :  { %2156 = vmatprep.subr.bf16.mxu0 %v2970_v44 }
 0x113   :  { %2157 = vmatpush1.bf16.msra.mxu0 %v2968_v45  ;;  %v2203_v45 = vld [vmem:[%s3992_s3] sm:$0x3] }
 0x114   :  { %2158 = vmatprep.subr.bf16.mxu0 %v2973_v46  ;;  %v2197_v46 = vsub.s32 1, %v2192_v40 }
 0x117   :  { %2159 = vmatpush1.bf16.msra.mxu0 %v2971_v47  ;;  %v2194_v47 = vrot.slane %v2189_v43, %v2193_v41 }
 0x118   :  { %2160 = vmatprep.subr.bf16.mxu0 %v2976_v48 }
 0x11b   :  { %2161 = vmatpush1.bf16.msra.mxu0 %v2974_v49  ;;  %v2208_v49 = vrot.slane %v2203_v45, %v2193_v41 }
 0x11c   :  { %2162 = vmatprep.subr.bf16.mxu0 %v2979_v50 }
 0x11f   :  { %2163 = vmatpush1.bf16.msra.mxu0 %v2977_v51 }
 0x120   :  { %2164 = vmatprep.subr.bf16.mxu0 %v2982_v52  ;;  %v3006_v52 = vmov 0  }
 0x123   :  { %2165 = vmatpush2.bf16.msra.mxu0 %v2980_v53  ;;  %v2221_v53 = vsel %vm2218_vm0, 1, %v3006_v52 }
 0x124   :  { %2166 = vmatprep.subr.bf16.mxu0 %v2985_v54  ;;  %v2198_v54 = vrot.slane %v2189_v43, %v2197_v46 }
 0x127   :  { %2167 = vmatpush2.bf16.msra.mxu0 %v2983_v55 }
 0x128   :  { %2168 = vmatprep.subr.bf16.mxu0 %v2988_v56 }
 0x12b   :  { %2169 = vmatpush2.bf16.msra.mxu0 %v2986_v57 }
 0x12c   :  { %2170 = vmatprep.subr.bf16.mxu0 %v2991_v58  ;;  %v2212_v58 = vrot.slane %v2203_v45, %v2197_v46 }
 0x12f   :  { %2171 = vmatpush2.bf16.msra.mxu0 %v2989_v59  ;;  %v2225_v59 = vrot.slane %v2221_v53, %v2193_v41 }
 0x130   :  { %2172 = vmatprep.subr.bf16.mxu0 %v2994_v60  ;;  %v2229_v60 = vrot.slane %v2221_v53, %v2197_v46 }
 0x131   :  { %vm2230_vm1 = vcmp.eq.s32.totalorder %v2225_v59, 1 }
 0x132   :  { %vm2231_vm2 = vcmp.eq.s32.totalorder %v2229_v60, 1 }
 0x133   :  { %2173 = vmatpush2.bf16.msra.mxu0 %v2992_v61 }
 0x134   :  { %2174 = vmatprep.subr.bf16.mxu0 %v2997_v62 }
 0x137   :  { %2175 = vmatpush2.bf16.msra.mxu0 %v2995_v63 }
 0x138   :  { %2176 = vmatprep.subr.bf16.mxu0 %v3000_v0 }
 0x13b   :  { %2177 = vmatpush2.bf16.msra.mxu0 %v2998_v1 }
 0x13c   :  { %2178 = vmatprep.subr.bf16.mxu0 %v3003_v2 }
 0x13f   :  { %2179 = vmatpush2.bf16.msra.mxu0 %v3001_v3 }
 0x142   :  { %v1936_v5 = vpop.f32.mrf.mxu0  ;;  %2181 = vmatmul.mubr.bf16.vlgmr.msra.gmra.mxu0 %v2263_v4 }
 0x143   :  { %v1977_v6 = vpop.f32.mrf.mxu1  ;;  %v1937_v7 = vadd.f32 %v1936_v5, %v3881_v24 }
 0x144   :  { %v1938_v8 = vpop.f32.mrf.mxu0 }
 0x145   :  { %v1979_v9 = vpop.f32.mrf.mxu1  ;;  %v1939_v10 = vadd.f32 %v1938_v8, %v3889_v36  ;;  %v1978_v11 = vadd.f32 %v1977_v6, %v1937_v7 }
 0x146   :  { %v1940_v12 = vpop.f32.mrf.mxu0 }
 0x147   :  { %v1981_v13 = vpop.f32.mrf.mxu1  ;;  %v1980_v14 = vadd.f32 %v1979_v9, %v1939_v10 }
 0x148   :  { %v1941_v15 = vpop.f32.mrf.mxu0 }
 0x149   :  { %v1982_v16 = vpop.f32.mrf.mxu1 }
 0x182   :  { %v2018_v17 = vpop.f32.mrf.mxu0 }
 0x183   :  { %v2059_v19 = vpop.f32.mrf.mxu1  ;;  %v2019_v21 = vadd.f32 %v2018_v17, %v1978_v11 }
 0x184   :  { %v2020_v22 = vpop.f32.mrf.mxu0 }
 0x185   :  { %v2061_v23 = vpop.f32.mrf.mxu1  ;;  %v2021_v26 = vadd.f32 %v2020_v22, %v1980_v14  ;;  %v2060_v18 = vadd.f32 %v2059_v19, %v2019_v21 }
 0x186   :  { %v2022_v20 = vpop.f32.mrf.mxu0 }
 0x187   :  { %v2063_v27 = vpop.f32.mrf.mxu1  ;;  %v2062_v28 = vadd.f32 %v2061_v23, %v2021_v26 }
 0x188   :  { %v2023_v29 = vpop.f32.mrf.mxu0 }
 0x189   :  { %v2064_v30 = vpop.f32.mrf.mxu1 }
 0x1c2   :  { %v2100_v31 = vpop.f32.mrf.mxu0 }
 0x1c3   :  { %v2141_v32 = vpop.f32.mrf.mxu1  ;;  %v2101_v24 = vadd.f32 %v2100_v31, %v2060_v18 }
 0x1c4   :  { %v2102_v25 = vpop.f32.mrf.mxu0 }
 0x1c5   :  { %v2143_v33 = vpop.f32.mrf.mxu1  ;;  %v2142_v34 = vadd.f32 %v2141_v32, %v2101_v24  ;;  %v2103_v44 = vadd.f32 %v2102_v25, %v2062_v28 }
 0x1c6   :  { %v2104_v35 = vpop.f32.mrf.mxu0 }
 0x1c7   :  { %v2145_v36 = vpop.f32.mrf.mxu1  ;;  %v2144_v50 = vadd.f32 %v2143_v33, %v2103_v44 }
 0x1c8   :  { %v2105_v37 = vpop.f32.mrf.mxu0 }
 0x1c9   :  { %v2146_v38 = vpop.f32.mrf.mxu1 }
 0x202   :  { %v2182_v48 = vpop.f32.mrf.mxu0 }
 0x203   :  { %v2183_v51 = vadd.f32 %v2182_v48, %v2142_v34 }
 0x204   :  { %v2184_v55 = vpop.f32.mrf.mxu0 }
 0x205   :  { %v2201_v56 = vmul.f32 %v2194_v47, %v2183_v51  ;;  %v2185_v57 = vadd.f32 %v2184_v55, %v2144_v50 }
 0x206   :  { %v2186_v61 = vpop.f32.mrf.mxu0 }
 0x207   :  { %v2215_v62 = vadd.f32 %v2208_v49, %v2201_v56  ;;  %v2202_v63 = vmul.f32 %v2198_v54, %v2185_v57 }
 0x208   :  { %v2187_v0 = vpop.f32.mrf.mxu0 }
 0x209   :  { %v2219_v1 = vmax.f32 %v2215_v62, 0.0  ;;  %v2216_v2 = vadd.f32 %v2212_v58, %v2202_v63 }
 0x20b   :  { %v2220_v3 = vmax.f32 %v2216_v2, 0.0  ;;  %v2232_v4 = vsel %vm2230_vm1, %v2219_v1, %v2215_v62 }
 0x20d   :  { %v2233_v5 = vsel %vm2231_vm2, %v2220_v3, %v2216_v2 }
 0x20e   :  { %v2554_v6 = vpack.c.bf16 %v2233_v5, %v2232_v4 }
 0x210   :  { %2242 = vst [vmem:[%s3993_s5] sm:$0xff] %v2554_v6 }

</bundles_post_ra>
